<compile_context>
chip_gen: v5e
topology: v5e:2x2
jax: 0.10.0
libtpu: 0.0.40
codegen_flags: <defaults>
</compile_context>

<pallas_src>
import jax
import jax.numpy as jnp
from jax.experimental import pallas as pl
from jax.experimental.pallas import tpu as pltpu

# ---------------- config (small, consistent with the module's forward) ----------------
BATCH = 2
B_PAD = 8                       # sublane-padded decoder batch
VOCAB = 16                      # shared parent / child / output vocab
EMB = 8
ENC_HIDDEN = 16                 # encoder per-direction hidden size
DEC_HIDDEN = 2 * ENC_HIDDEN     # decoder hidden = encoder.hidden_size * 2 (bidirectional)
NUM_LAYERS = 1
OUTPUT_SIZE = VOCAB
PARENT_LEN = 8
CHILD_LEN = 6
SOS_TOKEN = 1
TEACHER_FORCING_RATIO = 0.7

# fused / padded layouts
DIR_ROWS = 4                    # sublane rows per encoder direction (>= BATCH)
ROWS = 2 * DIR_ROWS             # 8: fwd batch rows 0:4, bwd batch rows 4:8
ENC_IN = 2 * EMB + 2            # [emb_fwd | emb_bwd | 1_fwd | 1_bwd] (bias folded)
GATES_ENC = 128                 # packed encoder gates: 4*16 = 64 real lanes, lane-padded
GATES_DEC = 4 * DEC_HIDDEN      # 128: packed decoder gates == exactly one lane tile
V_PAD = 128                     # lane-padded one-hot vocab width
OUT_PAD = 128                   # lane-padded logits width
XH = V_PAD + DEC_HIDDEN         # 160: [x one-hot | h] fused matmul input width


# ---------------- the single fused Pallas kernel ----------------
def _seq2seq_kernel(tf_ref, encx_ref, wex_ref, weh_ref, sos_ref, child_ref,
                    nh_ref, nc_ref, wdec_ref, fcw_ref, fcb_ref,
                    logits_ref, sp_ref,
                    xg_sc, h2_sc, xh_sc, c_sc):
    EH = ENC_HIDDEN
    DH = DEC_HIDDEN

    # ======================= encoder (both directions fused) =======================
    # hoisted input projection for ALL timesteps; per-direction biases already folded
    # into the matmul via the constant-1 lanes of encx.
    xg_sc[...] = jnp.dot(encx_ref[...], wex_ref[...], preferred_element_type=jnp.float32)
    # h with per-direction lane offsets: rows 0:4 hold [h_fwd | 0], rows 4:8 [0 | h_bwd]
    h2_sc[...] = jnp.zeros_like(h2_sc)

    def enc_step(t, c):
        row = pl.multiple_of(t * ROWS, ROWS)
        gates = (xg_sc[pl.ds(row, ROWS), :]
                 + jnp.dot(h2_sc[...], weh_ref[...], preferred_element_type=jnp.float32))
        sig = jax.nn.sigmoid(gates)            # one EUP pass over the packed gate vreg
        tg = jnp.tanh(gates)                   # one EUP pass
        i = sig[:, 0:EH]
        f = sig[:, EH:2 * EH]
        g = tg[:, 2 * EH:3 * EH]
        o = sig[:, 3 * EH:4 * EH]
        c = f * c + i * g
        h = o * jnp.tanh(c)                    # one EUP pass
        # write h back with per-direction lane offsets (off-direction blocks stay 0)
        h2_sc[0:DIR_ROWS, 0:EH] = h[0:DIR_ROWS, :]
        h2_sc[DIR_ROWS:ROWS, EH:2 * EH] = h[DIR_ROWS:ROWS, :]
        return c

    c_enc = jax.lax.fori_loop(0, PARENT_LEN, enc_step,
                              jnp.zeros((ROWS, EH), jnp.float32), unroll=True)

    # ============ torch `.view` quirk (batch==2) + noise -> decoder init ============
    # hidden.view(num_layers, B, 2H) mixes batch rows:
    #   row 0 = [dir0(b0) | dir0(b1)], row 1 = [dir1(b0) | dir1(b1)]
    # (replicated exactly; state_parent is the pre-noise cell state)
    sp_ref[0:1, 0:EH] = c_enc[0:1, :]
    sp_ref[0:1, EH:2 * EH] = c_enc[1:2, :]
    sp_ref[1:2, 0:EH] = c_enc[DIR_ROWS:DIR_ROWS + 1, :]
    sp_ref[1:2, EH:2 * EH] = c_enc[DIR_ROWS + 1:DIR_ROWS + 2, :]

    xh_sc[...] = jnp.zeros_like(xh_sc)
    xh_sc[:, 0:V_PAD] = sos_ref[...]                           # first decoder input = <sos>
    xh_sc[0:1, V_PAD:V_PAD + EH] = h2_sc[0:1, 0:EH]            # h_fwd(b0)
    xh_sc[0:1, V_PAD + EH:XH] = h2_sc[1:2, 0:EH]               # h_fwd(b1)
    xh_sc[1:2, V_PAD:V_PAD + EH] = h2_sc[DIR_ROWS:DIR_ROWS + 1, EH:2 * EH]       # h_bwd(b0)
    xh_sc[1:2, V_PAD + EH:XH] = h2_sc[DIR_ROWS + 1:DIR_ROWS + 2, EH:2 * EH]      # h_bwd(b1)
    xh_sc[0:BATCH, V_PAD:XH] = xh_sc[0:BATCH, V_PAD:XH] + nh_ref[...]            # + noise_h

    c_sc[...] = jnp.zeros_like(c_sc)
    c_sc[0:BATCH, :] = sp_ref[...] + nc_ref[...]                                 # + noise_c

    # ======================= decoder (LSTM + FC + next-token select) ================
    col = jax.lax.broadcasted_iota(jnp.int32, (B_PAD, OUT_PAD), 1)   # hoisted (no per-step iota)
    valid = col < OUTPUT_SIZE                                        # hoisted
    fcb = fcb_ref[...]                                               # already (B_PAD, OUT_PAD)

    def dec_step(t, carry):
        # ONE fused matmul: [x one-hot | h] @ [ dec_emb@Wih + b ; Whh ]
        gates = jnp.dot(xh_sc[...], wdec_ref[...], preferred_element_type=jnp.float32)
        sig = jax.nn.sigmoid(gates)
        tg = jnp.tanh(gates)
        i = sig[:, 0:DH]
        f = sig[:, DH:2 * DH]
        g = tg[:, 2 * DH:3 * DH]
        o = sig[:, 3 * DH:4 * DH]
        c_new = f * c_sc[...] + i * g
        h = o * jnp.tanh(c_new)
        c_sc[...] = c_new
        xh_sc[:, V_PAD:XH] = h

        # fused output projection; padded lanes carry 0 (masked in argmax below)
        logits = jnp.dot(h, fcw_ref[...], preferred_element_type=jnp.float32) + fcb
        logits_ref[t] = logits

        @pl.when(tf_ref[t] != 0)          # teacher forcing: just copy the target one-hot
        def _():
            xh_sc[:, 0:V_PAD] = child_ref[t]

        @pl.when(tf_ref[t] == 0)          # greedy: first-max argmax over valid vocab lanes
        def _():
            ml = jnp.where(valid, logits, -1e30)
            maxv = jnp.max(ml, axis=-1, keepdims=True)
            amax = jnp.min(jnp.where(ml == maxv, col, OUT_PAD), axis=-1, keepdims=True)
            xh_sc[:, 0:V_PAD] = (col == amax).astype(jnp.float32)

        return carry

    jax.lax.fori_loop(0, CHILD_LEN, dec_step, 0, unroll=True)


# ---------------- parameter init (small "real" weights) ----------------
def init_params(key):
    def u(k, shape, scale):
        return jax.random.uniform(k, shape, jnp.float32, -scale, scale)

    keys = jax.random.split(key, 13)
    se = ENC_HIDDEN ** -0.5
    sd = DEC_HIDDEN ** -0.5
    return {
        # encoder (single bias == b_ih + b_hh folded), gate order i,f,g,o
        "enc_emb":   u(keys[0], (VOCAB, EMB), 1.0),
        "enc_wih_f": u(keys[1], (EMB, 4 * ENC_HIDDEN), se),
        "enc_whh_f": u(keys[2], (ENC_HIDDEN, 4 * ENC_HIDDEN), se),
        "enc_b_f":   u(keys[3], (1, 4 * ENC_HIDDEN), se),
        "enc_wih_b": u(keys[4], (EMB, 4 * ENC_HIDDEN), se),
        "enc_whh_b": u(keys[5], (ENC_HIDDEN, 4 * ENC_HIDDEN), se),
        "enc_b_b":   u(keys[6], (1, 4 * ENC_HIDDEN), se),
        # decoder
        "dec_emb":   u(keys[7], (VOCAB, EMB), 1.0),
        "dec_wih":   u(keys[8], (EMB, 4 * DEC_HIDDEN), sd),
        "dec_whh":   u(keys[9], (DEC_HIDDEN, 4 * DEC_HIDDEN), sd),
        "dec_b":     u(keys[10], (1, 4 * DEC_HIDDEN), sd),
        "fc_w":      u(keys[11], (DEC_HIDDEN, OUTPUT_SIZE), sd),
        "fc_b":      u(keys[12], (1, OUTPUT_SIZE), sd),
    }


def pad_params(s):
    """One-time fusion / packing of the small weights into MXU-friendly tables."""
    hi = jax.lax.Precision.HIGHEST
    p = {"enc_emb": s["enc_emb"]}

    # encoder x-projection: block-diagonal over directions, biases folded via 1-lanes
    wex = jnp.zeros((ENC_IN, GATES_ENC), jnp.float32)
    wex = wex.at[0:EMB, 0:4 * ENC_HIDDEN].set(s["enc_wih_f"])
    wex = wex.at[EMB:2 * EMB, 0:4 * ENC_HIDDEN].set(s["enc_wih_b"])
    wex = wex.at[2 * EMB, 0:4 * ENC_HIDDEN].set(s["enc_b_f"][0])
    wex = wex.at[2 * EMB + 1, 0:4 * ENC_HIDDEN].set(s["enc_b_b"][0])
    p["w_enc_x"] = wex

    # encoder recurrent projection: per-direction weights stacked along the input rows
    weh = jnp.zeros((2 * ENC_HIDDEN, GATES_ENC), jnp.float32)
    weh = weh.at[0:ENC_HIDDEN, 0:4 * ENC_HIDDEN].set(s["enc_whh_f"])
    weh = weh.at[ENC_HIDDEN:2 * ENC_HIDDEN, 0:4 * ENC_HIDDEN].set(s["enc_whh_b"])
    p["w_enc_h"] = weh

    # decoder: embedding @ Wih + bias folded into a one-hot-indexable table (exact),
    # recurrent weights appended as the trailing rows of the same matrix
    wx = jnp.dot(s["dec_emb"], s["dec_wih"], precision=hi) + s["dec_b"]     # (VOCAB, 128)
    wdec = jnp.zeros((XH, GATES_DEC), jnp.float32)
    wdec = wdec.at[0:VOCAB, :].set(wx)
    wdec = wdec.at[V_PAD:XH, :].set(s["dec_whh"])
    p["w_dec_xh"] = wdec

    p["fc_w"] = jnp.zeros((DEC_HIDDEN, OUT_PAD), jnp.float32).at[:, :OUTPUT_SIZE].set(s["fc_w"])
    p["fc_b"] = jnp.zeros((B_PAD, OUT_PAD), jnp.float32).at[:, :OUTPUT_SIZE].set(
        jnp.broadcast_to(s["fc_b"], (B_PAD, OUTPUT_SIZE)))
    return p


# ---------------- forward (jitted, ONE pallas_call total) ----------------
def seq2seq_forward(p, parent_batch, child_batch, sos_token, noise_h, noise_c, tf_mask):
    B, T = parent_batch.shape

    # encoder input: fwd/bwd embeddings stacked block-diagonally (sublanes x lanes),
    # with constant-1 lanes carrying the per-direction biases
    emb = p["enc_emb"][parent_batch]                                  # (B, T, EMB)
    x = jnp.zeros((T, ROWS, ENC_IN), jnp.float32)
    x = x.at[:, 0:B, 0:EMB].set(jnp.transpose(emb, (1, 0, 2)))
    x = x.at[:, DIR_ROWS:DIR_ROWS + B, EMB:2 * EMB].set(jnp.transpose(emb[:, ::-1], (1, 0, 2)))
    x = x.at[:, 0:B, 2 * EMB].set(1.0)
    x = x.at[:, DIR_ROWS:DIR_ROWS + B, 2 * EMB + 1].set(1.0)
    enc_x = x.reshape(T * ROWS, ENC_IN)

    sos_oh = jax.nn.one_hot(jnp.full((B_PAD,), sos_token, jnp.int32), V_PAD, dtype=jnp.float32)
    child_oh = jax.nn.one_hot(child_batch.T, V_PAD, dtype=jnp.float32)     # (CHILD_LEN, B, V_PAD)
    child_oh = jnp.pad(child_oh, ((0, 0), (0, B_PAD - B), (0, 0)))

    vmem = pl.BlockSpec(memory_space=pltpu.MemorySpace.VMEM)
    smem = pl.BlockSpec(memory_space=pltpu.MemorySpace.SMEM)
    logits, sp = pl.pallas_call(
        _seq2seq_kernel,
        out_shape=(jax.ShapeDtypeStruct((CHILD_LEN, B_PAD, OUT_PAD), jnp.float32),
                   jax.ShapeDtypeStruct((BATCH, DEC_HIDDEN), jnp.float32)),
        in_specs=[smem] + [vmem] * 10,
        out_specs=(vmem, vmem),
        scratch_shapes=[pltpu.VMEM((PARENT_LEN * ROWS, GATES_ENC), jnp.float32),  # xg (hoisted x-proj)
                        pltpu.VMEM((ROWS, 2 * ENC_HIDDEN), jnp.float32),          # encoder h (lane-offset)
                        pltpu.VMEM((B_PAD, XH), jnp.float32),                     # decoder [x one-hot | h]
                        pltpu.VMEM((B_PAD, DEC_HIDDEN), jnp.float32)],            # decoder c
    )(tf_mask, enc_x, p["w_enc_x"], p["w_enc_h"], sos_oh, child_oh,
      noise_h[0], noise_c[0], p["w_dec_xh"], p["fc_w"], p["fc_b"])

    steps = jnp.transpose(logits[:, :B, :OUTPUT_SIZE], (1, 0, 2))               # (B, CHILD_LEN, V)
    outputs = jnp.concatenate([jnp.zeros((B, 1, OUTPUT_SIZE), jnp.float32), steps], axis=1)
    state_parent = sp.reshape(NUM_LAYERS, BATCH, 2 * ENC_HIDDEN)
    return outputs, state_parent


seq2seq_forward_jit = jax.jit(seq2seq_forward)
# TODO(synk): inference=True branch (1273 free-running steps) not implemented; training path only.


# ---------------- pure-JAX reference (unpadded) for numerical self-check ----------------
def _lstm_step_ref(x, h, c, wih, whh, b):
    H = h.shape[-1]
    gates = x @ wih + h @ whh + b
    i = jax.nn.sigmoid(gates[:, :H])
    f = jax.nn.sigmoid(gates[:, H:2 * H])
    g = jnp.tanh(gates[:, 2 * H:3 * H])
    o = jax.nn.sigmoid(gates[:, 3 * H:])
    c = f * c + i * g
    return o * jnp.tanh(c), c


def reference_forward(s, parent, child, sos, noise_h, noise_c, tf_mask):
    B, T = parent.shape
    emb = s["enc_emb"][parent]

    def run(wih, whh, b, seq):
        h = jnp.zeros((B, ENC_HIDDEN), jnp.float32)
        c = jnp.zeros((B, ENC_HIDDEN), jnp.float32)
        for t in range(T):
            h, c = _lstm_step_ref(seq[:, t], h, c, wih, whh, b)
        return h, c

    h_f, c_f = run(s["enc_wih_f"], s["enc_whh_f"], s["enc_b_f"], emb)
    h_b, c_b = run(s["enc_wih_b"], s["enc_whh_b"], s["enc_b_b"], emb[:, ::-1])
    hidden_ = jnp.stack([h_f, h_b], 0).reshape(NUM_LAYERS, B, 2 * ENC_HIDDEN)
    state_parent = jnp.stack([c_f, c_b], 0).reshape(NUM_LAYERS, B, 2 * ENC_HIDDEN)
    h = (hidden_ + noise_h)[0]
    c = (state_parent + noise_c)[0]
    x = jnp.full((B,), sos, jnp.int32)
    outs = [jnp.zeros((B, 1, OUTPUT_SIZE), jnp.float32)]
    for t in range(CHILD_LEN):
        e = s["dec_emb"][x]
        h, c = _lstm_step_ref(e, h, c, s["dec_wih"], s["dec_whh"], s["dec_b"])
        logits = h @ s["fc_w"] + s["fc_b"]
        outs.append(logits[:, None, :])
        x = jnp.where(tf_mask[t] > 0, child[:, t], jnp.argmax(logits, -1)).astype(jnp.int32)
    return jnp.concatenate(outs, 1), state_parent


# ---------------- main ----------------
if __name__ == "__main__":
    # make the XLA-side reference and the one-time weight fusion run at full f32
    # matmul precision so the self-check tolerance can be tight
    jax.config.update("jax_default_matmul_precision", "highest")

    root = jax.random.PRNGKey(0)
    k_params, k_parent, k_child, k_nh, k_nc, k_tf = jax.random.split(root, 6)

    small = init_params(k_params)
    padded = pad_params(small)

    parent_batch = jax.random.randint(k_parent, (BATCH, PARENT_LEN), 0, VOCAB, dtype=jnp.int32)
    child_batch = jax.random.randint(k_child, (BATCH, CHILD_LEN), 0, VOCAB, dtype=jnp.int32)
    noise_h = jax.random.normal(k_nh, (NUM_LAYERS, BATCH, 2 * ENC_HIDDEN), jnp.float32)
    noise_c = jax.random.normal(k_nc, (NUM_LAYERS, BATCH, 2 * ENC_HIDDEN), jnp.float32)

    # numerical self-check vs pure-JAX reference (full teacher forcing keeps it continuous)
    tf_ones = jnp.ones((CHILD_LEN,), jnp.int32)
    out_k, sp_k = seq2seq_forward_jit(padded, parent_batch, child_batch, SOS_TOKEN,
                                      noise_h, noise_c, tf_ones)
    out_r, sp_r = reference_forward(small, parent_batch, child_batch, SOS_TOKEN,
                                    noise_h, noise_c, tf_ones)
    err_out = float(jnp.max(jnp.abs(out_k - out_r)))
    err_sp = float(jnp.max(jnp.abs(sp_k - sp_r)))
    assert err_out < 1e-3, f"decoder outputs mismatch vs reference: max err {err_out}"
    assert err_sp < 1e-3, f"state_parent mismatch vs reference: max err {err_sp}"

    # real forward: stochastic teacher forcing (deterministic stand-in for random.random())
    tf_mask = (jax.random.uniform(k_tf, (CHILD_LEN,)) < TEACHER_FORCING_RATIO).astype(jnp.int32)
    outputs, state_parent = seq2seq_forward_jit(padded, parent_batch, child_batch, SOS_TOKEN,
                                                noise_h, noise_c, tf_mask)
    outputs = jax.block_until_ready(outputs)
    state_parent = jax.block_until_ready(state_parent)

    assert outputs.shape == (BATCH, CHILD_LEN + 1, OUTPUT_SIZE), outputs.shape
    assert state_parent.shape == (NUM_LAYERS, BATCH, 2 * ENC_HIDDEN), state_parent.shape
    print("KERNEL_OK")
</pallas_src>

<mosaic_0001>
module attributes {stable_mosaic.version = 11 : i64} {
  func.func @_seq2seq_kernel(%arg0: memref<6xi32, #tpu.memory_space<smem>>, %arg1: memref<64x18xf32, #tpu.memory_space<vmem>>, %arg2: memref<18x128xf32, #tpu.memory_space<vmem>>, %arg3: memref<32x128xf32, #tpu.memory_space<vmem>>, %arg4: memref<8x128xf32, #tpu.memory_space<vmem>>, %arg5: memref<6x8x128xf32, #tpu.memory_space<vmem>>, %arg6: memref<2x32xf32, #tpu.memory_space<vmem>>, %arg7: memref<2x32xf32, #tpu.memory_space<vmem>>, %arg8: memref<160x128xf32, #tpu.memory_space<vmem>>, %arg9: memref<32x128xf32, #tpu.memory_space<vmem>>, %arg10: memref<8x128xf32, #tpu.memory_space<vmem>>, %arg11: memref<6x8x128xf32, #tpu.memory_space<vmem>>, %arg12: memref<2x32xf32, #tpu.memory_space<vmem>>, %arg13: memref<64x128xf32, #tpu.memory_space<vmem>>, %arg14: memref<8x32xf32, #tpu.memory_space<vmem>>, %arg15: memref<8x160xf32, #tpu.memory_space<vmem>>, %arg16: memref<8x32xf32, #tpu.memory_space<vmem>>) attributes {dimension_semantics = [], scalar_prefetch = 0 : i64, scratch_operands = 4 : i64, tpu.core_type = #tpu.core_type<tc>} {
    %c0 = arith.constant 0 : index
    %c0_0 = arith.constant 0 : index
    %0 = vector.load %arg1[%c0, %c0_0] : memref<64x18xf32, #tpu.memory_space<vmem>>, vector<64x18xf32>
    %c0_1 = arith.constant 0 : index
    %c0_2 = arith.constant 0 : index
    %1 = vector.load %arg2[%c0_1, %c0_2] : memref<18x128xf32, #tpu.memory_space<vmem>>, vector<18x128xf32>
    %cst = arith.constant dense<0.000000e+00> : vector<64x128xf32>
    %2 = tpu.matmul %0, %1, %cst {dimension_numbers = #tpu.dot_dimension_numbers<[1], [0], [0], [1], [0, 0, 1, 1], [], []>, precision = #tpu.contract_precision<fp32>} : vector<64x18xf32>, vector<18x128xf32>, vector<64x128xf32> -> vector<64x128xf32>
    %c0_3 = arith.constant 0 : index
    %c0_4 = arith.constant 0 : index
    %3 = vector.load %arg13[%c0_3, %c0_4] : memref<64x128xf32, #tpu.memory_space<vmem>>, vector<64x128xf32>
    tpu.vector_store %arg13[%c0_3, %c0_4], %2 {strides = array<i32>} : memref<64x128xf32, #tpu.memory_space<vmem>>, vector<64x128xf32>,
    %cst_5 = arith.constant 0.000000e+00 : f32
    %4 = vector.broadcast %cst_5 : f32 to vector<8x32xf32>
    %c0_6 = arith.constant 0 : index
    %c0_7 = arith.constant 0 : index
    %5 = vector.load %arg14[%c0_6, %c0_7] : memref<8x32xf32, #tpu.memory_space<vmem>>, vector<8x32xf32>
    tpu.vector_store %arg14[%c0_6, %c0_7], %4 {strides = array<i32>} : memref<8x32xf32, #tpu.memory_space<vmem>>, vector<8x32xf32>,
    %cst_8 = arith.constant 0.000000e+00 : f32
    %6 = vector.broadcast %cst_8 : f32 to vector<8x16xf32>
    %c0_i32 = arith.constant 0 : i32
    %c8_i32 = arith.constant 8 : i32
    %7 = arith.muli %c0_i32, %c8_i32 : i32
    %8 = tpu.assume_multiple %7, 8 : i32
    %9 = arith.index_cast %8 : i32 to index
    %c0_9 = arith.constant 0 : index
    %10 = vector.load %arg13[%9, %c0_9] : memref<64x128xf32, #tpu.memory_space<vmem>>, vector<8x128xf32>
    %c0_10 = arith.constant 0 : index
    %c0_11 = arith.constant 0 : index
    %11 = vector.load %arg14[%c0_10, %c0_11] : memref<8x32xf32, #tpu.memory_space<vmem>>, vector<8x32xf32>
    %c0_12 = arith.constant 0 : index
    %c0_13 = arith.constant 0 : index
    %12 = vector.load %arg3[%c0_12, %c0_13] : memref<32x128xf32, #tpu.memory_space<vmem>>, vector<32x128xf32>
    %cst_14 = arith.constant dense<0.000000e+00> : vector<8x128xf32>
    %13 = tpu.matmul %11, %12, %cst_14 {dimension_numbers = #tpu.dot_dimension_numbers<[1], [0], [0], [1], [0, 0, 1, 1], [], []>, precision = #tpu.contract_precision<fp32>} : vector<8x32xf32>, vector<32x128xf32>, vector<8x128xf32> -> vector<8x128xf32>
    %14 = arith.addf %10, %13 : vector<8x128xf32>
    %15 = arith.negf %14 : vector<8x128xf32>
    %16 = math.exp %15 : vector<8x128xf32>
    %cst_15 = arith.constant 1.000000e+00 : f32
    %17 = vector.broadcast %cst_15 : f32 to vector<8x128xf32>
    %18 = arith.addf %17, %16 : vector<8x128xf32>
    %19 = arith.divf %17, %18 : vector<8x128xf32>
    %20 = math.tanh %14 : vector<8x128xf32>
    %21 = vector.extract_strided_slice %19 {offsets = [0, 0], sizes = [8, 16], strides = [1, 1]} : vector<8x128xf32> to vector<8x16xf32>
    %22 = vector.extract_strided_slice %19 {offsets = [0, 16], sizes = [8, 16], strides = [1, 1]} : vector<8x128xf32> to vector<8x16xf32>
    %23 = vector.extract_strided_slice %20 {offsets = [0, 32], sizes = [8, 16], strides = [1, 1]} : vector<8x128xf32> to vector<8x16xf32>
    %24 = vector.extract_strided_slice %19 {offsets = [0, 48], sizes = [8, 16], strides = [1, 1]} : vector<8x128xf32> to vector<8x16xf32>
    %25 = arith.mulf %22, %6 : vector<8x16xf32>
    %26 = arith.mulf %21, %23 : vector<8x16xf32>
    %27 = arith.addf %25, %26 : vector<8x16xf32>
    %28 = math.tanh %27 : vector<8x16xf32>
    %29 = arith.mulf %24, %28 : vector<8x16xf32>
    %30 = vector.extract_strided_slice %29 {offsets = [0, 0], sizes = [4, 16], strides = [1, 1]} : vector<8x16xf32> to vector<4x16xf32>
    %c0_16 = arith.constant 0 : index
    %c0_17 = arith.constant 0 : index
    %31 = vector.load %arg14[%c0_16, %c0_17] : memref<8x32xf32, #tpu.memory_space<vmem>>, vector<4x16xf32>
    tpu.vector_store %arg14[%c0_16, %c0_17], %30 {strides = array<i32>} : memref<8x32xf32, #tpu.memory_space<vmem>>, vector<4x16xf32>,
    %32 = vector.extract_strided_slice %29 {offsets = [4, 0], sizes = [4, 16], strides = [1, 1]} : vector<8x16xf32> to vector<4x16xf32>
    %c4 = arith.constant 4 : index
    %c16 = arith.constant 16 : index
    %33 = vector.load %arg14[%c4, %c16] : memref<8x32xf32, #tpu.memory_space<vmem>>, vector<4x16xf32>
    tpu.vector_store %arg14[%c4, %c16], %32 {strides = array<i32>} : memref<8x32xf32, #tpu.memory_space<vmem>>, vector<4x16xf32>,
    %c1_i32 = arith.constant 1 : i32
    %c8_i32_18 = arith.constant 8 : i32
    %34 = arith.muli %c1_i32, %c8_i32_18 : i32
    %35 = tpu.assume_multiple %34, 8 : i32
    %36 = arith.index_cast %35 : i32 to index
    %c0_19 = arith.constant 0 : index
    %37 = vector.load %arg13[%36, %c0_19] : memref<64x128xf32, #tpu.memory_space<vmem>>, vector<8x128xf32>
    %c0_20 = arith.constant 0 : index
    %c0_21 = arith.constant 0 : index
    %38 = vector.load %arg14[%c0_20, %c0_21] : memref<8x32xf32, #tpu.memory_space<vmem>>, vector<8x32xf32>
    %c0_22 = arith.constant 0 : index
    %c0_23 = arith.constant 0 : index
    %39 = vector.load %arg3[%c0_22, %c0_23] : memref<32x128xf32, #tpu.memory_space<vmem>>, vector<32x128xf32>
    %cst_24 = arith.constant dense<0.000000e+00> : vector<8x128xf32>
    %40 = tpu.matmul %38, %39, %cst_24 {dimension_numbers = #tpu.dot_dimension_numbers<[1], [0], [0], [1], [0, 0, 1, 1], [], []>, precision = #tpu.contract_precision<fp32>} : vector<8x32xf32>, vector<32x128xf32>, vector<8x128xf32> -> vector<8x128xf32>
    %41 = arith.addf %37, %40 : vector<8x128xf32>
    %42 = arith.negf %41 : vector<8x128xf32>
    %43 = math.exp %42 : vector<8x128xf32>
    %cst_25 = arith.constant 1.000000e+00 : f32
    %44 = vector.broadcast %cst_25 : f32 to vector<8x128xf32>
    %45 = arith.addf %44, %43 : vector<8x128xf32>
    %46 = arith.divf %44, %45 : vector<8x128xf32>
    %47 = math.tanh %41 : vector<8x128xf32>
    %48 = vector.extract_strided_slice %46 {offsets = [0, 0], sizes = [8, 16], strides = [1, 1]} : vector<8x128xf32> to vector<8x16xf32>
    %49 = vector.extract_strided_slice %46 {offsets = [0, 16], sizes = [8, 16], strides = [1, 1]} : vector<8x128xf32> to vector<8x16xf32>
    %50 = vector.extract_strided_slice %47 {offsets = [0, 32], sizes = [8, 16], strides = [1, 1]} : vector<8x128xf32> to vector<8x16xf32>
    %51 = vector.extract_strided_slice %46 {offsets = [0, 48], sizes = [8, 16], strides = [1, 1]} : vector<8x128xf32> to vector<8x16xf32>
    %52 = arith.mulf %49, %27 : vector<8x16xf32>
    %53 = arith.mulf %48, %50 : vector<8x16xf32>
    %54 = arith.addf %52, %53 : vector<8x16xf32>
    %55 = math.tanh %54 : vector<8x16xf32>
    %56 = arith.mulf %51, %55 : vector<8x16xf32>
    %57 = vector.extract_strided_slice %56 {offsets = [0, 0], sizes = [4, 16], strides = [1, 1]} : vector<8x16xf32> to vector<4x16xf32>
    %c0_26 = arith.constant 0 : index
    %c0_27 = arith.constant 0 : index
    %58 = vector.load %arg14[%c0_26, %c0_27] : memref<8x32xf32, #tpu.memory_space<vmem>>, vector<4x16xf32>
    tpu.vector_store %arg14[%c0_26, %c0_27], %57 {strides = array<i32>} : memref<8x32xf32, #tpu.memory_space<vmem>>, vector<4x16xf32>,
    %59 = vector.extract_strided_slice %56 {offsets = [4, 0], sizes = [4, 16], strides = [1, 1]} : vector<8x16xf32> to vector<4x16xf32>
    %c4_28 = arith.constant 4 : index
    %c16_29 = arith.constant 16 : index
    %60 = vector.load %arg14[%c4_28, %c16_29] : memref<8x32xf32, #tpu.memory_space<vmem>>, vector<4x16xf32>
    tpu.vector_store %arg14[%c4_28, %c16_29], %59 {strides = array<i32>} : memref<8x32xf32, #tpu.memory_space<vmem>>, vector<4x16xf32>,
    %c2_i32 = arith.constant 2 : i32
    %c8_i32_30 = arith.constant 8 : i32
    %61 = arith.muli %c2_i32, %c8_i32_30 : i32
    %62 = tpu.assume_multiple %61, 8 : i32
    %63 = arith.index_cast %62 : i32 to index
    %c0_31 = arith.constant 0 : index
    %64 = vector.load %arg13[%63, %c0_31] : memref<64x128xf32, #tpu.memory_space<vmem>>, vector<8x128xf32>
    %c0_32 = arith.constant 0 : index
    %c0_33 = arith.constant 0 : index
    %65 = vector.load %arg14[%c0_32, %c0_33] : memref<8x32xf32, #tpu.memory_space<vmem>>, vector<8x32xf32>
    %c0_34 = arith.constant 0 : index
    %c0_35 = arith.constant 0 : index
    %66 = vector.load %arg3[%c0_34, %c0_35] : memref<32x128xf32, #tpu.memory_space<vmem>>, vector<32x128xf32>
    %cst_36 = arith.constant dense<0.000000e+00> : vector<8x128xf32>
    %67 = tpu.matmul %65, %66, %cst_36 {dimension_numbers = #tpu.dot_dimension_numbers<[1], [0], [0], [1], [0, 0, 1, 1], [], []>, precision = #tpu.contract_precision<fp32>} : vector<8x32xf32>, vector<32x128xf32>, vector<8x128xf32> -> vector<8x128xf32>
    %68 = arith.addf %64, %67 : vector<8x128xf32>
    %69 = arith.negf %68 : vector<8x128xf32>
    %70 = math.exp %69 : vector<8x128xf32>
    %cst_37 = arith.constant 1.000000e+00 : f32
    %71 = vector.broadcast %cst_37 : f32 to vector<8x128xf32>
    %72 = arith.addf %71, %70 : vector<8x128xf32>
    %73 = arith.divf %71, %72 : vector<8x128xf32>
    %74 = math.tanh %68 : vector<8x128xf32>
    %75 = vector.extract_strided_slice %73 {offsets = [0, 0], sizes = [8, 16], strides = [1, 1]} : vector<8x128xf32> to vector<8x16xf32>
    %76 = vector.extract_strided_slice %73 {offsets = [0, 16], sizes = [8, 16], strides = [1, 1]} : vector<8x128xf32> to vector<8x16xf32>
    %77 = vector.extract_strided_slice %74 {offsets = [0, 32], sizes = [8, 16], strides = [1, 1]} : vector<8x128xf32> to vector<8x16xf32>
    %78 = vector.extract_strided_slice %73 {offsets = [0, 48], sizes = [8, 16], strides = [1, 1]} : vector<8x128xf32> to vector<8x16xf32>
    %79 = arith.mulf %76, %54 : vector<8x16xf32>
    %80 = arith.mulf %75, %77 : vector<8x16xf32>
    %81 = arith.addf %79, %80 : vector<8x16xf32>
    %82 = math.tanh %81 : vector<8x16xf32>
    %83 = arith.mulf %78, %82 : vector<8x16xf32>
    %84 = vector.extract_strided_slice %83 {offsets = [0, 0], sizes = [4, 16], strides = [1, 1]} : vector<8x16xf32> to vector<4x16xf32>
    %c0_38 = arith.constant 0 : index
    %c0_39 = arith.constant 0 : index
    %85 = vector.load %arg14[%c0_38, %c0_39] : memref<8x32xf32, #tpu.memory_space<vmem>>, vector<4x16xf32>
    tpu.vector_store %arg14[%c0_38, %c0_39], %84 {strides = array<i32>} : memref<8x32xf32, #tpu.memory_space<vmem>>, vector<4x16xf32>,
    %86 = vector.extract_strided_slice %83 {offsets = [4, 0], sizes = [4, 16], strides = [1, 1]} : vector<8x16xf32> to vector<4x16xf32>
    %c4_40 = arith.constant 4 : index
    %c16_41 = arith.constant 16 : index
    %87 = vector.load %arg14[%c4_40, %c16_41] : memref<8x32xf32, #tpu.memory_space<vmem>>, vector<4x16xf32>
    tpu.vector_store %arg14[%c4_40, %c16_41], %86 {strides = array<i32>} : memref<8x32xf32, #tpu.memory_space<vmem>>, vector<4x16xf32>,
    %c3_i32 = arith.constant 3 : i32
    %c8_i32_42 = arith.constant 8 : i32
    %88 = arith.muli %c3_i32, %c8_i32_42 : i32
    %89 = tpu.assume_multiple %88, 8 : i32
    %90 = arith.index_cast %89 : i32 to index
    %c0_43 = arith.constant 0 : index
    %91 = vector.load %arg13[%90, %c0_43] : memref<64x128xf32, #tpu.memory_space<vmem>>, vector<8x128xf32>
    %c0_44 = arith.constant 0 : index
    %c0_45 = arith.constant 0 : index
    %92 = vector.load %arg14[%c0_44, %c0_45] : memref<8x32xf32, #tpu.memory_space<vmem>>, vector<8x32xf32>
    %c0_46 = arith.constant 0 : index
    %c0_47 = arith.constant 0 : index
    %93 = vector.load %arg3[%c0_46, %c0_47] : memref<32x128xf32, #tpu.memory_space<vmem>>, vector<32x128xf32>
    %cst_48 = arith.constant dense<0.000000e+00> : vector<8x128xf32>
    %94 = tpu.matmul %92, %93, %cst_48 {dimension_numbers = #tpu.dot_dimension_numbers<[1], [0], [0], [1], [0, 0, 1, 1], [], []>, precision = #tpu.contract_precision<fp32>} : vector<8x32xf32>, vector<32x128xf32>, vector<8x128xf32> -> vector<8x128xf32>
    %95 = arith.addf %91, %94 : vector<8x128xf32>
    %96 = arith.negf %95 : vector<8x128xf32>
    %97 = math.exp %96 : vector<8x128xf32>
    %cst_49 = arith.constant 1.000000e+00 : f32
    %98 = vector.broadcast %cst_49 : f32 to vector<8x128xf32>
    %99 = arith.addf %98, %97 : vector<8x128xf32>
    %100 = arith.divf %98, %99 : vector<8x128xf32>
    %101 = math.tanh %95 : vector<8x128xf32>
    %102 = vector.extract_strided_slice %100 {offsets = [0, 0], sizes = [8, 16], strides = [1, 1]} : vector<8x128xf32> to vector<8x16xf32>
    %103 = vector.extract_strided_slice %100 {offsets = [0, 16], sizes = [8, 16], strides = [1, 1]} : vector<8x128xf32> to vector<8x16xf32>
    %104 = vector.extract_strided_slice %101 {offsets = [0, 32], sizes = [8, 16], strides = [1, 1]} : vector<8x128xf32> to vector<8x16xf32>
    %105 = vector.extract_strided_slice %100 {offsets = [0, 48], sizes = [8, 16], strides = [1, 1]} : vector<8x128xf32> to vector<8x16xf32>
    %106 = arith.mulf %103, %81 : vector<8x16xf32>
    %107 = arith.mulf %102, %104 : vector<8x16xf32>
    %108 = arith.addf %106, %107 : vector<8x16xf32>
    %109 = math.tanh %108 : vector<8x16xf32>
    %110 = arith.mulf %105, %109 : vector<8x16xf32>
    %111 = vector.extract_strided_slice %110 {offsets = [0, 0], sizes = [4, 16], strides = [1, 1]} : vector<8x16xf32> to vector<4x16xf32>
    %c0_50 = arith.constant 0 : index
    %c0_51 = arith.constant 0 : index
    %112 = vector.load %arg14[%c0_50, %c0_51] : memref<8x32xf32, #tpu.memory_space<vmem>>, vector<4x16xf32>
    tpu.vector_store %arg14[%c0_50, %c0_51], %111 {strides = array<i32>} : memref<8x32xf32, #tpu.memory_space<vmem>>, vector<4x16xf32>,
    %113 = vector.extract_strided_slice %110 {offsets = [4, 0], sizes = [4, 16], strides = [1, 1]} : vector<8x16xf32> to vector<4x16xf32>
    %c4_52 = arith.constant 4 : index
    %c16_53 = arith.constant 16 : index
    %114 = vector.load %arg14[%c4_52, %c16_53] : memref<8x32xf32, #tpu.memory_space<vmem>>, vector<4x16xf32>
    tpu.vector_store %arg14[%c4_52, %c16_53], %113 {strides = array<i32>} : memref<8x32xf32, #tpu.memory_space<vmem>>, vector<4x16xf32>,
    %c4_i32 = arith.constant 4 : i32
    %c8_i32_54 = arith.constant 8 : i32
    %115 = arith.muli %c4_i32, %c8_i32_54 : i32
    %116 = tpu.assume_multiple %115, 8 : i32
    %117 = arith.index_cast %116 : i32 to index
    %c0_55 = arith.constant 0 : index
    %118 = vector.load %arg13[%117, %c0_55] : memref<64x128xf32, #tpu.memory_space<vmem>>, vector<8x128xf32>
    %c0_56 = arith.constant 0 : index
    %c0_57 = arith.constant 0 : index
    %119 = vector.load %arg14[%c0_56, %c0_57] : memref<8x32xf32, #tpu.memory_space<vmem>>, vector<8x32xf32>
    %c0_58 = arith.constant 0 : index
    %c0_59 = arith.constant 0 : index
    %120 = vector.load %arg3[%c0_58, %c0_59] : memref<32x128xf32, #tpu.memory_space<vmem>>, vector<32x128xf32>
    %cst_60 = arith.constant dense<0.000000e+00> : vector<8x128xf32>
    %121 = tpu.matmul %119, %120, %cst_60 {dimension_numbers = #tpu.dot_dimension_numbers<[1], [0], [0], [1], [0, 0, 1, 1], [], []>, precision = #tpu.contract_precision<fp32>} : vector<8x32xf32>, vector<32x128xf32>, vector<8x128xf32> -> vector<8x128xf32>
    %122 = arith.addf %118, %121 : vector<8x128xf32>
    %123 = arith.negf %122 : vector<8x128xf32>
    %124 = math.exp %123 : vector<8x128xf32>
    %cst_61 = arith.constant 1.000000e+00 : f32
    %125 = vector.broadcast %cst_61 : f32 to vector<8x128xf32>
    %126 = arith.addf %125, %124 : vector<8x128xf32>
    %127 = arith.divf %125, %126 : vector<8x128xf32>
    %128 = math.tanh %122 : vector<8x128xf32>
    %129 = vector.extract_strided_slice %127 {offsets = [0, 0], sizes = [8, 16], strides = [1, 1]} : vector<8x128xf32> to vector<8x16xf32>
    %130 = vector.extract_strided_slice %127 {offsets = [0, 16], sizes = [8, 16], strides = [1, 1]} : vector<8x128xf32> to vector<8x16xf32>
    %131 = vector.extract_strided_slice %128 {offsets = [0, 32], sizes = [8, 16], strides = [1, 1]} : vector<8x128xf32> to vector<8x16xf32>
    %132 = vector.extract_strided_slice %127 {offsets = [0, 48], sizes = [8, 16], strides = [1, 1]} : vector<8x128xf32> to vector<8x16xf32>
    %133 = arith.mulf %130, %108 : vector<8x16xf32>
    %134 = arith.mulf %129, %131 : vector<8x16xf32>
    %135 = arith.addf %133, %134 : vector<8x16xf32>
    %136 = math.tanh %135 : vector<8x16xf32>
    %137 = arith.mulf %132, %136 : vector<8x16xf32>
    %138 = vector.extract_strided_slice %137 {offsets = [0, 0], sizes = [4, 16], strides = [1, 1]} : vector<8x16xf32> to vector<4x16xf32>
    %c0_62 = arith.constant 0 : index
    %c0_63 = arith.constant 0 : index
    %139 = vector.load %arg14[%c0_62, %c0_63] : memref<8x32xf32, #tpu.memory_space<vmem>>, vector<4x16xf32>
    tpu.vector_store %arg14[%c0_62, %c0_63], %138 {strides = array<i32>} : memref<8x32xf32, #tpu.memory_space<vmem>>, vector<4x16xf32>,
    %140 = vector.extract_strided_slice %137 {offsets = [4, 0], sizes = [4, 16], strides = [1, 1]} : vector<8x16xf32> to vector<4x16xf32>
    %c4_64 = arith.constant 4 : index
    %c16_65 = arith.constant 16 : index
    %141 = vector.load %arg14[%c4_64, %c16_65] : memref<8x32xf32, #tpu.memory_space<vmem>>, vector<4x16xf32>
    tpu.vector_store %arg14[%c4_64, %c16_65], %140 {strides = array<i32>} : memref<8x32xf32, #tpu.memory_space<vmem>>, vector<4x16xf32>,
    %c5_i32 = arith.constant 5 : i32
    %c8_i32_66 = arith.constant 8 : i32
    %142 = arith.muli %c5_i32, %c8_i32_66 : i32
    %143 = tpu.assume_multiple %142, 8 : i32
    %144 = arith.index_cast %143 : i32 to index
    %c0_67 = arith.constant 0 : index
    %145 = vector.load %arg13[%144, %c0_67] : memref<64x128xf32, #tpu.memory_space<vmem>>, vector<8x128xf32>
    %c0_68 = arith.constant 0 : index
    %c0_69 = arith.constant 0 : index
    %146 = vector.load %arg14[%c0_68, %c0_69] : memref<8x32xf32, #tpu.memory_space<vmem>>, vector<8x32xf32>
    %c0_70 = arith.constant 0 : index
    %c0_71 = arith.constant 0 : index
    %147 = vector.load %arg3[%c0_70, %c0_71] : memref<32x128xf32, #tpu.memory_space<vmem>>, vector<32x128xf32>
    %cst_72 = arith.constant dense<0.000000e+00> : vector<8x128xf32>
    %148 = tpu.matmul %146, %147, %cst_72 {dimension_numbers = #tpu.dot_dimension_numbers<[1], [0], [0], [1], [0, 0, 1, 1], [], []>, precision = #tpu.contract_precision<fp32>} : vector<8x32xf32>, vector<32x128xf32>, vector<8x128xf32> -> vector<8x128xf32>
    %149 = arith.addf %145, %148 : vector<8x128xf32>
    %150 = arith.negf %149 : vector<8x128xf32>
    %151 = math.exp %150 : vector<8x128xf32>
    %cst_73 = arith.constant 1.000000e+00 : f32
    %152 = vector.broadcast %cst_73 : f32 to vector<8x128xf32>
    %153 = arith.addf %152, %151 : vector<8x128xf32>
    %154 = arith.divf %152, %153 : vector<8x128xf32>
    %155 = math.tanh %149 : vector<8x128xf32>
    %156 = vector.extract_strided_slice %154 {offsets = [0, 0], sizes = [8, 16], strides = [1, 1]} : vector<8x128xf32> to vector<8x16xf32>
    %157 = vector.extract_strided_slice %154 {offsets = [0, 16], sizes = [8, 16], strides = [1, 1]} : vector<8x128xf32> to vector<8x16xf32>
    %158 = vector.extract_strided_slice %155 {offsets = [0, 32], sizes = [8, 16], strides = [1, 1]} : vector<8x128xf32> to vector<8x16xf32>
    %159 = vector.extract_strided_slice %154 {offsets = [0, 48], sizes = [8, 16], strides = [1, 1]} : vector<8x128xf32> to vector<8x16xf32>
    %160 = arith.mulf %157, %135 : vector<8x16xf32>
    %161 = arith.mulf %156, %158 : vector<8x16xf32>
    %162 = arith.addf %160, %161 : vector<8x16xf32>
    %163 = math.tanh %162 : vector<8x16xf32>
    %164 = arith.mulf %159, %163 : vector<8x16xf32>
    %165 = vector.extract_strided_slice %164 {offsets = [0, 0], sizes = [4, 16], strides = [1, 1]} : vector<8x16xf32> to vector<4x16xf32>
    %c0_74 = arith.constant 0 : index
    %c0_75 = arith.constant 0 : index
    %166 = vector.load %arg14[%c0_74, %c0_75] : memref<8x32xf32, #tpu.memory_space<vmem>>, vector<4x16xf32>
    tpu.vector_store %arg14[%c0_74, %c0_75], %165 {strides = array<i32>} : memref<8x32xf32, #tpu.memory_space<vmem>>, vector<4x16xf32>,
    %167 = vector.extract_strided_slice %164 {offsets = [4, 0], sizes = [4, 16], strides = [1, 1]} : vector<8x16xf32> to vector<4x16xf32>
    %c4_76 = arith.constant 4 : index
    %c16_77 = arith.constant 16 : index
    %168 = vector.load %arg14[%c4_76, %c16_77] : memref<8x32xf32, #tpu.memory_space<vmem>>, vector<4x16xf32>
    tpu.vector_store %arg14[%c4_76, %c16_77], %167 {strides = array<i32>} : memref<8x32xf32, #tpu.memory_space<vmem>>, vector<4x16xf32>,
    %c6_i32 = arith.constant 6 : i32
    %c8_i32_78 = arith.constant 8 : i32
    %169 = arith.muli %c6_i32, %c8_i32_78 : i32
    %170 = tpu.assume_multiple %169, 8 : i32
    %171 = arith.index_cast %170 : i32 to index
    %c0_79 = arith.constant 0 : index
    %172 = vector.load %arg13[%171, %c0_79] : memref<64x128xf32, #tpu.memory_space<vmem>>, vector<8x128xf32>
    %c0_80 = arith.constant 0 : index
    %c0_81 = arith.constant 0 : index
    %173 = vector.load %arg14[%c0_80, %c0_81] : memref<8x32xf32, #tpu.memory_space<vmem>>, vector<8x32xf32>
    %c0_82 = arith.constant 0 : index
    %c0_83 = arith.constant 0 : index
    %174 = vector.load %arg3[%c0_82, %c0_83] : memref<32x128xf32, #tpu.memory_space<vmem>>, vector<32x128xf32>
    %cst_84 = arith.constant dense<0.000000e+00> : vector<8x128xf32>
    %175 = tpu.matmul %173, %174, %cst_84 {dimension_numbers = #tpu.dot_dimension_numbers<[1], [0], [0], [1], [0, 0, 1, 1], [], []>, precision = #tpu.contract_precision<fp32>} : vector<8x32xf32>, vector<32x128xf32>, vector<8x128xf32> -> vector<8x128xf32>
    %176 = arith.addf %172, %175 : vector<8x128xf32>
    %177 = arith.negf %176 : vector<8x128xf32>
    %178 = math.exp %177 : vector<8x128xf32>
    %cst_85 = arith.constant 1.000000e+00 : f32
    %179 = vector.broadcast %cst_85 : f32 to vector<8x128xf32>
    %180 = arith.addf %179, %178 : vector<8x128xf32>
    %181 = arith.divf %179, %180 : vector<8x128xf32>
    %182 = math.tanh %176 : vector<8x128xf32>
    %183 = vector.extract_strided_slice %181 {offsets = [0, 0], sizes = [8, 16], strides = [1, 1]} : vector<8x128xf32> to vector<8x16xf32>
    %184 = vector.extract_strided_slice %181 {offsets = [0, 16], sizes = [8, 16], strides = [1, 1]} : vector<8x128xf32> to vector<8x16xf32>
    %185 = vector.extract_strided_slice %182 {offsets = [0, 32], sizes = [8, 16], strides = [1, 1]} : vector<8x128xf32> to vector<8x16xf32>
    %186 = vector.extract_strided_slice %181 {offsets = [0, 48], sizes = [8, 16], strides = [1, 1]} : vector<8x128xf32> to vector<8x16xf32>
    %187 = arith.mulf %184, %162 : vector<8x16xf32>
    %188 = arith.mulf %183, %185 : vector<8x16xf32>
    %189 = arith.addf %187, %188 : vector<8x16xf32>
    %190 = math.tanh %189 : vector<8x16xf32>
    %191 = arith.mulf %186, %190 : vector<8x16xf32>
    %192 = vector.extract_strided_slice %191 {offsets = [0, 0], sizes = [4, 16], strides = [1, 1]} : vector<8x16xf32> to vector<4x16xf32>
    %c0_86 = arith.constant 0 : index
    %c0_87 = arith.constant 0 : index
    %193 = vector.load %arg14[%c0_86, %c0_87] : memref<8x32xf32, #tpu.memory_space<vmem>>, vector<4x16xf32>
    tpu.vector_store %arg14[%c0_86, %c0_87], %192 {strides = array<i32>} : memref<8x32xf32, #tpu.memory_space<vmem>>, vector<4x16xf32>,
    %194 = vector.extract_strided_slice %191 {offsets = [4, 0], sizes = [4, 16], strides = [1, 1]} : vector<8x16xf32> to vector<4x16xf32>
    %c4_88 = arith.constant 4 : index
    %c16_89 = arith.constant 16 : index
    %195 = vector.load %arg14[%c4_88, %c16_89] : memref<8x32xf32, #tpu.memory_space<vmem>>, vector<4x16xf32>
    tpu.vector_store %arg14[%c4_88, %c16_89], %194 {strides = array<i32>} : memref<8x32xf32, #tpu.memory_space<vmem>>, vector<4x16xf32>,
    %c7_i32 = arith.constant 7 : i32
    %c8_i32_90 = arith.constant 8 : i32
    %196 = arith.muli %c7_i32, %c8_i32_90 : i32
    %197 = tpu.assume_multiple %196, 8 : i32
    %198 = arith.index_cast %197 : i32 to index
    %c0_91 = arith.constant 0 : index
    %199 = vector.load %arg13[%198, %c0_91] : memref<64x128xf32, #tpu.memory_space<vmem>>, vector<8x128xf32>
    %c0_92 = arith.constant 0 : index
    %c0_93 = arith.constant 0 : index
    %200 = vector.load %arg14[%c0_92, %c0_93] : memref<8x32xf32, #tpu.memory_space<vmem>>, vector<8x32xf32>
    %c0_94 = arith.constant 0 : index
    %c0_95 = arith.constant 0 : index
    %201 = vector.load %arg3[%c0_94, %c0_95] : memref<32x128xf32, #tpu.memory_space<vmem>>, vector<32x128xf32>
    %cst_96 = arith.constant dense<0.000000e+00> : vector<8x128xf32>
    %202 = tpu.matmul %200, %201, %cst_96 {dimension_numbers = #tpu.dot_dimension_numbers<[1], [0], [0], [1], [0, 0, 1, 1], [], []>, precision = #tpu.contract_precision<fp32>} : vector<8x32xf32>, vector<32x128xf32>, vector<8x128xf32> -> vector<8x128xf32>
    %203 = arith.addf %199, %202 : vector<8x128xf32>
    %204 = arith.negf %203 : vector<8x128xf32>
    %205 = math.exp %204 : vector<8x128xf32>
    %cst_97 = arith.constant 1.000000e+00 : f32
    %206 = vector.broadcast %cst_97 : f32 to vector<8x128xf32>
    %207 = arith.addf %206, %205 : vector<8x128xf32>
    %208 = arith.divf %206, %207 : vector<8x128xf32>
    %209 = math.tanh %203 : vector<8x128xf32>
    %210 = vector.extract_strided_slice %208 {offsets = [0, 0], sizes = [8, 16], strides = [1, 1]} : vector<8x128xf32> to vector<8x16xf32>
    %211 = vector.extract_strided_slice %208 {offsets = [0, 16], sizes = [8, 16], strides = [1, 1]} : vector<8x128xf32> to vector<8x16xf32>
    %212 = vector.extract_strided_slice %209 {offsets = [0, 32], sizes = [8, 16], strides = [1, 1]} : vector<8x128xf32> to vector<8x16xf32>
    %213 = vector.extract_strided_slice %208 {offsets = [0, 48], sizes = [8, 16], strides = [1, 1]} : vector<8x128xf32> to vector<8x16xf32>
    %214 = arith.mulf %211, %189 : vector<8x16xf32>
    %215 = arith.mulf %210, %212 : vector<8x16xf32>
    %216 = arith.addf %214, %215 : vector<8x16xf32>
    %217 = math.tanh %216 : vector<8x16xf32>
    %218 = arith.mulf %213, %217 : vector<8x16xf32>
    %219 = vector.extract_strided_slice %218 {offsets = [0, 0], sizes = [4, 16], strides = [1, 1]} : vector<8x16xf32> to vector<4x16xf32>
    %c0_98 = arith.constant 0 : index
    %c0_99 = arith.constant 0 : index
    %220 = vector.load %arg14[%c0_98, %c0_99] : memref<8x32xf32, #tpu.memory_space<vmem>>, vector<4x16xf32>
    tpu.vector_store %arg14[%c0_98, %c0_99], %219 {strides = array<i32>} : memref<8x32xf32, #tpu.memory_space<vmem>>, vector<4x16xf32>,
    %221 = vector.extract_strided_slice %218 {offsets = [4, 0], sizes = [4, 16], strides = [1, 1]} : vector<8x16xf32> to vector<4x16xf32>
    %c4_100 = arith.constant 4 : index
    %c16_101 = arith.constant 16 : index
    %222 = vector.load %arg14[%c4_100, %c16_101] : memref<8x32xf32, #tpu.memory_space<vmem>>, vector<4x16xf32>
    tpu.vector_store %arg14[%c4_100, %c16_101], %221 {strides = array<i32>} : memref<8x32xf32, #tpu.memory_space<vmem>>, vector<4x16xf32>,
    %c8_i32_102 = arith.constant 8 : i32
    %223 = vector.extract_strided_slice %216 {offsets = [0, 0], sizes = [1, 16], strides = [1, 1]} : vector<8x16xf32> to vector<1x16xf32>
    %c0_103 = arith.constant 0 : index
    %c0_104 = arith.constant 0 : index
    %224 = vector.load %arg12[%c0_103, %c0_104] : memref<2x32xf32, #tpu.memory_space<vmem>>, vector<1x16xf32>
    tpu.vector_store %arg12[%c0_103, %c0_104], %223 {strides = array<i32>} : memref<2x32xf32, #tpu.memory_space<vmem>>, vector<1x16xf32>,
    %225 = vector.extract_strided_slice %216 {offsets = [1, 0], sizes = [1, 16], strides = [1, 1]} : vector<8x16xf32> to vector<1x16xf32>
    %c0_105 = arith.constant 0 : index
    %c16_106 = arith.constant 16 : index
    %226 = vector.load %arg12[%c0_105, %c16_106] : memref<2x32xf32, #tpu.memory_space<vmem>>, vector<1x16xf32>
    tpu.vector_store %arg12[%c0_105, %c16_106], %225 {strides = array<i32>} : memref<2x32xf32, #tpu.memory_space<vmem>>, vector<1x16xf32>,
    %227 = vector.extract_strided_slice %216 {offsets = [4, 0], sizes = [1, 16], strides = [1, 1]} : vector<8x16xf32> to vector<1x16xf32>
    %c1 = arith.constant 1 : index
    %c0_107 = arith.constant 0 : index
    %228 = vector.load %arg12[%c1, %c0_107] : memref<2x32xf32, #tpu.memory_space<vmem>>, vector<1x16xf32>
    tpu.vector_store %arg12[%c1, %c0_107], %227 {strides = array<i32>} : memref<2x32xf32, #tpu.memory_space<vmem>>, vector<1x16xf32>,
    %229 = vector.extract_strided_slice %216 {offsets = [5, 0], sizes = [1, 16], strides = [1, 1]} : vector<8x16xf32> to vector<1x16xf32>
    %c1_108 = arith.constant 1 : index
    %c16_109 = arith.constant 16 : index
    %230 = vector.load %arg12[%c1_108, %c16_109] : memref<2x32xf32, #tpu.memory_space<vmem>>, vector<1x16xf32>
    tpu.vector_store %arg12[%c1_108, %c16_109], %229 {strides = array<i32>} : memref<2x32xf32, #tpu.memory_space<vmem>>, vector<1x16xf32>,
    %cst_110 = arith.constant 0.000000e+00 : f32
    %231 = vector.broadcast %cst_110 : f32 to vector<8x160xf32>
    %c0_111 = arith.constant 0 : index
    %c0_112 = arith.constant 0 : index
    %232 = vector.load %arg15[%c0_111, %c0_112] : memref<8x160xf32, #tpu.memory_space<vmem>>, vector<8x160xf32>
    tpu.vector_store %arg15[%c0_111, %c0_112], %231 {strides = array<i32>} : memref<8x160xf32, #tpu.memory_space<vmem>>, vector<8x160xf32>,
    %c0_113 = arith.constant 0 : index
    %c0_114 = arith.constant 0 : index
    %233 = vector.load %arg4[%c0_113, %c0_114] : memref<8x128xf32, #tpu.memory_space<vmem>>, vector<8x128xf32>
    %c0_115 = arith.constant 0 : index
    %c0_116 = arith.constant 0 : index
    %234 = vector.load %arg15[%c0_115, %c0_116] : memref<8x160xf32, #tpu.memory_space<vmem>>, vector<8x128xf32>
    tpu.vector_store %arg15[%c0_115, %c0_116], %233 {strides = array<i32>} : memref<8x160xf32, #tpu.memory_space<vmem>>, vector<8x128xf32>,
    %c0_117 = arith.constant 0 : index
    %c0_118 = arith.constant 0 : index
    %235 = vector.load %arg14[%c0_117, %c0_118] : memref<8x32xf32, #tpu.memory_space<vmem>>, vector<1x16xf32>
    %c0_119 = arith.constant 0 : index
    %c128 = arith.constant 128 : index
    %236 = vector.load %arg15[%c0_119, %c128] : memref<8x160xf32, #tpu.memory_space<vmem>>, vector<1x16xf32>
    tpu.vector_store %arg15[%c0_119, %c128], %235 {strides = array<i32>} : memref<8x160xf32, #tpu.memory_space<vmem>>, vector<1x16xf32>,
    %c1_120 = arith.constant 1 : index
    %c0_121 = arith.constant 0 : index
    %237 = vector.load %arg14[%c1_120, %c0_121] : memref<8x32xf32, #tpu.memory_space<vmem>>, vector<1x16xf32>
    %c0_122 = arith.constant 0 : index
    %c144 = arith.constant 144 : index
    %238 = vector.load %arg15[%c0_122, %c144] : memref<8x160xf32, #tpu.memory_space<vmem>>, vector<1x16xf32>
    tpu.vector_store %arg15[%c0_122, %c144], %237 {strides = array<i32>} : memref<8x160xf32, #tpu.memory_space<vmem>>, vector<1x16xf32>,
    %c4_123 = arith.constant 4 : index
    %c16_124 = arith.constant 16 : index
    %239 = vector.load %arg14[%c4_123, %c16_124] : memref<8x32xf32, #tpu.memory_space<vmem>>, vector<1x16xf32>
    %c1_125 = arith.constant 1 : index
    %c128_126 = arith.constant 128 : index
    %240 = vector.load %arg15[%c1_125, %c128_126] : memref<8x160xf32, #tpu.memory_space<vmem>>, vector<1x16xf32>
    tpu.vector_store %arg15[%c1_125, %c128_126], %239 {strides = array<i32>} : memref<8x160xf32, #tpu.memory_space<vmem>>, vector<1x16xf32>,
    %c5 = arith.constant 5 : index
    %c16_127 = arith.constant 16 : index
    %241 = vector.load %arg14[%c5, %c16_127] : memref<8x32xf32, #tpu.memory_space<vmem>>, vector<1x16xf32>
    %c1_128 = arith.constant 1 : index
    %c144_129 = arith.constant 144 : index
    %242 = vector.load %arg15[%c1_128, %c144_129] : memref<8x160xf32, #tpu.memory_space<vmem>>, vector<1x16xf32>
    tpu.vector_store %arg15[%c1_128, %c144_129], %241 {strides = array<i32>} : memref<8x160xf32, #tpu.memory_space<vmem>>, vector<1x16xf32>,
    %c0_130 = arith.constant 0 : index
    %c128_131 = arith.constant 128 : index
    %243 = vector.load %arg15[%c0_130, %c128_131] : memref<8x160xf32, #tpu.memory_space<vmem>>, vector<2x32xf32>
    %c0_132 = arith.constant 0 : index
    %c0_133 = arith.constant 0 : index
    %244 = vector.load %arg6[%c0_132, %c0_133] : memref<2x32xf32, #tpu.memory_space<vmem>>, vector<2x32xf32>
    %245 = arith.addf %243, %244 : vector<2x32xf32>
    %c0_134 = arith.constant 0 : index
    %c128_135 = arith.constant 128 : index
    %246 = vector.load %arg15[%c0_134, %c128_135] : memref<8x160xf32, #tpu.memory_space<vmem>>, vector<2x32xf32>
    tpu.vector_store %arg15[%c0_134, %c128_135], %245 {strides = array<i32>} : memref<8x160xf32, #tpu.memory_space<vmem>>, vector<2x32xf32>,
    %cst_136 = arith.constant 0.000000e+00 : f32
    %247 = vector.broadcast %cst_136 : f32 to vector<8x32xf32>
    %c0_137 = arith.constant 0 : index
    %c0_138 = arith.constant 0 : index
    %248 = vector.load %arg16[%c0_137, %c0_138] : memref<8x32xf32, #tpu.memory_space<vmem>>, vector<8x32xf32>
    tpu.vector_store %arg16[%c0_137, %c0_138], %247 {strides = array<i32>} : memref<8x32xf32, #tpu.memory_space<vmem>>, vector<8x32xf32>,
    %c0_139 = arith.constant 0 : index
    %c0_140 = arith.constant 0 : index
    %249 = vector.load %arg12[%c0_139, %c0_140] : memref<2x32xf32, #tpu.memory_space<vmem>>, vector<2x32xf32>
    %c0_141 = arith.constant 0 : index
    %c0_142 = arith.constant 0 : index
    %250 = vector.load %arg7[%c0_141, %c0_142] : memref<2x32xf32, #tpu.memory_space<vmem>>, vector<2x32xf32>
    %251 = arith.addf %249, %250 : vector<2x32xf32>
    %c0_143 = arith.constant 0 : index
    %c0_144 = arith.constant 0 : index
    %252 = vector.load %arg16[%c0_143, %c0_144] : memref<8x32xf32, #tpu.memory_space<vmem>>, vector<2x32xf32>
    tpu.vector_store %arg16[%c0_143, %c0_144], %251 {strides = array<i32>} : memref<8x32xf32, #tpu.memory_space<vmem>>, vector<2x32xf32>,
    %253 = tpu.iota {dimensions = array<i32: 1>} : vector<8x128xi32>
    %c16_i32 = arith.constant 16 : i32
    %254 = vector.broadcast %c16_i32 : i32 to vector<8x128xi32>
    %255 = arith.cmpi slt, %253, %254 : vector<8x128xi32>
    %c0_145 = arith.constant 0 : index
    %c0_146 = arith.constant 0 : index
    %256 = vector.load %arg10[%c0_145, %c0_146] : memref<8x128xf32, #tpu.memory_space<vmem>>, vector<8x128xf32>
    %c0_i32_147 = arith.constant 0 : i32
    %c0_148 = arith.constant 0 : index
    %c0_149 = arith.constant 0 : index
    %257 = vector.load %arg15[%c0_148, %c0_149] : memref<8x160xf32, #tpu.memory_space<vmem>>, vector<8x160xf32>
    %c0_150 = arith.constant 0 : index
    %c0_151 = arith.constant 0 : index
    %258 = vector.load %arg8[%c0_150, %c0_151] : memref<160x128xf32, #tpu.memory_space<vmem>>, vector<160x128xf32>
    %cst_152 = arith.constant dense<0.000000e+00> : vector<8x128xf32>
    %259 = tpu.matmul %257, %258, %cst_152 {dimension_numbers = #tpu.dot_dimension_numbers<[1], [0], [0], [1], [0, 0, 1, 1], [], []>, precision = #tpu.contract_precision<fp32>} : vector<8x160xf32>, vector<160x128xf32>, vector<8x128xf32> -> vector<8x128xf32>
    %260 = arith.negf %259 : vector<8x128xf32>
    %261 = math.exp %260 : vector<8x128xf32>
    %cst_153 = arith.constant 1.000000e+00 : f32
    %262 = vector.broadcast %cst_153 : f32 to vector<8x128xf32>
    %263 = arith.addf %262, %261 : vector<8x128xf32>
    %264 = arith.divf %262, %263 : vector<8x128xf32>
    %265 = math.tanh %259 : vector<8x128xf32>
    %266 = vector.extract_strided_slice %264 {offsets = [0, 0], sizes = [8, 32], strides = [1, 1]} : vector<8x128xf32> to vector<8x32xf32>
    %267 = vector.extract_strided_slice %264 {offsets = [0, 32], sizes = [8, 32], strides = [1, 1]} : vector<8x128xf32> to vector<8x32xf32>
    %268 = vector.extract_strided_slice %265 {offsets = [0, 64], sizes = [8, 32], strides = [1, 1]} : vector<8x128xf32> to vector<8x32xf32>
    %269 = vector.extract_strided_slice %264 {offsets = [0, 96], sizes = [8, 32], strides = [1, 1]} : vector<8x128xf32> to vector<8x32xf32>
    %c0_154 = arith.constant 0 : index
    %c0_155 = arith.constant 0 : index
    %270 = vector.load %arg16[%c0_154, %c0_155] : memref<8x32xf32, #tpu.memory_space<vmem>>, vector<8x32xf32>
    %271 = arith.mulf %267, %270 : vector<8x32xf32>
    %272 = arith.mulf %266, %268 : vector<8x32xf32>
    %273 = arith.addf %271, %272 : vector<8x32xf32>
    %274 = math.tanh %273 : vector<8x32xf32>
    %275 = arith.mulf %269, %274 : vector<8x32xf32>
    %c0_156 = arith.constant 0 : index
    %c0_157 = arith.constant 0 : index
    %276 = vector.load %arg16[%c0_156, %c0_157] : memref<8x32xf32, #tpu.memory_space<vmem>>, vector<8x32xf32>
    tpu.vector_store %arg16[%c0_156, %c0_157], %273 {strides = array<i32>} : memref<8x32xf32, #tpu.memory_space<vmem>>, vector<8x32xf32>,
    %c0_158 = arith.constant 0 : index
    %c128_159 = arith.constant 128 : index
    %277 = vector.load %arg15[%c0_158, %c128_159] : memref<8x160xf32, #tpu.memory_space<vmem>>, vector<8x32xf32>
    tpu.vector_store %arg15[%c0_158, %c128_159], %275 {strides = array<i32>} : memref<8x160xf32, #tpu.memory_space<vmem>>, vector<8x32xf32>,
    %c0_160 = arith.constant 0 : index
    %c0_161 = arith.constant 0 : index
    %278 = vector.load %arg9[%c0_160, %c0_161] : memref<32x128xf32, #tpu.memory_space<vmem>>, vector<32x128xf32>
    %cst_162 = arith.constant dense<0.000000e+00> : vector<8x128xf32>
    %279 = tpu.matmul %275, %278, %cst_162 {dimension_numbers = #tpu.dot_dimension_numbers<[1], [0], [0], [1], [0, 0, 1, 1], [], []>, precision = #tpu.contract_precision<fp32>} : vector<8x32xf32>, vector<32x128xf32>, vector<8x128xf32> -> vector<8x128xf32>
    %280 = arith.addf %279, %256 : vector<8x128xf32>
    %281 = arith.index_cast %c0_i32_147 : i32 to index
    %c0_163 = arith.constant 0 : index
    %c0_164 = arith.constant 0 : index
    %282 = vector.load %arg11[%281, %c0_163, %c0_164] : memref<6x8x128xf32, #tpu.memory_space<vmem>>, vector<1x8x128xf32>
    %283 = vector.shape_cast %282 : vector<1x8x128xf32> to vector<8x128xf32>
    %284 = vector.shape_cast %280 : vector<8x128xf32> to vector<1x8x128xf32>
    tpu.vector_store %arg11[%281, %c0_163, %c0_164], %284 {strides = array<i32>} : memref<6x8x128xf32, #tpu.memory_space<vmem>>, vector<1x8x128xf32>,
    %285 = arith.index_cast %c0_i32_147 : i32 to index
    %286 = memref.load %arg0[%285] : memref<6xi32, #tpu.memory_space<smem>>
    %c0_i32_165 = arith.constant 0 : i32
    %287 = arith.cmpi ne, %286, %c0_i32_165 : i32
    %288 = arith.extui %287 : i1 to i32
    %c0_i32_166 = arith.constant 0 : i32
    %289 = arith.cmpi ne, %288, %c0_i32_166 : i32
    scf.if %289 {
      %485 = arith.index_cast %c0_i32_147 : i32 to index
      %c0_280 = arith.constant 0 : index
      %c0_281 = arith.constant 0 : index
      %486 = vector.load %arg5[%485, %c0_280, %c0_281] : memref<6x8x128xf32, #tpu.memory_space<vmem>>, vector<1x8x128xf32>
      %487 = vector.shape_cast %486 : vector<1x8x128xf32> to vector<8x128xf32>
      %c0_282 = arith.constant 0 : index
      %c0_283 = arith.constant 0 : index
      %488 = vector.load %arg15[%c0_282, %c0_283] : memref<8x160xf32, #tpu.memory_space<vmem>>, vector<8x128xf32>
      tpu.vector_store %arg15[%c0_282, %c0_283], %487 {strides = array<i32>} : memref<8x160xf32, #tpu.memory_space<vmem>>, vector<8x128xf32>,
    } else {
    }
    %290 = arith.index_cast %c0_i32_147 : i32 to index
    %291 = memref.load %arg0[%290] : memref<6xi32, #tpu.memory_space<smem>>
    %c0_i32_167 = arith.constant 0 : i32
    %292 = arith.cmpi eq, %291, %c0_i32_167 : i32
    %293 = arith.extui %292 : i1 to i32
    %c0_i32_168 = arith.constant 0 : i32
    %294 = arith.cmpi ne, %293, %c0_i32_168 : i32
    scf.if %294 {
      %cst_280 = arith.constant -1.000000e+30 : f32
      %485 = vector.broadcast %cst_280 : f32 to vector<8x128xf32>
      %486 = arith.select %255, %280, %485 : vector<8x128xi1>, vector<8x128xf32>
      %cst_281 = arith.constant dense<0xFF800000> : vector<8xf32>
      %487 = vector.multi_reduction <maximumf>, %486, %cst_281 [1] : vector<8x128xf32> to vector<8xf32>
      %488 = vector.shape_cast %487 : vector<8xf32> to vector<8x1xf32>
      %489 = vector.broadcast %488 : vector<8x1xf32> to vector<8x128xf32>
      %490 = arith.cmpf oeq, %486, %489 : vector<8x128xf32>
      %c128_i32 = arith.constant 128 : i32
      %491 = vector.broadcast %c128_i32 : i32 to vector<8x128xi32>
      %492 = arith.select %490, %253, %491 : vector<8x128xi1>, vector<8x128xi32>
      %cst_282 = arith.constant dense<2147483647> : vector<8xi32>
      %493 = vector.multi_reduction <minsi>, %492, %cst_282 [1] : vector<8x128xi32> to vector<8xi32>
      %494 = vector.shape_cast %493 : vector<8xi32> to vector<8x1xi32>
      %495 = vector.broadcast %494 : vector<8x1xi32> to vector<8x128xi32>
      %496 = arith.cmpi eq, %253, %495 : vector<8x128xi32>
      %497 = arith.extui %496 : vector<8x128xi1> to vector<8x128xi32>
      %498 = arith.sitofp %497 : vector<8x128xi32> to vector<8x128xf32>
      %c0_283 = arith.constant 0 : index
      %c0_284 = arith.constant 0 : index
      %499 = vector.load %arg15[%c0_283, %c0_284] : memref<8x160xf32, #tpu.memory_space<vmem>>, vector<8x128xf32>
      tpu.vector_store %arg15[%c0_283, %c0_284], %498 {strides = array<i32>} : memref<8x160xf32, #tpu.memory_space<vmem>>, vector<8x128xf32>,
    } else {
    }
    %c1_i32_169 = arith.constant 1 : i32
    %c0_170 = arith.constant 0 : index
    %c0_171 = arith.constant 0 : index
    %295 = vector.load %arg15[%c0_170, %c0_171] : memref<8x160xf32, #tpu.memory_space<vmem>>, vector<8x160xf32>
    %c0_172 = arith.constant 0 : index
    %c0_173 = arith.constant 0 : index
    %296 = vector.load %arg8[%c0_172, %c0_173] : memref<160x128xf32, #tpu.memory_space<vmem>>, vector<160x128xf32>
    %cst_174 = arith.constant dense<0.000000e+00> : vector<8x128xf32>
    %297 = tpu.matmul %295, %296, %cst_174 {dimension_numbers = #tpu.dot_dimension_numbers<[1], [0], [0], [1], [0, 0, 1, 1], [], []>, precision = #tpu.contract_precision<fp32>} : vector<8x160xf32>, vector<160x128xf32>, vector<8x128xf32> -> vector<8x128xf32>
    %298 = arith.negf %297 : vector<8x128xf32>
    %299 = math.exp %298 : vector<8x128xf32>
    %cst_175 = arith.constant 1.000000e+00 : f32
    %300 = vector.broadcast %cst_175 : f32 to vector<8x128xf32>
    %301 = arith.addf %300, %299 : vector<8x128xf32>
    %302 = arith.divf %300, %301 : vector<8x128xf32>
    %303 = math.tanh %297 : vector<8x128xf32>
    %304 = vector.extract_strided_slice %302 {offsets = [0, 0], sizes = [8, 32], strides = [1, 1]} : vector<8x128xf32> to vector<8x32xf32>
    %305 = vector.extract_strided_slice %302 {offsets = [0, 32], sizes = [8, 32], strides = [1, 1]} : vector<8x128xf32> to vector<8x32xf32>
    %306 = vector.extract_strided_slice %303 {offsets = [0, 64], sizes = [8, 32], strides = [1, 1]} : vector<8x128xf32> to vector<8x32xf32>
    %307 = vector.extract_strided_slice %302 {offsets = [0, 96], sizes = [8, 32], strides = [1, 1]} : vector<8x128xf32> to vector<8x32xf32>
    %c0_176 = arith.constant 0 : index
    %c0_177 = arith.constant 0 : index
    %308 = vector.load %arg16[%c0_176, %c0_177] : memref<8x32xf32, #tpu.memory_space<vmem>>, vector<8x32xf32>
    %309 = arith.mulf %305, %308 : vector<8x32xf32>
    %310 = arith.mulf %304, %306 : vector<8x32xf32>
    %311 = arith.addf %309, %310 : vector<8x32xf32>
    %312 = math.tanh %311 : vector<8x32xf32>
    %313 = arith.mulf %307, %312 : vector<8x32xf32>
    %c0_178 = arith.constant 0 : index
    %c0_179 = arith.constant 0 : index
    %314 = vector.load %arg16[%c0_178, %c0_179] : memref<8x32xf32, #tpu.memory_space<vmem>>, vector<8x32xf32>
    tpu.vector_store %arg16[%c0_178, %c0_179], %311 {strides = array<i32>} : memref<8x32xf32, #tpu.memory_space<vmem>>, vector<8x32xf32>,
    %c0_180 = arith.constant 0 : index
    %c128_181 = arith.constant 128 : index
    %315 = vector.load %arg15[%c0_180, %c128_181] : memref<8x160xf32, #tpu.memory_space<vmem>>, vector<8x32xf32>
    tpu.vector_store %arg15[%c0_180, %c128_181], %313 {strides = array<i32>} : memref<8x160xf32, #tpu.memory_space<vmem>>, vector<8x32xf32>,
    %c0_182 = arith.constant 0 : index
    %c0_183 = arith.constant 0 : index
    %316 = vector.load %arg9[%c0_182, %c0_183] : memref<32x128xf32, #tpu.memory_space<vmem>>, vector<32x128xf32>
    %cst_184 = arith.constant dense<0.000000e+00> : vector<8x128xf32>
    %317 = tpu.matmul %313, %316, %cst_184 {dimension_numbers = #tpu.dot_dimension_numbers<[1], [0], [0], [1], [0, 0, 1, 1], [], []>, precision = #tpu.contract_precision<fp32>} : vector<8x32xf32>, vector<32x128xf32>, vector<8x128xf32> -> vector<8x128xf32>
    %318 = arith.addf %317, %256 : vector<8x128xf32>
    %319 = arith.index_cast %c1_i32_169 : i32 to index
    %c0_185 = arith.constant 0 : index
    %c0_186 = arith.constant 0 : index
    %320 = vector.load %arg11[%319, %c0_185, %c0_186] : memref<6x8x128xf32, #tpu.memory_space<vmem>>, vector<1x8x128xf32>
    %321 = vector.shape_cast %320 : vector<1x8x128xf32> to vector<8x128xf32>
    %322 = vector.shape_cast %318 : vector<8x128xf32> to vector<1x8x128xf32>
    tpu.vector_store %arg11[%319, %c0_185, %c0_186], %322 {strides = array<i32>} : memref<6x8x128xf32, #tpu.memory_space<vmem>>, vector<1x8x128xf32>,
    %323 = arith.index_cast %c1_i32_169 : i32 to index
    %324 = memref.load %arg0[%323] : memref<6xi32, #tpu.memory_space<smem>>
    %c0_i32_187 = arith.constant 0 : i32
    %325 = arith.cmpi ne, %324, %c0_i32_187 : i32
    %326 = arith.extui %325 : i1 to i32
    %c0_i32_188 = arith.constant 0 : i32
    %327 = arith.cmpi ne, %326, %c0_i32_188 : i32
    scf.if %327 {
      %485 = arith.index_cast %c1_i32_169 : i32 to index
      %c0_280 = arith.constant 0 : index
      %c0_281 = arith.constant 0 : index
      %486 = vector.load %arg5[%485, %c0_280, %c0_281] : memref<6x8x128xf32, #tpu.memory_space<vmem>>, vector<1x8x128xf32>
      %487 = vector.shape_cast %486 : vector<1x8x128xf32> to vector<8x128xf32>
      %c0_282 = arith.constant 0 : index
      %c0_283 = arith.constant 0 : index
      %488 = vector.load %arg15[%c0_282, %c0_283] : memref<8x160xf32, #tpu.memory_space<vmem>>, vector<8x128xf32>
      tpu.vector_store %arg15[%c0_282, %c0_283], %487 {strides = array<i32>} : memref<8x160xf32, #tpu.memory_space<vmem>>, vector<8x128xf32>,
    } else {
    }
    %328 = arith.index_cast %c1_i32_169 : i32 to index
    %329 = memref.load %arg0[%328] : memref<6xi32, #tpu.memory_space<smem>>
    %c0_i32_189 = arith.constant 0 : i32
    %330 = arith.cmpi eq, %329, %c0_i32_189 : i32
    %331 = arith.extui %330 : i1 to i32
    %c0_i32_190 = arith.constant 0 : i32
    %332 = arith.cmpi ne, %331, %c0_i32_190 : i32
    scf.if %332 {
      %cst_280 = arith.constant -1.000000e+30 : f32
      %485 = vector.broadcast %cst_280 : f32 to vector<8x128xf32>
      %486 = arith.select %255, %318, %485 : vector<8x128xi1>, vector<8x128xf32>
      %cst_281 = arith.constant dense<0xFF800000> : vector<8xf32>
      %487 = vector.multi_reduction <maximumf>, %486, %cst_281 [1] : vector<8x128xf32> to vector<8xf32>
      %488 = vector.shape_cast %487 : vector<8xf32> to vector<8x1xf32>
      %489 = vector.broadcast %488 : vector<8x1xf32> to vector<8x128xf32>
      %490 = arith.cmpf oeq, %486, %489 : vector<8x128xf32>
      %c128_i32 = arith.constant 128 : i32
      %491 = vector.broadcast %c128_i32 : i32 to vector<8x128xi32>
      %492 = arith.select %490, %253, %491 : vector<8x128xi1>, vector<8x128xi32>
      %cst_282 = arith.constant dense<2147483647> : vector<8xi32>
      %493 = vector.multi_reduction <minsi>, %492, %cst_282 [1] : vector<8x128xi32> to vector<8xi32>
      %494 = vector.shape_cast %493 : vector<8xi32> to vector<8x1xi32>
      %495 = vector.broadcast %494 : vector<8x1xi32> to vector<8x128xi32>
      %496 = arith.cmpi eq, %253, %495 : vector<8x128xi32>
      %497 = arith.extui %496 : vector<8x128xi1> to vector<8x128xi32>
      %498 = arith.sitofp %497 : vector<8x128xi32> to vector<8x128xf32>
      %c0_283 = arith.constant 0 : index
      %c0_284 = arith.constant 0 : index
      %499 = vector.load %arg15[%c0_283, %c0_284] : memref<8x160xf32, #tpu.memory_space<vmem>>, vector<8x128xf32>
      tpu.vector_store %arg15[%c0_283, %c0_284], %498 {strides = array<i32>} : memref<8x160xf32, #tpu.memory_space<vmem>>, vector<8x128xf32>,
    } else {
    }
    %c2_i32_191 = arith.constant 2 : i32
    %c0_192 = arith.constant 0 : index
    %c0_193 = arith.constant 0 : index
    %333 = vector.load %arg15[%c0_192, %c0_193] : memref<8x160xf32, #tpu.memory_space<vmem>>, vector<8x160xf32>
    %c0_194 = arith.constant 0 : index
    %c0_195 = arith.constant 0 : index
    %334 = vector.load %arg8[%c0_194, %c0_195] : memref<160x128xf32, #tpu.memory_space<vmem>>, vector<160x128xf32>
    %cst_196 = arith.constant dense<0.000000e+00> : vector<8x128xf32>
    %335 = tpu.matmul %333, %334, %cst_196 {dimension_numbers = #tpu.dot_dimension_numbers<[1], [0], [0], [1], [0, 0, 1, 1], [], []>, precision = #tpu.contract_precision<fp32>} : vector<8x160xf32>, vector<160x128xf32>, vector<8x128xf32> -> vector<8x128xf32>
    %336 = arith.negf %335 : vector<8x128xf32>
    %337 = math.exp %336 : vector<8x128xf32>
    %cst_197 = arith.constant 1.000000e+00 : f32
    %338 = vector.broadcast %cst_197 : f32 to vector<8x128xf32>
    %339 = arith.addf %338, %337 : vector<8x128xf32>
    %340 = arith.divf %338, %339 : vector<8x128xf32>
    %341 = math.tanh %335 : vector<8x128xf32>
    %342 = vector.extract_strided_slice %340 {offsets = [0, 0], sizes = [8, 32], strides = [1, 1]} : vector<8x128xf32> to vector<8x32xf32>
    %343 = vector.extract_strided_slice %340 {offsets = [0, 32], sizes = [8, 32], strides = [1, 1]} : vector<8x128xf32> to vector<8x32xf32>
    %344 = vector.extract_strided_slice %341 {offsets = [0, 64], sizes = [8, 32], strides = [1, 1]} : vector<8x128xf32> to vector<8x32xf32>
    %345 = vector.extract_strided_slice %340 {offsets = [0, 96], sizes = [8, 32], strides = [1, 1]} : vector<8x128xf32> to vector<8x32xf32>
    %c0_198 = arith.constant 0 : index
    %c0_199 = arith.constant 0 : index
    %346 = vector.load %arg16[%c0_198, %c0_199] : memref<8x32xf32, #tpu.memory_space<vmem>>, vector<8x32xf32>
    %347 = arith.mulf %343, %346 : vector<8x32xf32>
    %348 = arith.mulf %342, %344 : vector<8x32xf32>
    %349 = arith.addf %347, %348 : vector<8x32xf32>
    %350 = math.tanh %349 : vector<8x32xf32>
    %351 = arith.mulf %345, %350 : vector<8x32xf32>
    %c0_200 = arith.constant 0 : index
    %c0_201 = arith.constant 0 : index
    %352 = vector.load %arg16[%c0_200, %c0_201] : memref<8x32xf32, #tpu.memory_space<vmem>>, vector<8x32xf32>
    tpu.vector_store %arg16[%c0_200, %c0_201], %349 {strides = array<i32>} : memref<8x32xf32, #tpu.memory_space<vmem>>, vector<8x32xf32>,
    %c0_202 = arith.constant 0 : index
    %c128_203 = arith.constant 128 : index
    %353 = vector.load %arg15[%c0_202, %c128_203] : memref<8x160xf32, #tpu.memory_space<vmem>>, vector<8x32xf32>
    tpu.vector_store %arg15[%c0_202, %c128_203], %351 {strides = array<i32>} : memref<8x160xf32, #tpu.memory_space<vmem>>, vector<8x32xf32>,
    %c0_204 = arith.constant 0 : index
    %c0_205 = arith.constant 0 : index
    %354 = vector.load %arg9[%c0_204, %c0_205] : memref<32x128xf32, #tpu.memory_space<vmem>>, vector<32x128xf32>
    %cst_206 = arith.constant dense<0.000000e+00> : vector<8x128xf32>
    %355 = tpu.matmul %351, %354, %cst_206 {dimension_numbers = #tpu.dot_dimension_numbers<[1], [0], [0], [1], [0, 0, 1, 1], [], []>, precision = #tpu.contract_precision<fp32>} : vector<8x32xf32>, vector<32x128xf32>, vector<8x128xf32> -> vector<8x128xf32>
    %356 = arith.addf %355, %256 : vector<8x128xf32>
    %357 = arith.index_cast %c2_i32_191 : i32 to index
    %c0_207 = arith.constant 0 : index
    %c0_208 = arith.constant 0 : index
    %358 = vector.load %arg11[%357, %c0_207, %c0_208] : memref<6x8x128xf32, #tpu.memory_space<vmem>>, vector<1x8x128xf32>
    %359 = vector.shape_cast %358 : vector<1x8x128xf32> to vector<8x128xf32>
    %360 = vector.shape_cast %356 : vector<8x128xf32> to vector<1x8x128xf32>
    tpu.vector_store %arg11[%357, %c0_207, %c0_208], %360 {strides = array<i32>} : memref<6x8x128xf32, #tpu.memory_space<vmem>>, vector<1x8x128xf32>,
    %361 = arith.index_cast %c2_i32_191 : i32 to index
    %362 = memref.load %arg0[%361] : memref<6xi32, #tpu.memory_space<smem>>
    %c0_i32_209 = arith.constant 0 : i32
    %363 = arith.cmpi ne, %362, %c0_i32_209 : i32
    %364 = arith.extui %363 : i1 to i32
    %c0_i32_210 = arith.constant 0 : i32
    %365 = arith.cmpi ne, %364, %c0_i32_210 : i32
    scf.if %365 {
      %485 = arith.index_cast %c2_i32_191 : i32 to index
      %c0_280 = arith.constant 0 : index
      %c0_281 = arith.constant 0 : index
      %486 = vector.load %arg5[%485, %c0_280, %c0_281] : memref<6x8x128xf32, #tpu.memory_space<vmem>>, vector<1x8x128xf32>
      %487 = vector.shape_cast %486 : vector<1x8x128xf32> to vector<8x128xf32>
      %c0_282 = arith.constant 0 : index
      %c0_283 = arith.constant 0 : index
      %488 = vector.load %arg15[%c0_282, %c0_283] : memref<8x160xf32, #tpu.memory_space<vmem>>, vector<8x128xf32>
      tpu.vector_store %arg15[%c0_282, %c0_283], %487 {strides = array<i32>} : memref<8x160xf32, #tpu.memory_space<vmem>>, vector<8x128xf32>,
    } else {
    }
    %366 = arith.index_cast %c2_i32_191 : i32 to index
    %367 = memref.load %arg0[%366] : memref<6xi32, #tpu.memory_space<smem>>
    %c0_i32_211 = arith.constant 0 : i32
    %368 = arith.cmpi eq, %367, %c0_i32_211 : i32
    %369 = arith.extui %368 : i1 to i32
    %c0_i32_212 = arith.constant 0 : i32
    %370 = arith.cmpi ne, %369, %c0_i32_212 : i32
    scf.if %370 {
      %cst_280 = arith.constant -1.000000e+30 : f32
      %485 = vector.broadcast %cst_280 : f32 to vector<8x128xf32>
      %486 = arith.select %255, %356, %485 : vector<8x128xi1>, vector<8x128xf32>
      %cst_281 = arith.constant dense<0xFF800000> : vector<8xf32>
      %487 = vector.multi_reduction <maximumf>, %486, %cst_281 [1] : vector<8x128xf32> to vector<8xf32>
      %488 = vector.shape_cast %487 : vector<8xf32> to vector<8x1xf32>
      %489 = vector.broadcast %488 : vector<8x1xf32> to vector<8x128xf32>
      %490 = arith.cmpf oeq, %486, %489 : vector<8x128xf32>
      %c128_i32 = arith.constant 128 : i32
      %491 = vector.broadcast %c128_i32 : i32 to vector<8x128xi32>
      %492 = arith.select %490, %253, %491 : vector<8x128xi1>, vector<8x128xi32>
      %cst_282 = arith.constant dense<2147483647> : vector<8xi32>
      %493 = vector.multi_reduction <minsi>, %492, %cst_282 [1] : vector<8x128xi32> to vector<8xi32>
      %494 = vector.shape_cast %493 : vector<8xi32> to vector<8x1xi32>
      %495 = vector.broadcast %494 : vector<8x1xi32> to vector<8x128xi32>
      %496 = arith.cmpi eq, %253, %495 : vector<8x128xi32>
      %497 = arith.extui %496 : vector<8x128xi1> to vector<8x128xi32>
      %498 = arith.sitofp %497 : vector<8x128xi32> to vector<8x128xf32>
      %c0_283 = arith.constant 0 : index
      %c0_284 = arith.constant 0 : index
      %499 = vector.load %arg15[%c0_283, %c0_284] : memref<8x160xf32, #tpu.memory_space<vmem>>, vector<8x128xf32>
      tpu.vector_store %arg15[%c0_283, %c0_284], %498 {strides = array<i32>} : memref<8x160xf32, #tpu.memory_space<vmem>>, vector<8x128xf32>,
    } else {
    }
    %c3_i32_213 = arith.constant 3 : i32
    %c0_214 = arith.constant 0 : index
    %c0_215 = arith.constant 0 : index
    %371 = vector.load %arg15[%c0_214, %c0_215] : memref<8x160xf32, #tpu.memory_space<vmem>>, vector<8x160xf32>
    %c0_216 = arith.constant 0 : index
    %c0_217 = arith.constant 0 : index
    %372 = vector.load %arg8[%c0_216, %c0_217] : memref<160x128xf32, #tpu.memory_space<vmem>>, vector<160x128xf32>
    %cst_218 = arith.constant dense<0.000000e+00> : vector<8x128xf32>
    %373 = tpu.matmul %371, %372, %cst_218 {dimension_numbers = #tpu.dot_dimension_numbers<[1], [0], [0], [1], [0, 0, 1, 1], [], []>, precision = #tpu.contract_precision<fp32>} : vector<8x160xf32>, vector<160x128xf32>, vector<8x128xf32> -> vector<8x128xf32>
    %374 = arith.negf %373 : vector<8x128xf32>
    %375 = math.exp %374 : vector<8x128xf32>
    %cst_219 = arith.constant 1.000000e+00 : f32
    %376 = vector.broadcast %cst_219 : f32 to vector<8x128xf32>
    %377 = arith.addf %376, %375 : vector<8x128xf32>
    %378 = arith.divf %376, %377 : vector<8x128xf32>
    %379 = math.tanh %373 : vector<8x128xf32>
    %380 = vector.extract_strided_slice %378 {offsets = [0, 0], sizes = [8, 32], strides = [1, 1]} : vector<8x128xf32> to vector<8x32xf32>
    %381 = vector.extract_strided_slice %378 {offsets = [0, 32], sizes = [8, 32], strides = [1, 1]} : vector<8x128xf32> to vector<8x32xf32>
    %382 = vector.extract_strided_slice %379 {offsets = [0, 64], sizes = [8, 32], strides = [1, 1]} : vector<8x128xf32> to vector<8x32xf32>
    %383 = vector.extract_strided_slice %378 {offsets = [0, 96], sizes = [8, 32], strides = [1, 1]} : vector<8x128xf32> to vector<8x32xf32>
    %c0_220 = arith.constant 0 : index
    %c0_221 = arith.constant 0 : index
    %384 = vector.load %arg16[%c0_220, %c0_221] : memref<8x32xf32, #tpu.memory_space<vmem>>, vector<8x32xf32>
    %385 = arith.mulf %381, %384 : vector<8x32xf32>
    %386 = arith.mulf %380, %382 : vector<8x32xf32>
    %387 = arith.addf %385, %386 : vector<8x32xf32>
    %388 = math.tanh %387 : vector<8x32xf32>
    %389 = arith.mulf %383, %388 : vector<8x32xf32>
    %c0_222 = arith.constant 0 : index
    %c0_223 = arith.constant 0 : index
    %390 = vector.load %arg16[%c0_222, %c0_223] : memref<8x32xf32, #tpu.memory_space<vmem>>, vector<8x32xf32>
    tpu.vector_store %arg16[%c0_222, %c0_223], %387 {strides = array<i32>} : memref<8x32xf32, #tpu.memory_space<vmem>>, vector<8x32xf32>,
    %c0_224 = arith.constant 0 : index
    %c128_225 = arith.constant 128 : index
    %391 = vector.load %arg15[%c0_224, %c128_225] : memref<8x160xf32, #tpu.memory_space<vmem>>, vector<8x32xf32>
    tpu.vector_store %arg15[%c0_224, %c128_225], %389 {strides = array<i32>} : memref<8x160xf32, #tpu.memory_space<vmem>>, vector<8x32xf32>,
    %c0_226 = arith.constant 0 : index
    %c0_227 = arith.constant 0 : index
    %392 = vector.load %arg9[%c0_226, %c0_227] : memref<32x128xf32, #tpu.memory_space<vmem>>, vector<32x128xf32>
    %cst_228 = arith.constant dense<0.000000e+00> : vector<8x128xf32>
    %393 = tpu.matmul %389, %392, %cst_228 {dimension_numbers = #tpu.dot_dimension_numbers<[1], [0], [0], [1], [0, 0, 1, 1], [], []>, precision = #tpu.contract_precision<fp32>} : vector<8x32xf32>, vector<32x128xf32>, vector<8x128xf32> -> vector<8x128xf32>
    %394 = arith.addf %393, %256 : vector<8x128xf32>
    %395 = arith.index_cast %c3_i32_213 : i32 to index
    %c0_229 = arith.constant 0 : index
    %c0_230 = arith.constant 0 : index
    %396 = vector.load %arg11[%395, %c0_229, %c0_230] : memref<6x8x128xf32, #tpu.memory_space<vmem>>, vector<1x8x128xf32>
    %397 = vector.shape_cast %396 : vector<1x8x128xf32> to vector<8x128xf32>
    %398 = vector.shape_cast %394 : vector<8x128xf32> to vector<1x8x128xf32>
    tpu.vector_store %arg11[%395, %c0_229, %c0_230], %398 {strides = array<i32>} : memref<6x8x128xf32, #tpu.memory_space<vmem>>, vector<1x8x128xf32>,
    %399 = arith.index_cast %c3_i32_213 : i32 to index
    %400 = memref.load %arg0[%399] : memref<6xi32, #tpu.memory_space<smem>>
    %c0_i32_231 = arith.constant 0 : i32
    %401 = arith.cmpi ne, %400, %c0_i32_231 : i32
    %402 = arith.extui %401 : i1 to i32
    %c0_i32_232 = arith.constant 0 : i32
    %403 = arith.cmpi ne, %402, %c0_i32_232 : i32
    scf.if %403 {
      %485 = arith.index_cast %c3_i32_213 : i32 to index
      %c0_280 = arith.constant 0 : index
      %c0_281 = arith.constant 0 : index
      %486 = vector.load %arg5[%485, %c0_280, %c0_281] : memref<6x8x128xf32, #tpu.memory_space<vmem>>, vector<1x8x128xf32>
      %487 = vector.shape_cast %486 : vector<1x8x128xf32> to vector<8x128xf32>
      %c0_282 = arith.constant 0 : index
      %c0_283 = arith.constant 0 : index
      %488 = vector.load %arg15[%c0_282, %c0_283] : memref<8x160xf32, #tpu.memory_space<vmem>>, vector<8x128xf32>
      tpu.vector_store %arg15[%c0_282, %c0_283], %487 {strides = array<i32>} : memref<8x160xf32, #tpu.memory_space<vmem>>, vector<8x128xf32>,
    } else {
    }
    %404 = arith.index_cast %c3_i32_213 : i32 to index
    %405 = memref.load %arg0[%404] : memref<6xi32, #tpu.memory_space<smem>>
    %c0_i32_233 = arith.constant 0 : i32
    %406 = arith.cmpi eq, %405, %c0_i32_233 : i32
    %407 = arith.extui %406 : i1 to i32
    %c0_i32_234 = arith.constant 0 : i32
    %408 = arith.cmpi ne, %407, %c0_i32_234 : i32
    scf.if %408 {
      %cst_280 = arith.constant -1.000000e+30 : f32
      %485 = vector.broadcast %cst_280 : f32 to vector<8x128xf32>
      %486 = arith.select %255, %394, %485 : vector<8x128xi1>, vector<8x128xf32>
      %cst_281 = arith.constant dense<0xFF800000> : vector<8xf32>
      %487 = vector.multi_reduction <maximumf>, %486, %cst_281 [1] : vector<8x128xf32> to vector<8xf32>
      %488 = vector.shape_cast %487 : vector<8xf32> to vector<8x1xf32>
      %489 = vector.broadcast %488 : vector<8x1xf32> to vector<8x128xf32>
      %490 = arith.cmpf oeq, %486, %489 : vector<8x128xf32>
      %c128_i32 = arith.constant 128 : i32
      %491 = vector.broadcast %c128_i32 : i32 to vector<8x128xi32>
      %492 = arith.select %490, %253, %491 : vector<8x128xi1>, vector<8x128xi32>
      %cst_282 = arith.constant dense<2147483647> : vector<8xi32>
      %493 = vector.multi_reduction <minsi>, %492, %cst_282 [1] : vector<8x128xi32> to vector<8xi32>
      %494 = vector.shape_cast %493 : vector<8xi32> to vector<8x1xi32>
      %495 = vector.broadcast %494 : vector<8x1xi32> to vector<8x128xi32>
      %496 = arith.cmpi eq, %253, %495 : vector<8x128xi32>
      %497 = arith.extui %496 : vector<8x128xi1> to vector<8x128xi32>
      %498 = arith.sitofp %497 : vector<8x128xi32> to vector<8x128xf32>
      %c0_283 = arith.constant 0 : index
      %c0_284 = arith.constant 0 : index
      %499 = vector.load %arg15[%c0_283, %c0_284] : memref<8x160xf32, #tpu.memory_space<vmem>>, vector<8x128xf32>
      tpu.vector_store %arg15[%c0_283, %c0_284], %498 {strides = array<i32>} : memref<8x160xf32, #tpu.memory_space<vmem>>, vector<8x128xf32>,
    } else {
    }
    %c4_i32_235 = arith.constant 4 : i32
    %c0_236 = arith.constant 0 : index
    %c0_237 = arith.constant 0 : index
    %409 = vector.load %arg15[%c0_236, %c0_237] : memref<8x160xf32, #tpu.memory_space<vmem>>, vector<8x160xf32>
    %c0_238 = arith.constant 0 : index
    %c0_239 = arith.constant 0 : index
    %410 = vector.load %arg8[%c0_238, %c0_239] : memref<160x128xf32, #tpu.memory_space<vmem>>, vector<160x128xf32>
    %cst_240 = arith.constant dense<0.000000e+00> : vector<8x128xf32>
    %411 = tpu.matmul %409, %410, %cst_240 {dimension_numbers = #tpu.dot_dimension_numbers<[1], [0], [0], [1], [0, 0, 1, 1], [], []>, precision = #tpu.contract_precision<fp32>} : vector<8x160xf32>, vector<160x128xf32>, vector<8x128xf32> -> vector<8x128xf32>
    %412 = arith.negf %411 : vector<8x128xf32>
    %413 = math.exp %412 : vector<8x128xf32>
    %cst_241 = arith.constant 1.000000e+00 : f32
    %414 = vector.broadcast %cst_241 : f32 to vector<8x128xf32>
    %415 = arith.addf %414, %413 : vector<8x128xf32>
    %416 = arith.divf %414, %415 : vector<8x128xf32>
    %417 = math.tanh %411 : vector<8x128xf32>
    %418 = vector.extract_strided_slice %416 {offsets = [0, 0], sizes = [8, 32], strides = [1, 1]} : vector<8x128xf32> to vector<8x32xf32>
    %419 = vector.extract_strided_slice %416 {offsets = [0, 32], sizes = [8, 32], strides = [1, 1]} : vector<8x128xf32> to vector<8x32xf32>
    %420 = vector.extract_strided_slice %417 {offsets = [0, 64], sizes = [8, 32], strides = [1, 1]} : vector<8x128xf32> to vector<8x32xf32>
    %421 = vector.extract_strided_slice %416 {offsets = [0, 96], sizes = [8, 32], strides = [1, 1]} : vector<8x128xf32> to vector<8x32xf32>
    %c0_242 = arith.constant 0 : index
    %c0_243 = arith.constant 0 : index
    %422 = vector.load %arg16[%c0_242, %c0_243] : memref<8x32xf32, #tpu.memory_space<vmem>>, vector<8x32xf32>
    %423 = arith.mulf %419, %422 : vector<8x32xf32>
    %424 = arith.mulf %418, %420 : vector<8x32xf32>
    %425 = arith.addf %423, %424 : vector<8x32xf32>
    %426 = math.tanh %425 : vector<8x32xf32>
    %427 = arith.mulf %421, %426 : vector<8x32xf32>
    %c0_244 = arith.constant 0 : index
    %c0_245 = arith.constant 0 : index
    %428 = vector.load %arg16[%c0_244, %c0_245] : memref<8x32xf32, #tpu.memory_space<vmem>>, vector<8x32xf32>
    tpu.vector_store %arg16[%c0_244, %c0_245], %425 {strides = array<i32>} : memref<8x32xf32, #tpu.memory_space<vmem>>, vector<8x32xf32>,
    %c0_246 = arith.constant 0 : index
    %c128_247 = arith.constant 128 : index
    %429 = vector.load %arg15[%c0_246, %c128_247] : memref<8x160xf32, #tpu.memory_space<vmem>>, vector<8x32xf32>
    tpu.vector_store %arg15[%c0_246, %c128_247], %427 {strides = array<i32>} : memref<8x160xf32, #tpu.memory_space<vmem>>, vector<8x32xf32>,
    %c0_248 = arith.constant 0 : index
    %c0_249 = arith.constant 0 : index
    %430 = vector.load %arg9[%c0_248, %c0_249] : memref<32x128xf32, #tpu.memory_space<vmem>>, vector<32x128xf32>
    %cst_250 = arith.constant dense<0.000000e+00> : vector<8x128xf32>
    %431 = tpu.matmul %427, %430, %cst_250 {dimension_numbers = #tpu.dot_dimension_numbers<[1], [0], [0], [1], [0, 0, 1, 1], [], []>, precision = #tpu.contract_precision<fp32>} : vector<8x32xf32>, vector<32x128xf32>, vector<8x128xf32> -> vector<8x128xf32>
    %432 = arith.addf %431, %256 : vector<8x128xf32>
    %433 = arith.index_cast %c4_i32_235 : i32 to index
    %c0_251 = arith.constant 0 : index
    %c0_252 = arith.constant 0 : index
    %434 = vector.load %arg11[%433, %c0_251, %c0_252] : memref<6x8x128xf32, #tpu.memory_space<vmem>>, vector<1x8x128xf32>
    %435 = vector.shape_cast %434 : vector<1x8x128xf32> to vector<8x128xf32>
    %436 = vector.shape_cast %432 : vector<8x128xf32> to vector<1x8x128xf32>
    tpu.vector_store %arg11[%433, %c0_251, %c0_252], %436 {strides = array<i32>} : memref<6x8x128xf32, #tpu.memory_space<vmem>>, vector<1x8x128xf32>,
    %437 = arith.index_cast %c4_i32_235 : i32 to index
    %438 = memref.load %arg0[%437] : memref<6xi32, #tpu.memory_space<smem>>
    %c0_i32_253 = arith.constant 0 : i32
    %439 = arith.cmpi ne, %438, %c0_i32_253 : i32
    %440 = arith.extui %439 : i1 to i32
    %c0_i32_254 = arith.constant 0 : i32
    %441 = arith.cmpi ne, %440, %c0_i32_254 : i32
    scf.if %441 {
      %485 = arith.index_cast %c4_i32_235 : i32 to index
      %c0_280 = arith.constant 0 : index
      %c0_281 = arith.constant 0 : index
      %486 = vector.load %arg5[%485, %c0_280, %c0_281] : memref<6x8x128xf32, #tpu.memory_space<vmem>>, vector<1x8x128xf32>
      %487 = vector.shape_cast %486 : vector<1x8x128xf32> to vector<8x128xf32>
      %c0_282 = arith.constant 0 : index
      %c0_283 = arith.constant 0 : index
      %488 = vector.load %arg15[%c0_282, %c0_283] : memref<8x160xf32, #tpu.memory_space<vmem>>, vector<8x128xf32>
      tpu.vector_store %arg15[%c0_282, %c0_283], %487 {strides = array<i32>} : memref<8x160xf32, #tpu.memory_space<vmem>>, vector<8x128xf32>,
    } else {
    }
    %442 = arith.index_cast %c4_i32_235 : i32 to index
    %443 = memref.load %arg0[%442] : memref<6xi32, #tpu.memory_space<smem>>
    %c0_i32_255 = arith.constant 0 : i32
    %444 = arith.cmpi eq, %443, %c0_i32_255 : i32
    %445 = arith.extui %444 : i1 to i32
    %c0_i32_256 = arith.constant 0 : i32
    %446 = arith.cmpi ne, %445, %c0_i32_256 : i32
    scf.if %446 {
      %cst_280 = arith.constant -1.000000e+30 : f32
      %485 = vector.broadcast %cst_280 : f32 to vector<8x128xf32>
      %486 = arith.select %255, %432, %485 : vector<8x128xi1>, vector<8x128xf32>
      %cst_281 = arith.constant dense<0xFF800000> : vector<8xf32>
      %487 = vector.multi_reduction <maximumf>, %486, %cst_281 [1] : vector<8x128xf32> to vector<8xf32>
      %488 = vector.shape_cast %487 : vector<8xf32> to vector<8x1xf32>
      %489 = vector.broadcast %488 : vector<8x1xf32> to vector<8x128xf32>
      %490 = arith.cmpf oeq, %486, %489 : vector<8x128xf32>
      %c128_i32 = arith.constant 128 : i32
      %491 = vector.broadcast %c128_i32 : i32 to vector<8x128xi32>
      %492 = arith.select %490, %253, %491 : vector<8x128xi1>, vector<8x128xi32>
      %cst_282 = arith.constant dense<2147483647> : vector<8xi32>
      %493 = vector.multi_reduction <minsi>, %492, %cst_282 [1] : vector<8x128xi32> to vector<8xi32>
      %494 = vector.shape_cast %493 : vector<8xi32> to vector<8x1xi32>
      %495 = vector.broadcast %494 : vector<8x1xi32> to vector<8x128xi32>
      %496 = arith.cmpi eq, %253, %495 : vector<8x128xi32>
      %497 = arith.extui %496 : vector<8x128xi1> to vector<8x128xi32>
      %498 = arith.sitofp %497 : vector<8x128xi32> to vector<8x128xf32>
      %c0_283 = arith.constant 0 : index
      %c0_284 = arith.constant 0 : index
      %499 = vector.load %arg15[%c0_283, %c0_284] : memref<8x160xf32, #tpu.memory_space<vmem>>, vector<8x128xf32>
      tpu.vector_store %arg15[%c0_283, %c0_284], %498 {strides = array<i32>} : memref<8x160xf32, #tpu.memory_space<vmem>>, vector<8x128xf32>,
    } else {
    }
    %c5_i32_257 = arith.constant 5 : i32
    %c0_258 = arith.constant 0 : index
    %c0_259 = arith.constant 0 : index
    %447 = vector.load %arg15[%c0_258, %c0_259] : memref<8x160xf32, #tpu.memory_space<vmem>>, vector<8x160xf32>
    %c0_260 = arith.constant 0 : index
    %c0_261 = arith.constant 0 : index
    %448 = vector.load %arg8[%c0_260, %c0_261] : memref<160x128xf32, #tpu.memory_space<vmem>>, vector<160x128xf32>
    %cst_262 = arith.constant dense<0.000000e+00> : vector<8x128xf32>
    %449 = tpu.matmul %447, %448, %cst_262 {dimension_numbers = #tpu.dot_dimension_numbers<[1], [0], [0], [1], [0, 0, 1, 1], [], []>, precision = #tpu.contract_precision<fp32>} : vector<8x160xf32>, vector<160x128xf32>, vector<8x128xf32> -> vector<8x128xf32>
    %450 = arith.negf %449 : vector<8x128xf32>
    %451 = math.exp %450 : vector<8x128xf32>
    %cst_263 = arith.constant 1.000000e+00 : f32
    %452 = vector.broadcast %cst_263 : f32 to vector<8x128xf32>
    %453 = arith.addf %452, %451 : vector<8x128xf32>
    %454 = arith.divf %452, %453 : vector<8x128xf32>
    %455 = math.tanh %449 : vector<8x128xf32>
    %456 = vector.extract_strided_slice %454 {offsets = [0, 0], sizes = [8, 32], strides = [1, 1]} : vector<8x128xf32> to vector<8x32xf32>
    %457 = vector.extract_strided_slice %454 {offsets = [0, 32], sizes = [8, 32], strides = [1, 1]} : vector<8x128xf32> to vector<8x32xf32>
    %458 = vector.extract_strided_slice %455 {offsets = [0, 64], sizes = [8, 32], strides = [1, 1]} : vector<8x128xf32> to vector<8x32xf32>
    %459 = vector.extract_strided_slice %454 {offsets = [0, 96], sizes = [8, 32], strides = [1, 1]} : vector<8x128xf32> to vector<8x32xf32>
    %c0_264 = arith.constant 0 : index
    %c0_265 = arith.constant 0 : index
    %460 = vector.load %arg16[%c0_264, %c0_265] : memref<8x32xf32, #tpu.memory_space<vmem>>, vector<8x32xf32>
    %461 = arith.mulf %457, %460 : vector<8x32xf32>
    %462 = arith.mulf %456, %458 : vector<8x32xf32>
    %463 = arith.addf %461, %462 : vector<8x32xf32>
    %464 = math.tanh %463 : vector<8x32xf32>
    %465 = arith.mulf %459, %464 : vector<8x32xf32>
    %c0_266 = arith.constant 0 : index
    %c0_267 = arith.constant 0 : index
    %466 = vector.load %arg16[%c0_266, %c0_267] : memref<8x32xf32, #tpu.memory_space<vmem>>, vector<8x32xf32>
    tpu.vector_store %arg16[%c0_266, %c0_267], %463 {strides = array<i32>} : memref<8x32xf32, #tpu.memory_space<vmem>>, vector<8x32xf32>,
    %c0_268 = arith.constant 0 : index
    %c128_269 = arith.constant 128 : index
    %467 = vector.load %arg15[%c0_268, %c128_269] : memref<8x160xf32, #tpu.memory_space<vmem>>, vector<8x32xf32>
    tpu.vector_store %arg15[%c0_268, %c128_269], %465 {strides = array<i32>} : memref<8x160xf32, #tpu.memory_space<vmem>>, vector<8x32xf32>,
    %c0_270 = arith.constant 0 : index
    %c0_271 = arith.constant 0 : index
    %468 = vector.load %arg9[%c0_270, %c0_271] : memref<32x128xf32, #tpu.memory_space<vmem>>, vector<32x128xf32>
    %cst_272 = arith.constant dense<0.000000e+00> : vector<8x128xf32>
    %469 = tpu.matmul %465, %468, %cst_272 {dimension_numbers = #tpu.dot_dimension_numbers<[1], [0], [0], [1], [0, 0, 1, 1], [], []>, precision = #tpu.contract_precision<fp32>} : vector<8x32xf32>, vector<32x128xf32>, vector<8x128xf32> -> vector<8x128xf32>
    %470 = arith.addf %469, %256 : vector<8x128xf32>
    %471 = arith.index_cast %c5_i32_257 : i32 to index
    %c0_273 = arith.constant 0 : index
    %c0_274 = arith.constant 0 : index
    %472 = vector.load %arg11[%471, %c0_273, %c0_274] : memref<6x8x128xf32, #tpu.memory_space<vmem>>, vector<1x8x128xf32>
    %473 = vector.shape_cast %472 : vector<1x8x128xf32> to vector<8x128xf32>
    %474 = vector.shape_cast %470 : vector<8x128xf32> to vector<1x8x128xf32>
    tpu.vector_store %arg11[%471, %c0_273, %c0_274], %474 {strides = array<i32>} : memref<6x8x128xf32, #tpu.memory_space<vmem>>, vector<1x8x128xf32>,
    %475 = arith.index_cast %c5_i32_257 : i32 to index
    %476 = memref.load %arg0[%475] : memref<6xi32, #tpu.memory_space<smem>>
    %c0_i32_275 = arith.constant 0 : i32
    %477 = arith.cmpi ne, %476, %c0_i32_275 : i32
    %478 = arith.extui %477 : i1 to i32
    %c0_i32_276 = arith.constant 0 : i32
    %479 = arith.cmpi ne, %478, %c0_i32_276 : i32
    scf.if %479 {
      %485 = arith.index_cast %c5_i32_257 : i32 to index
      %c0_280 = arith.constant 0 : index
      %c0_281 = arith.constant 0 : index
      %486 = vector.load %arg5[%485, %c0_280, %c0_281] : memref<6x8x128xf32, #tpu.memory_space<vmem>>, vector<1x8x128xf32>
      %487 = vector.shape_cast %486 : vector<1x8x128xf32> to vector<8x128xf32>
      %c0_282 = arith.constant 0 : index
      %c0_283 = arith.constant 0 : index
      %488 = vector.load %arg15[%c0_282, %c0_283] : memref<8x160xf32, #tpu.memory_space<vmem>>, vector<8x128xf32>
      tpu.vector_store %arg15[%c0_282, %c0_283], %487 {strides = array<i32>} : memref<8x160xf32, #tpu.memory_space<vmem>>, vector<8x128xf32>,
    } else {
    }
    %480 = arith.index_cast %c5_i32_257 : i32 to index
    %481 = memref.load %arg0[%480] : memref<6xi32, #tpu.memory_space<smem>>
    %c0_i32_277 = arith.constant 0 : i32
    %482 = arith.cmpi eq, %481, %c0_i32_277 : i32
    %483 = arith.extui %482 : i1 to i32
    %c0_i32_278 = arith.constant 0 : i32
    %484 = arith.cmpi ne, %483, %c0_i32_278 : i32
    scf.if %484 {
      %cst_280 = arith.constant -1.000000e+30 : f32
      %485 = vector.broadcast %cst_280 : f32 to vector<8x128xf32>
      %486 = arith.select %255, %470, %485 : vector<8x128xi1>, vector<8x128xf32>
      %cst_281 = arith.constant dense<0xFF800000> : vector<8xf32>
      %487 = vector.multi_reduction <maximumf>, %486, %cst_281 [1] : vector<8x128xf32> to vector<8xf32>
      %488 = vector.shape_cast %487 : vector<8xf32> to vector<8x1xf32>
      %489 = vector.broadcast %488 : vector<8x1xf32> to vector<8x128xf32>
      %490 = arith.cmpf oeq, %486, %489 : vector<8x128xf32>
      %c128_i32 = arith.constant 128 : i32
      %491 = vector.broadcast %c128_i32 : i32 to vector<8x128xi32>
      %492 = arith.select %490, %253, %491 : vector<8x128xi1>, vector<8x128xi32>
      %cst_282 = arith.constant dense<2147483647> : vector<8xi32>
      %493 = vector.multi_reduction <minsi>, %492, %cst_282 [1] : vector<8x128xi32> to vector<8xi32>
      %494 = vector.shape_cast %493 : vector<8xi32> to vector<8x1xi32>
      %495 = vector.broadcast %494 : vector<8x1xi32> to vector<8x128xi32>
      %496 = arith.cmpi eq, %253, %495 : vector<8x128xi32>
      %497 = arith.extui %496 : vector<8x128xi1> to vector<8x128xi32>
      %498 = arith.sitofp %497 : vector<8x128xi32> to vector<8x128xf32>
      %c0_283 = arith.constant 0 : index
      %c0_284 = arith.constant 0 : index
      %499 = vector.load %arg15[%c0_283, %c0_284] : memref<8x160xf32, #tpu.memory_space<vmem>>, vector<8x128xf32>
      tpu.vector_store %arg15[%c0_283, %c0_284], %498 {strides = array<i32>} : memref<8x160xf32, #tpu.memory_space<vmem>>, vector<8x128xf32>,
    } else {
    }
    %c6_i32_279 = arith.constant 6 : i32
    return
  }
}

</mosaic_0001>

<bundles_post_ra>
// kernel: seq2seq_forward.1
= control target key start
LH: loop header
LB: loop body
LE: loop exit
PB: predicated region body
PF: predicated region fallthrough
CT: control target
= control target key end

     0   :  { %18 = vsyncpa [#allocation8], 0  ;;  %s10850_s0 = inlined_call_operand.vmem [shape: s32[6], index: 0, kind: input, shape index: {}]   ;;  %s10851_s1 = inlined_call_operand.vmem [shape: f32[64,18], index: 1, kind: input, shape index: {}]   ;;  %s10852_s2 = inlined_call_operand.vmem [shape: f32[18,128], index: 2, kind: input, shape index: {}]   ;;  %s10853_s3 = inlined_call_operand.vmem [shape: f32[32,128], index: 3, kind: input, shape index: {}]   ;;  %s10854_s4 = inlined_call_operand.vmem [shape: f32[8,128], index: 4, kind: input, shape index: {}]   ;;  %s10855_s5 = inlined_call_operand.vmem [shape: f32[6,8,128], index: 5, kind: input, shape index: {}]   ;;  %s10856_s6 = inlined_call_operand.vmem [shape: f32[2,32], index: 6, kind: input, shape index: {}]   ;;  %s10857_s7 = inlined_call_operand.vmem [shape: f32[2,32], index: 7, kind: input, shape index: {}]   ;;  %s10858_s8 = inlined_call_operand.vmem [shape: f32[160,128], index: 8, kind: input, shape index: {}]   ;;  %s10859_s9 = inlined_call_operand.vmem [shape: f32[32,128], index: 9, kind: input, shape index: {}]   ;;  %s10860_s10 = inlined_call_operand.vmem [shape: f32[8,128], index: 10, kind: input, shape index: {}]   ;;  %s10861_s11 = inlined_call_operand.vmem [shape: f32[6,8,128], index: 11, kind: output, shape index: {0}]   ;;  %s10862_s12 = inlined_call_operand.hbm [shape: f32[2,32], index: 12, kind: output, shape index: {1}]  }
   0x1   :  { %19 = vsyncpa [#allocation7], 0  ;;  %s25_s23 = sshll.u32 %s10850_s0, 4  ;;  %s7707_s24 = smov [#allocation6]   ;;  %s26_s23 = int_to_ptr.vmem [resolvable:$true] %s25_s23 }
   0x2   :  { %28 = dma.vmem_to_smem %s26_s23, 16, %s7707_s24, [#allocation8]  }
   0x3   :  { %7703 = dma.done.wait [#allocation8], 16  }
   0x4   :  { %7704 = vsyncadd [#allocation8], 4294967280 }
   0x5   :  { %53 = sfence }
   0x6   :  { %v64_v0 = vld [vmem:[%s10852_s2 + $0x10] sm:$0x3]  ;;  %vm90_vm0 = vcmask 1041408   ;;  %v63_v1 = vld [vmem:[%s10852_s2 + $0x8] sm:$0xff]  ;;  %v62_v2 = vld [vmem:[%s10852_s2] sm:$0xff]  ;;  %vm65_vm1 = vcmask 146432  }
   0x7   :  { %v92_v3 = vsel %vm90_vm0, %v64_v0, 0  ;;  %v7799_v4 = vand.u32 4294901760, %v63_v1  ;;  %v7801_v5 = vand.u32 4294901760, %v62_v2  ;;  %v54_v6 = vld [vmem:[%s10851_s1] sm:$0xff]  ;;  %v498_v7 = vld [vmem:[%s10853_s3 + $0x18] sm:$0xff]  ;;  %v55_v8 = vld [vmem:[%s10851_s1 + $0x8] sm:$0xff] }
   0x8   :  { %v7812_v9 = vand.u32 4294901760, %v92_v3  ;;  %v67_v10 = vsel %vm65_vm1, %v54_v6, 0  ;;  %v7815_v11 = vand.u32 4294901760, %v498_v7  ;;  %v70_v12 = vsel %vm65_vm1, %v55_v8, 0  ;;  %v497_v13 = vld [vmem:[%s10853_s3 + $0x10] sm:$0xff]  ;;  %v57_v44 = vld [vmem:[%s10851_s1 + $0x18] sm:$0xff] }
   0x9   :  { %v198_v14 = vsub.f32 %v63_v1, %v7799_v4  ;;  %v7823_v15 = vsub.f32 %v62_v2, %v7801_v5  ;;  %v7825_v16 = vand.u32 4294901760, %v67_v10  ;;  %v7827_v17 = vand.u32 4294901760, %v70_v12  ;;  %v56_v18 = vld [vmem:[%s10851_s1 + $0x10] sm:$0xff]  ;;  %v496_v45 = vld [vmem:[%s10853_s3 + $0x8] sm:$0xff]  ;;  %v58_v57 = vld [vmem:[%s10851_s1 + $0x20] sm:$0xff]  ;;  %s7710_s16 = smov 16  }
   0xa   :  { %v192_v19 = vsub.f32 %v92_v3, %v7812_v9  ;;  %319 = vmatpush.msra.mxu3 %v7812_v9  ;;  %108 = vmatpush.msra.mxu0 %v7812_v9  ;;  %v7836_v20 = vsub.f32 %v498_v7, %v7815_v11  ;;  %v7838_v21 = vand.u32 4294901760, %v497_v13  ;;  %v73_v28 = vsel %vm65_vm1, %v56_v18, 0  ;;  %v59_v3 = vld [vmem:[%s10851_s1 + $0x28] sm:$0xff]  ;;  %v60_v18 = vld [vmem:[%s10851_s1 + $0x30] sm:$0xff]  ;;  %s7711_s17 = smov 32   ;;  %s7712_s2 = smov 80  }
   0xb   :  { %v114_v22 = vsub.f32 %v67_v10, %v7825_v16  ;;  %v199_v23 = vand.u32 4294901760, %v198_v14  ;;  %v205_v24 = vand.u32 4294901760, %v7823_v15  ;;  %v122_v25 = vsub.f32 %v70_v12, %v7827_v17  ;;  %s3272_s19 = sld [smem:[#allocation6]] }
   0xc   :  { %257 = vmatpush.msra.mxu2 %v192_v19  ;;  %321 = vmatpush.msra.mxu3 %v7799_v4  ;;  %v193_v26 = vand.u32 4294901760, %v192_v19  ;;  %v7845_v27 = vand.u32 4294901760, %v7836_v20  ;;  %v7849_v29 = vsub.f32 %v497_v13, %v7838_v21  ;;  %v7860_v38 = vand.u32 4294901760, %v73_v28 }
   0xd   :  { %110 = vmatpush.msra.mxu0 %v7799_v4  ;;  %v115_v30 = vand.u32 4294901760, %v114_v22  ;;  %v200_v31 = vsub.f32 %v198_v14, %v199_v23  ;;  %v206_v34 = vsub.f32 %v7823_v15, %v205_v24  ;;  %v123_v37 = vand.u32 4294901760, %v122_v25 }
   0xe   :  { %260 = vmatpush.msra.mxu2 %v198_v14  ;;  %323 = vmatpush.msra.mxu3 %v7801_v5  ;;  %v194_v32 = vsub.f32 %v192_v19, %v193_v26  ;;  %v546_v33 = vsub.f32 %v7836_v20, %v7845_v27  ;;  %v7857_v35 = vand.u32 4294901760, %v7849_v29  ;;  %v130_v49 = vsub.f32 %v73_v28, %v7860_v38 }
   0xf   :  { %112 = vmatpush.msra.mxu0 %v7801_v5  ;;  %327 = vmatmul.f32.vlgmr.msra.gmra.mxu3 %v115_v30  ;;  %v116_v36 = vsub.f32 %v114_v22, %v115_v30  ;;  %v201_v41 = vand.u32 4294901760, %v200_v31  ;;  %v207_v46 = vand.u32 4294901760, %v206_v34  ;;  %v124_v48 = vsub.f32 %v122_v25, %v123_v37  ;;  %v61_v30 = vld [vmem:[%s10851_s1 + $0x38] sm:$0xff]  ;;  %s7709_s1 = smov 96  }
  0x10   :  { %263 = vmatpush.msra.mxu2 %v7823_v15  ;;  %v195_v39 = vand.u32 4294901760, %v194_v32  ;;  %v7863_v40 = vand.u32 4294901760, %v546_v33  ;;  %v552_v42 = vsub.f32 %v7849_v29, %v7857_v35  ;;  %v7878_v50 = vand.u32 4294901760, %v496_v45 }
  0x11   :  { %389 = vmatpush.msrb.mxu0 %v193_v26  ;;  %266 = vmatmul.f32.vlgmr.msra.gmra.mxu2 %v114_v22  ;;  %v117_v43 = vand.u32 4294901760, %v116_v36  ;;  %v76_v51 = vsel %vm65_vm1, %v57_v44, 0  ;;  %v125_v53 = vand.u32 4294901760, %v124_v48  ;;  %v131_v54 = vand.u32 4294901760, %v130_v49  ;;  %p7497_p0 = scmp.eq.s32.totalorder %s3272_s19, 0 }
  0x12   :  { %515 = vmatpush.msrb.mxu2 %v7815_v11  ;;  %196 = vmatpush.msra.mxu1 %v195_v39  ;;  %v7874_v47 = vand.u32 4294901760, %v552_v42  ;;  %v7884_v52 = vsub.f32 %v496_v45, %v7878_v50  ;;  %v7888_v55 = vand.u32 4294901760, %v76_v51  ;;  %v79_v62 = vsel %vm65_vm1, %v58_v57, 0 }
  0x13   :  { %118 = vmatmul.f32.vlgmr.msra.gmra.mxu0 %v117_v43  ;;  %548 = vmatpush.msrb.mxu3 %v7863_v40  ;;  %v132_v59 = vsub.f32 %v130_v49, %v131_v54  ;;  %vm491_vm2 = vcmask 261120   ;;  %v7911_v1 = vand.u32 4294901760, %v79_v62  ;;  %v7708_v2 = vmov 0.0  }
  0x14   :  { %202 = vmatpush.msra.mxu1 %v201_v41  ;;  %517 = vmatpush.msrb.mxu2 %v7838_v21  ;;  %v7891_v56 = vand.u32 4294901760, %v7884_v52  ;;  %v138_v60 = vsub.f32 %v76_v51, %v7888_v55  ;;  %492 = vst.msk [vmem:[#allocation3] sm:$0xff] %vm491_vm2, %v7708_v2  ;;  %v82_v8 = vsel %vm65_vm1, %v59_v3, 0  ;;  %v88_v33 = vsel %vm65_vm1, %v61_v30, 0 }
  0x15   :  { %554 = vmatpush.msrb.mxu3 %v7874_v47  ;;  %393 = vmatpush.msrb.mxu0 %v199_v23  ;;  %v133_v63 = vand.u32 4294901760, %v132_v59  ;;  %2443 = vst.msk [vmem:[#allocation4 + $0x8] sm:$0xff] %vm491_vm2, %v7708_v2  ;;  %v146_v7 = vsub.f32 %v79_v62, %v7911_v1  ;;  %v7938_v14 = vand.u32 4294901760, %v82_v8  ;;  %vm734_vm7 = vcmask 261252  }
  0x16   :  { %208 = vmatpush.msra.mxu1 %v207_v46  ;;  %519 = vmatpush.msrb.mxu2 %v7878_v50  ;;  %v558_v58 = vsub.f32 %v7884_v52, %v7891_v56  ;;  %v139_v0 = vand.u32 4294901760, %v138_v60  ;;  %2468 = vst.msk [vmem:[#allocation5] sm:$0xff] %vm491_vm2, %v7708_v2  ;;  %vm729_vm8 = vcmask 125952  }
  0x17   :  { %210 = vmatmul.f32.vlgmr.msra.gmra.mxu1 %v7825_v16  ;;  %333 = vmatmul.f32.gmra.mxu3 %v123_v37  ;;  %v147_v13 = vand.u32 4294901760, %v146_v7  ;;  %v154_v23 = vsub.f32 %v82_v8, %v7938_v14  ;;  %v7967_v37 = vand.u32 4294901760, %v88_v33 }
  0x18   :  { %445 = vmatpush.msrb.mxu1 %v7812_v9  ;;  %397 = vmatpush.msrb.mxu0 %v205_v24  ;;  %v7902_v61 = vand.u32 4294901760, %v558_v58  ;;  %v140_v6 = vsub.f32 %v138_v60, %v139_v0  ;;  %v85_v24 = vsel %vm65_vm1, %v60_v18, 0 }
  0x19   :  { %271 = vmatmul.f32.gmra.mxu2 %v122_v25  ;;  %v148_v22 = vsub.f32 %v146_v7, %v147_v13  ;;  %v155_v26 = vand.u32 4294901760, %v154_v23  ;;  %v7956_v28 = vand.u32 4294901760, %v85_v24  ;;  %v170_v43 = vsub.f32 %v88_v33, %v7967_v37 }
  0x1a   :  { %1130 = vmatpush.msra.mxu0 %v7845_v27  ;;  %447 = vmatpush.msrb.mxu1 %v7799_v4  ;;  %v495_v4 = vld [vmem:[%s10853_s3] sm:$0xff]  ;;  %v141_v12 = vand.u32 4294901760, %v140_v6 }
  0x1b   :  { %126 = vmatmul.f32.gmra.mxu0 %v125_v53  ;;  %560 = vmatpush.msrb.mxu3 %v7902_v61  ;;  %v149_v25 = vand.u32 4294901760, %v148_v22  ;;  %v156_v31 = vsub.f32 %v154_v23, %v155_v26  ;;  %v162_v32 = vsub.f32 %v85_v24, %v7956_v28  ;;  %v494_v39 = vld [vmem:[#allocation3] sm:$0xff]  ;;  %v171_v46 = vand.u32 4294901760, %v170_v43 }
  0x1c   :  { %449 = vmatpush.msrb.mxu1 %v7801_v5  ;;  %1134 = vmatpush.msra.mxu0 %v7857_v35  ;;  %v7923_v5 = vand.u32 4294901760, %v495_v4  ;;  %v500_v41 = vsel %vm491_vm2, %v494_v39, 0 }
  0x1d   :  { %v157_v34 = vand.u32 4294901760, %v156_v31  ;;  %v163_v36 = vand.u32 4294901760, %v162_v32  ;;  %v522_v44 = vand.u32 4294901760, %v500_v41 }
  0x1e   :  { %1161 = vmatpush.msra.mxu1 %v7815_v11  ;;  %1138 = vmatpush.msra.mxu0 %v7891_v56  ;;  %v7930_v9 = vsub.f32 %v495_v4, %v7923_v5 }
  0x1f   :  { %214 = vmatmul.f32.gmra.mxu1 %v7827_v17  ;;  %339 = vmatmul.f32.gmra.mxu3 %v131_v54  ;;  %v164_v42 = vsub.f32 %v162_v32, %v163_v36  ;;  %v523_v48 = vsub.f32 %v500_v41, %v522_v44 }
  0x20   :  { %1163 = vmatpush.msra.mxu1 %v7838_v21  ;;  %521 = vmatpush.msrb.mxu2 %v7923_v5  ;;  %v7935_v10 = vand.u32 4294901760, %v7930_v9 }
  0x21   :  { %276 = vmatmul.f32.gmra.mxu2 %v130_v49  ;;  %v165_v45 = vand.u32 4294901760, %v164_v42  ;;  %v172_v49 = vsub.f32 %v170_v43, %v171_v46  ;;  %v524_v51 = vand.u32 4294901760, %v523_v48 }
  0x22   :  { %1165 = vmatpush.msra.mxu1 %v7878_v50  ;;  %586 = vmatpush.msra.mxu2 %v7836_v20  ;;  %v564_v15 = vsub.f32 %v7930_v9, %v7935_v10 }
  0x23   :  { %134 = vmatmul.f32.gmra.mxu0 %v133_v63  ;;  %v173_v53 = vand.u32 4294901760, %v172_v49  ;;  %v525_v54 = vsub.f32 %v523_v48, %v524_v51 }
  0x24   :  { %1167 = vmatpush.msra.mxu1 %v7923_v5  ;;  %589 = vmatpush.msra.mxu2 %v7849_v29  ;;  %v7947_v19 = vand.u32 4294901760, %v564_v15 }
  0x25   :  { %1142 = vmatpush.msra.mxu0 %v7935_v10  ;;  %v526_v57 = vand.u32 4294901760, %v525_v54 }
  0x26   :  { %592 = vmatpush.msra.mxu2 %v7884_v52  ;;  %566 = vmatpush.msrb.mxu3 %v7947_v19 }
  0x27   :  { %218 = vmatmul.f32.gmra.mxu1 %v7860_v38  ;;  %345 = vmatmul.f32.gmra.mxu3 %v139_v0 }
  0x28   :  { %595 = vmatpush.msra.mxu2 %v7930_v9  ;;  %615 = vmatpush.msra.mxu3 %v7815_v11 }
  0x29   :  { %281 = vmatmul.f32.gmra.mxu2 %v138_v60 }
  0x2a   :  { %617 = vmatpush.msra.mxu3 %v7838_v21 }
  0x2b   :  { %142 = vmatmul.f32.gmra.mxu0 %v141_v12 }
  0x2c   :  { %619 = vmatpush.msra.mxu3 %v7878_v50 }
  0x2e   :  { %621 = vmatpush.msra.mxu3 %v7923_v5 }
  0x2f   :  { %222 = vmatmul.f32.gmra.mxu1 %v7888_v55  ;;  %351 = vmatmul.f32.gmra.mxu3 %v147_v13 }
  0x31   :  { %286 = vmatmul.f32.gmra.mxu2 %v146_v7 }
  0x33   :  { %150 = vmatmul.f32.gmra.mxu0 %v149_v25 }
  0x37   :  { %226 = vmatmul.f32.gmra.mxu1 %v7911_v1  ;;  %357 = vmatmul.f32.gmra.mxu3 %v155_v26 }
  0x39   :  { %291 = vmatmul.f32.gmra.mxu2 %v154_v23 }
  0x3b   :  { %158 = vmatmul.f32.gmra.mxu0 %v157_v34 }
  0x3f   :  { %230 = vmatmul.f32.gmra.mxu1 %v7938_v14  ;;  %363 = vmatmul.f32.gmra.mxu3 %v163_v36 }
  0x41   :  { %296 = vmatmul.f32.gmra.mxu2 %v162_v32 }
  0x43   :  { %166 = vmatmul.f32.gmra.mxu0 %v165_v45 }
  0x47   :  { %234 = vmatmul.f32.gmra.mxu1 %v7956_v28  ;;  %369 = vmatmul.f32.gmra.mxu3 %v171_v46 }
  0x49   :  { %301 = vmatmul.f32.gmra.mxu2 %v170_v43 }
  0x4b   :  { %174 = vmatmul.f32.gmra.mxu0 %v173_v53 }
  0x4f   :  { %238 = vmatmul.f32.gmra.mxu1 %v7967_v37  ;;  %568 = vmatmul.f32.vlgmr.msrb.gmra.mxu3 %v522_v44 }
  0x50   :  { %675 = vmatpush.msrb.mxu3 %v7815_v11 }
  0x51   :  { %527 = vmatmul.f32.vlgmr.msrb.gmra.mxu2 %v526_v57 }
  0x52   :  { %644 = vmatpush.msrb.mxu2 %v7845_v27  ;;  %677 = vmatpush.msrb.mxu3 %v7838_v21 }
  0x53   :  { %399 = vmatmul.f32.vlgmr.msrb.gmra.mxu0 %v7825_v16 }
  0x54   :  { %648 = vmatpush.msrb.mxu2 %v7857_v35  ;;  %679 = vmatpush.msrb.mxu3 %v7878_v50 }
  0x56   :  { %652 = vmatpush.msrb.mxu2 %v7891_v56  ;;  %681 = vmatpush.msrb.mxu3 %v7923_v5 }
  0x57   :  { %451 = vmatmul.f32.vlgmr.msrb.gmra.mxu1 %v7825_v16  ;;  %625 = vmatmul.f32.vlgmr.msra.gmra.mxu3 %v524_v51 }
  0x58   :  { %656 = vmatpush.msrb.mxu2 %v7935_v10  ;;  %792 = vmatpush.msra.mxu3 %v7863_v40 }
  0x59   :  { %598 = vmatmul.f32.vlgmr.msra.gmra.mxu2 %v523_v48 }
  0x5a   :  { %798 = vmatpush.msra.mxu3 %v7874_v47  ;;  %759 = vmatpush.msra.mxu2 %v7815_v11 }
  0x5b   :  { %403 = vmatmul.f32.gmra.mxu0 %v7827_v17 }
  0x5c   :  { %804 = vmatpush.msra.mxu3 %v7902_v61  ;;  %761 = vmatpush.msra.mxu2 %v7838_v21 }
  0x5e   :  { %810 = vmatpush.msra.mxu3 %v7947_v19  ;;  %763 = vmatpush.msra.mxu2 %v7878_v50 }
  0x5f   :  { %455 = vmatmul.f32.gmra.mxu1 %v7827_v17  ;;  %683 = vmatmul.f32.vlgmr.msrb.gmra.mxu3 %v522_v44 }
  0x60   :  { %859 = vmatpush.msrb.mxu3 %v7815_v11  ;;  %765 = vmatpush.msra.mxu2 %v7923_v5 }
  0x61   :  { %658 = vmatmul.f32.vlgmr.msrb.gmra.mxu2 %v522_v44 }
  0x62   :  { %861 = vmatpush.msrb.mxu3 %v7838_v21  ;;  %830 = vmatpush.msrb.mxu2 %v7836_v20 }
  0x63   :  { %407 = vmatmul.f32.gmra.mxu0 %v7860_v38 }
  0x64   :  { %863 = vmatpush.msrb.mxu3 %v7878_v50  ;;  %833 = vmatpush.msrb.mxu2 %v7849_v29 }
  0x66   :  { %865 = vmatpush.msrb.mxu3 %v7923_v5  ;;  %836 = vmatpush.msrb.mxu2 %v7884_v52 }
  0x67   :  { %459 = vmatmul.f32.gmra.mxu1 %v7860_v38 }
  0x68   :  { %839 = vmatpush.msrb.mxu2 %v7930_v9 }
  0x6b   :  { %411 = vmatmul.f32.gmra.mxu0 %v7888_v55 }
  0x6f   :  { %463 = vmatmul.f32.gmra.mxu1 %v7888_v55 }
  0x73   :  { %415 = vmatmul.f32.gmra.mxu0 %v7911_v1 }
  0x77   :  { %467 = vmatmul.f32.gmra.mxu1 %v7911_v1 }
  0x7b   :  { %419 = vmatmul.f32.gmra.mxu0 %v7938_v14 }
  0x7f   :  { %471 = vmatmul.f32.gmra.mxu1 %v7938_v14 }
  0x83   :  { %423 = vmatmul.f32.gmra.mxu0 %v7956_v28 }
  0x87   :  { %475 = vmatmul.f32.gmra.mxu1 %v7956_v28 }
  0x8b   :  { %427 = vmatmul.f32.gmra.mxu0 %v7967_v37 }
  0x8f   :  { %479 = vmatmul.f32.gmra.mxu1 %v7967_v37 }
  0x90   :  { %v119_v16 = vpop.f32.mrf.mxu0 }
  0x92   :  { %v328_v17 = vpop.f32.mrf.mxu3 }
  0x94   :  { %v211_v38 = vpop.f32.mrf.mxu1  ;;  %v267_v55 = vpop.f32.mrf.mxu2 }
  0x95   :  { %v212_v57 = vadd.f32 %v211_v38, %v119_v16 }
  0x98   :  { %v8014_v58 = vpop.f32.mrf.mxu0 }
  0x9a   :  { %v8016_v59 = vpop.f32.mrf.mxu3 }
  0x9c   :  { %v8018_v60 = vpop.f32.mrf.mxu1  ;;  %v8020_v62 = vpop.f32.mrf.mxu2 }
  0xa0   :  { %v8022_v63 = vpop.f32.mrf.mxu0 }
  0xa2   :  { %v8024_v0 = vpop.f32.mrf.mxu3 }
  0xa4   :  { %v8026_v1 = vpop.f32.mrf.mxu1  ;;  %v8028_v2 = vpop.f32.mrf.mxu2 }
  0xa8   :  { %v143_v3 = vpop.f32.mrf.mxu0 }
  0xaa   :  { %v346_v4 = vpop.f32.mrf.mxu3 }
  0xac   :  { %v223_v6 = vpop.f32.mrf.mxu1  ;;  %v282_v7 = vpop.f32.mrf.mxu2 }
  0xad   :  { %v224_v8 = vadd.f32 %v223_v6, %v143_v3 }
  0xb0   :  { %v151_v12 = vpop.f32.mrf.mxu0 }
  0xb2   :  { %v352_v13 = vpop.f32.mrf.mxu3 }
  0xb4   :  { %v227_v14 = vpop.f32.mrf.mxu1  ;;  %v287_v15 = vpop.f32.mrf.mxu2 }
  0xb5   :  { %v228_v18 = vadd.f32 %v227_v14, %v151_v12  ;;  %v268_v14 = vadd.f32 %v267_v55, %v212_v57 }
  0xb8   :  { %v159_v22 = vpop.f32.mrf.mxu0 }
  0xba   :  { %v358_v23 = vpop.f32.mrf.mxu3 }
  0xbc   :  { %v231_v24 = vpop.f32.mrf.mxu1  ;;  %v292_v25 = vpop.f32.mrf.mxu2 }
  0xbd   :  { %v232_v26 = vadd.f32 %v231_v24, %v159_v22 }
  0xc0   :  { %v167_v28 = vpop.f32.mrf.mxu0 }
  0xc2   :  { %v364_v30 = vpop.f32.mrf.mxu3 }
  0xc4   :  { %v235_v31 = vpop.f32.mrf.mxu1  ;;  %v297_v32 = vpop.f32.mrf.mxu2 }
  0xc5   :  { %v236_v33 = vadd.f32 %v235_v31, %v167_v28  ;;  %v329_v28 = vadd.f32 %v328_v17, %v268_v14 }
  0xc7   :  { %v298_v34 = vadd.f32 %v297_v32, %v236_v33 }
  0xc8   :  { %v175_v36 = vpop.f32.mrf.mxu0 }
  0xc9   :  { %v365_v37 = vadd.f32 %v364_v30, %v298_v34  ;;  %v283_v30 = vadd.f32 %v282_v7, %v224_v8 }
  0xca   :  { %v370_v39 = vpop.f32.mrf.mxu3 }
  0xcc   :  { %v239_v41 = vpop.f32.mrf.mxu1  ;;  %v302_v42 = vpop.f32.mrf.mxu2 }
  0xcd   :  { %v240_v43 = vadd.f32 %v239_v41, %v175_v36  ;;  %v347_v41 = vadd.f32 %v346_v4, %v283_v30 }
  0xcf   :  { %v303_v44 = vadd.f32 %v302_v42, %v240_v43 }
  0xd0   :  { %v400_v45 = vpop.f32.mrf.mxu0 }
  0xd1   :  { %v8030_v46 = vadd.f32 %v370_v39, %v303_v44  ;;  %v401_v36 = vadd.f32 %v400_v45, %v329_v28  ;;  %v293_v45 = vadd.f32 %v292_v25, %v232_v26 }
  0xd2   :  { %v569_v48 = vpop.f32.mrf.mxu3 }
  0xd4   :  { %v452_v49 = vpop.f32.mrf.mxu1  ;;  %v528_v51 = vpop.f32.mrf.mxu2 }
  0xd5   :  { %v570_v12 = vadd.f32 %v569_v48, %v528_v51  ;;  %v453_v42 = vadd.f32 %v452_v49, %v401_v36  ;;  %v288_v48 = vadd.f32 %v287_v15, %v228_v18  ;;  %v359_v49 = vadd.f32 %v358_v23, %v293_v45 }
  0xd7   :  { %v353_v17 = vadd.f32 %v352_v13, %v288_v48 }
  0xd8   :  { %v8032_v53 = vpop.f32.mrf.mxu0 }
  0xda   :  { %v626_v54 = vpop.f32.mrf.mxu3 }
  0xdc   :  { %v8034_v3 = vpop.f32.mrf.mxu1  ;;  %v599_v6 = vpop.f32.mrf.mxu2 }
  0xdd   :  { %v600_v22 = vadd.f32 %v599_v6, %v570_v12 }
  0xdf   :  { %v627_v31 = vadd.f32 %v626_v54, %v600_v22 }
  0xe0   :  { %v8036_v24 = vpop.f32.mrf.mxu0 }
  0xe2   :  { %v684_v32 = vpop.f32.mrf.mxu3 }
  0xe4   :  { %v8038_v33 = vpop.f32.mrf.mxu1  ;;  %v659_v34 = vpop.f32.mrf.mxu2 }
  0xe5   :  { %v660_v39 = vadd.f32 %v659_v34, %v627_v31 }
  0xe7   :  { %v685_v16 = vadd.f32 %v684_v32, %v660_v39 }
  0xe8   :  { %v412_v38 = vpop.f32.mrf.mxu0 }
  0xe9   :  { %v687_v43 = vadd.f32 %v685_v16, %v453_v42  ;;  %v413_v44 = vadd.f32 %v412_v38, %v347_v41 }
  0xeb   :  { %7555 = vtanh.f32 %v687_v43  ;;  %v7488_v30 = vmul.f32 -1.442695, %v687_v43 }
  0xec   :  { %v464_v55 = vpop.f32.mrf.mxu1 }
  0xed   :  { %v8040_v51 = vadd.f32 %v464_v55, %v413_v44  ;;  %7557 = vpow2.f32 %v7488_v30 }
  0xf0   :  { %v416_v7 = vpop.f32.mrf.mxu0 }
  0xf1   :  { %v7556_v8 = vpop.eup %7555  ;;  %v417_v54 = vadd.f32 %v416_v7, %v353_v17 }
  0xf2   :  { %710 = vrot.lane.b32.xlu0 %v7556_v8, %s7709_s1 }
  0xf3   :  { %v7558_v31 = vpop.eup %7557 }
  0xf4   :  { %v468_v57 = vpop.f32.mrf.mxu1  ;;  %v691_v32 = vadd.f32 1.0, %v7558_v31 }
  0xf5   :  { %v8043_v4 = vadd.f32 %v468_v57, %v417_v54 }
  0xf6   :  { %7559 = vrcp.f32 %v691_v32  ;;  %v703_v39 = vand.u32 2147483648, %v691_v32  ;;  %vm697_vm4 = vweird.f32 %v691_v32  ;;  %v701_v41 = vand.u32 2147483647, %v691_v32 }
  0xf8   :  { %v420_v6 = vpop.f32.mrf.mxu0  ;;  %vm702_vm6 = vcmp.eq.f32.partialorder %v701_v41, 8.507059e+37 }
  0xf9   :  { %v421_v12 = vadd.f32 %v420_v6, %v359_v49 }
  0xfc   :  { %v472_v14 = vpop.f32.mrf.mxu1  ;;  %v7560_v25 = vpop.eup %7559 }
  0xfd   :  { %v8045_v15 = vadd.f32 %v472_v14, %v421_v12  ;;  %v693_v26 = vmul.f32 %v7560_v25, %v691_v32  ;;  %vm698_vm3 = vweird.f32 %v7560_v25 }
  0xfe   :  { %vm699_vm5 = vmor %vm697_vm4, %vm698_vm3 }
  0xff   :  { %v694_v34 = vsub.f32 1.0, %v693_v26 }
 0x100   :  { %v424_v18 = vpop.f32.mrf.mxu0 }
 0x101   :  { %v425_v22 = vadd.f32 %v424_v18, %v365_v37  ;;  %v695_v36 = vmul.f32 %v7560_v25, %v694_v34  ;;  %v704_v37 = vor.u32 1.1754944e-38, %v703_v39 }
 0x103   :  { %v696_v23 = vadd.f32 %v7560_v25, %v695_v36 }
 0x104   :  { %v476_v28 = vpop.f32.mrf.mxu1 }
 0x105   :  { %v8047_v13 = vadd.f32 %v476_v28, %v425_v22  ;;  %v700_v42 = vsel %vm699_vm5, %v7560_v25, %v696_v23 }
 0x106   :  { %v705_v38 = vsel %vm702_vm6, %v704_v37, %v700_v42 }
 0x107   :  { %v708_v44 = vmul.f32 0.0, %v705_v38 }
 0x164   :  { %v711_v16 = vpop.permute.xlu0 %710 }
 0x165   :  { %v713_v43 = vmul.f32 %v711_v16, %v705_v38 }
 0x167   :  { %715 = vrot.lane.b32.xlu0 %v713_v43, %s7710_s16 }
 0x1d9   :  { %v716_v48 = vpop.permute.xlu0 %715 }
 0x1da   :  { %v8050_v55 = vadd.f32 %v716_v48, %v708_v44 }
 0x1dc   :  { %7561 = vtanh.f32 %v8050_v55 }
 0x1e2   :  { %v7562_v17 = vpop.eup %7561 }
 0x1e3   :  { %721 = vrot.lane.b32.xlu1 %v7562_v17, %s7711_s17 }
 0x255   :  { %v722_v7 = vpop.permute.xlu1 %721 }
 0x256   :  { %v724_v8 = vmul.f32 %v722_v7, %v705_v38 }
 0x258   :  { %731 = vrot.lane.b32.xlu2 %v724_v8, %s7709_s1  ;;  %726 = vrot.lane.b32.xlu1 %v724_v8, %s7712_s2 }
 0x2b2   :  { %v732_v54 = vpop.permute.xlu2 %731 }
 0x2b3   :  { %735 = vst.msk [vmem:[#allocation3] sm:$0xf0] %vm734_vm7, %v732_v54 }
 0x2ca   :  { %v727_v45 = vpop.permute.xlu1 %726 }
 0x2cb   :  { %730 = vst.msk [vmem:[#allocation3] sm:$0xf] %vm729_vm8, %v727_v45 }
 0x2d2   :  { %v738_v57 = vld [vmem:[#allocation3] sm:$0xff] }
 0x2d3   :  { %v744_v49 = vsel %vm491_vm2, %v738_v57, 0 }
 0x2d4   :  { %v766_v6 = vand.u32 4294901760, %v744_v49 }
 0x2d6   :  { %v767_v12 = vsub.f32 %v744_v49, %v766_v6  ;;  %812 = vmatmul.f32.vlgmr.msra.gmra.mxu3 %v766_v6 }
 0x2d7   :  { %919 = vmatpush.msra.mxu3 %v7815_v11 }
 0x2d8   :  { %v768_v14 = vand.u32 4294901760, %v767_v12 }
 0x2d9   :  { %921 = vmatpush.msra.mxu3 %v7838_v21 }
 0x2da   :  { %v769_v18 = vsub.f32 %v767_v12, %v768_v14 }
 0x2db   :  { %923 = vmatpush.msra.mxu3 %v7878_v50 }
 0x2dc   :  { %v770_v22 = vand.u32 4294901760, %v769_v18 }
 0x2dd   :  { %925 = vmatpush.msra.mxu3 %v7923_v5 }
 0x2de   :  { %771 = vmatmul.f32.vlgmr.msra.gmra.mxu2 %v770_v22  ;;  %869 = vmatmul.f32.vlgmr.msrb.gmra.mxu3 %v768_v14 }
 0x2df   :  { %888 = vmatpush.msra.mxu2 %v7845_v27  ;;  %1034 = vmatpush.msrb.mxu3 %v7863_v40  ;;  %v216_v40 = vadd.f32 %v8018_v60, %v8014_v58 }
 0x2e1   :  { %892 = vmatpush.msra.mxu2 %v7857_v35  ;;  %1040 = vmatpush.msrb.mxu3 %v7874_v47  ;;  %v273_v32 = vadd.f32 %v8020_v62, %v216_v40 }
 0x2e3   :  { %896 = vmatpush.msra.mxu2 %v7891_v56  ;;  %1046 = vmatpush.msrb.mxu3 %v7902_v61  ;;  %v335_v26 = vadd.f32 %v8016_v59, %v273_v32 }
 0x2e5   :  { %900 = vmatpush.msra.mxu2 %v7935_v10  ;;  %1052 = vmatpush.msrb.mxu3 %v7947_v19  ;;  %v405_v36 = vadd.f32 %v8032_v53, %v335_v26 }
 0x2e6   :  { %842 = vmatmul.f32.vlgmr.msrb.gmra.mxu2 %v767_v12  ;;  %927 = vmatmul.f32.vlgmr.msra.gmra.mxu3 %v766_v6 }
 0x2e7   :  { %1001 = vmatpush.msrb.mxu2 %v7815_v11  ;;  %1101 = vmatpush.msra.mxu3 %v7815_v11  ;;  %v457_v41 = vadd.f32 %v8034_v3, %v405_v36  ;;  %v8105_v36 = vpop.f32.mrf.mxu1 }
 0x2e9   :  { %1003 = vmatpush.msrb.mxu2 %v7838_v21  ;;  %1103 = vmatpush.msra.mxu3 %v7838_v21 }
 0x2eb   :  { %1005 = vmatpush.msrb.mxu2 %v7878_v50  ;;  %1105 = vmatpush.msra.mxu3 %v7878_v50 }
 0x2ed   :  { %1007 = vmatpush.msrb.mxu2 %v7923_v5  ;;  %1107 = vmatpush.msra.mxu3 %v7923_v5 }
 0x2ee   :  { %902 = vmatmul.f32.vlgmr.msra.gmra.mxu2 %v766_v6 }
 0x2ef   :  { %1072 = vmatpush.msra.mxu2 %v7836_v20 }
 0x2f1   :  { %1075 = vmatpush.msra.mxu2 %v7849_v29 }
 0x2f3   :  { %1078 = vmatpush.msra.mxu2 %v7884_v52 }
 0x2f5   :  { %1081 = vmatpush.msra.mxu2 %v7930_v9 }
 0x359   :  { %v813_v11 = vpop.f32.mrf.mxu3 }
 0x361   :  { %v772_v27 = vpop.f32.mrf.mxu2  ;;  %v870_v28 = vpop.f32.mrf.mxu3 }
 0x362   :  { %v814_v31 = vadd.f32 %v813_v11, %v772_v27 }
 0x369   :  { %v843_v30 = vpop.f32.mrf.mxu2  ;;  %v928_v39 = vpop.f32.mrf.mxu3 }
 0x36a   :  { %v844_v25 = vadd.f32 %v843_v30, %v814_v31 }
 0x36c   :  { %v871_v20 = vadd.f32 %v870_v28, %v844_v25 }
 0x371   :  { %v903_v34 = vpop.f32.mrf.mxu2 }
 0x372   :  { %v904_v23 = vadd.f32 %v903_v34, %v871_v20  ;;  %v220_v20 = vadd.f32 %v8026_v1, %v8022_v63  ;;  %v8103_v34 = vpop.f32.mrf.mxu0 }
 0x374   :  { %v929_v42 = vadd.f32 %v928_v39, %v904_v23  ;;  %v278_v23 = vadd.f32 %v8028_v2, %v220_v20 }
 0x376   :  { %v931_v37 = vadd.f32 %v929_v42, %v457_v41 }
 0x378   :  { %7563 = vtanh.f32 %v931_v37  ;;  %v7489_v60 = vmul.f32 -1.442695, %v931_v37 }
 0x37a   :  { %7565 = vpow2.f32 %v7489_v60 }
 0x37e   :  { %v7564_v58 = vpop.eup %7563 }
 0x37f   :  { %954 = vrot.lane.b32.xlu2 %v7564_v58, %s7709_s1  ;;  %v341_v58 = vadd.f32 %v8024_v0, %v278_v23 }
 0x380   :  { %v7566_v62 = vpop.eup %7565 }
 0x381   :  { %v935_v16 = vadd.f32 1.0, %v7566_v62 }
 0x383   :  { %7567 = vrcp.f32 %v935_v16  ;;  %v947_v48 = vand.u32 2147483648, %v935_v16  ;;  %vm941_vm10 = vweird.f32 %v935_v16  ;;  %v945_v3 = vand.u32 2147483647, %v935_v16 }
 0x385   :  { %v948_v7 = vor.u32 1.1754944e-38, %v947_v48  ;;  %vm946_vm12 = vcmp.eq.f32.partialorder %v945_v3, 8.507059e+37 }
 0x389   :  { %v7568_v59 = vpop.eup %7567 }
 0x38a   :  { %v937_v38 = vmul.f32 %v7568_v59, %v935_v16  ;;  %vm942_vm9 = vweird.f32 %v7568_v59  ;;  %v409_v16 = vadd.f32 %v8036_v24, %v341_v58 }
 0x38b   :  { %vm943_vm11 = vmor %vm941_vm10, %vm942_vm9 }
 0x38c   :  { %v938_v43 = vsub.f32 1.0, %v937_v38  ;;  %v461_v63 = vadd.f32 %v8038_v33, %v409_v16 }
 0x38e   :  { %v939_v44 = vmul.f32 %v7568_v59, %v938_v43 }
 0x390   :  { %v940_v53 = vadd.f32 %v7568_v59, %v939_v44 }
 0x392   :  { %v944_v17 = vsel %vm943_vm11, %v7568_v59, %v940_v53 }
 0x393   :  { %v949_v54 = vsel %vm946_vm12, %v948_v7, %v944_v17 }
 0x394   :  { %v952_v57 = vmul.f32 %v949_v54, %v8050_v55 }
 0x3d9   :  { %v955_v8 = vpop.permute.xlu2 %954 }
 0x3da   :  { %v957_v45 = vmul.f32 %v955_v8, %v949_v54 }
 0x3dc   :  { %959 = vrot.lane.b32.xlu0 %v957_v45, %s7710_s16 }
 0x44e   :  { %v960_v49 = vpop.permute.xlu0 %959 }
 0x44f   :  { %v8092_v6 = vadd.f32 %v960_v49, %v952_v57 }
 0x451   :  { %7569 = vtanh.f32 %v8092_v6 }
 0x457   :  { %v7570_v12 = vpop.eup %7569 }
 0x458   :  { %965 = vrot.lane.b32.xlu1 %v7570_v12, %s7711_s17 }
 0x4ca   :  { %v966_v14 = vpop.permute.xlu1 %965 }
 0x4cb   :  { %v968_v18 = vmul.f32 %v966_v14, %v949_v54 }
 0x4cd   :  { %974 = vrot.lane.b32.xlu0 %v968_v18, %s7709_s1  ;;  %970 = vrot.lane.b32.xlu2 %v968_v18, %s7712_s2 }
 0x527   :  { %v971_v22 = vpop.permute.xlu2 %970 }
 0x528   :  { %973 = vst.msk [vmem:[#allocation3] sm:$0xf] %vm729_vm8, %v971_v22 }
 0x53f   :  { %v975_v11 = vpop.permute.xlu0 %974 }
 0x540   :  { %977 = vst.msk [vmem:[#allocation3] sm:$0xf0] %vm734_vm7, %v975_v11 }
 0x547   :  { %v980_v55 = vld [vmem:[#allocation3] sm:$0xff] }
 0x548   :  { %v986_v27 = vsel %vm491_vm2, %v980_v55, 0 }
 0x549   :  { %v1008_v40 = vand.u32 4294901760, %v986_v27 }
 0x54b   :  { %v1009_v28 = vsub.f32 %v986_v27, %v1008_v40  ;;  %1054 = vmatmul.f32.vlgmr.msrb.gmra.mxu3 %v1008_v40  ;;  %1144 = vmatmul.f32.vlgmr.msra.gmra.mxu0 %v1008_v40 }
 0x54c   :  { %1169 = vmatmul.f32.vlgmr.msra.gmra.mxu1 %v1008_v40  ;;  %v1226_v40 = vld [vmem:[%s10853_s3 + $0x18] sm:$0xff] }
 0x54d   :  { %v1010_v30 = vand.u32 4294901760, %v1009_v28 }
 0x54f   :  { %v1011_v31 = vsub.f32 %v1009_v28, %v1010_v30 }
 0x551   :  { %v1012_v32 = vand.u32 4294901760, %v1011_v31 }
 0x553   :  { %1013 = vmatmul.f32.vlgmr.msrb.gmra.mxu2 %v1012_v32  ;;  %1111 = vmatmul.f32.vlgmr.msra.gmra.mxu3 %v1010_v30 }
 0x55b   :  { %1084 = vmatmul.f32.vlgmr.msra.gmra.mxu2 %v1009_v28  ;;  %v8123_v28 = vand.u32 4294901760, %v1226_v40 }
 0x55d   :  { %1343 = vmatpush.msrb.mxu1 %v8123_v28  ;;  %1243 = vmatpush.msrb.mxu2 %v8123_v28 }
 0x55f   :  { %1345 = vmatpush.msrb.mxu1 %v7838_v21  ;;  %1245 = vmatpush.msrb.mxu2 %v7838_v21 }
 0x561   :  { %1347 = vmatpush.msrb.mxu1 %v7878_v50  ;;  %1247 = vmatpush.msrb.mxu2 %v7878_v50 }
 0x563   :  { %1349 = vmatpush.msrb.mxu1 %v7923_v5  ;;  %1249 = vmatpush.msrb.mxu2 %v7923_v5 }
 0x5c8   :  { %v1145_v62 = vpop.f32.mrf.mxu0 }
 0x5c9   :  { %v1170_v38 = vpop.f32.mrf.mxu1 }
 0x5ce   :  { %v1055_v25 = vpop.f32.mrf.mxu3 }
 0x5d6   :  { %v1014_v26 = vpop.f32.mrf.mxu2  ;;  %v1112_v37 = vpop.f32.mrf.mxu3 }
 0x5d7   :  { %v1056_v39 = vadd.f32 %v1055_v25, %v1014_v26 }
 0x5de   :  { %v1085_v41 = vpop.f32.mrf.mxu2 }
 0x5df   :  { %v1086_v42 = vadd.f32 %v1085_v41, %v1056_v39 }
 0x5e1   :  { %v1113_v60 = vadd.f32 %v1112_v37, %v1086_v42 }
 0x5e3   :  { %v1146_v59 = vadd.f32 %v1145_v62, %v1113_v60 }
 0x5e5   :  { %v1171_v1 = vadd.f32 %v1170_v38, %v1146_v59 }
 0x5e7   :  { %v1173_v43 = vadd.f32 %v1171_v1, %v461_v63 }
 0x5e9   :  { %7571 = vtanh.f32 %v1173_v43  ;;  %v7490_v2 = vmul.f32 -1.442695, %v1173_v43 }
 0x5eb   :  { %7573 = vpow2.f32 %v7490_v2 }
 0x5ef   :  { %v7572_v44 = vpop.eup %7571 }
 0x5f0   :  { %1196 = vrot.lane.b32.xlu1 %v7572_v44, %s7709_s1 }
 0x5f1   :  { %v7574_v53 = vpop.eup %7573 }
 0x5f2   :  { %v1177_v48 = vadd.f32 1.0, %v7574_v53 }
 0x5f4   :  { %7575 = vrcp.f32 %v1177_v48  ;;  %v1189_v8 = vand.u32 2147483648, %v1177_v48  ;;  %vm1183_vm14 = vweird.f32 %v1177_v48  ;;  %v1187_v33 = vand.u32 2147483647, %v1177_v48 }
 0x5f6   :  { %v1190_v45 = vor.u32 1.1754944e-38, %v1189_v8  ;;  %vm1188_vm0 = vcmp.eq.f32.partialorder %v1187_v33, 8.507059e+37 }
 0x5fa   :  { %v7576_v0 = vpop.eup %7575 }
 0x5fb   :  { %v1179_v3 = vmul.f32 %v7576_v0, %v1177_v48  ;;  %vm1184_vm13 = vweird.f32 %v7576_v0 }
 0x5fc   :  { %vm1185_vm15 = vmor %vm1183_vm14, %vm1184_vm13 }
 0x5fd   :  { %v1180_v17 = vsub.f32 1.0, %v1179_v3 }
 0x5ff   :  { %v1181_v7 = vmul.f32 %v7576_v0, %v1180_v17 }
 0x601   :  { %v1182_v24 = vadd.f32 %v7576_v0, %v1181_v7 }
 0x603   :  { %v1186_v54 = vsel %vm1185_vm15, %v7576_v0, %v1182_v24 }
 0x604   :  { %v1191_v49 = vsel %vm1188_vm0, %v1190_v45, %v1186_v54 }
 0x605   :  { %v1194_v14 = vmul.f32 %v1191_v49, %v8092_v6  ;;  %v8126_v6 = vsub.f32 %v1226_v40, %v8123_v28 }
 0x607   :  { %v8131_v30 = vand.u32 4294901760, %v8126_v6  ;;  %1314 = vmatpush.msrb.mxu0 %v8126_v6 }
 0x609   :  { %v1274_v31 = vsub.f32 %v8126_v6, %v8131_v30  ;;  %1317 = vmatpush.msrb.mxu0 %v7849_v29  ;;  %1372 = vmatpush.msra.mxu2 %v8131_v30 }
 0x60b   :  { %v8141_v32 = vand.u32 4294901760, %v1274_v31  ;;  %1320 = vmatpush.msrb.mxu0 %v7884_v52  ;;  %1376 = vmatpush.msra.mxu2 %v7857_v35 }
 0x60d   :  { %1276 = vmatpush.msrb.mxu3 %v8141_v32  ;;  %1323 = vmatpush.msrb.mxu0 %v7930_v9 }
 0x60e   :  { %1518 = vmatpush.msra.mxu1 %v8141_v32  ;;  %1380 = vmatpush.msra.mxu2 %v7891_v56 }
 0x60f   :  { %1282 = vmatpush.msrb.mxu3 %v7874_v47  ;;  %1485 = vmatpush.msra.mxu0 %v8123_v28 }
 0x610   :  { %1384 = vmatpush.msra.mxu2 %v7935_v10 }
 0x611   :  { %1288 = vmatpush.msrb.mxu3 %v7902_v61 }
 0x613   :  { %1294 = vmatpush.msrb.mxu3 %v7947_v19 }
 0x615   :  { %1403 = vmatpush.msra.mxu3 %v8123_v28 }
 0x617   :  { %1405 = vmatpush.msra.mxu3 %v7838_v21 }
 0x619   :  { %1407 = vmatpush.msra.mxu3 %v7878_v50 }
 0x61b   :  { %1409 = vmatpush.msra.mxu3 %v7923_v5 }
 0x662   :  { %v1197_v57 = vpop.permute.xlu1 %1196 }
 0x663   :  { %v1199_v12 = vmul.f32 %v1197_v57, %v1191_v49  ;;  %v1467_v57 = vld [vmem:[%s10853_s3 + $0x10] sm:$0xff] }
 0x665   :  { %1201 = vrot.lane.b32.xlu2 %v1199_v12, %s7710_s16  ;;  %v1466_v12 = vld [vmem:[%s10853_s3 + $0x8] sm:$0xff] }
 0x6bf   :  { %v1202_v18 = vpop.permute.xlu2 %1201 }
 0x6c0   :  { %v8114_v22 = vadd.f32 %v1202_v18, %v1194_v14  ;;  %v8187_v18 = vand.u32 4294901760, %v1466_v12 }
 0x6c2   :  { %7577 = vtanh.f32 %v8114_v22 }
 0x6c8   :  { %v7578_v11 = vpop.eup %7577 }
 0x6c9   :  { %1207 = vrot.lane.b32.xlu0 %v7578_v11, %s7711_s17 }
 0x73b   :  { %v1208_v55 = vpop.permute.xlu0 %1207 }
 0x73c   :  { %v1210_v27 = vmul.f32 %v1208_v55, %v1191_v49  ;;  %v8179_v49 = vand.u32 4294901760, %v1467_v57  ;;  %v8198_v55 = vsub.f32 %v1466_v12, %v8187_v18 }
 0x73e   :  { %1216 = vrot.lane.b32.xlu2 %v1210_v27, %s7709_s1  ;;  %1212 = vrot.lane.b32.xlu1 %v1210_v27, %s7712_s2  ;;  %v8185_v14 = vsub.f32 %v1467_v57, %v8179_v49  ;;  %v8208_v31 = vand.u32 4294901760, %v8198_v55 }
 0x73f   :  { %1487 = vmatpush.msra.mxu0 %v8179_v49 }
 0x740   :  { %v8195_v11 = vand.u32 4294901760, %v8185_v14 }
 0x741   :  { %1489 = vmatpush.msra.mxu0 %v8187_v18 }
 0x742   :  { %v1522_v40 = vsub.f32 %v8185_v14, %v8195_v11 }
 0x798   :  { %v1217_v29 = vpop.permute.xlu2 %1216 }
 0x799   :  { %1219 = vst.msk [vmem:[#allocation3] sm:$0xf0] %vm734_vm7, %v1217_v29 }
 0x7b0   :  { %v1213_v47 = vpop.permute.xlu1 %1212 }
 0x7b1   :  { %1215 = vst.msk [vmem:[#allocation3] sm:$0xf] %vm729_vm8, %v1213_v47  ;;  %v8217_v47 = vand.u32 4294901760, %v1522_v40 }
 0x7b3   :  { %1524 = vmatpush.msra.mxu1 %v8217_v47 }
 0x7b8   :  { %v1222_v35 = vld [vmem:[#allocation3] sm:$0xff] }
 0x7b9   :  { %v1228_v52 = vsel %vm491_vm2, %v1222_v35, 0  ;;  %v1528_v35 = vsub.f32 %v8198_v55, %v8208_v31 }
 0x7ba   :  { %v1250_v61 = vand.u32 4294901760, %v1228_v52 }
 0x7bc   :  { %1296 = vmatmul.f32.vlgmr.msrb.gmra.mxu3 %v1250_v61  ;;  %v1251_v56 = vsub.f32 %v1228_v52, %v1250_v61 }
 0x7bd   :  { %1585 = vmatpush.msrb.mxu3 %v8123_v28 }
 0x7be   :  { %1326 = vmatmul.f32.vlgmr.msrb.gmra.mxu0 %v1251_v56  ;;  %v1252_v9 = vand.u32 4294901760, %v1251_v56 }
 0x7bf   :  { %1587 = vmatpush.msrb.mxu3 %v8179_v49 }
 0x7c0   :  { %1353 = vmatmul.f32.vlgmr.msrb.gmra.mxu1 %v1252_v9  ;;  %v1253_v10 = vsub.f32 %v1251_v56, %v1252_v9 }
 0x7c1   :  { %1589 = vmatpush.msrb.mxu3 %v8187_v18 }
 0x7c2   :  { %v1254_v21 = vand.u32 4294901760, %v1253_v10 }
 0x7c4   :  { %1255 = vmatmul.f32.vlgmr.msrb.gmra.mxu2 %v1254_v21  ;;  %1411 = vmatmul.f32.vlgmr.msra.gmra.mxu3 %v1250_v61 }
 0x7c5   :  { %1556 = vmatpush.msrb.mxu2 %v8126_v6 }
 0x7c7   :  { %1559 = vmatpush.msrb.mxu2 %v8185_v14 }
 0x7c9   :  { %1562 = vmatpush.msrb.mxu2 %v8198_v55 }
 0x7cc   :  { %1386 = vmatmul.f32.vlgmr.msra.gmra.mxu2 %v1250_v61  ;;  %v8228_v61 = vand.u32 4294901760, %v1528_v35 }
 0x7ce   :  { %1530 = vmatpush.msra.mxu1 %v8228_v61 }
 0x83b   :  { %v1327_v25 = vpop.f32.mrf.mxu0 }
 0x83d   :  { %v1354_v20 = vpop.f32.mrf.mxu1 }
 0x83f   :  { %v1297_v50 = vpop.f32.mrf.mxu3 }
 0x847   :  { %v1256_v5 = vpop.f32.mrf.mxu2  ;;  %v1412_v42 = vpop.f32.mrf.mxu3 }
 0x848   :  { %v1298_v19 = vadd.f32 %v1297_v50, %v1256_v5 }
 0x84a   :  { %v1328_v26 = vadd.f32 %v1327_v25, %v1298_v19 }
 0x84c   :  { %v1355_v23 = vadd.f32 %v1354_v20, %v1328_v26 }
 0x84f   :  { %v1387_v39 = vpop.f32.mrf.mxu2 }
 0x850   :  { %v1388_v41 = vadd.f32 %v1387_v39, %v1355_v23 }
 0x852   :  { %v1413_v37 = vadd.f32 %v1412_v42, %v1388_v41 }
 0x854   :  { %v1415_v58 = vadd.f32 %v1413_v37, %v8040_v51 }
 0x856   :  { %7579 = vtanh.f32 %v1415_v58  ;;  %v7491_v62 = vmul.f32 -1.442695, %v1415_v58 }
 0x858   :  { %7581 = vpow2.f32 %v7491_v62 }
 0x85c   :  { %v7580_v60 = vpop.eup %7579 }
 0x85d   :  { %1438 = vrot.lane.b32.xlu0 %v7580_v60, %s7709_s1 }
 0x85e   :  { %v7582_v16 = vpop.eup %7581 }
 0x85f   :  { %v1419_v59 = vadd.f32 1.0, %v7582_v16 }
 0x861   :  { %7583 = vrcp.f32 %v1419_v59  ;;  %v1431_v2 = vand.u32 2147483648, %v1419_v59  ;;  %vm1425_vm3 = vweird.f32 %v1419_v59  ;;  %v1429_v53 = vand.u32 2147483647, %v1419_v59 }
 0x863   :  { %v1432_v48 = vor.u32 1.1754944e-38, %v1431_v2  ;;  %vm1430_vm5 = vcmp.eq.f32.partialorder %v1429_v53, 8.507059e+37 }
 0x867   :  { %v7584_v38 = vpop.eup %7583 }
 0x868   :  { %v1421_v63 = vmul.f32 %v7584_v38, %v1419_v59  ;;  %vm1426_vm1 = vweird.f32 %v7584_v38 }
 0x869   :  { %vm1427_vm4 = vmor %vm1425_vm3, %vm1426_vm1 }
 0x86a   :  { %v1422_v1 = vsub.f32 1.0, %v1421_v63 }
 0x86c   :  { %v1423_v43 = vmul.f32 %v7584_v38, %v1422_v1 }
 0x86e   :  { %v1424_v44 = vadd.f32 %v7584_v38, %v1423_v43 }
 0x870   :  { %v1428_v51 = vsel %vm1427_vm4, %v7584_v38, %v1424_v44 }
 0x871   :  { %v1433_v3 = vsel %vm1430_vm5, %v1432_v48, %v1428_v51 }
 0x872   :  { %v1436_v7 = vmul.f32 %v1433_v3, %v8114_v22  ;;  %v1465_v22 = vld [vmem:[%s10853_s3] sm:$0xff]  ;;  %s7713_s3 = smov 112  }
 0x873   :  { %v8201_v27 = vand.u32 4294901760, %v1465_v22 }
 0x875   :  { %v8211_v29 = vsub.f32 %v1465_v22, %v8201_v27  ;;  %1591 = vmatpush.msrb.mxu3 %v8201_v27  ;;  %1491 = vmatpush.msra.mxu0 %v8201_v27 }
 0x877   :  { %1760 = vmatpush.msra.mxu3 %v8141_v32  ;;  %v8222_v52 = vand.u32 4294901760, %v8211_v29  ;;  %1565 = vmatpush.msrb.mxu2 %v8211_v29 }
 0x878   :  { %1614 = vmatpush.msrb.mxu0 %v8131_v30 }
 0x879   :  { %1727 = vmatpush.msra.mxu2 %v8123_v28  ;;  %v1534_v56 = vsub.f32 %v8211_v29, %v8222_v52  ;;  %1766 = vmatpush.msra.mxu3 %v8217_v47 }
 0x87a   :  { %1618 = vmatpush.msrb.mxu0 %v8195_v11 }
 0x87b   :  { %1729 = vmatpush.msra.mxu2 %v8179_v49  ;;  %v8236_v9 = vand.u32 4294901760, %v1534_v56  ;;  %1772 = vmatpush.msra.mxu3 %v8228_v61 }
 0x87c   :  { %1622 = vmatpush.msrb.mxu0 %v8208_v31 }
 0x87d   :  { %1731 = vmatpush.msra.mxu2 %v8187_v18  ;;  %1536 = vmatpush.msra.mxu1 %v8236_v9 }
 0x87e   :  { %1626 = vmatpush.msrb.mxu0 %v8222_v52  ;;  %1778 = vmatpush.msra.mxu3 %v8236_v9 }
 0x87f   :  { %1645 = vmatpush.msrb.mxu1 %v8123_v28  ;;  %1733 = vmatpush.msra.mxu2 %v8201_v27 }
 0x881   :  { %1647 = vmatpush.msrb.mxu1 %v8179_v49 }
 0x883   :  { %1649 = vmatpush.msrb.mxu1 %v8187_v18 }
 0x885   :  { %1651 = vmatpush.msrb.mxu1 %v8201_v27 }
 0x8cf   :  { %v1439_v0 = vpop.permute.xlu0 %1438 }
 0x8d0   :  { %v1441_v17 = vmul.f32 %v1439_v0, %v1433_v3 }
 0x8d2   :  { %1443 = vrot.lane.b32.xlu1 %v1441_v17, %s7710_s16 }
 0x944   :  { %v1444_v24 = vpop.permute.xlu1 %1443 }
 0x945   :  { %v8170_v8 = vadd.f32 %v1444_v24, %v1436_v7 }
 0x947   :  { %7585 = vtanh.f32 %v8170_v8 }
 0x94d   :  { %v7586_v33 = vpop.eup %7585 }
 0x94e   :  { %1449 = vrot.lane.b32.xlu2 %v7586_v33, %s7711_s17 }
 0x9a8   :  { %v1450_v54 = vpop.permute.xlu2 %1449 }
 0x9a9   :  { %v1452_v45 = vmul.f32 %v1450_v54, %v1433_v3 }
 0x9ab   :  { %1458 = vrot.lane.b32.xlu1 %v1452_v45, %s7709_s1  ;;  %1454 = vrot.lane.b32.xlu0 %v1452_v45, %s7712_s2 }
 0xa1d   :  { %v1459_v10 = vpop.permute.xlu1 %1458  ;;  %v1455_v21 = vpop.permute.xlu0 %1454 }
 0xa1e   :  { %1461 = vst.msk [vmem:[#allocation3] sm:$0xf0] %vm734_vm7, %v1459_v10 }
 0xa1f   :  { %1457 = vst.msk [vmem:[#allocation3] sm:$0xf] %vm729_vm8, %v1455_v21 }
 0xa26   :  { %v1464_v50 = vld [vmem:[#allocation3] sm:$0xff] }
 0xa27   :  { %v1470_v5 = vsel %vm491_vm2, %v1464_v50, 0 }
 0xa28   :  { %v1492_v19 = vand.u32 4294901760, %v1470_v5 }
 0xa2a   :  { %1538 = vmatmul.f32.vlgmr.msra.gmra.mxu1 %v1492_v19  ;;  %v1493_v25 = vsub.f32 %v1470_v5, %v1492_v19 }
 0xa2b   :  { %1827 = vmatpush.msra.mxu1 %v8123_v28 }
 0xa2c   :  { %1568 = vmatmul.f32.vlgmr.msrb.gmra.mxu2 %v1493_v25  ;;  %v1494_v26 = vand.u32 4294901760, %v1493_v25 }
 0xa2d   :  { %1829 = vmatpush.msra.mxu1 %v8179_v49  ;;  %1856 = vmatpush.msrb.mxu2 %v8131_v30 }
 0xa2e   :  { %1595 = vmatmul.f32.vlgmr.msrb.gmra.mxu3 %v1494_v26  ;;  %v1495_v20 = vsub.f32 %v1493_v25, %v1494_v26 }
 0xa2f   :  { %1831 = vmatpush.msra.mxu1 %v8187_v18  ;;  %1887 = vmatpush.msrb.mxu3 %v8123_v28 }
 0xa30   :  { %v1496_v23 = vand.u32 4294901760, %v1495_v20  ;;  %1860 = vmatpush.msrb.mxu2 %v8195_v11 }
 0xa31   :  { %1833 = vmatpush.msra.mxu1 %v8201_v27  ;;  %1889 = vmatpush.msrb.mxu3 %v8179_v49 }
 0xa32   :  { %1497 = vmatmul.f32.vlgmr.msra.gmra.mxu0 %v1496_v23  ;;  %1653 = vmatmul.f32.vlgmr.msrb.gmra.mxu1 %v1492_v19 }
 0xa33   :  { %1798 = vmatpush.msra.mxu0 %v8126_v6  ;;  %1891 = vmatpush.msrb.mxu3 %v8187_v18 }
 0xa34   :  { %1864 = vmatpush.msrb.mxu2 %v8208_v31  ;;  %2002 = vmatpush.msrb.mxu1 %v8141_v32 }
 0xa35   :  { %1801 = vmatpush.msra.mxu0 %v8185_v14  ;;  %1893 = vmatpush.msrb.mxu3 %v8201_v27 }
 0xa36   :  { %1868 = vmatpush.msrb.mxu2 %v8222_v52  ;;  %2008 = vmatpush.msrb.mxu1 %v8217_v47 }
 0xa37   :  { %1804 = vmatpush.msra.mxu0 %v8198_v55 }
 0xa38   :  { %2014 = vmatpush.msrb.mxu1 %v8228_v61 }
 0xa39   :  { %1807 = vmatpush.msra.mxu0 %v8211_v29 }
 0xa3a   :  { %1628 = vmatmul.f32.vlgmr.msrb.gmra.mxu0 %v1492_v19  ;;  %2020 = vmatpush.msrb.mxu1 %v8236_v9 }
 0xa3b   :  { %1969 = vmatpush.msrb.mxu0 %v8123_v28 }
 0xa3d   :  { %1971 = vmatpush.msrb.mxu0 %v8179_v49 }
 0xa3f   :  { %1973 = vmatpush.msrb.mxu0 %v8187_v18 }
 0xa41   :  { %1975 = vmatpush.msrb.mxu0 %v8201_v27 }
 0xaa7   :  { %v1539_v39 = vpop.f32.mrf.mxu1 }
 0xaaf   :  { %v1498_v41 = vpop.f32.mrf.mxu0  ;;  %v1569_v37 = vpop.f32.mrf.mxu2 }
 0xab0   :  { %v1540_v42 = vadd.f32 %v1539_v39, %v1498_v41  ;;  %v1654_v38 = vpop.f32.mrf.mxu1 }
 0xab1   :  { %v1596_v60 = vpop.f32.mrf.mxu3 }
 0xab2   :  { %v1570_v58 = vadd.f32 %v1569_v37, %v1540_v42 }
 0xab4   :  { %v1597_v62 = vadd.f32 %v1596_v60, %v1570_v58 }
 0xab7   :  { %v1629_v16 = vpop.f32.mrf.mxu0 }
 0xab8   :  { %v1630_v59 = vadd.f32 %v1629_v16, %v1597_v62 }
 0xaba   :  { %v1655_v63 = vadd.f32 %v1654_v38, %v1630_v59 }
 0xabc   :  { %v1657_v1 = vadd.f32 %v1655_v63, %v8043_v4 }
 0xabe   :  { %7587 = vtanh.f32 %v1657_v1  ;;  %v7492_v44 = vmul.f32 -1.442695, %v1657_v1 }
 0xac0   :  { %7589 = vpow2.f32 %v7492_v44 }
 0xac4   :  { %v7588_v43 = vpop.eup %7587 }
 0xac5   :  { %1680 = vrot.lane.b32.xlu2 %v7588_v43, %s7709_s1 }
 0xac6   :  { %v7590_v2 = vpop.eup %7589 }
 0xac7   :  { %v1661_v53 = vadd.f32 1.0, %v7590_v2 }
 0xac9   :  { %7591 = vrcp.f32 %v1661_v53  ;;  %v1673_v7 = vand.u32 2147483648, %v1661_v53  ;;  %vm1667_vm9 = vweird.f32 %v1661_v53  ;;  %v1671_v24 = vand.u32 2147483647, %v1661_v53 }
 0xacb   :  { %v1674_v33 = vor.u32 1.1754944e-38, %v1673_v7  ;;  %vm1672_vm11 = vcmp.eq.f32.partialorder %v1671_v24, 8.507059e+37 }
 0xacf   :  { %v7592_v51 = vpop.eup %7591 }
 0xad0   :  { %v1663_v48 = vmul.f32 %v7592_v51, %v1661_v53  ;;  %vm1668_vm6 = vweird.f32 %v7592_v51 }
 0xad1   :  { %vm1669_vm10 = vmor %vm1667_vm9, %vm1668_vm6 }
 0xad2   :  { %v1664_v0 = vsub.f32 1.0, %v1663_v48 }
 0xad4   :  { %v1665_v3 = vmul.f32 %v7592_v51, %v1664_v0 }
 0xad6   :  { %v1666_v17 = vadd.f32 %v7592_v51, %v1665_v3 }
 0xad8   :  { %v1670_v4 = vsel %vm1669_vm10, %v7592_v51, %v1666_v17 }
 0xad9   :  { %v1675_v45 = vsel %vm1672_vm11, %v1674_v33, %v1670_v4  ;;  %vm2436_vm11 = vcmask 255105  }
 0xada   :  { %v1678_v12 = vmul.f32 %v1675_v45, %v8170_v8 }
 0xb1f   :  { %v1681_v54 = vpop.permute.xlu2 %1680 }
 0xb20   :  { %v1683_v57 = vmul.f32 %v1681_v54, %v1675_v45 }
 0xb22   :  { %1685 = vrot.lane.b32.xlu0 %v1683_v57, %s7710_s16 }
 0xb94   :  { %v1686_v22 = vpop.permute.xlu0 %1685 }
 0xb95   :  { %v8280_v40 = vadd.f32 %v1686_v22, %v1678_v12 }
 0xb97   :  { %7593 = vtanh.f32 %v8280_v40 }
 0xb9d   :  { %v7594_v35 = vpop.eup %7593 }
 0xb9e   :  { %1691 = vrot.lane.b32.xlu1 %v7594_v35, %s7711_s17 }
 0xc10   :  { %v1692_v56 = vpop.permute.xlu1 %1691 }
 0xc11   :  { %v1694_v10 = vmul.f32 %v1692_v56, %v1675_v45 }
 0xc13   :  { %1700 = vrot.lane.b32.xlu0 %v1694_v10, %s7709_s1  ;;  %1696 = vrot.lane.b32.xlu2 %v1694_v10, %s7712_s2 }
 0xc6d   :  { %v1697_v21 = vpop.permute.xlu2 %1696 }
 0xc6e   :  { %1699 = vst.msk [vmem:[#allocation3] sm:$0xf] %vm729_vm8, %v1697_v21 }
 0xc85   :  { %v1701_v50 = vpop.permute.xlu0 %1700 }
 0xc86   :  { %1703 = vst.msk [vmem:[#allocation3] sm:$0xf0] %vm734_vm7, %v1701_v50 }
 0xc8d   :  { %v1706_v8 = vld [vmem:[#allocation3] sm:$0xff] }
 0xc8e   :  { %v1712_v5 = vsel %vm491_vm2, %v1706_v8, 0 }
 0xc8f   :  { %v1734_v19 = vand.u32 4294901760, %v1712_v5 }
 0xc91   :  { %1780 = vmatmul.f32.vlgmr.msra.gmra.mxu3 %v1734_v19  ;;  %v1735_v25 = vsub.f32 %v1712_v5, %v1734_v19 }
 0xc92   :  { %2069 = vmatpush.msra.mxu3 %v8123_v28 }
 0xc93   :  { %1810 = vmatmul.f32.vlgmr.msra.gmra.mxu0 %v1735_v25  ;;  %v1736_v26 = vand.u32 4294901760, %v1735_v25 }
 0xc94   :  { %2071 = vmatpush.msra.mxu3 %v8179_v49  ;;  %2098 = vmatpush.msra.mxu0 %v8131_v30 }
 0xc95   :  { %1837 = vmatmul.f32.vlgmr.msra.gmra.mxu1 %v1736_v26  ;;  %v1737_v20 = vsub.f32 %v1735_v25, %v1736_v26 }
 0xc96   :  { %2073 = vmatpush.msra.mxu3 %v8187_v18  ;;  %2129 = vmatpush.msra.mxu1 %v8123_v28 }
 0xc97   :  { %v1738_v23 = vand.u32 4294901760, %v1737_v20  ;;  %2102 = vmatpush.msra.mxu0 %v8195_v11 }
 0xc98   :  { %2075 = vmatpush.msra.mxu3 %v8201_v27  ;;  %2131 = vmatpush.msra.mxu1 %v8179_v49 }
 0xc99   :  { %1739 = vmatmul.f32.vlgmr.msra.gmra.mxu2 %v1738_v23  ;;  %1895 = vmatmul.f32.vlgmr.msrb.gmra.mxu3 %v1734_v19 }
 0xc9a   :  { %2040 = vmatpush.msra.mxu2 %v8126_v6  ;;  %2133 = vmatpush.msra.mxu1 %v8187_v18 }
 0xc9b   :  { %2106 = vmatpush.msra.mxu0 %v8208_v31  ;;  %2244 = vmatpush.msrb.mxu3 %v8141_v32 }
 0xc9c   :  { %2043 = vmatpush.msra.mxu2 %v8185_v14  ;;  %2135 = vmatpush.msra.mxu1 %v8201_v27 }
 0xc9d   :  { %2110 = vmatpush.msra.mxu0 %v8222_v52  ;;  %2250 = vmatpush.msrb.mxu3 %v8217_v47 }
 0xc9e   :  { %2046 = vmatpush.msra.mxu2 %v8198_v55 }
 0xc9f   :  { %2256 = vmatpush.msrb.mxu3 %v8228_v61 }
 0xca0   :  { %2049 = vmatpush.msra.mxu2 %v8211_v29 }
 0xca1   :  { %1870 = vmatmul.f32.vlgmr.msrb.gmra.mxu2 %v1734_v19  ;;  %2262 = vmatpush.msrb.mxu3 %v8236_v9 }
 0xca2   :  { %2211 = vmatpush.msrb.mxu2 %v8123_v28 }
 0xca4   :  { %2213 = vmatpush.msrb.mxu2 %v8179_v49 }
 0xca6   :  { %2215 = vmatpush.msrb.mxu2 %v8187_v18 }
 0xca8   :  { %2217 = vmatpush.msrb.mxu2 %v8201_v27 }
 0xd10   :  { %v1811_v41 = vpop.f32.mrf.mxu0 }
 0xd12   :  { %v1838_v37 = vpop.f32.mrf.mxu1 }
 0xd14   :  { %v1781_v32 = vpop.f32.mrf.mxu3 }
 0xd1c   :  { %v1740_v39 = vpop.f32.mrf.mxu2  ;;  %v1896_v62 = vpop.f32.mrf.mxu3 }
 0xd1d   :  { %v1782_v47 = vadd.f32 %v1781_v32, %v1740_v39 }
 0xd1f   :  { %v1812_v42 = vadd.f32 %v1811_v41, %v1782_v47 }
 0xd21   :  { %v1839_v61 = vadd.f32 %v1838_v37, %v1812_v42 }
 0xd24   :  { %v1871_v58 = vpop.f32.mrf.mxu2 }
 0xd25   :  { %v1872_v60 = vadd.f32 %v1871_v58, %v1839_v61 }
 0xd27   :  { %v1897_v16 = vadd.f32 %v1896_v62, %v1872_v60 }
 0xd29   :  { %v1899_v9 = vadd.f32 %v1897_v16, %v8045_v15 }
 0xd2b   :  { %7595 = vtanh.f32 %v1899_v9  ;;  %v7493_v38 = vmul.f32 -1.442695, %v1899_v9 }
 0xd2d   :  { %7597 = vpow2.f32 %v7493_v38 }
 0xd31   :  { %v7596_v59 = vpop.eup %7595 }
 0xd32   :  { %1922 = vrot.lane.b32.xlu1 %v7596_v59, %s7709_s1 }
 0xd33   :  { %v7598_v63 = vpop.eup %7597 }
 0xd34   :  { %v1903_v1 = vadd.f32 1.0, %v7598_v63 }
 0xd36   :  { %7599 = vrcp.f32 %v1903_v1  ;;  %v1915_v48 = vand.u32 2147483648, %v1903_v1  ;;  %vm1909_vm13 = vweird.f32 %v1903_v1  ;;  %v1913_v0 = vand.u32 2147483647, %v1903_v1 }
 0xd38   :  { %v1916_v3 = vor.u32 1.1754944e-38, %v1915_v48  ;;  %vm1914_vm15 = vcmp.eq.f32.partialorder %v1913_v0, 8.507059e+37 }
 0xd3c   :  { %v7600_v43 = vpop.eup %7599 }
 0xd3d   :  { %v1905_v44 = vmul.f32 %v7600_v43, %v1903_v1  ;;  %vm1910_vm12 = vweird.f32 %v7600_v43 }
 0xd3e   :  { %vm1911_vm14 = vmor %vm1909_vm13, %vm1910_vm12  ;;  %vm2438_vm12 = vcmask 126980   ;;  %vm2440_vm13 = vcmask 259205  }
 0xd3f   :  { %v1906_v2 = vsub.f32 1.0, %v1905_v44 }
 0xd41   :  { %v1907_v53 = vmul.f32 %v7600_v43, %v1906_v2 }
 0xd43   :  { %v1908_v51 = vadd.f32 %v7600_v43, %v1907_v53 }
 0xd45   :  { %v1912_v15 = vsel %vm1911_vm14, %v7600_v43, %v1908_v51  ;;  %vm2466_vm14 = vcmask 254976  }
 0xd46   :  { %v1917_v7 = vsel %vm1914_vm15, %v1916_v3, %v1912_v15  ;;  %vm2453_vm15 = vcmask 254080  }
 0xd47   :  { %v1920_v4 = vmul.f32 %v1917_v7, %v8280_v40 }
 0xda4   :  { %v1923_v17 = vpop.permute.xlu1 %1922 }
 0xda5   :  { %v1925_v24 = vmul.f32 %v1923_v17, %v1917_v7 }
 0xda7   :  { %1927 = vrot.lane.b32.xlu2 %v1925_v24, %s7710_s16 }
 0xe01   :  { %v1928_v33 = vpop.permute.xlu2 %1927 }
 0xe02   :  { %v8317_v54 = vadd.f32 %v1928_v33, %v1920_v4 }
 0xe04   :  { %7601 = vtanh.f32 %v8317_v54 }
 0xe0a   :  { %v7602_v45 = vpop.eup %7601 }
 0xe0b   :  { %1933 = vrot.lane.b32.xlu0 %v7602_v45, %s7711_s17 }
 0xe7d   :  { %v1934_v57 = vpop.permute.xlu0 %1933 }
 0xe7e   :  { %v1936_v12 = vmul.f32 %v1934_v57, %v1917_v7 }
 0xe80   :  { %1942 = vrot.lane.b32.xlu2 %v1936_v12, %s7709_s1  ;;  %1938 = vrot.lane.b32.xlu1 %v1936_v12, %s7712_s2  ;;  %v429_v12 = vadd.f32 %v8103_v34, %v8030_v46 }
 0xeda   :  { %v1943_v22 = vpop.permute.xlu2 %1942 }
 0xedb   :  { %1945 = vst.msk [vmem:[#allocation3] sm:$0xf0] %vm734_vm7, %v1943_v22 }
 0xef2   :  { %v1939_v35 = vpop.permute.xlu1 %1938 }
 0xef3   :  { %1941 = vst.msk [vmem:[#allocation3] sm:$0xf] %vm729_vm8, %v1939_v35 }
 0xefa   :  { %v1948_v40 = vld [vmem:[#allocation3] sm:$0xff] }
 0xefb   :  { %v1954_v56 = vsel %vm491_vm2, %v1948_v40, 0  ;;  %v481_v40 = vadd.f32 %v8105_v36, %v429_v12 }
 0xefc   :  { %v1976_v10 = vand.u32 4294901760, %v1954_v56 }
 0xefe   :  { %2022 = vmatmul.f32.vlgmr.msrb.gmra.mxu1 %v1976_v10  ;;  %v1977_v21 = vsub.f32 %v1954_v56, %v1976_v10 }
 0xeff   :  { %2311 = vmatpush.msrb.mxu1 %v8123_v28 }
 0xf00   :  { %2052 = vmatmul.f32.vlgmr.msra.gmra.mxu2 %v1977_v21  ;;  %v1978_v50 = vand.u32 4294901760, %v1977_v21 }
 0xf01   :  { %2313 = vmatpush.msrb.mxu1 %v8179_v49  ;;  %2340 = vmatpush.msra.mxu2 %v8131_v30 }
 0xf02   :  { %2079 = vmatmul.f32.vlgmr.msra.gmra.mxu3 %v1978_v50  ;;  %v1979_v8 = vsub.f32 %v1977_v21, %v1978_v50 }
 0xf03   :  { %2315 = vmatpush.msrb.mxu1 %v8187_v18  ;;  %2371 = vmatpush.msra.mxu3 %v8123_v28 }
 0xf04   :  { %v1980_v5 = vand.u32 4294901760, %v1979_v8  ;;  %2344 = vmatpush.msra.mxu2 %v8195_v11 }
 0xf05   :  { %2317 = vmatpush.msrb.mxu1 %v8201_v27  ;;  %2373 = vmatpush.msra.mxu3 %v8179_v49 }
 0xf06   :  { %1981 = vmatmul.f32.vlgmr.msrb.gmra.mxu0 %v1980_v5  ;;  %2137 = vmatmul.f32.vlgmr.msra.gmra.mxu1 %v1976_v10 }
 0xf07   :  { %2282 = vmatpush.msrb.mxu0 %v8126_v6  ;;  %2375 = vmatpush.msra.mxu3 %v8187_v18 }
 0xf08   :  { %2348 = vmatpush.msra.mxu2 %v8208_v31 }
 0xf09   :  { %2285 = vmatpush.msrb.mxu0 %v8185_v14  ;;  %2377 = vmatpush.msra.mxu3 %v8201_v27 }
 0xf0a   :  { %2352 = vmatpush.msra.mxu2 %v8222_v52 }
 0xf0b   :  { %2288 = vmatpush.msrb.mxu0 %v8198_v55 }
 0xf0d   :  { %2291 = vmatpush.msrb.mxu0 %v8211_v29 }
 0xf0e   :  { %2112 = vmatmul.f32.vlgmr.msra.gmra.mxu0 %v1976_v10 }
 0xf7b   :  { %v2023_v28 = vpop.f32.mrf.mxu1 }
 0xf83   :  { %v1982_v30 = vpop.f32.mrf.mxu0  ;;  %v2053_v11 = vpop.f32.mrf.mxu2 }
 0xf84   :  { %v2024_v49 = vadd.f32 %v2023_v28, %v1982_v30  ;;  %v2138_v26 = vpop.f32.mrf.mxu1 }
 0xf85   :  { %v2080_v19 = vpop.f32.mrf.mxu3 }
 0xf86   :  { %v2054_v6 = vadd.f32 %v2053_v11, %v2024_v49 }
 0xf88   :  { %v2081_v18 = vadd.f32 %v2080_v19, %v2054_v6 }
 0xf8b   :  { %v2113_v25 = vpop.f32.mrf.mxu0 }
 0xf8c   :  { %v2114_v31 = vadd.f32 %v2113_v25, %v2081_v18 }
 0xf8e   :  { %v2139_v14 = vadd.f32 %v2138_v26, %v2114_v31 }
 0xf90   :  { %v2141_v27 = vadd.f32 %v2139_v14, %v8047_v13 }
 0xf92   :  { %7603 = vtanh.f32 %v2141_v27  ;;  %v7494_v55 = vmul.f32 -1.442695, %v2141_v27 }
 0xf94   :  { %7605 = vpow2.f32 %v7494_v55 }
 0xf98   :  { %v7604_v52 = vpop.eup %7603 }
 0xf99   :  { %2164 = vrot.lane.b32.xlu0 %v7604_v52, %s7709_s1 }
 0xf9a   :  { %v7606_v29 = vpop.eup %7605 }
 0xf9b   :  { %v2145_v20 = vadd.f32 1.0, %v7606_v29 }
 0xf9d   :  { %7607 = vrcp.f32 %v2145_v20  ;;  %v2157_v42 = vand.u32 2147483648, %v2145_v20  ;;  %vm2151_vm1 = vweird.f32 %v2145_v20  ;;  %v2155_v37 = vand.u32 2147483647, %v2145_v20 }
 0xf9f   :  { %v2158_v61 = vor.u32 1.1754944e-38, %v2157_v42  ;;  %vm2156_vm4 = vcmp.eq.f32.partialorder %v2155_v37, 8.507059e+37 }
 0xfa3   :  { %v7608_v23 = vpop.eup %7607 }
 0xfa4   :  { %v2147_v32 = vmul.f32 %v7608_v23, %v2145_v20  ;;  %vm2152_vm0 = vweird.f32 %v7608_v23 }
 0xfa5   :  { %vm2153_vm3 = vmor %vm2151_vm1, %vm2152_vm0 }
 0xfa6   :  { %v2148_v39 = vsub.f32 1.0, %v2147_v32  ;;  %v2473_v32 = vlaneseq }
 0xfa8   :  { %v2149_v47 = vmul.f32 %v7608_v23, %v2148_v39  ;;  %v2494_v39 = vld [vmem:[%s10858_s8 + $0x78] sm:$0xff] }
 0xfa9   :  { %v8378_v42 = vand.u32 4294901760, %v2494_v39 }
 0xfaa   :  { %v2150_v41 = vadd.f32 %v7608_v23, %v2149_v47  ;;  %v2493_v47 = vld [vmem:[%s10858_s8 + $0x70] sm:$0xff] }
 0xfab   :  { %v8380_v37 = vand.u32 4294901760, %v2493_v47  ;;  %2503 = vmatpush.msra.mxu0 %v8378_v42 }
 0xfac   :  { %v2154_v13 = vsel %vm2153_vm3, %v7608_v23, %v2150_v41  ;;  %v2492_v41 = vld [vmem:[%s10858_s8 + $0x68] sm:$0xff] }
 0xfad   :  { %v2159_v60 = vsel %vm2156_vm4, %v2158_v61, %v2154_v13  ;;  %v8382_v13 = vand.u32 4294901760, %v2492_v41  ;;  %v2491_v61 = vld [vmem:[%s10858_s8 + $0x60] sm:$0xff]  ;;  %2505 = vmatpush.msra.mxu0 %v8380_v37 }
 0xfae   :  { %v2162_v16 = vmul.f32 %v2159_v60, %v8317_v54 }
 0xfaf   :  { %2507 = vmatpush.msra.mxu0 %v8382_v13 }
0x100b   :  { %v2165_v58 = vpop.permute.xlu0 %2164 }
0x100c   :  { %v2167_v62 = vmul.f32 %v2165_v58, %v2159_v60  ;;  %v2490_v58 = vld [vmem:[%s10858_s8 + $0x58] sm:$0xff] }
0x100e   :  { %2169 = vrot.lane.b32.xlu1 %v2167_v62, %s7710_s16 }
0x1080   :  { %v2170_v9 = vpop.permute.xlu1 %2169 }
0x1081   :  { %v8346_v59 = vadd.f32 %v2170_v9, %v2162_v16  ;;  %v8393_v16 = vand.u32 127, %v2473_v32  ;;  %v8395_v9 = vand.u32 4294901760, %v2491_v61 }
0x1083   :  { %7609 = vtanh.f32 %v8346_v59  ;;  %2509 = vmatpush.msra.mxu0 %v8395_v9 }
0x1089   :  { %v7610_v38 = vpop.eup %7609 }
0x108a   :  { %2175 = vrot.lane.b32.xlu2 %v7610_v38, %s7711_s17 }
0x10e4   :  { %v2176_v63 = vpop.permute.xlu2 %2175 }
0x10e5   :  { %v2178_v1 = vmul.f32 %v2176_v63, %v2159_v60  ;;  %v2489_v60 = vld [vmem:[%s10858_s8 + $0x50] sm:$0xff]  ;;  %v2488_v63 = vld [vmem:[%s10858_s8 + $0x48] sm:$0xff] }
0x10e6   :  { %v8399_v38 = vand.u32 4294901760, %v2489_v60 }
0x10e7   :  { %2184 = vrot.lane.b32.xlu1 %v2178_v1, %s7709_s1  ;;  %2180 = vrot.lane.b32.xlu0 %v2178_v1, %s7712_s2  ;;  %v2487_v1 = vld [vmem:[%s10858_s8 + $0x40] sm:$0xff] }
0x1159   :  { %v2185_v43 = vpop.permute.xlu1 %2184  ;;  %v2181_v44 = vpop.permute.xlu0 %2180 }
0x115a   :  { %2187 = vst.msk [vmem:[#allocation3] sm:$0xf0] %vm734_vm7, %v2185_v43  ;;  %v8410_v43 = vsub.f32 %v2494_v39, %v8378_v42 }
0x115b   :  { %2183 = vst.msk [vmem:[#allocation3] sm:$0xf] %vm729_vm8, %v2181_v44  ;;  %v8413_v44 = vsub.f32 %v2493_v47, %v8380_v37 }
0x1162   :  { %v2190_v2 = vld [vmem:[#allocation3] sm:$0xff] }
0x1163   :  { %v2196_v53 = vsel %vm491_vm2, %v2190_v2, 0  ;;  %v8416_v2 = vsub.f32 %v2492_v41, %v8382_v13 }
0x1164   :  { %v2218_v51 = vand.u32 4294901760, %v2196_v53 }
0x1166   :  { %2264 = vmatmul.f32.vlgmr.msrb.gmra.mxu3 %v2218_v51  ;;  %v2219_v48 = vsub.f32 %v2196_v53, %v2218_v51  ;;  %v8418_v53 = vand.u32 4294901760, %v2488_v63 }
0x1167   :  { %2699 = vmatpush.msrb.mxu3 %v8378_v42 }
0x1168   :  { %2294 = vmatmul.f32.vlgmr.msrb.gmra.mxu0 %v2219_v48  ;;  %v2220_v0 = vand.u32 4294901760, %v2219_v48 }
0x1169   :  { %2701 = vmatpush.msrb.mxu3 %v8380_v37 }
0x116a   :  { %2321 = vmatmul.f32.vlgmr.msrb.gmra.mxu1 %v2220_v0  ;;  %v2221_v15 = vsub.f32 %v2219_v48, %v2220_v0  ;;  %v8428_v0 = vsub.f32 %v2489_v60, %v8399_v38  ;;  %v2470_v60 = vld [vmem:[%s10857_s7] sm:$0x3] }
0x116b   :  { %2703 = vmatpush.msrb.mxu3 %v8382_v13 }
0x116c   :  { %v2222_v3 = vand.u32 4294901760, %v2221_v15  ;;  %v2486_v15 = vld [vmem:[%s10858_s8 + $0x38] sm:$0xff] }
0x116d   :  { %2705 = vmatpush.msrb.mxu3 %v8395_v9 }
0x116e   :  { %2223 = vmatmul.f32.vlgmr.msrb.gmra.mxu2 %v2222_v3  ;;  %2379 = vmatmul.f32.vlgmr.msra.gmra.mxu3 %v2218_v51  ;;  %v2545_v3 = vand.u32 4294901760, %v8410_v43 }
0x116f   :  { %2646 = vmatpush.msrb.mxu2 %v8410_v43 }
0x1171   :  { %2649 = vmatpush.msrb.mxu2 %v8413_v44 }
0x1173   :  { %2652 = vmatpush.msrb.mxu2 %v8416_v2 }
0x1176   :  { %2354 = vmatmul.f32.vlgmr.msra.gmra.mxu2 %v2218_v51  ;;  %v8422_v51 = vsub.f32 %v2491_v61, %v8395_v9 }
0x1178   :  { %2655 = vmatpush.msrb.mxu2 %v8422_v51 }
0x11e5   :  { %v2295_v4 = vpop.f32.mrf.mxu0 }
0x11e7   :  { %v2322_v54 = vpop.f32.mrf.mxu1 }
0x11e9   :  { %v2265_v17 = vpop.f32.mrf.mxu3 }
0x11f1   :  { %v2224_v7 = vpop.f32.mrf.mxu2  ;;  %v2380_v35 = vpop.f32.mrf.mxu3 }
0x11f2   :  { %v2266_v24 = vadd.f32 %v2265_v17, %v2224_v7  ;;  %v2551_v17 = vand.u32 4294901760, %v8413_v44  ;;  %v2557_v7 = vand.u32 4294901760, %v8416_v2 }
0x11f4   :  { %v2296_v33 = vadd.f32 %v2295_v4, %v2266_v24  ;;  %v8438_v24 = vand.u32 4294901760, %v2487_v1  ;;  %v2563_v4 = vand.u32 4294901760, %v8422_v51  ;;  %v2558_v12 = vsub.f32 %v8416_v2, %v2557_v7 }
0x11f6   :  { %v2323_v45 = vadd.f32 %v2322_v54, %v2296_v33  ;;  %v8444_v54 = vsub.f32 %v2488_v63, %v8418_v53 }
0x11f9   :  { %v2355_v57 = vpop.f32.mrf.mxu2 }
0x11fa   :  { %v2356_v22 = vadd.f32 %v2355_v57, %v2323_v45  ;;  %v2546_v45 = vsub.f32 %v8410_v43, %v2545_v3  ;;  %v2552_v57 = vsub.f32 %v8413_v44, %v2551_v17  ;;  %v2498_v44 = vld [vmem:[%s10858_s8 + $0x98] sm:$0xff] }
0x11fb   :  { %v8643_v2 = vand.u32 4294901760, %v2498_v44 }
0x11fc   :  { %v2381_v56 = vadd.f32 %v2380_v35, %v2356_v22  ;;  %v8457_v22 = vand.u32 4294901760, %v2486_v15  ;;  %v2564_v35 = vsub.f32 %v8422_v51, %v2563_v4  ;;  %v2497_v51 = vld [vmem:[%s10858_s8 + $0x90] sm:$0xff] }
0x11fe   :  { %v2383_v10 = vadd.f32 %v2381_v56, %v481_v40  ;;  %v2575_v40 = vand.u32 4294901760, %v8428_v0  ;;  %v2485_v56 = vld [vmem:[%s10858_s8 + $0x30] sm:$0xff] }
0x1200   :  { %7611 = vtanh.f32 %v2383_v10  ;;  %v7495_v50 = vmul.f32 -1.442695, %v2383_v10  ;;  %v2484_v10 = vld [vmem:[%s10858_s8 + $0x28] sm:$0xff] }
0x1202   :  { %7613 = vpow2.f32 %v7495_v50  ;;  %v2553_v50 = vand.u32 4294901760, %v2552_v57 }
0x1206   :  { %v7612_v21 = vpop.eup %7611 }
0x1207   :  { %2406 = vrot.lane.b32.xlu2 %v7612_v21, %s7709_s1  ;;  %v2547_v21 = vand.u32 4294901760, %v2546_v45 }
0x1208   :  { %v7614_v8 = vpop.eup %7613 }
0x1209   :  { %v2387_v5 = vadd.f32 1.0, %v7614_v8  ;;  %v8473_v8 = vsub.f32 %v2487_v1, %v8438_v24  ;;  %2548 = vmatpush.msra.mxu1 %v2547_v21 }
0x120b   :  { %7615 = vrcp.f32 %v2387_v5  ;;  %v2399_v34 = vand.u32 2147483648, %v2387_v5  ;;  %vm2393_vm6 = vweird.f32 %v2387_v5  ;;  %v2397_v36 = vand.u32 2147483647, %v2387_v5  ;;  %2554 = vmatpush.msra.mxu1 %v2553_v50 }
0x120d   :  { %v2400_v19 = vor.u32 1.1754944e-38, %v2399_v34  ;;  %vm2398_vm10 = vcmp.eq.f32.partialorder %v2397_v36, 8.507059e+37  ;;  %v8486_v34 = vand.u32 4294901760, %v2485_v56  ;;  %v8489_v36 = vsub.f32 %v2486_v15, %v8457_v22 }
0x1211   :  { %v7616_v28 = vpop.eup %7615 }
0x1212   :  { %v2389_v30 = vmul.f32 %v7616_v28, %v2387_v5  ;;  %vm2394_vm5 = vweird.f32 %v7616_v28 }
0x1213   :  { %vm2395_vm9 = vmor %vm2393_vm6, %vm2394_vm5 }
0x1214   :  { %v2390_v49 = vsub.f32 1.0, %v2389_v30 }
0x1216   :  { %v2391_v11 = vmul.f32 %v7616_v28, %v2390_v49  ;;  %v2581_v49 = vand.u32 4294901760, %v8444_v54 }
0x1218   :  { %v2392_v46 = vadd.f32 %v7616_v28, %v2391_v11  ;;  %v2483_v11 = vld [vmem:[%s10858_s8 + $0x20] sm:$0xff] }
0x121a   :  { %v2396_v6 = vsel %vm2395_vm9, %v7616_v28, %v2392_v46  ;;  %v2559_v46 = vand.u32 4294901760, %v2558_v12 }
0x121b   :  { %v2401_v25 = vsel %vm2398_vm10, %v2400_v19, %v2396_v6  ;;  %v8491_v6 = vand.u32 4294901760, %v2484_v10  ;;  %v2565_v19 = vand.u32 4294901760, %v2564_v35 }
0x121c   :  { %v2404_v26 = vmul.f32 %v2401_v25, %v8346_v59  ;;  %v8397_v59 = vand.u32 4294901760, %v2490_v58  ;;  %2560 = vmatpush.msra.mxu1 %v2559_v46 }
0x121d   :  { %v8522_v32 = vsub.f32 %v2484_v10, %v8491_v6 }
0x121e   :  { %v8425_v48 = vsub.f32 %v2490_v58, %v8397_v59  ;;  %2511 = vmatpush.msra.mxu0 %v8397_v59  ;;  %2707 = vmatpush.msrb.mxu3 %v8397_v59 }
0x121f   :  { %2566 = vmatpush.msra.mxu1 %v2565_v19  ;;  %v2605_v1 = vand.u32 4294901760, %v8522_v32 }
0x1220   :  { %v2569_v33 = vand.u32 4294901760, %v8425_v48  ;;  %2513 = vmatpush.msra.mxu0 %v8399_v38  ;;  %2709 = vmatpush.msrb.mxu3 %v8399_v38 }
0x1221   :  { %2658 = vmatpush.msrb.mxu2 %v8425_v48  ;;  %v2606_v50 = vsub.f32 %v8522_v32, %v2605_v1 }
0x1222   :  { %v2570_v30 = vsub.f32 %v8425_v48, %v2569_v33  ;;  %2515 = vmatpush.msra.mxu0 %v8418_v53  ;;  %2711 = vmatpush.msrb.mxu3 %v8418_v53  ;;  %v8657_v48 = vand.u32 4294901760, %v2497_v51 }
0x1223   :  { %2661 = vmatpush.msrb.mxu2 %v8428_v0  ;;  %v2607_v46 = vand.u32 4294901760, %v2606_v50 }
0x1224   :  { %2517 = vmatpush.msra.mxu0 %v8438_v24  ;;  %2713 = vmatpush.msrb.mxu3 %v8438_v24 }
0x1225   :  { %2664 = vmatpush.msrb.mxu2 %v8444_v54 }
0x1226   :  { %2519 = vmatpush.msra.mxu0 %v8457_v22  ;;  %2715 = vmatpush.msrb.mxu3 %v8457_v22 }
0x1227   :  { %2667 = vmatpush.msrb.mxu2 %v8473_v8 }
0x1228   :  { %2521 = vmatpush.msra.mxu0 %v8486_v34  ;;  %2717 = vmatpush.msrb.mxu3 %v8486_v34 }
0x1229   :  { %2670 = vmatpush.msrb.mxu2 %v8489_v36 }
0x122a   :  { %2523 = vmatpush.msra.mxu0 %v8491_v6  ;;  %2719 = vmatpush.msrb.mxu3 %v8491_v6 }
0x1261   :  { %v2407_v18 = vpop.permute.xlu2 %2406 }
0x1262   :  { %v2409_v31 = vmul.f32 %v2407_v18, %v2401_v25  ;;  %v2576_v18 = vsub.f32 %v8428_v0, %v2575_v40 }
0x1264   :  { %2411 = vrot.lane.b32.xlu0 %v2409_v31, %s7710_s16  ;;  %v2587_v31 = vand.u32 4294901760, %v8473_v8  ;;  %v2577_v39 = vand.u32 4294901760, %v2576_v18  ;;  %v2480_v18 = vld [vmem:[%s10858_s8 + $0x8] sm:$0xff] }
0x1266   :  { %v2588_v47 = vsub.f32 %v8473_v8, %v2587_v31 }
0x1268   :  { %v2589_v57 = vand.u32 4294901760, %v2588_v47  ;;  %v2479_v47 = vld [vmem:[%s10858_s8] sm:$0xff] }
0x12d6   :  { %v2412_v14 = vpop.permute.xlu0 %2411 }
0x12d7   :  { %v8361_v27 = vadd.f32 %v2412_v14, %v2404_v26  ;;  %v8506_v26 = vsub.f32 %v2485_v56, %v8486_v34  ;;  %v8508_v14 = vand.u32 4294901760, %v2483_v11 }
0x12d9   :  { %7617 = vtanh.f32 %v8361_v27  ;;  %v2599_v41 = vand.u32 4294901760, %v8506_v26  ;;  %v8535_v61 = vsub.f32 %v2483_v11, %v8508_v14  ;;  %2525 = vmatpush.msra.mxu0 %v8508_v14  ;;  %2721 = vmatpush.msrb.mxu3 %v8508_v14 }
0x12da   :  { %2673 = vmatpush.msrb.mxu2 %v8506_v26 }
0x12db   :  { %v2600_v12 = vsub.f32 %v8506_v26, %v2599_v41  ;;  %v2611_v35 = vand.u32 4294901760, %v8535_v61 }
0x12dc   :  { %2676 = vmatpush.msrb.mxu2 %v8522_v32 }
0x12de   :  { %2679 = vmatpush.msrb.mxu2 %v8535_v61 }
0x12df   :  { %v7618_v52 = vpop.eup %7617 }
0x12e0   :  { %2417 = vrot.lane.b32.xlu1 %v7618_v52, %s7711_s17 }
0x1352   :  { %v2418_v55 = vpop.permute.xlu1 %2417 }
0x1353   :  { %v2420_v29 = vmul.f32 %v2418_v55, %v2401_v25  ;;  %v2482_v25 = vld [vmem:[%s10858_s8 + $0x18] sm:$0xff]  ;;  %v2571_v55 = vand.u32 4294901760, %v2570_v30  ;;  %v2612_v30 = vsub.f32 %v8535_v61, %v2611_v35 }
0x1355   :  { %2422 = vrot.lane.b32.xlu0 %v2420_v29, %s7712_s2  ;;  %2426 = vrot.lane.b32.xlu2 %v2420_v29, %s7709_s1  ;;  %v2481_v29 = vld [vmem:[%s10858_s8 + $0x10] sm:$0xff] }
0x1356   :  { %v8537_v58 = vand.u32 4294901760, %v2481_v29  ;;  %2572 = vmatpush.msra.mxu1 %v2571_v55  ;;  %v8594_v55 = vand.u32 4294901760, %v2480_v18 }
0x1358   :  { %2578 = vmatpush.msra.mxu1 %v2577_v39  ;;  %v8560_v56 = vsub.f32 %v2481_v29, %v8537_v58 }
0x135a   :  { %v2623_v11 = vand.u32 4294901760, %v8560_v56 }
0x135d   :  { %2431 = vrot.lane.b32.xlu0 %v8361_v27, %s7713_s3 }
0x13af   :  { %v2427_v20 = vpop.permute.xlu2 %2426 }
0x13b0   :  { %2429 = vst.msk [vmem:[#allocation3] sm:$0xf0] %vm734_vm7, %v2427_v20  ;;  %vm2475_vm7 = vcmp.lt.s32.totalorder %v8393_v16, 16  ;;  %v2582_v20 = vsub.f32 %v8444_v54, %v2581_v49 }
0x13b7   :  { %v2455_v23 = vld [vmem:[#allocation3 + $0x4] sm:$0x1] }
0x13b8   :  { %2457 = vrot.lane.b32.xlu1 %v2455_v23, %s7713_s3  ;;  %v2593_v23 = vand.u32 4294901760, %v8489_v36 }
0x13ba   :  { %v2594_v63 = vsub.f32 %v8489_v36, %v2593_v23 }
0x13bc   :  { %v2595_v21 = vand.u32 4294901760, %v2594_v63 }
0x13c7   :  { %v2423_v62 = vpop.permute.xlu0 %2422 }
0x13c8   :  { %2425 = vst.msk [vmem:[#allocation3] sm:$0xf] %vm729_vm8, %v2423_v62  ;;  %vm2434_vm8 = vcmask 122880   ;;  %v2583_v62 = vand.u32 4294901760, %v2582_v20 }
0x13ca   :  { %2584 = vmatpush.msra.mxu1 %v2583_v62  ;;  %v8609_v62 = vsub.f32 %v2480_v18, %v8594_v55 }
0x13cc   :  { %2590 = vmatpush.msra.mxu1 %v2589_v57  ;;  %v2629_v63 = vand.u32 4294901760, %v8609_v62 }
0x13ce   :  { %2596 = vmatpush.msra.mxu1 %v2595_v21  ;;  %v2630_v57 = vsub.f32 %v8609_v62, %v2629_v63 }
0x13cf   :  { %v2432_v5 = vpop.permute.xlu0 %2431  ;;  %v2448_v28 = vld [vmem:[#allocation3 + $0x1] sm:$0x1]  ;;  %v2446_v52 = vld [vmem:[#allocation3] sm:$0x1] }
0x13d0   :  { %2435 = vst.msk [vmem:[#allocation9] sm:$0x1] %vm2434_vm8, %v2432_v5  ;;  %2450 = vrot.lane.b32.xlu2 %v2448_v28, %s7710_s16  ;;  %v2601_v28 = vand.u32 4294901760, %v2600_v12 }
0x13d1   :  { %2437 = vst.msk [vmem:[#allocation9 - $0x1] sm:$0x2] %vm2436_vm11, %v8361_v27 }
0x13d2   :  { %2439 = vst.msk [vmem:[#allocation9 - $0x3] sm:$0x10] %vm2438_vm12, %v2432_v5  ;;  %2602 = vmatpush.msra.mxu1 %v2601_v28 }
0x13d3   :  { %2441 = vst.msk [vmem:[#allocation9 - $0x4] sm:$0x20] %vm2440_vm13, %v8361_v27  ;;  %v8524_v27 = vand.u32 4294901760, %v2482_v25 }
0x13d4   :  { %2447 = vst.msk [vmem:[#allocation4 + $0x8] sm:$0x1] %vm2434_vm8, %v2446_v52  ;;  %v2624_v52 = vsub.f32 %v8560_v56, %v2623_v11  ;;  %2608 = vmatpush.msra.mxu1 %v2607_v46 }
0x13d5   :  { %v8550_v15 = vsub.f32 %v2482_v25, %v8524_v27  ;;  %2527 = vmatpush.msra.mxu0 %v8524_v27  ;;  %2723 = vmatpush.msrb.mxu3 %v8524_v27  ;;  %v2613_v25 = vand.u32 4294901760, %v2612_v30 }
0x13d6   :  { %v2625_v39 = vand.u32 4294901760, %v2624_v52 }
0x13d7   :  { %v2617_v5 = vand.u32 4294901760, %v8550_v15  ;;  %2529 = vmatpush.msra.mxu0 %v8537_v58  ;;  %2725 = vmatpush.msrb.mxu3 %v8537_v58 }
0x13d8   :  { %2614 = vmatpush.msra.mxu1 %v2613_v25  ;;  %2682 = vmatpush.msrb.mxu2 %v8550_v15 }
0x13d9   :  { %v2618_v19 = vsub.f32 %v8550_v15, %v2617_v5  ;;  %2531 = vmatpush.msra.mxu0 %v8594_v55  ;;  %2727 = vmatpush.msrb.mxu3 %v8594_v55 }
0x13da   :  { %v2469_v45 = vld [vmem:[#allocation9] sm:$0x3]  ;;  %2685 = vmatpush.msrb.mxu2 %v8560_v56 }
0x13db   :  { %v2471_v10 = vadd.f32 %v2470_v60, %v2469_v45  ;;  %v2619_v20 = vand.u32 4294901760, %v2618_v19  ;;  %v8606_v60 = vand.u32 4294901760, %v2479_v47 }
0x13dc   :  { %2688 = vmatpush.msrb.mxu2 %v8609_v62 }
0x13dd   :  { %2472 = vst.msk [vmem:[#allocation5] sm:$0x3] %vm2466_vm14, %v2471_v10  ;;  %2620 = vmatpush.msra.mxu1 %v2619_v20  ;;  %2533 = vmatpush.msra.mxu0 %v8606_v60  ;;  %v8614_v45 = vsub.f32 %v2479_v47, %v8606_v60  ;;  %v2631_v10 = vand.u32 4294901760, %v2630_v57 }
0x13de   :  { %2729 = vmatpush.msrb.mxu3 %v8606_v60 }
0x13df   :  { %2626 = vmatpush.msra.mxu1 %v2625_v39  ;;  %2740 = vmatpush.msrb.mxu0 %v2545_v3  ;;  %v2635_v12 = vand.u32 4294901760, %v8614_v45  ;;  %v2496_v3 = vld [vmem:[%s10858_s8 + $0x88] sm:$0xff] }
0x13e0   :  { %2691 = vmatpush.msrb.mxu2 %v8614_v45 }
0x13e1   :  { %2744 = vmatpush.msrb.mxu0 %v2551_v17  ;;  %v2636_v21 = vsub.f32 %v8614_v45, %v2635_v12  ;;  %2632 = vmatpush.msra.mxu1 %v2631_v10  ;;  %v8670_v17 = vsub.f32 %v2497_v51, %v8657_v48 }
0x13e2   :  { %2856 = vmatpush.msra.mxu2 %v8643_v2 }
0x13e3   :  { %2748 = vmatpush.msrb.mxu0 %v2557_v7  ;;  %v2637_v43 = vand.u32 4294901760, %v2636_v21  ;;  %v8672_v7 = vand.u32 4294901760, %v2496_v3  ;;  %v2892_v54 = vand.u32 4294901760, %v8670_v17 }
0x13e4   :  { %v3048_v29 = vld [vmem:[#allocation5] sm:$0xff]  ;;  %2858 = vmatpush.msra.mxu2 %v8657_v48 }
0x13e5   :  { %3050 = vrot.lane.b32.xlu2 %v3048_v29, %s7711_s17  ;;  %2752 = vmatpush.msrb.mxu0 %v2563_v4 }
0x13e6   :  { %2638 = vmatpush.msra.mxu1 %v2637_v43  ;;  %2860 = vmatpush.msra.mxu2 %v8672_v7 }
0x13e7   :  { %2756 = vmatpush.msrb.mxu0 %v2569_v33  ;;  %v2495_v33 = vld [vmem:[%s10858_s8 + $0x80] sm:$0xff] }
0x13e8   :  { %2807 = vmatpush.msrb.mxu1 %v8378_v42  ;;  %v2444_v42 = vld [vmem:[%s10854_s4] sm:$0xff]  ;;  %v8690_v8 = vand.u32 4294901760, %v2495_v33 }
0x13e9   :  { %2760 = vmatpush.msrb.mxu0 %v2575_v40  ;;  %2445 = vst [vmem:[#allocation4] sm:$0xff] %v2444_v42  ;;  %v8659_v0 = vand.u32 4294901760, %v2444_v42  ;;  %v8688_v40 = vsub.f32 %v2496_v3, %v8672_v7 }
0x13ea   :  { %2809 = vmatpush.msrb.mxu1 %v8380_v37  ;;  %v8655_v37 = vsub.f32 %v2498_v44, %v8643_v2  ;;  %2862 = vmatpush.msra.mxu2 %v8690_v8 }
0x13eb   :  { %2764 = vmatpush.msrb.mxu0 %v2581_v49  ;;  %v2535_v4 = vsub.f32 %v2444_v42, %v8659_v0  ;;  %2640 = vmatmul.f32.vlgmr.msra.gmra.mxu1 %v8659_v0  ;;  %v2898_v36 = vand.u32 4294901760, %v8688_v40 }
0x13ec   :  { %2811 = vmatpush.msrb.mxu1 %v8382_v13  ;;  %v2886_v13 = vand.u32 4294901760, %v8655_v37 }
0x13ed   :  { %2768 = vmatpush.msrb.mxu0 %v2587_v31  ;;  %v2536_v49 = vand.u32 4294901760, %v2535_v4  ;;  %2694 = vmatmul.f32.vlgmr.msrb.gmra.mxu2 %v2535_v4  ;;  %v2899_v50 = vsub.f32 %v8688_v40, %v2898_v36 }
0x13ee   :  { %2813 = vmatpush.msrb.mxu1 %v8395_v9  ;;  %v2887_v9 = vsub.f32 %v8655_v37, %v2886_v13  ;;  %2927 = vmatpush.msrb.mxu2 %v8655_v37 }
0x13ef   :  { %2772 = vmatpush.msrb.mxu0 %v2593_v23  ;;  %v8700_v23 = vsub.f32 %v2495_v33, %v8690_v8  ;;  %2733 = vmatmul.f32.vlgmr.msrb.gmra.mxu3 %v2536_v49  ;;  %v2900_v26 = vand.u32 4294901760, %v2899_v50 }
0x13f0   :  { %2815 = vmatpush.msrb.mxu1 %v8397_v59  ;;  %v2888_v31 = vand.u32 4294901760, %v2887_v9  ;;  %v2893_v59 = vsub.f32 %v8670_v17, %v2892_v54  ;;  %2930 = vmatpush.msrb.mxu2 %v8670_v17 }
0x13f1   :  { %2776 = vmatpush.msrb.mxu0 %v2599_v41  ;;  %v2904_v28 = vand.u32 4294901760, %v8700_v23  ;;  %v2537_v41 = vsub.f32 %v2535_v4, %v2536_v49 }
0x13f2   :  { %2817 = vmatpush.msrb.mxu1 %v8399_v38  ;;  %2889 = vmatpush.msra.mxu3 %v2888_v31  ;;  %v2894_v38 = vand.u32 4294901760, %v2893_v59 }
0x13f3   :  { %2780 = vmatpush.msrb.mxu0 %v2605_v1  ;;  %2933 = vmatpush.msrb.mxu2 %v8688_v40 }
0x13f4   :  { %2819 = vmatpush.msrb.mxu1 %v8418_v53  ;;  %2895 = vmatpush.msra.mxu3 %v2894_v38  ;;  %v2905_v53 = vsub.f32 %v8700_v23, %v2904_v28 }
0x13f5   :  { %2784 = vmatpush.msrb.mxu0 %v2611_v35  ;;  %2936 = vmatpush.msrb.mxu2 %v8700_v23 }
0x13f6   :  { %2821 = vmatpush.msrb.mxu1 %v8438_v24  ;;  %2901 = vmatpush.msra.mxu3 %v2900_v26  ;;  %v2906_v32 = vand.u32 4294901760, %v2905_v53  ;;  %v2538_v24 = vand.u32 4294901760, %v2537_v41  ;;  %v3082_v26 = vld [vmem:[%s10859_s9 + $0x10] sm:$0xff] }
0x13f7   :  { %2788 = vmatpush.msrb.mxu0 %v2617_v5 }
0x13f8   :  { %2823 = vmatpush.msrb.mxu1 %v8457_v22  ;;  %2907 = vmatpush.msra.mxu3 %v2906_v32  ;;  %v3100_v32 = vand.u32 4294901760, %v3082_v26 }
0x13f9   :  { %2792 = vmatpush.msrb.mxu0 %v2623_v11 }
0x13fa   :  { %2825 = vmatpush.msrb.mxu1 %v8486_v34  ;;  %2956 = vmatpush.msrb.mxu3 %v8643_v2 }
0x13fb   :  { %2539 = vmatmul.f32.vlgmr.msra.gmra.mxu0 %v2538_v24  ;;  %v3134_v24 = vsub.f32 %v3082_v26, %v3100_v32 }
0x13fc   :  { %2827 = vmatpush.msrb.mxu1 %v8491_v6  ;;  %2958 = vmatpush.msrb.mxu3 %v8657_v48  ;;  %v2461_v6 = vld [vmem:[#allocation3 + $0x5] sm:$0x1] }
0x13fd   :  { %2796 = vmatpush.msrb.mxu0 %v2629_v63 }
0x13fe   :  { %2829 = vmatpush.msrb.mxu1 %v8508_v14  ;;  %2960 = vmatpush.msrb.mxu3 %v8672_v7  ;;  %v2464_v14 = vld [vmem:[%s10856_s6] sm:$0x3]  ;;  %s7714_s6 = smov 64  }
0x13ff   :  { %2800 = vmatpush.msrb.mxu0 %v2635_v12 }
0x1400   :  { %2831 = vmatpush.msrb.mxu1 %v8524_v27  ;;  %2962 = vmatpush.msrb.mxu3 %v8690_v8 }
0x1402   :  { %2833 = vmatpush.msrb.mxu1 %v8537_v58 }
0x1403   :  { %2802 = vmatmul.f32.vlgmr.msrb.gmra.mxu0 %v8659_v0 }
0x1404   :  { %2835 = vmatpush.msrb.mxu1 %v8594_v55 }
0x1406   :  { %2837 = vmatpush.msrb.mxu1 %v8606_v60 }
0x1407   :  { %2839 = vmatmul.f32.vlgmr.msrb.gmra.mxu1 %v8659_v0 }
0x142a   :  { %v2458_v22 = vpop.permute.xlu1 %2457  ;;  %v2451_v34 = vpop.permute.xlu2 %2450 }
0x142b   :  { %2460 = vst.msk [vmem:[#allocation4 + $0x9] sm:$0x1] %vm2434_vm8, %v2458_v22 }
0x142c   :  { %2462 = vst.msk [vmem:[#allocation4 + $0x9] sm:$0x1] %vm2453_vm15, %v2461_v6 }
0x142d   :  { %2454 = vst.msk [vmem:[#allocation4 + $0x8] sm:$0x1] %vm2453_vm15, %v2451_v34  ;;  %v3135_v34 = vand.u32 4294901760, %v3134_v24 }
0x1434   :  { %v2463_v27 = vld [vmem:[#allocation4 + $0x8] sm:$0x3] }
0x1435   :  { %v2465_v61 = vadd.f32 %v2464_v14, %v2463_v27  ;;  %v3136_v14 = vsub.f32 %v3134_v24, %v3135_v34 }
0x1437   :  { %2467 = vst.msk [vmem:[#allocation4 + $0x8] sm:$0x3] %vm2466_vm14, %v2465_v61  ;;  %v3137_v61 = vand.u32 4294901760, %v3136_v14 }
0x143e   :  { %v2478_v1 = vld [vmem:[#allocation4 + $0x8] sm:$0xff] }
0x143f   :  { %v2500_v58 = vsel %vm491_vm2, %v2478_v1, 0  ;;  %v3051_v59 = vpop.permute.xlu2 %3050 }
0x1440   :  { %v2863_v15 = vand.u32 4294901760, %v2500_v58 }
0x1442   :  { %v2864_v35 = vsub.f32 %v2500_v58, %v2863_v15  ;;  %2909 = vmatmul.f32.vlgmr.msra.gmra.mxu3 %v2863_v15 }
0x1443   :  { %3016 = vmatpush.msra.mxu3 %v8643_v2 }
0x1444   :  { %v2865_v56 = vand.u32 4294901760, %v2864_v35 }
0x1445   :  { %3018 = vmatpush.msra.mxu3 %v8657_v48 }
0x1446   :  { %v2866_v5 = vsub.f32 %v2864_v35, %v2865_v56 }
0x1447   :  { %3020 = vmatpush.msra.mxu3 %v8672_v7 }
0x1448   :  { %v2867_v30 = vand.u32 4294901760, %v2866_v5  ;;  %v3080_v5 = vld [vmem:[%s10859_s9] sm:$0xff] }
0x1449   :  { %3022 = vmatpush.msra.mxu3 %v8690_v8 }
0x144a   :  { %2868 = vmatmul.f32.vlgmr.msra.gmra.mxu2 %v2867_v30  ;;  %2966 = vmatmul.f32.vlgmr.msrb.gmra.mxu3 %v2865_v56 }
0x144b   :  { %2985 = vmatpush.msra.mxu2 %v2886_v13 }
0x144d   :  { %2989 = vmatpush.msra.mxu2 %v2892_v54 }
0x144f   :  { %2993 = vmatpush.msra.mxu2 %v2898_v36 }
0x1451   :  { %2997 = vmatpush.msra.mxu2 %v2904_v28  ;;  %v3083_v28 = vld [vmem:[%s10859_s9 + $0x18] sm:$0xff] }
0x1452   :  { %2939 = vmatmul.f32.vlgmr.msrb.gmra.mxu2 %v2864_v35  ;;  %3024 = vmatmul.f32.vlgmr.msra.gmra.mxu3 %v2863_v15  ;;  %v3098_v53 = vand.u32 4294901760, %v3083_v28  ;;  %v3081_v35 = vld [vmem:[%s10859_s9 + $0x8] sm:$0xff] }
0x1453   :  { %v3102_v56 = vand.u32 4294901760, %v3081_v35 }
0x1454   :  { %v3128_v41 = vsub.f32 %v3083_v28, %v3098_v53  ;;  %3199 = vmatpush.msra.mxu1 %v3098_v53  ;;  %3099 = vmatpush.msrb.mxu2 %v3098_v53 }
0x1455   :  { %v3140_v30 = vsub.f32 %v3081_v35, %v3102_v56 }
0x1456   :  { %v3129_v22 = vand.u32 4294901760, %v3128_v41  ;;  %3170 = vmatpush.msra.mxu0 %v3128_v41  ;;  %3201 = vmatpush.msra.mxu1 %v3100_v32 }
0x1457   :  { %3101 = vmatpush.msrb.mxu2 %v3100_v32 }
0x1458   :  { %v3130_v6 = vsub.f32 %v3128_v41, %v3129_v22  ;;  %3173 = vmatpush.msra.mxu0 %v3134_v24  ;;  %3203 = vmatpush.msra.mxu1 %v3102_v56 }
0x1459   :  { %3103 = vmatpush.msrb.mxu2 %v3102_v56 }
0x145a   :  { %2999 = vmatmul.f32.vlgmr.msra.gmra.mxu2 %v2863_v15  ;;  %v3131_v27 = vand.u32 4294901760, %v3130_v6  ;;  %3176 = vmatpush.msra.mxu0 %v3140_v30 }
0x145c   :  { %3132 = vmatpush.msrb.mxu3 %v3131_v27 }
0x145e   :  { %3138 = vmatpush.msrb.mxu3 %v3137_v61 }
0x1468   :  { %v2641_v11 = vpop.f32.mrf.mxu1 }
0x1470   :  { %v2695_v18 = vpop.f32.mrf.mxu2 }
0x1472   :  { %v2734_v25 = vpop.f32.mrf.mxu3 }
0x1478   :  { %v2540_v46 = vpop.f32.mrf.mxu0 }
0x1479   :  { %v2642_v19 = vadd.f32 %v2641_v11, %v2540_v46  ;;  %v3104_v11 = vand.u32 4294901760, %v3080_v5  ;;  %v3141_v46 = vand.u32 4294901760, %v3140_v30 }
0x147b   :  { %v2696_v52 = vadd.f32 %v2695_v18, %v2642_v19  ;;  %v3146_v19 = vsub.f32 %v3080_v5, %v3104_v11  ;;  %3205 = vmatpush.msra.mxu1 %v3104_v11  ;;  %3105 = vmatpush.msrb.mxu2 %v3104_v11  ;;  %v3142_v18 = vsub.f32 %v3140_v30, %v3141_v46 }
0x147d   :  { %v2735_v55 = vadd.f32 %v2734_v25, %v2696_v52  ;;  %v3147_v25 = vand.u32 4294901760, %v3146_v19  ;;  %3179 = vmatpush.msra.mxu0 %v3146_v19  ;;  %3228 = vmatpush.msra.mxu2 %v3129_v22  ;;  %v3143_v52 = vand.u32 4294901760, %v3142_v18 }
0x147f   :  { %3232 = vmatpush.msra.mxu2 %v3135_v34  ;;  %3144 = vmatpush.msrb.mxu3 %v3143_v52 }
0x1480   :  { %v2803_v29 = vpop.f32.mrf.mxu0 }
0x1481   :  { %v2804_v20 = vadd.f32 %v2803_v29, %v2735_v55  ;;  %v3148_v55 = vsub.f32 %v3146_v19, %v3147_v25  ;;  %3236 = vmatpush.msra.mxu2 %v3141_v46 }
0x1483   :  { %v3149_v29 = vand.u32 4294901760, %v3148_v55  ;;  %3240 = vmatpush.msra.mxu2 %v3147_v25 }
0x1484   :  { %v2840_v47 = vpop.f32.mrf.mxu1 }
0x1485   :  { %v2841_v62 = vadd.f32 %v2840_v47, %v2804_v20  ;;  %3150 = vmatpush.msrb.mxu3 %v3149_v29 }
0x1487   :  { %3259 = vmatpush.msra.mxu3 %v3098_v53 }
0x1489   :  { %3261 = vmatpush.msra.mxu3 %v3100_v32 }
0x148b   :  { %3263 = vmatpush.msra.mxu3 %v3102_v56 }
0x148d   :  { %3265 = vmatpush.msra.mxu3 %v3104_v11 }
0x14c5   :  { %v2910_v39 = vpop.f32.mrf.mxu3 }
0x14cd   :  { %v2869_v60 = vpop.f32.mrf.mxu2  ;;  %v2967_v45 = vpop.f32.mrf.mxu3 }
0x14ce   :  { %v2870_v63 = vadd.f32 %v2869_v60, %v2841_v62 }
0x14d0   :  { %v2911_v12 = vadd.f32 %v2910_v39, %v2870_v63 }
0x14d5   :  { %v2940_v57 = vpop.f32.mrf.mxu2  ;;  %v3025_v2 = vpop.f32.mrf.mxu3 }
0x14d6   :  { %v2941_v10 = vadd.f32 %v2940_v57, %v2911_v12  ;;  %v8784_v57 = vld [vmem:[%s10860_s10] sm:$0xff] }
0x14d8   :  { %v2968_v21 = vadd.f32 %v2967_v45, %v2941_v10 }
0x14dd   :  { %v3000_v43 = vpop.f32.mrf.mxu2 }
0x14de   :  { %v3001_v44 = vadd.f32 %v3000_v43, %v2968_v21 }
0x14e0   :  { %v3026_v51 = vadd.f32 %v3025_v2, %v3001_v44 }
0x14e2   :  { %7619 = vtanh.f32 %v3026_v51  ;;  %v7496_v37 = vmul.f32 -1.442695, %v3026_v51 }
0x14e4   :  { %7621 = vpow2.f32 %v7496_v37 }
0x14e8   :  { %v7620_v42 = vpop.eup %7619 }
0x14e9   :  { %3055 = vrot.lane.b32.xlu1 %v7620_v42, %s7714_s6 }
0x14ea   :  { %v7622_v48 = vpop.eup %7621 }
0x14eb   :  { %v3031_v0 = vadd.f32 1.0, %v7622_v48 }
0x14ed   :  { %7623 = vrcp.f32 %v3031_v0  ;;  %v3043_v33 = vand.u32 2147483648, %v3031_v0  ;;  %vm3037_vm1 = vweird.f32 %v3031_v0  ;;  %v3041_v9 = vand.u32 2147483647, %v3031_v0 }
0x14ef   :  { %v3044_v40 = vor.u32 1.1754944e-38, %v3043_v33  ;;  %vm3042_vm4 = vcmp.eq.f32.partialorder %v3041_v9, 8.507059e+37 }
0x14f3   :  { %v7624_v3 = vpop.eup %7623 }
0x14f4   :  { %v3033_v13 = vmul.f32 %v7624_v3, %v3031_v0  ;;  %vm3038_vm0 = vweird.f32 %v7624_v3 }
0x14f5   :  { %vm3039_vm3 = vmor %vm3037_vm1, %vm3038_vm0 }
0x14f6   :  { %v3034_v17 = vsub.f32 1.0, %v3033_v13 }
0x14f8   :  { %v3035_v7 = vmul.f32 %v7624_v3, %v3034_v17 }
0x14fa   :  { %v3036_v4 = vadd.f32 %v7624_v3, %v3035_v7 }
0x14fc   :  { %v3040_v54 = vsel %vm3039_vm3, %v7624_v3, %v3036_v4 }
0x14fd   :  { %v3045_v49 = vsel %vm3042_vm4, %v3044_v40, %v3040_v54 }
0x14fe   :  { %v3053_v36 = vmul.f32 %v3051_v59, %v3045_v49 }
0x155b   :  { %v3056_v8 = vpop.permute.xlu1 %3055 }
0x155c   :  { %v3058_v31 = vmul.f32 %v3056_v8, %v3045_v49 }
0x155e   :  { %3060 = vrot.lane.b32.xlu0 %v3058_v31, %s7711_s17 }
0x15d0   :  { %v3061_v23 = vpop.permute.xlu0 %3060 }
0x15d1   :  { %v3063_v38 = vadd.f32 %v3061_v23, %v3053_v36 }
0x15d3   :  { %7625 = vtanh.f32 %v3063_v38  ;;  %3071 = vrot.lane.b32.xlu0 %v3063_v38, %s7709_s1 }
0x15d9   :  { %v7626_v50 = vpop.eup %7625 }
0x15da   :  { %3066 = vrot.lane.b32.xlu1 %v7626_v50, %s7714_s6 }
0x1645   :  { %v3072_v1 = vpop.permute.xlu0 %3071 }
0x1646   :  { %3074 = vst.msk [vmem:[#allocation5] sm:$0xff] %vm491_vm2, %v3072_v1 }
0x164c   :  { %v3067_v58 = vpop.permute.xlu1 %3066 }
0x164d   :  { %v3069_v15 = vmul.f32 %v3067_v58, %v3045_v49 }
0x164f   :  { %3076 = vrot.lane.b32.xlu2 %v3069_v15, %s7711_s17 }
0x16a9   :  { %v3077_v20 = vpop.permute.xlu2 %3076 }
0x16aa   :  { %3079 = vst.msk [vmem:[#allocation4 + $0x8] sm:$0xff] %vm491_vm2, %v3077_v20  ;;  %v3084_v39 = vsel %vm491_vm2, %v3077_v20, 0 }
0x16ab   :  { %v3106_v47 = vand.u32 4294901760, %v3084_v39 }
0x16ad   :  { %v3107_v60 = vsub.f32 %v3084_v39, %v3106_v47  ;;  %3152 = vmatmul.f32.vlgmr.msrb.gmra.mxu3 %v3106_v47 }
0x16af   :  { %v3108_v62 = vand.u32 4294901760, %v3107_v60  ;;  %3182 = vmatmul.f32.vlgmr.msra.gmra.mxu0 %v3107_v60 }
0x16b1   :  { %v3109_v63 = vsub.f32 %v3107_v60, %v3108_v62  ;;  %3209 = vmatmul.f32.vlgmr.msra.gmra.mxu1 %v3108_v62 }
0x16b3   :  { %v3110_v45 = vand.u32 4294901760, %v3109_v63 }
0x16b5   :  { %3111 = vmatmul.f32.vlgmr.msrb.gmra.mxu2 %v3110_v45  ;;  %3267 = vmatmul.f32.vlgmr.msra.gmra.mxu3 %v3106_v47 }
0x16bd   :  { %3242 = vmatmul.f32.vlgmr.msra.gmra.mxu2 %v3106_v47 }
0x172c   :  { %v3183_v44 = vpop.f32.mrf.mxu0 }
0x172e   :  { %v3210_v51 = vpop.f32.mrf.mxu1 }
0x1730   :  { %v3153_v12 = vpop.f32.mrf.mxu3 }
0x1738   :  { %v3112_v10 = vpop.f32.mrf.mxu2  ;;  %v3268_v0 = vpop.f32.mrf.mxu3 }
0x1739   :  { %v3113_v21 = vadd.f32 %v3112_v10, %v8784_v57 }
0x173b   :  { %v3154_v43 = vadd.f32 %v3153_v12, %v3113_v21 }
0x173d   :  { %v3184_v2 = vadd.f32 %v3183_v44, %v3154_v43 }
0x173f   :  { %v3211_v42 = vadd.f32 %v3210_v51, %v3184_v2 }
0x1740   :  { %v3243_v37 = vpop.f32.mrf.mxu2 }
0x1741   :  { %v3244_v48 = vadd.f32 %v3243_v37, %v3211_v42  ;;  %3276 = sbr.rel (%p7497_p0) target bundleno = 5960 (0x1748), region = 53 }
0x1743   :  { %v3269_v3 = vadd.f32 %v3268_v0, %v3244_v48 }
0x1745   :  { %3271 = vst [vmem:[%s10861_s11] sm:$0xff] %v3269_v3 }
0x1746   :  { %v3277_v13 = vld [vmem:[%s10855_s5] sm:$0xff] }
0x1747   :  { %3278 = vst [vmem:[#allocation4] sm:$0xff] %v3277_v13 }
0x1748 PF:  { %s3279_s25 = sld [smem:[#allocation6]] }
0x174e   :  { %p7498_p1 = scmp.ne.s32.totalorder %s3279_s25, 0 }
0x1750   :  { %3283 = sbr.rel (%p7498_p1) target bundleno = 6337 (0x18c1), region = 57 }
0x1755   :  { %v3284_v17 = vsel %vm2475_vm7, %v3269_v3, -1e+30  ;;  %v7715_v50 = vmov 0.0  }
0x1756   :  { %3285 = vmax.xlane.f32.xlu0 %v3284_v17 }
0x17c9   :  { %v3286_v7 = vpop.xlane.xlu0 %3285 }
0x17ca   :  { %vm3287_vm5 = vcmp.eq.f32.partialorder %v3284_v17, %v3286_v7 }
0x17cb   :  { %v3288_v4 = vsel %vm3287_vm5, %v8393_v16, 128 }
0x17cc   :  { %v3290_v33 = vshra.s32 %v3288_v4, 16  ;;  %v3289_v54 = vand.u32 65535, %v3288_v4 }
0x17ce   :  { %v3292_v9 = vcvt.s32.f32 %v3290_v33  ;;  %v3291_v8 = vcvt.s32.f32 %v3289_v54 }
0x17d0   :  { %3293 = vmin.xlane.f32.xlu0 %v3292_v9 }
0x1843   :  { %v3294_v40 = vpop.xlane.xlu0 %3293 }
0x1844   :  { %vm3295_vm6 = vcmp.eq.f32.partialorder %v3292_v9, %v3294_v40  ;;  %v3300_v31 = vcvt.f32.s32 %v3294_v40 }
0x1845   :  { %v3296_v49 = vsel %vm3295_vm6, %v3291_v8, inf }
0x1846   :  { %3297 = vmin.xlane.f32.xlu1 %v3296_v49  ;;  %v3301_v36 = vshll.u32 %v3300_v31, 16 }
0x18b9   :  { %v3298_v59 = vpop.xlane.xlu1 %3297 }
0x18ba   :  { %v3299_v23 = vcvt.f32.s32 %v3298_v59 }
0x18bc   :  { %v3302_v38 = vadd.s32 %v3301_v36, %v3299_v23 }
0x18be   :  { %vm3303_vm9 = vcmp.eq.s32.totalorder %v8393_v16, %v3302_v38 }
0x18bf   :  { %v7499_v28 = vsel %vm3303_vm9, 1.0, %v7715_v50 }
0x18c0   :  { %3306 = vst [vmem:[#allocation4] sm:$0xff] %v7499_v28 }
0x18c1 PF:  { %v3324_v26 = vld [vmem:[%s10858_s8 + $0x78] sm:$0xff]  ;;  %v3323_v53 = vld [vmem:[%s10858_s8 + $0x70] sm:$0xff]  ;;  %v3322_v32 = vld [vmem:[%s10858_s8 + $0x68] sm:$0xff]  ;;  %s7502_s27 = sld [smem:[#allocation6 + $0x1]] }
0x18c2   :  { %v8806_v41 = vand.u32 4294901760, %v3324_v26  ;;  %v8808_v24 = vand.u32 4294901760, %v3323_v53  ;;  %v8810_v22 = vand.u32 4294901760, %v3322_v32  ;;  %v3321_v34 = vld [vmem:[%s10858_s8 + $0x60] sm:$0xff]  ;;  %v3320_v6 = vld [vmem:[%s10858_s8 + $0x58] sm:$0xff]  ;;  %v3319_v14 = vld [vmem:[%s10858_s8 + $0x50] sm:$0xff] }
0x18c3   :  { %v8821_v27 = vand.u32 4294901760, %v3321_v34  ;;  %v8823_v61 = vand.u32 4294901760, %v3320_v6  ;;  %v8825_v1 = vand.u32 4294901760, %v3319_v14  ;;  %v3318_v58 = vld [vmem:[%s10858_s8 + $0x48] sm:$0xff]  ;;  %v3317_v15 = vld [vmem:[%s10858_s8 + $0x40] sm:$0xff]  ;;  %v3316_v11 = vld [vmem:[%s10858_s8 + $0x38] sm:$0xff] }
0x18c4   :  { %3333 = vmatpush.msrb.mxu0 %v8806_v41  ;;  %v8835_v35 = vsub.f32 %v3324_v26, %v8806_v41  ;;  %v8838_v56 = vsub.f32 %v3323_v53, %v8808_v24  ;;  %v8840_v5 = vand.u32 4294901760, %v3318_v58  ;;  %v8843_v30 = vsub.f32 %v3322_v32, %v8810_v22  ;;  %3529 = vmatpush.msrb.mxu3 %v8806_v41  ;;  %v3315_v29 = vld [vmem:[%s10858_s8 + $0x30] sm:$0xff]  ;;  %v3314_v21 = vld [vmem:[%s10858_s8 + $0x28] sm:$0xff]  ;;  %v3313_v42 = vld [vmem:[%s10858_s8 + $0x20] sm:$0xff] }
0x18c5   :  { %v8850_v46 = vsub.f32 %v3321_v34, %v8821_v27  ;;  %v8853_v19 = vsub.f32 %v3320_v6, %v8823_v61  ;;  %v8859_v55 = vand.u32 4294901760, %v3317_v15  ;;  %v8866_v39 = vand.u32 4294901760, %v3316_v11  ;;  %v3312_v4 = vld [vmem:[%s10858_s8 + $0x18] sm:$0xff]  ;;  %v3311_v40 = vld [vmem:[%s10858_s8 + $0x10] sm:$0xff]  ;;  %v3310_v23 = vld [vmem:[%s10858_s8 + $0x8] sm:$0xff] }
0x18c6   :  { %3335 = vmatpush.msrb.mxu0 %v8808_v24  ;;  %v3375_v18 = vand.u32 4294901760, %v8835_v35  ;;  %v3381_v25 = vand.u32 4294901760, %v8838_v56  ;;  %v3387_v52 = vand.u32 4294901760, %v8843_v30  ;;  %3476 = vmatpush.msrb.mxu2 %v8835_v35  ;;  %v8870_v60 = vsub.f32 %v3319_v14, %v8825_v1  ;;  %v3309_v34 = vld [vmem:[%s10858_s8] sm:$0xff]  ;;  %v3328_v14 = vld [vmem:[%s10858_s8 + $0x98] sm:$0xff] }
0x18c7   :  { %v3393_v20 = vand.u32 4294901760, %v8850_v46  ;;  %v3399_v47 = vand.u32 4294901760, %v8853_v19  ;;  %3531 = vmatpush.msrb.mxu3 %v8808_v24  ;;  %v8884_v12 = vsub.f32 %v3318_v58, %v8840_v5  ;;  %v8886_v10 = vand.u32 4294901760, %v3315_v29  ;;  %p7503_p2 = scmp.eq.s32.totalorder %s7502_s27, 0 }
0x18c8   :  { %3337 = vmatpush.msrb.mxu0 %v8810_v22  ;;  %v3376_v62 = vsub.f32 %v8835_v35, %v3375_v18  ;;  %v3382_v63 = vsub.f32 %v8838_v56, %v3381_v25  ;;  %v3388_v45 = vsub.f32 %v8843_v30, %v3387_v52  ;;  %3479 = vmatpush.msrb.mxu2 %v8838_v56  ;;  %v10871_v51 = vand.u32 4294901760, %v8870_v60 }
0x18c9   :  { %3533 = vmatpush.msrb.mxu3 %v8810_v22  ;;  %v3394_v2 = vsub.f32 %v8850_v46, %v3393_v20  ;;  %v3400_v37 = vsub.f32 %v8853_v19, %v3399_v47  ;;  %v8905_v48 = vsub.f32 %v3317_v15, %v8859_v55  ;;  %v8910_v3 = vand.u32 4294901760, %v3314_v21 }
0x18ca   :  { %3339 = vmatpush.msrb.mxu0 %v8821_v27  ;;  %v3377_v43 = vand.u32 4294901760, %v3376_v62  ;;  %v3383_v44 = vand.u32 4294901760, %v3382_v63  ;;  %3482 = vmatpush.msrb.mxu2 %v8843_v30  ;;  %v3389_v0 = vand.u32 4294901760, %v3388_v45  ;;  %v10868_v13 = vand.u32 4294901760, %v8884_v12 }
0x18cb   :  { %3535 = vmatpush.msrb.mxu3 %v8821_v27  ;;  %v8914_v17 = vsub.f32 %v3316_v11, %v8866_v39  ;;  %v8916_v7 = vand.u32 4294901760, %v3313_v42  ;;  %v3395_v33 = vand.u32 4294901760, %v3394_v2  ;;  %v3406_v9 = vsub.f32 %v8870_v60, %v10871_v51 }
0x18cc   :  { %3341 = vmatpush.msrb.mxu0 %v8823_v61  ;;  %3378 = vmatpush.msrb.mxu1 %v3377_v43  ;;  %v10867_v54 = vand.u32 4294901760, %v8905_v48  ;;  %v8932_v8 = vsub.f32 %v3315_v29, %v8886_v10  ;;  %v3401_v49 = vand.u32 4294901760, %v3400_v37  ;;  %v3412_v31 = vsub.f32 %v8884_v12, %v10868_v13  ;;  %v3327_v37 = vld [vmem:[%s10858_s8 + $0x90] sm:$0xff] }
0x18cd   :  { %3485 = vmatpush.msrb.mxu2 %v8850_v46  ;;  %3537 = vmatpush.msrb.mxu3 %v8823_v61  ;;  %v8940_v59 = vand.u32 4294901760, %v3312_v4  ;;  %v10866_v36 = vand.u32 4294901760, %v8914_v17  ;;  %v8947_v38 = vsub.f32 %v3314_v21, %v8910_v3  ;;  %v8949_v50 = vand.u32 4294901760, %v3311_v40  ;;  %v3307_v21 = vld [vmem:[#allocation4] sm:$0xff] }
0x18ce   :  { %3343 = vmatpush.msrb.mxu0 %v8825_v1  ;;  %3384 = vmatpush.msrb.mxu1 %v3383_v44  ;;  %v8953_v28 = vsub.f32 %v3313_v42, %v8916_v7  ;;  %v3407_v26 = vand.u32 4294901760, %v3406_v9  ;;  %v3418_v53 = vsub.f32 %v8905_v48, %v10867_v54  ;;  %v10865_v32 = vand.u32 4294901760, %v8932_v8 }
0x18cf   :  { %3488 = vmatpush.msrb.mxu2 %v8853_v19  ;;  %3539 = vmatpush.msrb.mxu3 %v8825_v1  ;;  %v8964_v6 = vand.u32 4294901760, %v3310_v23  ;;  %v3413_v58 = vand.u32 4294901760, %v3412_v31  ;;  %v3424_v15 = vsub.f32 %v8914_v17, %v10866_v36  ;;  %v10864_v11 = vand.u32 4294901760, %v8947_v38 }
0x18d0   :  { %3345 = vmatpush.msrb.mxu0 %v8840_v5  ;;  %3390 = vmatpush.msrb.mxu1 %v3389_v0  ;;  %v8977_v29 = vsub.f32 %v3312_v4, %v8940_v59  ;;  %v8979_v62 = vand.u32 4294901760, %v3309_v34  ;;  %v10863_v63 = vand.u32 4294901760, %v8953_v28  ;;  %v8984_v45 = vsub.f32 %v3311_v40, %v8949_v50  ;;  %v3308_v40 = vld [vmem:[#allocation4 + $0x8] sm:$0xff] }
0x18d1   :  { %3491 = vmatpush.msrb.mxu2 %v8870_v60  ;;  %3541 = vmatpush.msrb.mxu3 %v8840_v5  ;;  %v3419_v43 = vand.u32 4294901760, %v3418_v53  ;;  %v3430_v44 = vsub.f32 %v8932_v8, %v10865_v32  ;;  %v8991_v2 = vand.u32 4294901760, %v3328_v14  ;;  %v8995_v42 = vsub.f32 %v3310_v23, %v8964_v6 }
0x18d2   :  { %3347 = vmatpush.msrb.mxu0 %v8859_v55  ;;  %3396 = vmatpush.msrb.mxu1 %v3395_v33  ;;  %v3425_v0 = vand.u32 4294901760, %v3424_v15  ;;  %v3436_v4 = vsub.f32 %v8947_v38, %v10864_v11  ;;  %v10870_v33 = vand.u32 4294901760, %v8977_v29  ;;  %v9006_v9 = vand.u32 4294901760, %v3307_v21 }
0x18d3   :  { %3494 = vmatpush.msrb.mxu2 %v8884_v12  ;;  %3543 = vmatpush.msrb.mxu3 %v8859_v55  ;;  %v10869_v31 = vand.u32 4294901760, %v8984_v45  ;;  %v9014_v23 = vsub.f32 %v3309_v34, %v8979_v62  ;;  %v3431_v53 = vand.u32 4294901760, %v3430_v44  ;;  %v9024_v15 = vsub.f32 %v3328_v14, %v8991_v2  ;;  %v3325_v34 = vld [vmem:[%s10858_s8 + $0x80] sm:$0xff] }
0x18d4   :  { %3349 = vmatpush.msrb.mxu0 %v8866_v39  ;;  %3402 = vmatpush.msrb.mxu1 %v3401_v49  ;;  %v3442_v49 = vsub.f32 %v8953_v28, %v10863_v63  ;;  %v10873_v63 = vand.u32 4294901760, %v8995_v42  ;;  %v3330_v11 = vsel %vm491_vm2, %v3308_v40, 0  ;;  %v3448_v14 = vsub.f32 %v8977_v29, %v10870_v33 }
0x18d5   :  { %3497 = vmatpush.msrb.mxu2 %v8905_v48  ;;  %3545 = vmatpush.msrb.mxu3 %v8866_v39  ;;  %v3365_v44 = vsub.f32 %v3307_v21, %v9006_v9  ;;  %v3454_v54 = vsub.f32 %v8984_v45, %v10869_v31  ;;  %v10872_v13 = vand.u32 4294901760, %v9014_v23  ;;  %v9053_v40 = vand.u32 4294901760, %v3330_v11 }
0x18d6   :  { %3351 = vmatpush.msrb.mxu0 %v8886_v10  ;;  %3408 = vmatpush.msrb.mxu1 %v3407_v26  ;;  %v3326_v26 = vld [vmem:[%s10858_s8 + $0x88] sm:$0xff]  ;;  %v3443_v36 = vand.u32 4294901760, %v3442_v49  ;;  %v3449_v49 = vand.u32 4294901760, %v3448_v14  ;;  %v10927_v19 = vand.u32 4294901760, %v8995_v42 }
0x18d7   :  { %3500 = vmatpush.msrb.mxu2 %v8914_v17  ;;  %3547 = vmatpush.msrb.mxu3 %v8886_v10  ;;  %v9038_v32 = vand.u32 4294901760, %v3326_v26  ;;  %v3366_v31 = vand.u32 4294901760, %v3365_v44  ;;  %v3455_v33 = vand.u32 4294901760, %v3454_v54  ;;  %v3466_v51 = vsub.f32 %v9014_v23, %v10872_v13 }
0x18d8   :  { %3353 = vmatpush.msrb.mxu0 %v8910_v3  ;;  %3414 = vmatpush.msrb.mxu1 %v3413_v58  ;;  %v9021_v58 = vand.u32 4294901760, %v3327_v37 }
0x18d9   :  { %3503 = vmatpush.msrb.mxu2 %v8932_v8  ;;  %3549 = vmatpush.msrb.mxu3 %v8910_v3 }
0x18da   :  { %3355 = vmatpush.msrb.mxu0 %v8916_v7  ;;  %3420 = vmatpush.msrb.mxu1 %v3419_v43  ;;  %v3437_v43 = vand.u32 4294901760, %v3436_v4  ;;  %v9049_v21 = vsub.f32 %v3327_v37, %v9021_v58  ;;  %v9051_v4 = vand.u32 4294901760, %v3325_v34  ;;  %v9062_v37 = vsub.f32 %v3326_v26, %v9038_v32 }
0x18db   :  { %3506 = vmatpush.msrb.mxu2 %v8947_v38  ;;  %3551 = vmatpush.msrb.mxu3 %v8916_v7  ;;  %v9075_v26 = vsub.f32 %v3330_v11, %v9053_v40  ;;  %v3467_v11 = vand.u32 4294901760, %v3466_v51 }
0x18dc   :  { %3357 = vmatpush.msrb.mxu0 %v8940_v59  ;;  %3426 = vmatpush.msrb.mxu1 %v3425_v0  ;;  %v3716_v0 = vand.u32 4294901760, %v9024_v15  ;;  %v3722_v14 = vand.u32 4294901760, %v9049_v21  ;;  %v9078_v54 = vsub.f32 %v3325_v34, %v9051_v4 }
0x18dd   :  { %3509 = vmatpush.msrb.mxu2 %v8953_v28  ;;  %3553 = vmatpush.msrb.mxu3 %v8940_v59 }
0x18de   :  { %3359 = vmatpush.msrb.mxu0 %v8949_v50  ;;  %3432 = vmatpush.msrb.mxu1 %v3431_v53  ;;  %v3460_v53 = vsub.f32 %v8995_v42, %v10873_v63  ;;  %v3728_v63 = vand.u32 4294901760, %v9062_v37  ;;  %v3723_v35 = vsub.f32 %v9049_v21, %v3722_v14 }
0x18df   :  { %3512 = vmatpush.msrb.mxu2 %v8977_v29  ;;  %3555 = vmatpush.msrb.mxu3 %v8949_v50 }
0x18e0   :  { %3361 = vmatpush.msrb.mxu0 %v8964_v6  ;;  %3438 = vmatpush.msrb.mxu1 %v3437_v43  ;;  %v3717_v43 = vsub.f32 %v9024_v15, %v3716_v0  ;;  %v3461_v13 = vand.u32 4294901760, %v3460_v53  ;;  %v3724_v51 = vand.u32 4294901760, %v3723_v35 }
0x18e1   :  { %3515 = vmatpush.msrb.mxu2 %v8984_v45  ;;  %3557 = vmatpush.msrb.mxu3 %v8964_v6 }
0x18e2   :  { %3363 = vmatpush.msrb.mxu0 %v8979_v62  ;;  %3444 = vmatpush.msrb.mxu1 %v3443_v36  ;;  %v3367_v36 = vsub.f32 %v3365_v44, %v3366_v31  ;;  %v3718_v34 = vand.u32 4294901760, %v3717_v43 }
0x18e3   :  { %3518 = vmatpush.msrb.mxu2 %v8995_v42  ;;  %3559 = vmatpush.msrb.mxu3 %v8979_v62 }
0x18e4   :  { %3570 = vmatpush.msra.mxu0 %v3375_v18  ;;  %3450 = vmatpush.msrb.mxu1 %v3449_v49  ;;  %v3695_v18 = vand.u32 4294901760, %v9075_v26  ;;  %v3734_v49 = vand.u32 4294901760, %v9078_v54  ;;  %v3368_v56 = vand.u32 4294901760, %v3367_v36 }
0x18e5   :  { %3521 = vmatpush.msrb.mxu2 %v9014_v23  ;;  %3563 = vmatmul.f32.vlgmr.msrb.gmra.mxu3 %v3366_v31  ;;  %v10919_v31 = vand.u32 4294901760, %v8884_v12 }
0x18e6   :  { %3574 = vmatpush.msra.mxu0 %v3381_v25  ;;  %3456 = vmatpush.msrb.mxu1 %v3455_v33  ;;  %v3729_v25 = vsub.f32 %v9062_v37, %v3728_v63  ;;  %v3696_v30 = vsub.f32 %v9075_v26, %v3695_v18 }
0x18e7   :  { %3524 = vmatmul.f32.vlgmr.msrb.gmra.mxu2 %v3365_v44  ;;  %3719 = vmatpush.msra.mxu3 %v3718_v34 }
0x18e8   :  { %3578 = vmatpush.msra.mxu0 %v3387_v52  ;;  %3686 = vmatpush.msra.mxu2 %v8991_v2  ;;  %v3735_v52 = vsub.f32 %v9078_v54, %v3734_v49  ;;  %v3730_v46 = vand.u32 4294901760, %v3729_v25 }
0x18e9   :  { %3462 = vmatpush.msrb.mxu1 %v3461_v13  ;;  %3369 = vmatmul.f32.vlgmr.msrb.gmra.mxu0 %v3368_v56  ;;  %v3697_v13 = vand.u32 4294901760, %v3696_v30  ;;  %v3912_v30 = vld [vmem:[%s10859_s9 + $0x10] sm:$0xff] }
0x18ea   :  { %3582 = vmatpush.msra.mxu0 %v3393_v20  ;;  %3688 = vmatpush.msra.mxu2 %v9021_v58  ;;  %v10918_v20 = vand.u32 4294901760, %v8870_v60  ;;  %v3736_v33 = vand.u32 4294901760, %v3735_v52 }
0x18eb   :  { %3468 = vmatpush.msrb.mxu1 %v3467_v11  ;;  %3725 = vmatpush.msra.mxu3 %v3724_v51  ;;  %v3913_v51 = vld [vmem:[%s10859_s9 + $0x18] sm:$0xff] }
0x18ec   :  { %3586 = vmatpush.msra.mxu0 %v3399_v47  ;;  %3470 = vmatmul.f32.vlgmr.msrb.gmra.mxu1 %v9006_v9  ;;  %v3928_v52 = vand.u32 4294901760, %v3913_v51 }
0x18ed   :  { %3637 = vmatpush.msra.mxu1 %v8806_v41  ;;  %3690 = vmatpush.msra.mxu2 %v9038_v32  ;;  %v10920_v41 = vand.u32 4294901760, %v8905_v48 }
0x18ee   :  { %3590 = vmatpush.msra.mxu0 %v10918_v20  ;;  %3731 = vmatpush.msra.mxu3 %v3730_v46  ;;  %v3930_v46 = vand.u32 4294901760, %v3912_v30  ;;  %v3958_v20 = vsub.f32 %v3913_v51, %v3928_v52 }
0x18ef   :  { %3639 = vmatpush.msra.mxu1 %v8808_v24  ;;  %3692 = vmatpush.msra.mxu2 %v9051_v4  ;;  %v10921_v24 = vand.u32 4294901760, %v8914_v17 }
0x18f0   :  { %3594 = vmatpush.msra.mxu0 %v10919_v31  ;;  %3698 = vmatmul.f32.vlgmr.msra.gmra.mxu2 %v3697_v13  ;;  %v3964_v13 = vsub.f32 %v3912_v30, %v3930_v46 }
0x18f1   :  { %3641 = vmatpush.msra.mxu1 %v8810_v22  ;;  %3737 = vmatpush.msra.mxu3 %v3736_v33  ;;  %v10922_v22 = vand.u32 4294901760, %v8932_v8  ;;  %v3959_v33 = vand.u32 4294901760, %v3958_v20 }
0x18f2   :  { %3598 = vmatpush.msra.mxu0 %v10920_v41  ;;  %3757 = vmatpush.msrb.mxu2 %v9024_v15  ;;  %v3965_v31 = vand.u32 4294901760, %v3964_v13 }
0x18f3   :  { %3643 = vmatpush.msra.mxu1 %v8821_v27  ;;  %3739 = vmatmul.f32.vlgmr.msra.gmra.mxu3 %v9053_v40  ;;  %v10923_v27 = vand.u32 4294901760, %v8947_v38  ;;  %v3960_v41 = vsub.f32 %v3958_v20, %v3959_v33 }
0x18f4   :  { %3602 = vmatpush.msra.mxu0 %v10921_v24  ;;  %3760 = vmatpush.msrb.mxu2 %v9049_v21  ;;  %v3966_v24 = vsub.f32 %v3964_v13, %v3965_v31 }
0x18f5   :  { %3645 = vmatpush.msra.mxu1 %v8823_v61  ;;  %3786 = vmatpush.msrb.mxu3 %v8991_v2  ;;  %v10924_v61 = vand.u32 4294901760, %v8953_v28 }
0x18f6   :  { %3606 = vmatpush.msra.mxu0 %v10922_v22  ;;  %3763 = vmatpush.msrb.mxu2 %v9062_v37  ;;  %v3961_v22 = vand.u32 4294901760, %v3960_v41 }
0x18f7   :  { %3647 = vmatpush.msra.mxu1 %v8825_v1  ;;  %3788 = vmatpush.msrb.mxu3 %v9021_v58  ;;  %v10925_v1 = vand.u32 4294901760, %v8977_v29 }
0x18f8   :  { %3610 = vmatpush.msra.mxu0 %v10923_v27  ;;  %3766 = vmatpush.msrb.mxu2 %v9078_v54  ;;  %v3967_v27 = vand.u32 4294901760, %v3966_v24 }
0x18f9   :  { %3649 = vmatpush.msra.mxu1 %v8840_v5  ;;  %3790 = vmatpush.msrb.mxu3 %v9038_v32  ;;  %v10926_v5 = vand.u32 4294901760, %v8984_v45 }
0x18fa   :  { %3614 = vmatpush.msra.mxu0 %v10924_v61  ;;  %3769 = vmatmul.f32.vlgmr.msrb.gmra.mxu2 %v9075_v26 }
0x18fb   :  { %3651 = vmatpush.msra.mxu1 %v8859_v55  ;;  %3792 = vmatpush.msrb.mxu3 %v9051_v4  ;;  %v10928_v55 = vand.u32 4294901760, %v9014_v23 }
0x18fc   :  { %3618 = vmatpush.msra.mxu0 %v10925_v1  ;;  %3815 = vmatpush.msra.mxu2 %v3716_v0 }
0x18fd   :  { %3653 = vmatpush.msra.mxu1 %v8866_v39  ;;  %3796 = vmatmul.f32.vlgmr.msrb.gmra.mxu3 %v3695_v18 }
0x18fe   :  { %3622 = vmatpush.msra.mxu0 %v10926_v5  ;;  %3819 = vmatpush.msra.mxu2 %v3722_v14  ;;  %v3911_v5 = vld [vmem:[%s10859_s9 + $0x8] sm:$0xff] }
0x18ff   :  { %3655 = vmatpush.msra.mxu1 %v8886_v10  ;;  %3846 = vmatpush.msra.mxu3 %v8991_v2 }
0x1900   :  { %3626 = vmatpush.msra.mxu0 %v10927_v19  ;;  %3823 = vmatpush.msra.mxu2 %v3728_v63  ;;  %v3932_v19 = vand.u32 4294901760, %v3911_v5 }
0x1901   :  { %3657 = vmatpush.msra.mxu1 %v8910_v3  ;;  %3848 = vmatpush.msra.mxu3 %v9021_v58  ;;  %v3878_v58 = vld [vmem:[#allocation5] sm:$0xff] }
0x1902   :  { %3630 = vmatpush.msra.mxu0 %v10928_v55  ;;  %3827 = vmatpush.msra.mxu2 %v3734_v49  ;;  %v3910_v55 = vld [vmem:[%s10859_s9] sm:$0xff] }
0x1903   :  { %3659 = vmatpush.msra.mxu1 %v8916_v7  ;;  %3632 = vmatmul.f32.vlgmr.msra.gmra.mxu0 %v9006_v9 }
0x1904   :  { %3850 = vmatpush.msra.mxu3 %v9038_v32  ;;  %3829 = vmatmul.f32.vlgmr.msra.gmra.mxu2 %v9053_v40 }
0x1905   :  { %3661 = vmatpush.msra.mxu1 %v8940_v59  ;;  %3929 = vmatpush.msrb.mxu2 %v3928_v52 }
0x1906   :  { %3852 = vmatpush.msra.mxu3 %v9051_v4  ;;  %4000 = vmatpush.msrb.mxu0 %v3958_v20 }
0x1907   :  { %3663 = vmatpush.msra.mxu1 %v8949_v50  ;;  %3854 = vmatmul.f32.vlgmr.msra.gmra.mxu3 %v9053_v40 }
0x1908   :  { %3931 = vmatpush.msrb.mxu2 %v3930_v46  ;;  %4003 = vmatpush.msrb.mxu0 %v3964_v13 }
0x1909   :  { %3665 = vmatpush.msra.mxu1 %v8964_v6  ;;  %3962 = vmatpush.msrb.mxu3 %v3961_v22 }
0x190a   :  { %3933 = vmatpush.msrb.mxu2 %v3932_v19 }
0x190b   :  { %3667 = vmatpush.msra.mxu1 %v8979_v62  ;;  %3968 = vmatpush.msrb.mxu3 %v3967_v27 }
0x190c   :  { %3669 = vmatmul.f32.vlgmr.msra.gmra.mxu1 %v9006_v9 }
0x190d   :  { %4029 = vmatpush.msrb.mxu1 %v3928_v52 }
0x190f   :  { %4031 = vmatpush.msrb.mxu1 %v3930_v46 }
0x1911   :  { %4033 = vmatpush.msrb.mxu1 %v3932_v19 }
0x1966   :  { %v3370_v60 = vpop.f32.mrf.mxu0 }
0x1968   :  { %v3564_v47 = vpop.f32.mrf.mxu3 }
0x1969   :  { %v3471_v12 = vpop.f32.mrf.mxu1 }
0x196a   :  { %v3525_v39 = vpop.f32.mrf.mxu2  ;;  %v3472_v48 = vadd.f32 %v3471_v12, %v3370_v60 }
0x196c   :  { %v3526_v17 = vadd.f32 %v3525_v39, %v3472_v48  ;;  %v3970_v39 = vsub.f32 %v3911_v5, %v3932_v19 }
0x196e   :  { %v3565_v8 = vadd.f32 %v3564_v47, %v3526_v17  ;;  %v3934_v47 = vand.u32 4294901760, %v3910_v55  ;;  %v3971_v60 = vand.u32 4294901760, %v3970_v39  ;;  %4006 = vmatpush.msrb.mxu0 %v3970_v39 }
0x1970   :  { %v3976_v12 = vsub.f32 %v3910_v55, %v3934_v47  ;;  %4035 = vmatpush.msrb.mxu1 %v3934_v47  ;;  %3935 = vmatpush.msrb.mxu2 %v3934_v47 }
0x1972   :  { %v3977_v48 = vand.u32 4294901760, %v3976_v12  ;;  %4009 = vmatpush.msrb.mxu0 %v3976_v12  ;;  %4058 = vmatpush.msra.mxu2 %v3959_v33 }
0x1973   :  { %v3699_v10 = vpop.f32.mrf.mxu2 }
0x1974   :  { %v3978_v17 = vsub.f32 %v3976_v12, %v3977_v48  ;;  %4062 = vmatpush.msra.mxu2 %v3965_v31 }
0x1976   :  { %v3740_v3 = vpop.f32.mrf.mxu3  ;;  %4066 = vmatpush.msra.mxu2 %v3971_v60 }
0x1978   :  { %4070 = vmatpush.msra.mxu2 %v3977_v48 }
0x197d   :  { %v3770_v59 = vpop.f32.mrf.mxu2 }
0x1980   :  { %v3633_v7 = vpop.f32.mrf.mxu0  ;;  %v3797_v28 = vpop.f32.mrf.mxu3 }
0x1981   :  { %v3634_v38 = vadd.f32 %v3633_v7, %v3565_v8  ;;  %v3979_v7 = vand.u32 4294901760, %v3978_v17 }
0x1987   :  { %v3830_v63 = vpop.f32.mrf.mxu2 }
0x1989   :  { %v3670_v50 = vpop.f32.mrf.mxu1 }
0x198a   :  { %v3671_v32 = vadd.f32 %v3670_v50, %v3634_v38  ;;  %v3855_v2 = vpop.f32.mrf.mxu3 }
0x198c   :  { %v3700_v6 = vadd.f32 %v3699_v10, %v3671_v32  ;;  %v3972_v10 = vsub.f32 %v3970_v39, %v3971_v60 }
0x198e   :  { %v3741_v29 = vadd.f32 %v3740_v3, %v3700_v6  ;;  %v3973_v3 = vand.u32 4294901760, %v3972_v10 }
0x1990   :  { %v3771_v62 = vadd.f32 %v3770_v59, %v3741_v29  ;;  %3974 = vmatpush.msrb.mxu3 %v3973_v3 }
0x1992   :  { %v3798_v45 = vadd.f32 %v3797_v28, %v3771_v62  ;;  %3980 = vmatpush.msrb.mxu3 %v3979_v7 }
0x1994   :  { %v3831_v42 = vadd.f32 %v3830_v63, %v3798_v45  ;;  %4089 = vmatpush.msra.mxu3 %v3928_v52 }
0x1996   :  { %v3856_v9 = vadd.f32 %v3855_v2, %v3831_v42  ;;  %4091 = vmatpush.msra.mxu3 %v3930_v46 }
0x1998   :  { %7627 = vtanh.f32 %v3856_v9  ;;  %v7500_v15 = vmul.f32 -1.442695, %v3856_v9  ;;  %4093 = vmatpush.msra.mxu3 %v3932_v19 }
0x199a   :  { %7629 = vpow2.f32 %v7500_v15  ;;  %4095 = vmatpush.msra.mxu3 %v3934_v47 }
0x199e   :  { %v7628_v23 = vpop.eup %7627 }
0x199f   :  { %3885 = vrot.lane.b32.xlu0 %v7628_v23, %s7714_s6 }
0x19a0   :  { %v7630_v44 = vpop.eup %7629 }
0x19a1   :  { %v3861_v0 = vadd.f32 1.0, %v7630_v44 }
0x19a3   :  { %7631 = vrcp.f32 %v3861_v0  ;;  %v3873_v43 = vand.u32 2147483648, %v3861_v0  ;;  %vm3867_vm8 = vweird.f32 %v3861_v0  ;;  %v3871_v14 = vand.u32 2147483647, %v3861_v0 }
0x19a5   :  { %v3874_v54 = vor.u32 1.1754944e-38, %v3873_v43  ;;  %vm3872_vm12 = vcmp.eq.f32.partialorder %v3871_v14, 8.507059e+37 }
0x19a7   :  { %3880 = vrot.lane.b32.xlu0 %v3878_v58, %s7711_s17 }
0x19a9   :  { %v7632_v21 = vpop.eup %7631 }
0x19aa   :  { %v3863_v4 = vmul.f32 %v7632_v21, %v3861_v0  ;;  %vm3868_vm10 = vweird.f32 %v7632_v21 }
0x19ab   :  { %vm3869_vm11 = vmor %vm3867_vm8, %vm3868_vm10 }
0x19ac   :  { %v3864_v40 = vsub.f32 1.0, %v3863_v4 }
0x19ae   :  { %v3865_v53 = vmul.f32 %v7632_v21, %v3864_v40 }
0x19b0   :  { %v3866_v37 = vadd.f32 %v7632_v21, %v3865_v53 }
0x19b2   :  { %v3870_v26 = vsel %vm3869_vm11, %v7632_v21, %v3866_v37 }
0x19b3   :  { %v3875_v11 = vsel %vm3872_vm12, %v3874_v54, %v3870_v26 }
0x1a11   :  { %v3886_v36 = vpop.permute.xlu0 %3885 }
0x1a12   :  { %v3888_v34 = vmul.f32 %v3886_v36, %v3875_v11 }
0x1a14   :  { %3890 = vrot.lane.b32.xlu1 %v3888_v34, %s7711_s17 }
0x1a19   :  { %v3881_v35 = vpop.permute.xlu0 %3880 }
0x1a1a   :  { %v3883_v18 = vmul.f32 %v3881_v35, %v3875_v11 }
0x1a86   :  { %v3891_v49 = vpop.permute.xlu1 %3890 }
0x1a87   :  { %v3893_v56 = vadd.f32 %v3891_v49, %v3883_v18 }
0x1a89   :  { %7633 = vtanh.f32 %v3893_v56 }
0x1a8f   :  { %v7634_v25 = vpop.eup %7633 }
0x1a90   :  { %3896 = vrot.lane.b32.xlu1 %v7634_v25, %s7714_s6 }
0x1b02   :  { %v3897_v61 = vpop.permute.xlu1 %3896 }
0x1b03   :  { %v3899_v1 = vmul.f32 %v3897_v61, %v3875_v11 }
0x1b05   :  { %3906 = vrot.lane.b32.xlu2 %v3899_v1, %s7711_s17 }
0x1b0d   :  { %3901 = vrot.lane.b32.xlu2 %v3893_v56, %s7709_s1 }
0x1b5f   :  { %v3907_v8 = vpop.permute.xlu2 %3906 }
0x1b60   :  { %3909 = vst.msk [vmem:[#allocation4 + $0x8] sm:$0xff] %vm491_vm2, %v3907_v8  ;;  %v3914_v59 = vsel %vm491_vm2, %v3907_v8, 0 }
0x1b61   :  { %v3936_v38 = vand.u32 4294901760, %v3914_v59 }
0x1b63   :  { %v3937_v50 = vsub.f32 %v3914_v59, %v3936_v38  ;;  %3982 = vmatmul.f32.vlgmr.msrb.gmra.mxu3 %v3936_v38 }
0x1b65   :  { %v3938_v28 = vand.u32 4294901760, %v3937_v50  ;;  %4012 = vmatmul.f32.vlgmr.msrb.gmra.mxu0 %v3937_v50 }
0x1b67   :  { %v3939_v32 = vsub.f32 %v3937_v50, %v3938_v28  ;;  %4039 = vmatmul.f32.vlgmr.msrb.gmra.mxu1 %v3938_v28  ;;  %v3902_v6 = vpop.permute.xlu2 %3901 }
0x1b68   :  { %3904 = vst.msk [vmem:[#allocation5] sm:$0xff] %vm491_vm2, %v3902_v6 }
0x1b69   :  { %v3940_v29 = vand.u32 4294901760, %v3939_v32 }
0x1b6b   :  { %3941 = vmatmul.f32.vlgmr.msrb.gmra.mxu2 %v3940_v29  ;;  %4097 = vmatmul.f32.vlgmr.msra.gmra.mxu3 %v3936_v38 }
0x1b73   :  { %4072 = vmatmul.f32.vlgmr.msra.gmra.mxu2 %v3936_v38 }
0x1be2   :  { %v4013_v42 = vpop.f32.mrf.mxu0 }
0x1be4   :  { %v4040_v23 = vpop.f32.mrf.mxu1 }
0x1be6   :  { %v3983_v62 = vpop.f32.mrf.mxu3 }
0x1bee   :  { %v3942_v63 = vpop.f32.mrf.mxu2  ;;  %v4098_v0 = vpop.f32.mrf.mxu3 }
0x1bef   :  { %v3943_v45 = vadd.f32 %v3942_v63, %v8784_v57 }
0x1bf1   :  { %v3984_v2 = vadd.f32 %v3983_v62, %v3943_v45 }
0x1bf3   :  { %v4014_v9 = vadd.f32 %v4013_v42, %v3984_v2 }
0x1bf5   :  { %v4041_v58 = vadd.f32 %v4040_v23, %v4014_v9 }
0x1bf6   :  { %v4073_v15 = vpop.f32.mrf.mxu2 }
0x1bf7   :  { %v4074_v44 = vadd.f32 %v4073_v15, %v4041_v58  ;;  %4107 = sbr.rel (%p7503_p2) target bundleno = 7166 (0x1bfe), region = 61 }
0x1bf9   :  { %v4099_v21 = vadd.f32 %v4098_v0, %v4074_v44 }
0x1bfb   :  { %7501 = vst [vmem:[%s10861_s11 + $0x8] sm:$0xff] %v4099_v21 }
0x1bfc   :  { %v7504_v4 = vld [vmem:[%s10855_s5 + $0x8] sm:$0xff] }
0x1bfd   :  { %4110 = vst [vmem:[#allocation4] sm:$0xff] %v7504_v4 }
0x1bfe PF:  { %s7505_s16 = sld [smem:[#allocation6 + $0x1]] }
0x1c04   :  { %p7506_p3 = scmp.ne.s32.totalorder %s7505_s16, 0 }
0x1c06   :  { %4115 = sbr.rel (%p7506_p3) target bundleno = 7543 (0x1d77), region = 65 }
0x1c0b   :  { %v4116_v40 = vsel %vm2475_vm7, %v4099_v21, -1e+30  ;;  %v7716_v25 = vmov 0.0  }
0x1c0c   :  { %4117 = vmax.xlane.f32.xlu0 %v4116_v40 }
0x1c7f   :  { %v4118_v53 = vpop.xlane.xlu0 %4117 }
0x1c80   :  { %vm4119_vm13 = vcmp.eq.f32.partialorder %v4116_v40, %v4118_v53 }
0x1c81   :  { %v4120_v37 = vsel %vm4119_vm13, %v8393_v16, 128 }
0x1c82   :  { %v4122_v43 = vshra.s32 %v4120_v37, 16  ;;  %v4121_v26 = vand.u32 65535, %v4120_v37 }
0x1c84   :  { %v4124_v14 = vcvt.s32.f32 %v4122_v43  ;;  %v4123_v36 = vcvt.s32.f32 %v4121_v26 }
0x1c86   :  { %4125 = vmin.xlane.f32.xlu0 %v4124_v14 }
0x1cf9   :  { %v4126_v54 = vpop.xlane.xlu0 %4125 }
0x1cfa   :  { %vm4127_vm14 = vcmp.eq.f32.partialorder %v4124_v14, %v4126_v54  ;;  %v4132_v34 = vcvt.f32.s32 %v4126_v54 }
0x1cfb   :  { %v4128_v11 = vsel %vm4127_vm14, %v4123_v36, inf }
0x1cfc   :  { %4129 = vmin.xlane.f32.xlu1 %v4128_v11  ;;  %v4133_v18 = vshll.u32 %v4132_v34, 16 }
0x1d6f   :  { %v4130_v35 = vpop.xlane.xlu1 %4129 }
0x1d70   :  { %v4131_v49 = vcvt.f32.s32 %v4130_v35 }
0x1d72   :  { %v4134_v56 = vadd.s32 %v4133_v18, %v4131_v49 }
0x1d74   :  { %vm4135_vm15 = vcmp.eq.s32.totalorder %v8393_v16, %v4134_v56 }
0x1d75   :  { %v7507_v51 = vsel %vm4135_vm15, 1.0, %v7716_v25 }
0x1d76   :  { %4138 = vst [vmem:[#allocation4] sm:$0xff] %v7507_v51 }
0x1d77 PF:  { %v4156_v30 = vld [vmem:[%s10858_s8 + $0x78] sm:$0xff]  ;;  %v4155_v52 = vld [vmem:[%s10858_s8 + $0x70] sm:$0xff]  ;;  %v4154_v46 = vld [vmem:[%s10858_s8 + $0x68] sm:$0xff]  ;;  %s7510_s14 = sld [smem:[#allocation6 + $0x2]] }
0x1d78   :  { %v9216_v20 = vand.u32 4294901760, %v4156_v30  ;;  %v9218_v13 = vand.u32 4294901760, %v4155_v52  ;;  %v9220_v33 = vand.u32 4294901760, %v4154_v46  ;;  %v4153_v31 = vld [vmem:[%s10858_s8 + $0x60] sm:$0xff]  ;;  %v4152_v41 = vld [vmem:[%s10858_s8 + $0x58] sm:$0xff]  ;;  %v4151_v24 = vld [vmem:[%s10858_s8 + $0x50] sm:$0xff] }
0x1d79   :  { %v9231_v22 = vand.u32 4294901760, %v4153_v31  ;;  %v9233_v27 = vand.u32 4294901760, %v4152_v41  ;;  %v9235_v61 = vand.u32 4294901760, %v4151_v24  ;;  %v4150_v1 = vld [vmem:[%s10858_s8 + $0x48] sm:$0xff]  ;;  %v4149_v5 = vld [vmem:[%s10858_s8 + $0x40] sm:$0xff]  ;;  %v4148_v60 = vld [vmem:[%s10858_s8 + $0x38] sm:$0xff] }
0x1d7a   :  { %4165 = vmatpush.msra.mxu0 %v9216_v20  ;;  %v9245_v19 = vsub.f32 %v4156_v30, %v9216_v20  ;;  %v9248_v55 = vsub.f32 %v4155_v52, %v9218_v13  ;;  %v9250_v39 = vand.u32 4294901760, %v4150_v1  ;;  %v9253_v47 = vsub.f32 %v4154_v46, %v9220_v33  ;;  %4361 = vmatpush.msrb.mxu3 %v9216_v20  ;;  %v4147_v8 = vld [vmem:[%s10858_s8 + $0x30] sm:$0xff]  ;;  %v4146_v45 = vld [vmem:[%s10858_s8 + $0x28] sm:$0xff]  ;;  %v4145_v58 = vld [vmem:[%s10858_s8 + $0x20] sm:$0xff] }
0x1d7b   :  { %v9260_v12 = vsub.f32 %v4153_v31, %v9231_v22  ;;  %v9263_v10 = vsub.f32 %v4152_v41, %v9233_v27  ;;  %v9269_v7 = vand.u32 4294901760, %v4149_v5  ;;  %v9276_v38 = vand.u32 4294901760, %v4148_v60  ;;  %v4144_v37 = vld [vmem:[%s10858_s8 + $0x18] sm:$0xff]  ;;  %v4143_v54 = vld [vmem:[%s10858_s8 + $0x10] sm:$0xff]  ;;  %v4142_v49 = vld [vmem:[%s10858_s8 + $0x8] sm:$0xff] }
0x1d7c   :  { %4167 = vmatpush.msra.mxu0 %v9218_v13  ;;  %v4207_v48 = vand.u32 4294901760, %v9245_v19  ;;  %v4213_v3 = vand.u32 4294901760, %v9248_v55  ;;  %v4219_v17 = vand.u32 4294901760, %v9253_v47  ;;  %4308 = vmatpush.msrb.mxu2 %v9245_v19  ;;  %v9280_v28 = vsub.f32 %v4151_v24, %v9235_v61  ;;  %v4141_v31 = vld [vmem:[%s10858_s8] sm:$0xff]  ;;  %v4160_v24 = vld [vmem:[%s10858_s8 + $0x98] sm:$0xff] }
0x1d7d   :  { %v4225_v59 = vand.u32 4294901760, %v9260_v12  ;;  %v4231_v50 = vand.u32 4294901760, %v9263_v10  ;;  %4363 = vmatpush.msrb.mxu3 %v9218_v13  ;;  %v9294_v62 = vsub.f32 %v4150_v1, %v9250_v39  ;;  %v9296_v63 = vand.u32 4294901760, %v4147_v8  ;;  %p7511_p4 = scmp.eq.s32.totalorder %s7510_s14, 0 }
0x1d7e   :  { %4169 = vmatpush.msra.mxu0 %v9220_v33  ;;  %v4208_v32 = vsub.f32 %v9245_v19, %v4207_v48  ;;  %v4214_v6 = vsub.f32 %v9248_v55, %v4213_v3  ;;  %v4220_v29 = vsub.f32 %v9253_v47, %v4219_v17  ;;  %4311 = vmatpush.msrb.mxu2 %v9248_v55  ;;  %v10882_v23 = vand.u32 4294901760, %v9280_v28 }
0x1d7f   :  { %4365 = vmatpush.msrb.mxu3 %v9220_v33  ;;  %v4226_v9 = vsub.f32 %v9260_v12, %v4225_v59  ;;  %v4232_v15 = vsub.f32 %v9263_v10, %v4231_v50  ;;  %v9315_v44 = vsub.f32 %v4149_v5, %v9269_v7  ;;  %v9320_v21 = vand.u32 4294901760, %v4146_v45 }
0x1d80   :  { %4171 = vmatpush.msra.mxu0 %v9231_v22  ;;  %v4209_v2 = vand.u32 4294901760, %v4208_v32  ;;  %v4215_v42 = vand.u32 4294901760, %v4214_v6  ;;  %4314 = vmatpush.msrb.mxu2 %v9253_v47  ;;  %v4221_v0 = vand.u32 4294901760, %v4220_v29  ;;  %v10879_v4 = vand.u32 4294901760, %v9294_v62 }
0x1d81   :  { %4367 = vmatpush.msrb.mxu3 %v9231_v22  ;;  %v9324_v40 = vsub.f32 %v4148_v60, %v9276_v38  ;;  %v9326_v53 = vand.u32 4294901760, %v4145_v58  ;;  %v4227_v43 = vand.u32 4294901760, %v4226_v9  ;;  %v4238_v14 = vsub.f32 %v9280_v28, %v10882_v23 }
0x1d82   :  { %4173 = vmatpush.msra.mxu0 %v9233_v27  ;;  %4210 = vmatpush.msra.mxu1 %v4209_v2  ;;  %v10878_v26 = vand.u32 4294901760, %v9315_v44  ;;  %v9342_v36 = vsub.f32 %v4147_v8, %v9296_v63  ;;  %v4233_v11 = vand.u32 4294901760, %v4232_v15  ;;  %v4244_v34 = vsub.f32 %v9294_v62, %v10879_v4  ;;  %v4159_v15 = vld [vmem:[%s10858_s8 + $0x90] sm:$0xff] }
0x1d83   :  { %4317 = vmatpush.msrb.mxu2 %v9260_v12  ;;  %4369 = vmatpush.msrb.mxu3 %v9233_v27  ;;  %v9350_v35 = vand.u32 4294901760, %v4144_v37  ;;  %v10877_v18 = vand.u32 4294901760, %v9324_v40  ;;  %v9357_v56 = vsub.f32 %v4146_v45, %v9320_v21  ;;  %v9359_v25 = vand.u32 4294901760, %v4143_v54  ;;  %v4139_v45 = vld [vmem:[#allocation4] sm:$0xff] }
0x1d84   :  { %4175 = vmatpush.msra.mxu0 %v9235_v61  ;;  %4216 = vmatpush.msra.mxu1 %v4215_v42  ;;  %v9363_v51 = vsub.f32 %v4145_v58, %v9326_v53  ;;  %v4239_v30 = vand.u32 4294901760, %v4238_v14  ;;  %v4250_v52 = vsub.f32 %v9315_v44, %v10878_v26  ;;  %v10876_v46 = vand.u32 4294901760, %v9342_v36 }
0x1d85   :  { %4320 = vmatpush.msrb.mxu2 %v9263_v10  ;;  %4371 = vmatpush.msrb.mxu3 %v9235_v61  ;;  %v9374_v41 = vand.u32 4294901760, %v4142_v49  ;;  %v4245_v1 = vand.u32 4294901760, %v4244_v34  ;;  %v4256_v5 = vsub.f32 %v9324_v40, %v10877_v18  ;;  %v10875_v60 = vand.u32 4294901760, %v9357_v56 }
0x1d86   :  { %4177 = vmatpush.msra.mxu0 %v9250_v39  ;;  %4222 = vmatpush.msra.mxu1 %v4221_v0  ;;  %v9387_v8 = vsub.f32 %v4144_v37, %v9350_v35  ;;  %v9389_v32 = vand.u32 4294901760, %v4141_v31  ;;  %v10874_v6 = vand.u32 4294901760, %v9363_v51  ;;  %v9394_v29 = vsub.f32 %v4143_v54, %v9359_v25  ;;  %v4140_v54 = vld [vmem:[#allocation4 + $0x8] sm:$0xff] }
0x1d87   :  { %4323 = vmatpush.msrb.mxu2 %v9280_v28  ;;  %4373 = vmatpush.msrb.mxu3 %v9250_v39  ;;  %v4251_v2 = vand.u32 4294901760, %v4250_v52  ;;  %v4262_v42 = vsub.f32 %v9342_v36, %v10876_v46  ;;  %v9401_v9 = vand.u32 4294901760, %v4160_v24  ;;  %v9405_v58 = vsub.f32 %v4142_v49, %v9374_v41 }
0x1d88   :  { %4179 = vmatpush.msra.mxu0 %v9269_v7  ;;  %4228 = vmatpush.msra.mxu1 %v4227_v43  ;;  %v4257_v0 = vand.u32 4294901760, %v4256_v5  ;;  %v4268_v37 = vsub.f32 %v9357_v56, %v10875_v60  ;;  %v10881_v43 = vand.u32 4294901760, %v9387_v8  ;;  %v9416_v14 = vand.u32 4294901760, %v4139_v45 }
0x1d89   :  { %4326 = vmatpush.msrb.mxu2 %v9294_v62  ;;  %4375 = vmatpush.msrb.mxu3 %v9269_v7  ;;  %v10880_v34 = vand.u32 4294901760, %v9394_v29  ;;  %v9424_v49 = vsub.f32 %v4141_v31, %v9389_v32  ;;  %v4263_v52 = vand.u32 4294901760, %v4262_v42  ;;  %v9434_v5 = vsub.f32 %v4160_v24, %v9401_v9  ;;  %v4157_v31 = vld [vmem:[%s10858_s8 + $0x80] sm:$0xff] }
0x1d8a   :  { %4181 = vmatpush.msra.mxu0 %v9276_v38  ;;  %4234 = vmatpush.msra.mxu1 %v4233_v11  ;;  %v4274_v11 = vsub.f32 %v9363_v51, %v10874_v6  ;;  %v10884_v6 = vand.u32 4294901760, %v9405_v58  ;;  %v4162_v60 = vsel %vm491_vm2, %v4140_v54, 0  ;;  %v4280_v24 = vsub.f32 %v9387_v8, %v10881_v43 }
0x1d8b   :  { %4329 = vmatpush.msrb.mxu2 %v9315_v44  ;;  %4377 = vmatpush.msrb.mxu3 %v9276_v38  ;;  %v4197_v42 = vsub.f32 %v4139_v45, %v9416_v14  ;;  %v4286_v26 = vsub.f32 %v9394_v29, %v10880_v34  ;;  %v10883_v4 = vand.u32 4294901760, %v9424_v49  ;;  %v9463_v54 = vand.u32 4294901760, %v4162_v60 }
0x1d8c   :  { %4183 = vmatpush.msra.mxu0 %v9296_v63  ;;  %4240 = vmatpush.msra.mxu1 %v4239_v30  ;;  %v4158_v30 = vld [vmem:[%s10858_s8 + $0x88] sm:$0xff]  ;;  %v4275_v18 = vand.u32 4294901760, %v4274_v11  ;;  %v4281_v11 = vand.u32 4294901760, %v4280_v24  ;;  %v10938_v10 = vand.u32 4294901760, %v9405_v58 }
0x1d8d   :  { %4332 = vmatpush.msrb.mxu2 %v9324_v40  ;;  %4379 = vmatpush.msrb.mxu3 %v9296_v63  ;;  %v9448_v46 = vand.u32 4294901760, %v4158_v30  ;;  %v4198_v34 = vand.u32 4294901760, %v4197_v42  ;;  %v4287_v43 = vand.u32 4294901760, %v4286_v26  ;;  %v4298_v23 = vsub.f32 %v9424_v49, %v10883_v4 }
0x1d8e   :  { %4185 = vmatpush.msra.mxu0 %v9320_v21  ;;  %4246 = vmatpush.msra.mxu1 %v4245_v1  ;;  %v9431_v1 = vand.u32 4294901760, %v4159_v15 }
0x1d8f   :  { %4335 = vmatpush.msrb.mxu2 %v9342_v36  ;;  %4381 = vmatpush.msrb.mxu3 %v9320_v21 }
0x1d90   :  { %4187 = vmatpush.msra.mxu0 %v9326_v53  ;;  %4252 = vmatpush.msra.mxu1 %v4251_v2  ;;  %v4269_v2 = vand.u32 4294901760, %v4268_v37  ;;  %v9459_v45 = vsub.f32 %v4159_v15, %v9431_v1  ;;  %v9461_v37 = vand.u32 4294901760, %v4157_v31  ;;  %v9472_v15 = vsub.f32 %v4158_v30, %v9448_v46 }
0x1d91   :  { %4338 = vmatpush.msrb.mxu2 %v9357_v56  ;;  %4383 = vmatpush.msrb.mxu3 %v9326_v53  ;;  %v9485_v30 = vsub.f32 %v4162_v60, %v9463_v54  ;;  %v4299_v60 = vand.u32 4294901760, %v4298_v23 }
0x1d92   :  { %4189 = vmatpush.msra.mxu0 %v9350_v35  ;;  %4258 = vmatpush.msra.mxu1 %v4257_v0  ;;  %v4548_v0 = vand.u32 4294901760, %v9434_v5  ;;  %v4554_v24 = vand.u32 4294901760, %v9459_v45  ;;  %v9488_v26 = vsub.f32 %v4157_v31, %v9461_v37 }
0x1d93   :  { %4341 = vmatpush.msrb.mxu2 %v9363_v51  ;;  %4385 = vmatpush.msrb.mxu3 %v9350_v35 }
0x1d94   :  { %4191 = vmatpush.msra.mxu0 %v9359_v25  ;;  %4264 = vmatpush.msra.mxu1 %v4263_v52  ;;  %v4292_v52 = vsub.f32 %v9405_v58, %v10884_v6  ;;  %v4560_v6 = vand.u32 4294901760, %v9472_v15  ;;  %v4555_v19 = vsub.f32 %v9459_v45, %v4554_v24 }
0x1d95   :  { %4344 = vmatpush.msrb.mxu2 %v9387_v8  ;;  %4387 = vmatpush.msrb.mxu3 %v9359_v25 }
0x1d96   :  { %4193 = vmatpush.msra.mxu0 %v9374_v41  ;;  %4270 = vmatpush.msra.mxu1 %v4269_v2  ;;  %v4549_v2 = vsub.f32 %v9434_v5, %v4548_v0  ;;  %v4293_v4 = vand.u32 4294901760, %v4292_v52  ;;  %v4556_v23 = vand.u32 4294901760, %v4555_v19 }
0x1d97   :  { %4347 = vmatpush.msrb.mxu2 %v9394_v29  ;;  %4389 = vmatpush.msrb.mxu3 %v9374_v41 }
0x1d98   :  { %4195 = vmatpush.msra.mxu0 %v9389_v32  ;;  %4276 = vmatpush.msra.mxu1 %v4275_v18  ;;  %v4199_v18 = vsub.f32 %v4197_v42, %v4198_v34  ;;  %v4550_v31 = vand.u32 4294901760, %v4549_v2 }
0x1d99   :  { %4350 = vmatpush.msrb.mxu2 %v9405_v58  ;;  %4391 = vmatpush.msrb.mxu3 %v9389_v32 }
0x1d9a   :  { %4402 = vmatpush.msrb.mxu0 %v4207_v48  ;;  %4282 = vmatpush.msra.mxu1 %v4281_v11  ;;  %v4527_v48 = vand.u32 4294901760, %v9485_v30  ;;  %v4566_v11 = vand.u32 4294901760, %v9488_v26  ;;  %v4200_v55 = vand.u32 4294901760, %v4199_v18 }
0x1d9b   :  { %4353 = vmatpush.msrb.mxu2 %v9424_v49  ;;  %4395 = vmatmul.f32.vlgmr.msrb.gmra.mxu3 %v4198_v34  ;;  %v10930_v34 = vand.u32 4294901760, %v9294_v62 }
0x1d9c   :  { %4406 = vmatpush.msrb.mxu0 %v4213_v3  ;;  %4288 = vmatpush.msra.mxu1 %v4287_v43  ;;  %v4561_v3 = vsub.f32 %v9472_v15, %v4560_v6  ;;  %v4528_v47 = vsub.f32 %v9485_v30, %v4527_v48 }
0x1d9d   :  { %4356 = vmatmul.f32.vlgmr.msrb.gmra.mxu2 %v4197_v42  ;;  %4551 = vmatpush.msra.mxu3 %v4550_v31 }
0x1d9e   :  { %4410 = vmatpush.msrb.mxu0 %v4219_v17  ;;  %4518 = vmatpush.msra.mxu2 %v9401_v9  ;;  %v4567_v17 = vsub.f32 %v9488_v26, %v4566_v11  ;;  %v4562_v12 = vand.u32 4294901760, %v4561_v3 }
0x1d9f   :  { %4294 = vmatpush.msra.mxu1 %v4293_v4  ;;  %4201 = vmatmul.f32.vlgmr.msra.gmra.mxu0 %v4200_v55  ;;  %v4529_v4 = vand.u32 4294901760, %v4528_v47  ;;  %v4744_v47 = vld [vmem:[%s10859_s9 + $0x10] sm:$0xff] }
0x1da0   :  { %4414 = vmatpush.msrb.mxu0 %v4225_v59  ;;  %4520 = vmatpush.msra.mxu2 %v9431_v1  ;;  %v10929_v59 = vand.u32 4294901760, %v9280_v28  ;;  %v4568_v43 = vand.u32 4294901760, %v4567_v17 }
0x1da1   :  { %4300 = vmatpush.msra.mxu1 %v4299_v60  ;;  %4557 = vmatpush.msra.mxu3 %v4556_v23  ;;  %v4745_v23 = vld [vmem:[%s10859_s9 + $0x18] sm:$0xff] }
0x1da2   :  { %4418 = vmatpush.msrb.mxu0 %v4231_v50  ;;  %4302 = vmatmul.f32.vlgmr.msra.gmra.mxu1 %v9416_v14  ;;  %v4760_v17 = vand.u32 4294901760, %v4745_v23 }
0x1da3   :  { %4469 = vmatpush.msrb.mxu1 %v9216_v20  ;;  %4522 = vmatpush.msra.mxu2 %v9448_v46  ;;  %v10931_v20 = vand.u32 4294901760, %v9315_v44 }
0x1da4   :  { %4422 = vmatpush.msrb.mxu0 %v10929_v59  ;;  %4563 = vmatpush.msra.mxu3 %v4562_v12  ;;  %v4762_v12 = vand.u32 4294901760, %v4744_v47  ;;  %v4790_v59 = vsub.f32 %v4745_v23, %v4760_v17 }
0x1da5   :  { %4471 = vmatpush.msrb.mxu1 %v9218_v13  ;;  %4524 = vmatpush.msra.mxu2 %v9461_v37  ;;  %v10932_v13 = vand.u32 4294901760, %v9324_v40 }
0x1da6   :  { %4426 = vmatpush.msrb.mxu0 %v10930_v34  ;;  %4530 = vmatmul.f32.vlgmr.msra.gmra.mxu2 %v4529_v4  ;;  %v4796_v4 = vsub.f32 %v4744_v47, %v4762_v12 }
0x1da7   :  { %4473 = vmatpush.msrb.mxu1 %v9220_v33  ;;  %4569 = vmatpush.msra.mxu3 %v4568_v43  ;;  %v10933_v33 = vand.u32 4294901760, %v9342_v36  ;;  %v4791_v43 = vand.u32 4294901760, %v4790_v59 }
0x1da8   :  { %4430 = vmatpush.msrb.mxu0 %v10931_v20  ;;  %4589 = vmatpush.msrb.mxu2 %v9434_v5  ;;  %v4797_v34 = vand.u32 4294901760, %v4796_v4 }
0x1da9   :  { %4475 = vmatpush.msrb.mxu1 %v9231_v22  ;;  %4571 = vmatmul.f32.vlgmr.msra.gmra.mxu3 %v9463_v54  ;;  %v10934_v22 = vand.u32 4294901760, %v9357_v56  ;;  %v4792_v20 = vsub.f32 %v4790_v59, %v4791_v43 }
0x1daa   :  { %4434 = vmatpush.msrb.mxu0 %v10932_v13  ;;  %4592 = vmatpush.msrb.mxu2 %v9459_v45  ;;  %v4798_v13 = vsub.f32 %v4796_v4, %v4797_v34 }
0x1dab   :  { %4477 = vmatpush.msrb.mxu1 %v9233_v27  ;;  %4618 = vmatpush.msrb.mxu3 %v9401_v9  ;;  %v10935_v27 = vand.u32 4294901760, %v9363_v51 }
0x1dac   :  { %4438 = vmatpush.msrb.mxu0 %v10933_v33  ;;  %4595 = vmatpush.msrb.mxu2 %v9472_v15  ;;  %v4793_v33 = vand.u32 4294901760, %v4792_v20 }
0x1dad   :  { %4479 = vmatpush.msrb.mxu1 %v9235_v61  ;;  %4620 = vmatpush.msrb.mxu3 %v9431_v1  ;;  %v10936_v61 = vand.u32 4294901760, %v9387_v8 }
0x1dae   :  { %4442 = vmatpush.msrb.mxu0 %v10934_v22  ;;  %4598 = vmatpush.msrb.mxu2 %v9488_v26  ;;  %v4799_v22 = vand.u32 4294901760, %v4798_v13 }
0x1daf   :  { %4481 = vmatpush.msrb.mxu1 %v9250_v39  ;;  %4622 = vmatpush.msrb.mxu3 %v9448_v46  ;;  %v10937_v39 = vand.u32 4294901760, %v9394_v29 }
0x1db0   :  { %4446 = vmatpush.msrb.mxu0 %v10935_v27  ;;  %4601 = vmatmul.f32.vlgmr.msrb.gmra.mxu2 %v9485_v30 }
0x1db1   :  { %4483 = vmatpush.msrb.mxu1 %v9269_v7  ;;  %4624 = vmatpush.msrb.mxu3 %v9461_v37  ;;  %v10939_v7 = vand.u32 4294901760, %v9424_v49 }
0x1db2   :  { %4450 = vmatpush.msrb.mxu0 %v10936_v61  ;;  %4647 = vmatpush.msra.mxu2 %v4548_v0 }
0x1db3   :  { %4485 = vmatpush.msrb.mxu1 %v9276_v38  ;;  %4628 = vmatmul.f32.vlgmr.msrb.gmra.mxu3 %v4527_v48 }
0x1db4   :  { %4454 = vmatpush.msrb.mxu0 %v10937_v39  ;;  %4651 = vmatpush.msra.mxu2 %v4554_v24  ;;  %v4743_v39 = vld [vmem:[%s10859_s9 + $0x8] sm:$0xff] }
0x1db5   :  { %4487 = vmatpush.msrb.mxu1 %v9296_v63  ;;  %4678 = vmatpush.msra.mxu3 %v9401_v9 }
0x1db6   :  { %4458 = vmatpush.msrb.mxu0 %v10938_v10  ;;  %4655 = vmatpush.msra.mxu2 %v4560_v6  ;;  %v4764_v10 = vand.u32 4294901760, %v4743_v39 }
0x1db7   :  { %4489 = vmatpush.msrb.mxu1 %v9320_v21  ;;  %4680 = vmatpush.msra.mxu3 %v9431_v1  ;;  %v4710_v1 = vld [vmem:[#allocation5] sm:$0xff] }
0x1db8   :  { %4462 = vmatpush.msrb.mxu0 %v10939_v7  ;;  %4659 = vmatpush.msra.mxu2 %v4566_v11  ;;  %v4742_v7 = vld [vmem:[%s10859_s9] sm:$0xff] }
0x1db9   :  { %4491 = vmatpush.msrb.mxu1 %v9326_v53  ;;  %4464 = vmatmul.f32.vlgmr.msrb.gmra.mxu0 %v9416_v14 }
0x1dba   :  { %4682 = vmatpush.msra.mxu3 %v9448_v46  ;;  %4661 = vmatmul.f32.vlgmr.msra.gmra.mxu2 %v9463_v54 }
0x1dbb   :  { %4493 = vmatpush.msrb.mxu1 %v9350_v35  ;;  %4761 = vmatpush.msrb.mxu2 %v4760_v17 }
0x1dbc   :  { %4684 = vmatpush.msra.mxu3 %v9461_v37  ;;  %4832 = vmatpush.msra.mxu0 %v4790_v59 }
0x1dbd   :  { %4495 = vmatpush.msrb.mxu1 %v9359_v25  ;;  %4686 = vmatmul.f32.vlgmr.msra.gmra.mxu3 %v9463_v54 }
0x1dbe   :  { %4763 = vmatpush.msrb.mxu2 %v4762_v12  ;;  %4835 = vmatpush.msra.mxu0 %v4796_v4 }
0x1dbf   :  { %4497 = vmatpush.msrb.mxu1 %v9374_v41  ;;  %4794 = vmatpush.msrb.mxu3 %v4793_v33 }
0x1dc0   :  { %4765 = vmatpush.msrb.mxu2 %v4764_v10 }
0x1dc1   :  { %4499 = vmatpush.msrb.mxu1 %v9389_v32  ;;  %4800 = vmatpush.msrb.mxu3 %v4799_v22 }
0x1dc2   :  { %4501 = vmatmul.f32.vlgmr.msrb.gmra.mxu1 %v9416_v14 }
0x1dc3   :  { %4861 = vmatpush.msra.mxu1 %v4760_v17 }
0x1dc5   :  { %4863 = vmatpush.msra.mxu1 %v4762_v12 }
0x1dc7   :  { %4865 = vmatpush.msra.mxu1 %v4764_v10 }
0x1e1c   :  { %v4202_v28 = vpop.f32.mrf.mxu0 }
0x1e1e   :  { %v4396_v50 = vpop.f32.mrf.mxu3 }
0x1e1f   :  { %v4303_v62 = vpop.f32.mrf.mxu1 }
0x1e20   :  { %v4357_v38 = vpop.f32.mrf.mxu2  ;;  %v4304_v44 = vadd.f32 %v4303_v62, %v4202_v28 }
0x1e22   :  { %v4358_v40 = vadd.f32 %v4357_v38, %v4304_v44  ;;  %v4802_v38 = vsub.f32 %v4743_v39, %v4764_v10 }
0x1e24   :  { %v4397_v36 = vadd.f32 %v4396_v50, %v4358_v40  ;;  %v4766_v50 = vand.u32 4294901760, %v4742_v7  ;;  %v4803_v28 = vand.u32 4294901760, %v4802_v38  ;;  %4838 = vmatpush.msra.mxu0 %v4802_v38 }
0x1e26   :  { %v4808_v62 = vsub.f32 %v4742_v7, %v4766_v50  ;;  %4867 = vmatpush.msra.mxu1 %v4766_v50  ;;  %4767 = vmatpush.msrb.mxu2 %v4766_v50 }
0x1e28   :  { %v4809_v44 = vand.u32 4294901760, %v4808_v62  ;;  %4841 = vmatpush.msra.mxu0 %v4808_v62  ;;  %4890 = vmatpush.msra.mxu2 %v4791_v43 }
0x1e29   :  { %v4531_v63 = vpop.f32.mrf.mxu2 }
0x1e2a   :  { %v4810_v40 = vsub.f32 %v4808_v62, %v4809_v44  ;;  %4894 = vmatpush.msra.mxu2 %v4797_v34 }
0x1e2c   :  { %v4572_v21 = vpop.f32.mrf.mxu3  ;;  %4898 = vmatpush.msra.mxu2 %v4803_v28 }
0x1e2e   :  { %4902 = vmatpush.msra.mxu2 %v4809_v44 }
0x1e33   :  { %v4602_v35 = vpop.f32.mrf.mxu2 }
0x1e36   :  { %v4465_v53 = vpop.f32.mrf.mxu0  ;;  %v4629_v51 = vpop.f32.mrf.mxu3 }
0x1e37   :  { %v4466_v56 = vadd.f32 %v4465_v53, %v4397_v36  ;;  %v4811_v53 = vand.u32 4294901760, %v4810_v40 }
0x1e3d   :  { %v4662_v6 = vpop.f32.mrf.mxu2 }
0x1e3f   :  { %v4502_v25 = vpop.f32.mrf.mxu1 }
0x1e40   :  { %v4503_v46 = vadd.f32 %v4502_v25, %v4466_v56  ;;  %v4687_v9 = vpop.f32.mrf.mxu3 }
0x1e42   :  { %v4532_v41 = vadd.f32 %v4531_v63, %v4503_v46  ;;  %v4804_v63 = vsub.f32 %v4802_v38, %v4803_v28 }
0x1e44   :  { %v4573_v8 = vadd.f32 %v4572_v21, %v4532_v41  ;;  %v4805_v21 = vand.u32 4294901760, %v4804_v63 }
0x1e46   :  { %v4603_v32 = vadd.f32 %v4602_v35, %v4573_v8  ;;  %4806 = vmatpush.msrb.mxu3 %v4805_v21 }
0x1e48   :  { %v4630_v29 = vadd.f32 %v4629_v51, %v4603_v32  ;;  %4812 = vmatpush.msrb.mxu3 %v4811_v53 }
0x1e4a   :  { %v4663_v58 = vadd.f32 %v4662_v6, %v4630_v29  ;;  %4921 = vmatpush.msra.mxu3 %v4760_v17 }
0x1e4c   :  { %v4688_v14 = vadd.f32 %v4687_v9, %v4663_v58  ;;  %4923 = vmatpush.msra.mxu3 %v4762_v12 }
0x1e4e   :  { %7635 = vtanh.f32 %v4688_v14  ;;  %v7508_v5 = vmul.f32 -1.442695, %v4688_v14  ;;  %4925 = vmatpush.msra.mxu3 %v4764_v10 }
0x1e50   :  { %7637 = vpow2.f32 %v7508_v5  ;;  %4927 = vmatpush.msra.mxu3 %v4766_v50 }
0x1e54   :  { %v7636_v49 = vpop.eup %7635 }
0x1e55   :  { %4717 = vrot.lane.b32.xlu0 %v7636_v49, %s7714_s6 }
0x1e56   :  { %v7638_v42 = vpop.eup %7637 }
0x1e57   :  { %v4693_v0 = vadd.f32 1.0, %v7638_v42 }
0x1e59   :  { %7639 = vrcp.f32 %v4693_v0  ;;  %v4705_v2 = vand.u32 2147483648, %v4693_v0  ;;  %vm4699_vm1 = vweird.f32 %v4693_v0  ;;  %v4703_v24 = vand.u32 2147483647, %v4693_v0 }
0x1e5b   :  { %v4706_v26 = vor.u32 1.1754944e-38, %v4705_v2  ;;  %vm4704_vm4 = vcmp.eq.f32.partialorder %v4703_v24, 8.507059e+37 }
0x1e5d   :  { %4712 = vrot.lane.b32.xlu0 %v4710_v1, %s7711_s17 }
0x1e5f   :  { %v7640_v45 = vpop.eup %7639 }
0x1e60   :  { %v4695_v37 = vmul.f32 %v7640_v45, %v4693_v0  ;;  %vm4700_vm0 = vweird.f32 %v7640_v45 }
0x1e61   :  { %vm4701_vm3 = vmor %vm4699_vm1, %vm4700_vm0 }
0x1e62   :  { %v4696_v54 = vsub.f32 1.0, %v4695_v37 }
0x1e64   :  { %v4697_v52 = vmul.f32 %v7640_v45, %v4696_v54 }
0x1e66   :  { %v4698_v15 = vadd.f32 %v7640_v45, %v4697_v52 }
0x1e68   :  { %v4702_v30 = vsel %vm4701_vm3, %v7640_v45, %v4698_v15 }
0x1e69   :  { %v4707_v60 = vsel %vm4704_vm4, %v4706_v26, %v4702_v30 }
0x1ec7   :  { %v4718_v18 = vpop.permute.xlu0 %4717 }
0x1ec8   :  { %v4720_v31 = vmul.f32 %v4718_v18, %v4707_v60 }
0x1eca   :  { %4722 = vrot.lane.b32.xlu1 %v4720_v31, %s7711_s17 }
0x1ecf   :  { %v4713_v19 = vpop.permute.xlu0 %4712 }
0x1ed0   :  { %v4715_v48 = vmul.f32 %v4713_v19, %v4707_v60 }
0x1f3c   :  { %v4723_v11 = vpop.permute.xlu1 %4722 }
0x1f3d   :  { %v4725_v55 = vadd.f32 %v4723_v11, %v4715_v48 }
0x1f3f   :  { %7641 = vtanh.f32 %v4725_v55 }
0x1f45   :  { %v7642_v3 = vpop.eup %7641 }
0x1f46   :  { %4728 = vrot.lane.b32.xlu1 %v7642_v3, %s7714_s6 }
0x1fb8   :  { %v4729_v27 = vpop.permute.xlu1 %4728 }
0x1fb9   :  { %v4731_v61 = vmul.f32 %v4729_v27, %v4707_v60 }
0x1fbb   :  { %4738 = vrot.lane.b32.xlu2 %v4731_v61, %s7711_s17 }
0x1fc3   :  { %4733 = vrot.lane.b32.xlu2 %v4725_v55, %s7709_s1 }
0x2015   :  { %v4739_v36 = vpop.permute.xlu2 %4738 }
0x2016   :  { %4741 = vst.msk [vmem:[#allocation4 + $0x8] sm:$0xff] %vm491_vm2, %v4739_v36  ;;  %v4746_v35 = vsel %vm491_vm2, %v4739_v36, 0 }
0x2017   :  { %v4768_v56 = vand.u32 4294901760, %v4746_v35 }
0x2019   :  { %v4769_v25 = vsub.f32 %v4746_v35, %v4768_v56  ;;  %4814 = vmatmul.f32.vlgmr.msrb.gmra.mxu3 %v4768_v56 }
0x201b   :  { %v4770_v51 = vand.u32 4294901760, %v4769_v25  ;;  %4844 = vmatmul.f32.vlgmr.msra.gmra.mxu0 %v4769_v25 }
0x201d   :  { %v4771_v46 = vsub.f32 %v4769_v25, %v4770_v51  ;;  %4871 = vmatmul.f32.vlgmr.msra.gmra.mxu1 %v4770_v51  ;;  %v4734_v41 = vpop.permute.xlu2 %4733 }
0x201e   :  { %4736 = vst.msk [vmem:[#allocation5] sm:$0xff] %vm491_vm2, %v4734_v41 }
0x201f   :  { %v4772_v8 = vand.u32 4294901760, %v4771_v46 }
0x2021   :  { %4773 = vmatmul.f32.vlgmr.msrb.gmra.mxu2 %v4772_v8  ;;  %4929 = vmatmul.f32.vlgmr.msra.gmra.mxu3 %v4768_v56 }
0x2029   :  { %4904 = vmatmul.f32.vlgmr.msra.gmra.mxu2 %v4768_v56 }
0x2098   :  { %v4845_v58 = vpop.f32.mrf.mxu0 }
0x209a   :  { %v4872_v49 = vpop.f32.mrf.mxu1 }
0x209c   :  { %v4815_v32 = vpop.f32.mrf.mxu3 }
0x20a4   :  { %v4774_v6 = vpop.f32.mrf.mxu2  ;;  %v4930_v0 = vpop.f32.mrf.mxu3 }
0x20a5   :  { %v4775_v29 = vadd.f32 %v4774_v6, %v8784_v57 }
0x20a7   :  { %v4816_v9 = vadd.f32 %v4815_v32, %v4775_v29 }
0x20a9   :  { %v4846_v14 = vadd.f32 %v4845_v58, %v4816_v9 }
0x20ab   :  { %v4873_v1 = vadd.f32 %v4872_v49, %v4846_v14 }
0x20ac   :  { %v4905_v5 = vpop.f32.mrf.mxu2 }
0x20ad   :  { %v4906_v42 = vadd.f32 %v4905_v5, %v4873_v1  ;;  %4939 = sbr.rel (%p7511_p4) target bundleno = 8372 (0x20b4), region = 69 }
0x20af   :  { %v4931_v45 = vadd.f32 %v4930_v0, %v4906_v42 }
0x20b1   :  { %7509 = vst [vmem:[%s10861_s11 + $0x10] sm:$0xff] %v4931_v45 }
0x20b2   :  { %v7512_v37 = vld [vmem:[%s10855_s5 + $0x10] sm:$0xff] }
0x20b3   :  { %4942 = vst [vmem:[#allocation4] sm:$0xff] %v7512_v37 }
0x20b4 PF:  { %s7513_s19 = sld [smem:[#allocation6 + $0x2]] }
0x20ba   :  { %p7514_p5 = scmp.ne.s32.totalorder %s7513_s19, 0 }
0x20bc   :  { %4947 = sbr.rel (%p7514_p5) target bundleno = 8749 (0x222d), region = 73 }
0x20c1   :  { %v4948_v54 = vsel %vm2475_vm7, %v4931_v45, -1e+30  ;;  %v7717_v3 = vmov 0.0  }
0x20c2   :  { %4949 = vmax.xlane.f32.xlu0 %v4948_v54 }
0x2135   :  { %v4950_v52 = vpop.xlane.xlu0 %4949 }
0x2136   :  { %vm4951_vm5 = vcmp.eq.f32.partialorder %v4948_v54, %v4950_v52 }
0x2137   :  { %v4952_v15 = vsel %vm4951_vm5, %v8393_v16, 128 }
0x2138   :  { %v4954_v2 = vshra.s32 %v4952_v15, 16  ;;  %v4953_v30 = vand.u32 65535, %v4952_v15 }
0x213a   :  { %v4956_v24 = vcvt.s32.f32 %v4954_v2  ;;  %v4955_v18 = vcvt.s32.f32 %v4953_v30 }
0x213c   :  { %4957 = vmin.xlane.f32.xlu0 %v4956_v24 }
0x21af   :  { %v4958_v26 = vpop.xlane.xlu0 %4957 }
0x21b0   :  { %vm4959_vm6 = vcmp.eq.f32.partialorder %v4956_v24, %v4958_v26  ;;  %v4964_v31 = vcvt.f32.s32 %v4958_v26 }
0x21b1   :  { %v4960_v60 = vsel %vm4959_vm6, %v4955_v18, inf }
0x21b2   :  { %4961 = vmin.xlane.f32.xlu1 %v4960_v60  ;;  %v4965_v48 = vshll.u32 %v4964_v31, 16 }
0x2225   :  { %v4962_v19 = vpop.xlane.xlu1 %4961 }
0x2226   :  { %v4963_v11 = vcvt.f32.s32 %v4962_v19 }
0x2228   :  { %v4966_v55 = vadd.s32 %v4965_v48, %v4963_v11 }
0x222a   :  { %vm4967_vm9 = vcmp.eq.s32.totalorder %v8393_v16, %v4966_v55 }
0x222b   :  { %v7515_v23 = vsel %vm4967_vm9, 1.0, %v7717_v3 }
0x222c   :  { %4970 = vst [vmem:[#allocation4] sm:$0xff] %v7515_v23 }
0x222d PF:  { %v4988_v47 = vld [vmem:[%s10858_s8 + $0x78] sm:$0xff]  ;;  %v4987_v17 = vld [vmem:[%s10858_s8 + $0x70] sm:$0xff]  ;;  %v4986_v12 = vld [vmem:[%s10858_s8 + $0x68] sm:$0xff]  ;;  %s7518_s22 = sld [smem:[#allocation6 + $0x3]] }
0x222e   :  { %v9626_v59 = vand.u32 4294901760, %v4988_v47  ;;  %v9628_v4 = vand.u32 4294901760, %v4987_v17  ;;  %v9630_v43 = vand.u32 4294901760, %v4986_v12  ;;  %v4985_v34 = vld [vmem:[%s10858_s8 + $0x60] sm:$0xff]  ;;  %v4984_v20 = vld [vmem:[%s10858_s8 + $0x58] sm:$0xff]  ;;  %v4983_v13 = vld [vmem:[%s10858_s8 + $0x50] sm:$0xff] }
0x222f   :  { %v9641_v33 = vand.u32 4294901760, %v4985_v34  ;;  %v9643_v22 = vand.u32 4294901760, %v4984_v20  ;;  %v9645_v27 = vand.u32 4294901760, %v4983_v13  ;;  %v4982_v61 = vld [vmem:[%s10858_s8 + $0x48] sm:$0xff]  ;;  %v4981_v39 = vld [vmem:[%s10858_s8 + $0x40] sm:$0xff]  ;;  %v4980_v28 = vld [vmem:[%s10858_s8 + $0x38] sm:$0xff] }
0x2230   :  { %4997 = vmatpush.msrb.mxu0 %v9626_v59  ;;  %v9655_v10 = vsub.f32 %v4988_v47, %v9626_v59  ;;  %v9658_v7 = vsub.f32 %v4987_v17, %v9628_v4  ;;  %v9660_v38 = vand.u32 4294901760, %v4982_v61  ;;  %v9663_v50 = vsub.f32 %v4986_v12, %v9630_v43  ;;  %5193 = vmatpush.msrb.mxu3 %v9626_v59  ;;  %v4979_v36 = vld [vmem:[%s10858_s8 + $0x30] sm:$0xff]  ;;  %v4978_v29 = vld [vmem:[%s10858_s8 + $0x28] sm:$0xff]  ;;  %v4977_v1 = vld [vmem:[%s10858_s8 + $0x20] sm:$0xff] }
0x2231   :  { %v9670_v62 = vsub.f32 %v4985_v34, %v9641_v33  ;;  %v9673_v63 = vsub.f32 %v4984_v20, %v9643_v22  ;;  %v9679_v53 = vand.u32 4294901760, %v4981_v39  ;;  %v9686_v56 = vand.u32 4294901760, %v4980_v28  ;;  %v4976_v15 = vld [vmem:[%s10858_s8 + $0x18] sm:$0xff]  ;;  %v4975_v26 = vld [vmem:[%s10858_s8 + $0x10] sm:$0xff]  ;;  %v4974_v11 = vld [vmem:[%s10858_s8 + $0x8] sm:$0xff] }
0x2232   :  { %4999 = vmatpush.msrb.mxu0 %v9628_v4  ;;  %v5039_v44 = vand.u32 4294901760, %v9655_v10  ;;  %v5045_v21 = vand.u32 4294901760, %v9658_v7  ;;  %v5051_v40 = vand.u32 4294901760, %v9663_v50  ;;  %5140 = vmatpush.msrb.mxu2 %v9655_v10  ;;  %v9690_v51 = vsub.f32 %v4983_v13, %v9645_v27  ;;  %v4973_v34 = vld [vmem:[%s10858_s8] sm:$0xff]  ;;  %v4992_v13 = vld [vmem:[%s10858_s8 + $0x98] sm:$0xff] }
0x2233   :  { %v5057_v35 = vand.u32 4294901760, %v9670_v62  ;;  %v5063_v25 = vand.u32 4294901760, %v9673_v63  ;;  %5195 = vmatpush.msrb.mxu3 %v9628_v4  ;;  %v9704_v32 = vsub.f32 %v4982_v61, %v9660_v38  ;;  %v9706_v6 = vand.u32 4294901760, %v4979_v36  ;;  %p7519_p6 = scmp.eq.s32.totalorder %s7518_s22, 0 }
0x2234   :  { %5001 = vmatpush.msrb.mxu0 %v9630_v43  ;;  %v5040_v46 = vsub.f32 %v9655_v10, %v5039_v44  ;;  %v5046_v41 = vsub.f32 %v9658_v7, %v5045_v21  ;;  %v5052_v8 = vsub.f32 %v9663_v50, %v5051_v40  ;;  %5143 = vmatpush.msrb.mxu2 %v9658_v7  ;;  %v10893_v49 = vand.u32 4294901760, %v9690_v51 }
0x2235   :  { %5197 = vmatpush.msrb.mxu3 %v9630_v43  ;;  %v5058_v14 = vsub.f32 %v9670_v62, %v5057_v35  ;;  %v5064_v5 = vsub.f32 %v9673_v63, %v5063_v25  ;;  %v9725_v42 = vsub.f32 %v4981_v39, %v9679_v53  ;;  %v9730_v45 = vand.u32 4294901760, %v4978_v29 }
0x2236   :  { %5003 = vmatpush.msrb.mxu0 %v9641_v33  ;;  %v5041_v9 = vand.u32 4294901760, %v5040_v46  ;;  %v5047_v58 = vand.u32 4294901760, %v5046_v41  ;;  %5146 = vmatpush.msrb.mxu2 %v9663_v50  ;;  %v5053_v0 = vand.u32 4294901760, %v5052_v8  ;;  %v10890_v37 = vand.u32 4294901760, %v9704_v32 }
0x2237   :  { %5199 = vmatpush.msrb.mxu3 %v9641_v33  ;;  %v9734_v54 = vsub.f32 %v4980_v28, %v9686_v56  ;;  %v9736_v52 = vand.u32 4294901760, %v4977_v1  ;;  %v5059_v2 = vand.u32 4294901760, %v5058_v14  ;;  %v5070_v24 = vsub.f32 %v9690_v51, %v10893_v49 }
0x2238   :  { %5005 = vmatpush.msrb.mxu0 %v9643_v22  ;;  %5042 = vmatpush.msrb.mxu1 %v5041_v9  ;;  %v10889_v30 = vand.u32 4294901760, %v9725_v42  ;;  %v9752_v18 = vsub.f32 %v4979_v36, %v9706_v6  ;;  %v5065_v60 = vand.u32 4294901760, %v5064_v5  ;;  %v5076_v31 = vsub.f32 %v9704_v32, %v10890_v37  ;;  %v4991_v5 = vld [vmem:[%s10858_s8 + $0x90] sm:$0xff] }
0x2239   :  { %5149 = vmatpush.msrb.mxu2 %v9670_v62  ;;  %5201 = vmatpush.msrb.mxu3 %v9643_v22  ;;  %v9760_v19 = vand.u32 4294901760, %v4976_v15  ;;  %v10888_v48 = vand.u32 4294901760, %v9734_v54  ;;  %v9767_v55 = vsub.f32 %v4978_v29, %v9730_v45  ;;  %v9769_v3 = vand.u32 4294901760, %v4975_v26  ;;  %v4971_v29 = vld [vmem:[#allocation4] sm:$0xff] }
0x223a   :  { %5007 = vmatpush.msrb.mxu0 %v9645_v27  ;;  %5048 = vmatpush.msrb.mxu1 %v5047_v58  ;;  %v9773_v23 = vsub.f32 %v4977_v1, %v9736_v52  ;;  %v5071_v47 = vand.u32 4294901760, %v5070_v24  ;;  %v5082_v17 = vsub.f32 %v9725_v42, %v10889_v30  ;;  %v10887_v12 = vand.u32 4294901760, %v9752_v18 }
0x223b   :  { %5152 = vmatpush.msrb.mxu2 %v9673_v63  ;;  %5203 = vmatpush.msrb.mxu3 %v9645_v27  ;;  %v9784_v20 = vand.u32 4294901760, %v4974_v11  ;;  %v5077_v61 = vand.u32 4294901760, %v5076_v31  ;;  %v5088_v39 = vsub.f32 %v9734_v54, %v10888_v48  ;;  %v10886_v28 = vand.u32 4294901760, %v9767_v55 }
0x223c   :  { %5009 = vmatpush.msrb.mxu0 %v9660_v38  ;;  %5054 = vmatpush.msrb.mxu1 %v5053_v0  ;;  %v9797_v36 = vsub.f32 %v4976_v15, %v9760_v19  ;;  %v9799_v46 = vand.u32 4294901760, %v4973_v34  ;;  %v10885_v41 = vand.u32 4294901760, %v9773_v23  ;;  %v9804_v8 = vsub.f32 %v4975_v26, %v9769_v3  ;;  %v4972_v26 = vld [vmem:[#allocation4 + $0x8] sm:$0xff] }
0x223d   :  { %5155 = vmatpush.msrb.mxu2 %v9690_v51  ;;  %5205 = vmatpush.msrb.mxu3 %v9660_v38  ;;  %v5083_v9 = vand.u32 4294901760, %v5082_v17  ;;  %v5094_v58 = vsub.f32 %v9752_v18, %v10887_v12  ;;  %v9811_v14 = vand.u32 4294901760, %v4992_v13  ;;  %v9815_v1 = vsub.f32 %v4974_v11, %v9784_v20 }
0x223e   :  { %5011 = vmatpush.msrb.mxu0 %v9679_v53  ;;  %5060 = vmatpush.msrb.mxu1 %v5059_v2  ;;  %v5089_v0 = vand.u32 4294901760, %v5088_v39  ;;  %v5100_v15 = vsub.f32 %v9767_v55, %v10886_v28  ;;  %v10892_v2 = vand.u32 4294901760, %v9797_v36  ;;  %v9826_v24 = vand.u32 4294901760, %v4971_v29 }
0x223f   :  { %5158 = vmatpush.msrb.mxu2 %v9704_v32  ;;  %5207 = vmatpush.msrb.mxu3 %v9679_v53  ;;  %v10891_v31 = vand.u32 4294901760, %v9804_v8  ;;  %v9834_v11 = vsub.f32 %v4973_v34, %v9799_v46  ;;  %v5095_v17 = vand.u32 4294901760, %v5094_v58  ;;  %v9844_v39 = vsub.f32 %v4992_v13, %v9811_v14  ;;  %v4989_v34 = vld [vmem:[%s10858_s8 + $0x80] sm:$0xff] }
0x2240   :  { %5013 = vmatpush.msrb.mxu0 %v9686_v56  ;;  %5066 = vmatpush.msrb.mxu1 %v5065_v60  ;;  %v5106_v60 = vsub.f32 %v9773_v23, %v10885_v41  ;;  %v10895_v41 = vand.u32 4294901760, %v9815_v1  ;;  %v4994_v28 = vsel %vm491_vm2, %v4972_v26, 0  ;;  %v5112_v13 = vsub.f32 %v9797_v36, %v10892_v2 }
0x2241   :  { %5161 = vmatpush.msrb.mxu2 %v9725_v42  ;;  %5209 = vmatpush.msrb.mxu3 %v9686_v56  ;;  %v5029_v58 = vsub.f32 %v4971_v29, %v9826_v24  ;;  %v5118_v30 = vsub.f32 %v9804_v8, %v10891_v31  ;;  %v10894_v37 = vand.u32 4294901760, %v9834_v11  ;;  %v9873_v26 = vand.u32 4294901760, %v4994_v28 }
0x2242   :  { %5015 = vmatpush.msrb.mxu0 %v9706_v6  ;;  %5072 = vmatpush.msrb.mxu1 %v5071_v47  ;;  %v4990_v47 = vld [vmem:[%s10858_s8 + $0x88] sm:$0xff]  ;;  %v5107_v48 = vand.u32 4294901760, %v5106_v60  ;;  %v5113_v60 = vand.u32 4294901760, %v5112_v13  ;;  %v10949_v63 = vand.u32 4294901760, %v9815_v1 }
0x2243   :  { %5164 = vmatpush.msrb.mxu2 %v9734_v54  ;;  %5211 = vmatpush.msrb.mxu3 %v9706_v6  ;;  %v9858_v12 = vand.u32 4294901760, %v4990_v47  ;;  %v5030_v31 = vand.u32 4294901760, %v5029_v58  ;;  %v5119_v2 = vand.u32 4294901760, %v5118_v30  ;;  %v5130_v49 = vsub.f32 %v9834_v11, %v10894_v37 }
0x2244   :  { %5017 = vmatpush.msrb.mxu0 %v9730_v45  ;;  %5078 = vmatpush.msrb.mxu1 %v5077_v61  ;;  %v9841_v61 = vand.u32 4294901760, %v4991_v5 }
0x2245   :  { %5167 = vmatpush.msrb.mxu2 %v9752_v18  ;;  %5213 = vmatpush.msrb.mxu3 %v9730_v45 }
0x2246   :  { %5019 = vmatpush.msrb.mxu0 %v9736_v52  ;;  %5084 = vmatpush.msrb.mxu1 %v5083_v9  ;;  %v5101_v9 = vand.u32 4294901760, %v5100_v15  ;;  %v9869_v29 = vsub.f32 %v4991_v5, %v9841_v61  ;;  %v9871_v15 = vand.u32 4294901760, %v4989_v34  ;;  %v9882_v5 = vsub.f32 %v4990_v47, %v9858_v12 }
0x2247   :  { %5170 = vmatpush.msrb.mxu2 %v9767_v55  ;;  %5215 = vmatpush.msrb.mxu3 %v9736_v52  ;;  %v9895_v47 = vsub.f32 %v4994_v28, %v9873_v26  ;;  %v5131_v28 = vand.u32 4294901760, %v5130_v49 }
0x2248   :  { %5021 = vmatpush.msrb.mxu0 %v9760_v19  ;;  %5090 = vmatpush.msrb.mxu1 %v5089_v0  ;;  %v5380_v0 = vand.u32 4294901760, %v9844_v39  ;;  %v5386_v13 = vand.u32 4294901760, %v9869_v29  ;;  %v9898_v30 = vsub.f32 %v4989_v34, %v9871_v15 }
0x2249   :  { %5173 = vmatpush.msrb.mxu2 %v9773_v23  ;;  %5217 = vmatpush.msrb.mxu3 %v9760_v19 }
0x224a   :  { %5023 = vmatpush.msrb.mxu0 %v9769_v3  ;;  %5096 = vmatpush.msrb.mxu1 %v5095_v17  ;;  %v5124_v17 = vsub.f32 %v9815_v1, %v10895_v41  ;;  %v5392_v41 = vand.u32 4294901760, %v9882_v5  ;;  %v5387_v10 = vsub.f32 %v9869_v29, %v5386_v13 }
0x224b   :  { %5176 = vmatpush.msrb.mxu2 %v9797_v36  ;;  %5219 = vmatpush.msrb.mxu3 %v9769_v3 }
0x224c   :  { %5025 = vmatpush.msrb.mxu0 %v9784_v20  ;;  %5102 = vmatpush.msrb.mxu1 %v5101_v9  ;;  %v5381_v9 = vsub.f32 %v9844_v39, %v5380_v0  ;;  %v5125_v37 = vand.u32 4294901760, %v5124_v17  ;;  %v5388_v49 = vand.u32 4294901760, %v5387_v10 }
0x224d   :  { %5179 = vmatpush.msrb.mxu2 %v9804_v8  ;;  %5221 = vmatpush.msrb.mxu3 %v9784_v20 }
0x224e   :  { %5027 = vmatpush.msrb.mxu0 %v9799_v46  ;;  %5108 = vmatpush.msrb.mxu1 %v5107_v48  ;;  %v5031_v48 = vsub.f32 %v5029_v58, %v5030_v31  ;;  %v5382_v34 = vand.u32 4294901760, %v5381_v9 }
0x224f   :  { %5182 = vmatpush.msrb.mxu2 %v9815_v1  ;;  %5223 = vmatpush.msrb.mxu3 %v9799_v46 }
0x2250   :  { %5234 = vmatpush.msra.mxu0 %v5039_v44  ;;  %5114 = vmatpush.msrb.mxu1 %v5113_v60  ;;  %v5359_v44 = vand.u32 4294901760, %v9895_v47  ;;  %v5398_v60 = vand.u32 4294901760, %v9898_v30  ;;  %v5032_v7 = vand.u32 4294901760, %v5031_v48 }
0x2251   :  { %5185 = vmatpush.msrb.mxu2 %v9834_v11  ;;  %5227 = vmatmul.f32.vlgmr.msrb.gmra.mxu3 %v5030_v31  ;;  %v10941_v31 = vand.u32 4294901760, %v9704_v32 }
0x2252   :  { %5238 = vmatpush.msra.mxu0 %v5045_v21  ;;  %5120 = vmatpush.msrb.mxu1 %v5119_v2  ;;  %v5393_v21 = vsub.f32 %v9882_v5, %v5392_v41  ;;  %v5360_v50 = vsub.f32 %v9895_v47, %v5359_v44 }
0x2253   :  { %5188 = vmatmul.f32.vlgmr.msrb.gmra.mxu2 %v5029_v58  ;;  %5383 = vmatpush.msra.mxu3 %v5382_v34 }
0x2254   :  { %5242 = vmatpush.msra.mxu0 %v5051_v40  ;;  %5350 = vmatpush.msra.mxu2 %v9811_v14  ;;  %v5399_v40 = vsub.f32 %v9898_v30, %v5398_v60  ;;  %v5394_v62 = vand.u32 4294901760, %v5393_v21 }
0x2255   :  { %5126 = vmatpush.msrb.mxu1 %v5125_v37  ;;  %5033 = vmatmul.f32.vlgmr.msrb.gmra.mxu0 %v5032_v7  ;;  %v5361_v37 = vand.u32 4294901760, %v5360_v50  ;;  %v5576_v50 = vld [vmem:[%s10859_s9 + $0x10] sm:$0xff] }
0x2256   :  { %5246 = vmatpush.msra.mxu0 %v5057_v35  ;;  %5352 = vmatpush.msra.mxu2 %v9841_v61  ;;  %v10940_v35 = vand.u32 4294901760, %v9690_v51  ;;  %v5400_v2 = vand.u32 4294901760, %v5399_v40 }
0x2257   :  { %5132 = vmatpush.msrb.mxu1 %v5131_v28  ;;  %5389 = vmatpush.msra.mxu3 %v5388_v49  ;;  %v5577_v49 = vld [vmem:[%s10859_s9 + $0x18] sm:$0xff] }
0x2258   :  { %5250 = vmatpush.msra.mxu0 %v5063_v25  ;;  %5134 = vmatmul.f32.vlgmr.msrb.gmra.mxu1 %v9826_v24  ;;  %v5592_v40 = vand.u32 4294901760, %v5577_v49 }
0x2259   :  { %5301 = vmatpush.msra.mxu1 %v9626_v59  ;;  %5354 = vmatpush.msra.mxu2 %v9858_v12  ;;  %v10942_v59 = vand.u32 4294901760, %v9725_v42 }
0x225a   :  { %5254 = vmatpush.msra.mxu0 %v10940_v35  ;;  %5395 = vmatpush.msra.mxu3 %v5394_v62  ;;  %v5594_v62 = vand.u32 4294901760, %v5576_v50  ;;  %v5622_v35 = vsub.f32 %v5577_v49, %v5592_v40 }
0x225b   :  { %5303 = vmatpush.msra.mxu1 %v9628_v4  ;;  %5356 = vmatpush.msra.mxu2 %v9871_v15  ;;  %v10943_v4 = vand.u32 4294901760, %v9734_v54 }
0x225c   :  { %5258 = vmatpush.msra.mxu0 %v10941_v31  ;;  %5362 = vmatmul.f32.vlgmr.msra.gmra.mxu2 %v5361_v37  ;;  %v5628_v37 = vsub.f32 %v5576_v50, %v5594_v62 }
0x225d   :  { %5305 = vmatpush.msra.mxu1 %v9630_v43  ;;  %5401 = vmatpush.msra.mxu3 %v5400_v2  ;;  %v10944_v43 = vand.u32 4294901760, %v9752_v18  ;;  %v5623_v2 = vand.u32 4294901760, %v5622_v35 }
0x225e   :  { %5262 = vmatpush.msra.mxu0 %v10942_v59  ;;  %5421 = vmatpush.msrb.mxu2 %v9844_v39  ;;  %v5629_v31 = vand.u32 4294901760, %v5628_v37 }
0x225f   :  { %5307 = vmatpush.msra.mxu1 %v9641_v33  ;;  %5403 = vmatmul.f32.vlgmr.msra.gmra.mxu3 %v9873_v26  ;;  %v10945_v33 = vand.u32 4294901760, %v9767_v55  ;;  %v5624_v59 = vsub.f32 %v5622_v35, %v5623_v2 }
0x2260   :  { %5266 = vmatpush.msra.mxu0 %v10943_v4  ;;  %5424 = vmatpush.msrb.mxu2 %v9869_v29  ;;  %v5630_v4 = vsub.f32 %v5628_v37, %v5629_v31 }
0x2261   :  { %5309 = vmatpush.msra.mxu1 %v9643_v22  ;;  %5450 = vmatpush.msrb.mxu3 %v9811_v14  ;;  %v10946_v22 = vand.u32 4294901760, %v9773_v23 }
0x2262   :  { %5270 = vmatpush.msra.mxu0 %v10944_v43  ;;  %5427 = vmatpush.msrb.mxu2 %v9882_v5  ;;  %v5625_v43 = vand.u32 4294901760, %v5624_v59 }
0x2263   :  { %5311 = vmatpush.msra.mxu1 %v9645_v27  ;;  %5452 = vmatpush.msrb.mxu3 %v9841_v61  ;;  %v10947_v27 = vand.u32 4294901760, %v9797_v36 }
0x2264   :  { %5274 = vmatpush.msra.mxu0 %v10945_v33  ;;  %5430 = vmatpush.msrb.mxu2 %v9898_v30  ;;  %v5631_v33 = vand.u32 4294901760, %v5630_v4 }
0x2265   :  { %5313 = vmatpush.msra.mxu1 %v9660_v38  ;;  %5454 = vmatpush.msrb.mxu3 %v9858_v12  ;;  %v10948_v38 = vand.u32 4294901760, %v9804_v8 }
0x2266   :  { %5278 = vmatpush.msra.mxu0 %v10946_v22  ;;  %5433 = vmatmul.f32.vlgmr.msrb.gmra.mxu2 %v9895_v47 }
0x2267   :  { %5315 = vmatpush.msra.mxu1 %v9679_v53  ;;  %5456 = vmatpush.msrb.mxu3 %v9871_v15  ;;  %v10950_v53 = vand.u32 4294901760, %v9834_v11 }
0x2268   :  { %5282 = vmatpush.msra.mxu0 %v10947_v27  ;;  %5479 = vmatpush.msra.mxu2 %v5380_v0 }
0x2269   :  { %5317 = vmatpush.msra.mxu1 %v9686_v56  ;;  %5460 = vmatmul.f32.vlgmr.msrb.gmra.mxu3 %v5359_v44 }
0x226a   :  { %5286 = vmatpush.msra.mxu0 %v10948_v38  ;;  %5483 = vmatpush.msra.mxu2 %v5386_v13  ;;  %v5575_v38 = vld [vmem:[%s10859_s9 + $0x8] sm:$0xff] }
0x226b   :  { %5319 = vmatpush.msra.mxu1 %v9706_v6  ;;  %5510 = vmatpush.msra.mxu3 %v9811_v14 }
0x226c   :  { %5290 = vmatpush.msra.mxu0 %v10949_v63  ;;  %5487 = vmatpush.msra.mxu2 %v5392_v41  ;;  %v5596_v63 = vand.u32 4294901760, %v5575_v38 }
0x226d   :  { %5321 = vmatpush.msra.mxu1 %v9730_v45  ;;  %5512 = vmatpush.msra.mxu3 %v9841_v61  ;;  %v5542_v61 = vld [vmem:[#allocation5] sm:$0xff] }
0x226e   :  { %5294 = vmatpush.msra.mxu0 %v10950_v53  ;;  %5491 = vmatpush.msra.mxu2 %v5398_v60  ;;  %v5574_v53 = vld [vmem:[%s10859_s9] sm:$0xff] }
0x226f   :  { %5323 = vmatpush.msra.mxu1 %v9736_v52  ;;  %5296 = vmatmul.f32.vlgmr.msra.gmra.mxu0 %v9826_v24 }
0x2270   :  { %5514 = vmatpush.msra.mxu3 %v9858_v12  ;;  %5493 = vmatmul.f32.vlgmr.msra.gmra.mxu2 %v9873_v26 }
0x2271   :  { %5325 = vmatpush.msra.mxu1 %v9760_v19  ;;  %5593 = vmatpush.msrb.mxu2 %v5592_v40 }
0x2272   :  { %5516 = vmatpush.msra.mxu3 %v9871_v15  ;;  %5664 = vmatpush.msrb.mxu0 %v5622_v35 }
0x2273   :  { %5327 = vmatpush.msra.mxu1 %v9769_v3  ;;  %5518 = vmatmul.f32.vlgmr.msra.gmra.mxu3 %v9873_v26 }
0x2274   :  { %5595 = vmatpush.msrb.mxu2 %v5594_v62  ;;  %5667 = vmatpush.msrb.mxu0 %v5628_v37 }
0x2275   :  { %5329 = vmatpush.msra.mxu1 %v9784_v20  ;;  %5626 = vmatpush.msrb.mxu3 %v5625_v43 }
0x2276   :  { %5597 = vmatpush.msrb.mxu2 %v5596_v63 }
0x2277   :  { %5331 = vmatpush.msra.mxu1 %v9799_v46  ;;  %5632 = vmatpush.msrb.mxu3 %v5631_v33 }
0x2278   :  { %5333 = vmatmul.f32.vlgmr.msra.gmra.mxu1 %v9826_v24 }
0x2279   :  { %5693 = vmatpush.msrb.mxu1 %v5592_v40 }
0x227b   :  { %5695 = vmatpush.msrb.mxu1 %v5594_v62 }
0x227d   :  { %5697 = vmatpush.msrb.mxu1 %v5596_v63 }
0x22d2   :  { %v5034_v51 = vpop.f32.mrf.mxu0 }
0x22d4   :  { %v5228_v25 = vpop.f32.mrf.mxu3 }
0x22d5   :  { %v5135_v32 = vpop.f32.mrf.mxu1 }
0x22d6   :  { %v5189_v56 = vpop.f32.mrf.mxu2  ;;  %v5136_v42 = vadd.f32 %v5135_v32, %v5034_v51 }
0x22d8   :  { %v5190_v54 = vadd.f32 %v5189_v56, %v5136_v42  ;;  %v5634_v56 = vsub.f32 %v5575_v38, %v5596_v63 }
0x22da   :  { %v5229_v18 = vadd.f32 %v5228_v25, %v5190_v54  ;;  %v5598_v25 = vand.u32 4294901760, %v5574_v53  ;;  %v5635_v51 = vand.u32 4294901760, %v5634_v56  ;;  %5670 = vmatpush.msrb.mxu0 %v5634_v56 }
0x22dc   :  { %v5640_v32 = vsub.f32 %v5574_v53, %v5598_v25  ;;  %5699 = vmatpush.msrb.mxu1 %v5598_v25  ;;  %5599 = vmatpush.msrb.mxu2 %v5598_v25 }
0x22de   :  { %v5641_v42 = vand.u32 4294901760, %v5640_v32  ;;  %5673 = vmatpush.msrb.mxu0 %v5640_v32  ;;  %5722 = vmatpush.msra.mxu2 %v5623_v2 }
0x22df   :  { %v5363_v6 = vpop.f32.mrf.mxu2 }
0x22e0   :  { %v5642_v54 = vsub.f32 %v5640_v32, %v5641_v42  ;;  %5726 = vmatpush.msra.mxu2 %v5629_v31 }
0x22e2   :  { %v5404_v45 = vpop.f32.mrf.mxu3  ;;  %5730 = vmatpush.msra.mxu2 %v5635_v51 }
0x22e4   :  { %5734 = vmatpush.msra.mxu2 %v5641_v42 }
0x22e9   :  { %v5434_v19 = vpop.f32.mrf.mxu2 }
0x22ec   :  { %v5297_v52 = vpop.f32.mrf.mxu0  ;;  %v5461_v23 = vpop.f32.mrf.mxu3 }
0x22ed   :  { %v5298_v55 = vadd.f32 %v5297_v52, %v5229_v18  ;;  %v5643_v52 = vand.u32 4294901760, %v5642_v54 }
0x22f3   :  { %v5494_v41 = vpop.f32.mrf.mxu2 }
0x22f5   :  { %v5334_v3 = vpop.f32.mrf.mxu1 }
0x22f6   :  { %v5335_v12 = vadd.f32 %v5334_v3, %v5298_v55  ;;  %v5519_v14 = vpop.f32.mrf.mxu3 }
0x22f8   :  { %v5364_v20 = vadd.f32 %v5363_v6, %v5335_v12  ;;  %v5636_v6 = vsub.f32 %v5634_v56, %v5635_v51 }
0x22fa   :  { %v5405_v36 = vadd.f32 %v5404_v45, %v5364_v20  ;;  %v5637_v45 = vand.u32 4294901760, %v5636_v6 }
0x22fc   :  { %v5435_v46 = vadd.f32 %v5434_v19, %v5405_v36  ;;  %5638 = vmatpush.msrb.mxu3 %v5637_v45 }
0x22fe   :  { %v5462_v8 = vadd.f32 %v5461_v23, %v5435_v46  ;;  %5644 = vmatpush.msrb.mxu3 %v5643_v52 }
0x2300   :  { %v5495_v1 = vadd.f32 %v5494_v41, %v5462_v8  ;;  %5753 = vmatpush.msra.mxu3 %v5592_v40 }
0x2302   :  { %v5520_v24 = vadd.f32 %v5519_v14, %v5495_v1  ;;  %5755 = vmatpush.msra.mxu3 %v5594_v62 }
0x2304   :  { %7643 = vtanh.f32 %v5520_v24  ;;  %v7516_v39 = vmul.f32 -1.442695, %v5520_v24  ;;  %5757 = vmatpush.msra.mxu3 %v5596_v63 }
0x2306   :  { %7645 = vpow2.f32 %v7516_v39  ;;  %5759 = vmatpush.msra.mxu3 %v5598_v25 }
0x230a   :  { %v7644_v11 = vpop.eup %7643 }
0x230b   :  { %5549 = vrot.lane.b32.xlu0 %v7644_v11, %s7714_s6 }
0x230c   :  { %v7646_v58 = vpop.eup %7645 }
0x230d   :  { %v5525_v0 = vadd.f32 1.0, %v7646_v58 }
0x230f   :  { %7647 = vrcp.f32 %v5525_v0  ;;  %v5537_v9 = vand.u32 2147483648, %v5525_v0  ;;  %vm5531_vm8 = vweird.f32 %v5525_v0  ;;  %v5535_v13 = vand.u32 2147483647, %v5525_v0 }
0x2311   :  { %v5538_v30 = vor.u32 1.1754944e-38, %v5537_v9  ;;  %vm5536_vm12 = vcmp.eq.f32.partialorder %v5535_v13, 8.507059e+37 }
0x2313   :  { %5544 = vrot.lane.b32.xlu0 %v5542_v61, %s7711_s17 }
0x2315   :  { %v7648_v29 = vpop.eup %7647 }
0x2316   :  { %v5527_v15 = vmul.f32 %v7648_v29, %v5525_v0  ;;  %vm5532_vm10 = vweird.f32 %v7648_v29 }
0x2317   :  { %vm5533_vm11 = vmor %vm5531_vm8, %vm5532_vm10 }
0x2318   :  { %v5528_v26 = vsub.f32 1.0, %v5527_v15 }
0x231a   :  { %v5529_v17 = vmul.f32 %v7648_v29, %v5528_v26 }
0x231c   :  { %v5530_v5 = vadd.f32 %v7648_v29, %v5529_v17 }
0x231e   :  { %v5534_v47 = vsel %vm5533_vm11, %v7648_v29, %v5530_v5 }
0x231f   :  { %v5539_v28 = vsel %vm5536_vm12, %v5538_v30, %v5534_v47 }
0x237d   :  { %v5550_v48 = vpop.permute.xlu0 %5549 }
0x237e   :  { %v5552_v34 = vmul.f32 %v5550_v48, %v5539_v28 }
0x2380   :  { %5554 = vrot.lane.b32.xlu1 %v5552_v34, %s7711_s17 }
0x2385   :  { %v5545_v10 = vpop.permute.xlu0 %5544 }
0x2386   :  { %v5547_v44 = vmul.f32 %v5545_v10, %v5539_v28 }
0x23f2   :  { %v5555_v60 = vpop.permute.xlu1 %5554 }
0x23f3   :  { %v5557_v7 = vadd.f32 %v5555_v60, %v5547_v44 }
0x23f5   :  { %7649 = vtanh.f32 %v5557_v7 }
0x23fb   :  { %v7650_v21 = vpop.eup %7649 }
0x23fc   :  { %5560 = vrot.lane.b32.xlu1 %v7650_v21, %s7714_s6 }
0x246e   :  { %v5561_v22 = vpop.permute.xlu1 %5560 }
0x246f   :  { %v5563_v27 = vmul.f32 %v5561_v22, %v5539_v28 }
0x2471   :  { %5570 = vrot.lane.b32.xlu2 %v5563_v27, %s7711_s17 }
0x2479   :  { %5565 = vrot.lane.b32.xlu2 %v5557_v7, %s7709_s1 }
0x24cb   :  { %v5571_v18 = vpop.permute.xlu2 %5570 }
0x24cc   :  { %5573 = vst.msk [vmem:[#allocation4 + $0x8] sm:$0xff] %vm491_vm2, %v5571_v18  ;;  %v5578_v19 = vsel %vm491_vm2, %v5571_v18, 0 }
0x24cd   :  { %v5600_v55 = vand.u32 4294901760, %v5578_v19 }
0x24cf   :  { %v5601_v3 = vsub.f32 %v5578_v19, %v5600_v55  ;;  %5646 = vmatmul.f32.vlgmr.msrb.gmra.mxu3 %v5600_v55 }
0x24d1   :  { %v5602_v23 = vand.u32 4294901760, %v5601_v3  ;;  %5676 = vmatmul.f32.vlgmr.msrb.gmra.mxu0 %v5601_v3 }
0x24d3   :  { %v5603_v12 = vsub.f32 %v5601_v3, %v5602_v23  ;;  %5703 = vmatmul.f32.vlgmr.msrb.gmra.mxu1 %v5602_v23  ;;  %v5566_v20 = vpop.permute.xlu2 %5565 }
0x24d4   :  { %5568 = vst.msk [vmem:[#allocation5] sm:$0xff] %vm491_vm2, %v5566_v20 }
0x24d5   :  { %v5604_v36 = vand.u32 4294901760, %v5603_v12 }
0x24d7   :  { %5605 = vmatmul.f32.vlgmr.msrb.gmra.mxu2 %v5604_v36  ;;  %5761 = vmatmul.f32.vlgmr.msra.gmra.mxu3 %v5600_v55 }
0x24df   :  { %5736 = vmatmul.f32.vlgmr.msra.gmra.mxu2 %v5600_v55 }
0x254e   :  { %v5677_v1 = vpop.f32.mrf.mxu0 }
0x2550   :  { %v5704_v11 = vpop.f32.mrf.mxu1 }
0x2552   :  { %v5647_v46 = vpop.f32.mrf.mxu3 }
0x255a   :  { %v5606_v41 = vpop.f32.mrf.mxu2  ;;  %v5762_v0 = vpop.f32.mrf.mxu3 }
0x255b   :  { %v5607_v8 = vadd.f32 %v5606_v41, %v8784_v57 }
0x255d   :  { %v5648_v14 = vadd.f32 %v5647_v46, %v5607_v8 }
0x255f   :  { %v5678_v24 = vadd.f32 %v5677_v1, %v5648_v14 }
0x2561   :  { %v5705_v61 = vadd.f32 %v5704_v11, %v5678_v24 }
0x2562   :  { %v5737_v39 = vpop.f32.mrf.mxu2 }
0x2563   :  { %v5738_v58 = vadd.f32 %v5737_v39, %v5705_v61  ;;  %5771 = sbr.rel (%p7519_p6) target bundleno = 9578 (0x256a), region = 77 }
0x2565   :  { %v5763_v29 = vadd.f32 %v5762_v0, %v5738_v58 }
0x2567   :  { %7517 = vst [vmem:[%s10861_s11 + $0x18] sm:$0xff] %v5763_v29 }
0x2568   :  { %v7520_v15 = vld [vmem:[%s10855_s5 + $0x18] sm:$0xff] }
0x2569   :  { %5774 = vst [vmem:[#allocation4] sm:$0xff] %v7520_v15 }
0x256a PF:  { %s7521_s3 = sld [smem:[#allocation6 + $0x3]] }
0x2570   :  { %p7522_p7 = scmp.ne.s32.totalorder %s7521_s3, 0 }
0x2572   :  { %5779 = sbr.rel (%p7522_p7) target bundleno = 9955 (0x26e3), region = 81 }
0x2577   :  { %v5780_v26 = vsel %vm2475_vm7, %v5763_v29, -1e+30  ;;  %v7718_v21 = vmov 0.0  }
0x2578   :  { %5781 = vmax.xlane.f32.xlu0 %v5780_v26 }
0x25eb   :  { %v5782_v17 = vpop.xlane.xlu0 %5781 }
0x25ec   :  { %vm5783_vm13 = vcmp.eq.f32.partialorder %v5780_v26, %v5782_v17 }
0x25ed   :  { %v5784_v5 = vsel %vm5783_vm13, %v8393_v16, 128 }
0x25ee   :  { %v5786_v9 = vshra.s32 %v5784_v5, 16  ;;  %v5785_v47 = vand.u32 65535, %v5784_v5 }
0x25f0   :  { %v5788_v13 = vcvt.s32.f32 %v5786_v9  ;;  %v5787_v48 = vcvt.s32.f32 %v5785_v47 }
0x25f2   :  { %5789 = vmin.xlane.f32.xlu0 %v5788_v13 }
0x2665   :  { %v5790_v30 = vpop.xlane.xlu0 %5789 }
0x2666   :  { %vm5791_vm14 = vcmp.eq.f32.partialorder %v5788_v13, %v5790_v30  ;;  %v5796_v34 = vcvt.f32.s32 %v5790_v30 }
0x2667   :  { %v5792_v28 = vsel %vm5791_vm14, %v5787_v48, inf }
0x2668   :  { %5793 = vmin.xlane.f32.xlu1 %v5792_v28  ;;  %v5797_v44 = vshll.u32 %v5796_v34, 16 }
0x26db   :  { %v5794_v10 = vpop.xlane.xlu1 %5793 }
0x26dc   :  { %v5795_v60 = vcvt.f32.s32 %v5794_v10 }
0x26de   :  { %v5798_v7 = vadd.s32 %v5797_v44, %v5795_v60 }
0x26e0   :  { %vm5799_vm15 = vcmp.eq.s32.totalorder %v8393_v16, %v5798_v7 }
0x26e1   :  { %v7523_v49 = vsel %vm5799_vm15, 1.0, %v7718_v21 }
0x26e2   :  { %5802 = vst [vmem:[#allocation4] sm:$0xff] %v7523_v49 }
0x26e3 PF:  { %v5820_v50 = vld [vmem:[%s10858_s8 + $0x78] sm:$0xff]  ;;  %v5819_v40 = vld [vmem:[%s10858_s8 + $0x70] sm:$0xff]  ;;  %v5818_v62 = vld [vmem:[%s10858_s8 + $0x68] sm:$0xff]  ;;  %s7526_s4 = sld [smem:[#allocation6 + $0x4]] }
0x26e4   :  { %v10036_v35 = vand.u32 4294901760, %v5820_v50  ;;  %v10038_v37 = vand.u32 4294901760, %v5819_v40  ;;  %v10040_v2 = vand.u32 4294901760, %v5818_v62  ;;  %v5817_v31 = vld [vmem:[%s10858_s8 + $0x60] sm:$0xff]  ;;  %v5816_v59 = vld [vmem:[%s10858_s8 + $0x58] sm:$0xff]  ;;  %v5815_v4 = vld [vmem:[%s10858_s8 + $0x50] sm:$0xff] }
0x26e5   :  { %v10051_v43 = vand.u32 4294901760, %v5817_v31  ;;  %v10053_v33 = vand.u32 4294901760, %v5816_v59  ;;  %v10055_v22 = vand.u32 4294901760, %v5815_v4  ;;  %v5814_v27 = vld [vmem:[%s10858_s8 + $0x48] sm:$0xff]  ;;  %v5813_v38 = vld [vmem:[%s10858_s8 + $0x40] sm:$0xff]  ;;  %v5812_v51 = vld [vmem:[%s10858_s8 + $0x38] sm:$0xff] }
0x26e6   :  { %5829 = vmatpush.msra.mxu0 %v10036_v35  ;;  %v10065_v63 = vsub.f32 %v5820_v50, %v10036_v35  ;;  %v10068_v53 = vsub.f32 %v5819_v40, %v10038_v37  ;;  %v10070_v56 = vand.u32 4294901760, %v5814_v27  ;;  %v10073_v25 = vsub.f32 %v5818_v62, %v10040_v2  ;;  %6025 = vmatpush.msrb.mxu3 %v10036_v35  ;;  %v5811_v18 = vld [vmem:[%s10858_s8 + $0x30] sm:$0xff]  ;;  %v5810_v8 = vld [vmem:[%s10858_s8 + $0x28] sm:$0xff]  ;;  %v5809_v61 = vld [vmem:[%s10858_s8 + $0x20] sm:$0xff] }
0x26e7   :  { %v10080_v32 = vsub.f32 %v5817_v31, %v10051_v43  ;;  %v10083_v6 = vsub.f32 %v5816_v59, %v10053_v33  ;;  %v10089_v52 = vand.u32 4294901760, %v5813_v38  ;;  %v10096_v55 = vand.u32 4294901760, %v5812_v51  ;;  %v5808_v5 = vld [vmem:[%s10858_s8 + $0x18] sm:$0xff]  ;;  %v5807_v30 = vld [vmem:[%s10858_s8 + $0x10] sm:$0xff]  ;;  %v5806_v60 = vld [vmem:[%s10858_s8 + $0x8] sm:$0xff] }
0x26e8   :  { %5831 = vmatpush.msra.mxu0 %v10038_v37  ;;  %v5871_v42 = vand.u32 4294901760, %v10065_v63  ;;  %v5877_v45 = vand.u32 4294901760, %v10068_v53  ;;  %v5883_v54 = vand.u32 4294901760, %v10073_v25  ;;  %5972 = vmatpush.msrb.mxu2 %v10065_v63  ;;  %v10100_v23 = vsub.f32 %v5815_v4, %v10055_v22  ;;  %v5805_v31 = vld [vmem:[%s10858_s8] sm:$0xff]  ;;  %v5824_v4 = vld [vmem:[%s10858_s8 + $0x98] sm:$0xff] }
0x26e9   :  { %v5889_v19 = vand.u32 4294901760, %v10080_v32  ;;  %v5895_v3 = vand.u32 4294901760, %v10083_v6  ;;  %6027 = vmatpush.msrb.mxu3 %v10038_v37  ;;  %v10114_v46 = vsub.f32 %v5814_v27, %v10070_v56  ;;  %v10116_v41 = vand.u32 4294901760, %v5811_v18  ;;  %p7527_p8 = scmp.eq.s32.totalorder %s7526_s4, 0 }
0x26ea   :  { %5833 = vmatpush.msra.mxu0 %v10040_v2  ;;  %v5872_v12 = vsub.f32 %v10065_v63, %v5871_v42  ;;  %v5878_v20 = vsub.f32 %v10068_v53, %v5877_v45  ;;  %v5884_v36 = vsub.f32 %v10073_v25, %v5883_v54  ;;  %5975 = vmatpush.msrb.mxu2 %v10068_v53  ;;  %v10904_v11 = vand.u32 4294901760, %v10100_v23 }
0x26eb   :  { %6029 = vmatpush.msrb.mxu3 %v10040_v2  ;;  %v5890_v24 = vsub.f32 %v10080_v32, %v5889_v19  ;;  %v5896_v39 = vsub.f32 %v10083_v6, %v5895_v3  ;;  %v10135_v58 = vsub.f32 %v5813_v38, %v10089_v52  ;;  %v10140_v29 = vand.u32 4294901760, %v5810_v8 }
0x26ec   :  { %5835 = vmatpush.msra.mxu0 %v10051_v43  ;;  %v5873_v14 = vand.u32 4294901760, %v5872_v12  ;;  %v5879_v1 = vand.u32 4294901760, %v5878_v20  ;;  %5978 = vmatpush.msrb.mxu2 %v10073_v25  ;;  %v5885_v0 = vand.u32 4294901760, %v5884_v36  ;;  %v10901_v15 = vand.u32 4294901760, %v10114_v46 }
0x26ed   :  { %6031 = vmatpush.msrb.mxu3 %v10051_v43  ;;  %v10144_v26 = vsub.f32 %v5812_v51, %v10096_v55  ;;  %v10146_v17 = vand.u32 4294901760, %v5809_v61  ;;  %v5891_v9 = vand.u32 4294901760, %v5890_v24  ;;  %v5902_v13 = vsub.f32 %v10100_v23, %v10904_v11 }
0x26ee   :  { %5837 = vmatpush.msra.mxu0 %v10053_v33  ;;  %5874 = vmatpush.msra.mxu1 %v5873_v14  ;;  %v10900_v47 = vand.u32 4294901760, %v10135_v58  ;;  %v10162_v48 = vsub.f32 %v5811_v18, %v10116_v41  ;;  %v5897_v28 = vand.u32 4294901760, %v5896_v39  ;;  %v5908_v34 = vsub.f32 %v10114_v46, %v10901_v15  ;;  %v5823_v39 = vld [vmem:[%s10858_s8 + $0x90] sm:$0xff] }
0x26ef   :  { %5981 = vmatpush.msrb.mxu2 %v10080_v32  ;;  %6033 = vmatpush.msrb.mxu3 %v10053_v33  ;;  %v10170_v10 = vand.u32 4294901760, %v5808_v5  ;;  %v10899_v44 = vand.u32 4294901760, %v10144_v26  ;;  %v10177_v7 = vsub.f32 %v5810_v8, %v10140_v29  ;;  %v10179_v21 = vand.u32 4294901760, %v5807_v30  ;;  %v5803_v8 = vld [vmem:[#allocation4] sm:$0xff] }
0x26f0   :  { %5839 = vmatpush.msra.mxu0 %v10055_v22  ;;  %5880 = vmatpush.msra.mxu1 %v5879_v1  ;;  %v10183_v49 = vsub.f32 %v5809_v61, %v10146_v17  ;;  %v5903_v50 = vand.u32 4294901760, %v5902_v13  ;;  %v5914_v40 = vsub.f32 %v10135_v58, %v10900_v47  ;;  %v10898_v62 = vand.u32 4294901760, %v10162_v48 }
0x26f1   :  { %5984 = vmatpush.msrb.mxu2 %v10083_v6  ;;  %6035 = vmatpush.msrb.mxu3 %v10055_v22  ;;  %v10194_v59 = vand.u32 4294901760, %v5806_v60  ;;  %v5909_v27 = vand.u32 4294901760, %v5908_v34  ;;  %v5920_v38 = vsub.f32 %v10144_v26, %v10899_v44  ;;  %v10897_v51 = vand.u32 4294901760, %v10177_v7 }
0x26f2   :  { %5841 = vmatpush.msra.mxu0 %v10070_v56  ;;  %5886 = vmatpush.msra.mxu1 %v5885_v0  ;;  %v10207_v18 = vsub.f32 %v5808_v5, %v10170_v10  ;;  %v10209_v12 = vand.u32 4294901760, %v5805_v31  ;;  %v10896_v20 = vand.u32 4294901760, %v10183_v49  ;;  %v10214_v36 = vsub.f32 %v5807_v30, %v10179_v21  ;;  %v5804_v30 = vld [vmem:[#allocation4 + $0x8] sm:$0xff] }
0x26f3   :  { %5987 = vmatpush.msrb.mxu2 %v10100_v23  ;;  %6037 = vmatpush.msrb.mxu3 %v10070_v56  ;;  %v5915_v14 = vand.u32 4294901760, %v5914_v40  ;;  %v5926_v1 = vsub.f32 %v10162_v48, %v10898_v62  ;;  %v10221_v24 = vand.u32 4294901760, %v5824_v4  ;;  %v10225_v61 = vsub.f32 %v5806_v60, %v10194_v59 }
0x26f4   :  { %5843 = vmatpush.msra.mxu0 %v10089_v52  ;;  %5892 = vmatpush.msra.mxu1 %v5891_v9  ;;  %v5921_v0 = vand.u32 4294901760, %v5920_v38  ;;  %v5932_v5 = vsub.f32 %v10177_v7, %v10897_v51  ;;  %v10903_v9 = vand.u32 4294901760, %v10207_v18  ;;  %v10236_v13 = vand.u32 4294901760, %v5803_v8 }
0x26f5   :  { %5990 = vmatpush.msrb.mxu2 %v10114_v46  ;;  %6039 = vmatpush.msrb.mxu3 %v10089_v52  ;;  %v10902_v34 = vand.u32 4294901760, %v10214_v36  ;;  %v10244_v60 = vsub.f32 %v5805_v31, %v10209_v12  ;;  %v5927_v40 = vand.u32 4294901760, %v5926_v1  ;;  %v10254_v38 = vsub.f32 %v5824_v4, %v10221_v24  ;;  %v5821_v31 = vld [vmem:[%s10858_s8 + $0x80] sm:$0xff] }
0x26f6   :  { %5845 = vmatpush.msra.mxu0 %v10096_v55  ;;  %5898 = vmatpush.msra.mxu1 %v5897_v28  ;;  %v5938_v28 = vsub.f32 %v10183_v49, %v10896_v20  ;;  %v10906_v20 = vand.u32 4294901760, %v10225_v61  ;;  %v5826_v51 = vsel %vm491_vm2, %v5804_v30, 0  ;;  %v5944_v4 = vsub.f32 %v10207_v18, %v10903_v9 }
0x26f7   :  { %5993 = vmatpush.msrb.mxu2 %v10135_v58  ;;  %6041 = vmatpush.msrb.mxu3 %v10096_v55  ;;  %v5861_v1 = vsub.f32 %v5803_v8, %v10236_v13  ;;  %v5950_v47 = vsub.f32 %v10214_v36, %v10902_v34  ;;  %v10905_v15 = vand.u32 4294901760, %v10244_v60  ;;  %v10283_v30 = vand.u32 4294901760, %v5826_v51 }
0x26f8   :  { %5847 = vmatpush.msra.mxu0 %v10116_v41  ;;  %5904 = vmatpush.msra.mxu1 %v5903_v50  ;;  %v5822_v50 = vld [vmem:[%s10858_s8 + $0x88] sm:$0xff]  ;;  %v5939_v44 = vand.u32 4294901760, %v5938_v28  ;;  %v5945_v28 = vand.u32 4294901760, %v5944_v4  ;;  %v10960_v6 = vand.u32 4294901760, %v10225_v61 }
0x26f9   :  { %5996 = vmatpush.msrb.mxu2 %v10144_v26  ;;  %6043 = vmatpush.msrb.mxu3 %v10116_v41  ;;  %v10268_v62 = vand.u32 4294901760, %v5822_v50  ;;  %v5862_v34 = vand.u32 4294901760, %v5861_v1  ;;  %v5951_v9 = vand.u32 4294901760, %v5950_v47  ;;  %v5962_v11 = vsub.f32 %v10244_v60, %v10905_v15 }
0x26fa   :  { %5849 = vmatpush.msra.mxu0 %v10140_v29  ;;  %5910 = vmatpush.msra.mxu1 %v5909_v27  ;;  %v10251_v27 = vand.u32 4294901760, %v5823_v39 }
0x26fb   :  { %5999 = vmatpush.msrb.mxu2 %v10162_v48  ;;  %6045 = vmatpush.msrb.mxu3 %v10140_v29 }
0x26fc   :  { %5851 = vmatpush.msra.mxu0 %v10146_v17  ;;  %5916 = vmatpush.msra.mxu1 %v5915_v14  ;;  %v5933_v14 = vand.u32 4294901760, %v5932_v5  ;;  %v10279_v8 = vsub.f32 %v5823_v39, %v10251_v27  ;;  %v10281_v5 = vand.u32 4294901760, %v5821_v31  ;;  %v10292_v39 = vsub.f32 %v5822_v50, %v10268_v62 }
0x26fd   :  { %6002 = vmatpush.msrb.mxu2 %v10177_v7  ;;  %6047 = vmatpush.msrb.mxu3 %v10146_v17  ;;  %v10305_v50 = vsub.f32 %v5826_v51, %v10283_v30  ;;  %v5963_v51 = vand.u32 4294901760, %v5962_v11 }
0x26fe   :  { %5853 = vmatpush.msra.mxu0 %v10170_v10  ;;  %5922 = vmatpush.msra.mxu1 %v5921_v0  ;;  %v6212_v0 = vand.u32 4294901760, %v10254_v38  ;;  %v6218_v4 = vand.u32 4294901760, %v10279_v8  ;;  %v10308_v47 = vsub.f32 %v5821_v31, %v10281_v5 }
0x26ff   :  { %6005 = vmatpush.msrb.mxu2 %v10183_v49  ;;  %6049 = vmatpush.msrb.mxu3 %v10170_v10 }
0x2700   :  { %5855 = vmatpush.msra.mxu0 %v10179_v21  ;;  %5928 = vmatpush.msra.mxu1 %v5927_v40  ;;  %v5956_v40 = vsub.f32 %v10225_v61, %v10906_v20  ;;  %v6224_v20 = vand.u32 4294901760, %v10292_v39  ;;  %v6219_v63 = vsub.f32 %v10279_v8, %v6218_v4 }
0x2701   :  { %6008 = vmatpush.msrb.mxu2 %v10207_v18  ;;  %6051 = vmatpush.msrb.mxu3 %v10179_v21 }
0x2702   :  { %5857 = vmatpush.msra.mxu0 %v10194_v59  ;;  %5934 = vmatpush.msra.mxu1 %v5933_v14  ;;  %v6213_v14 = vsub.f32 %v10254_v38, %v6212_v0  ;;  %v5957_v15 = vand.u32 4294901760, %v5956_v40  ;;  %v6220_v11 = vand.u32 4294901760, %v6219_v63 }
0x2703   :  { %6011 = vmatpush.msrb.mxu2 %v10214_v36  ;;  %6053 = vmatpush.msrb.mxu3 %v10194_v59 }
0x2704   :  { %5859 = vmatpush.msra.mxu0 %v10209_v12  ;;  %5940 = vmatpush.msra.mxu1 %v5939_v44  ;;  %v5863_v44 = vsub.f32 %v5861_v1, %v5862_v34  ;;  %v6214_v31 = vand.u32 4294901760, %v6213_v14 }
0x2705   :  { %6014 = vmatpush.msrb.mxu2 %v10225_v61  ;;  %6055 = vmatpush.msrb.mxu3 %v10209_v12 }
0x2706   :  { %6066 = vmatpush.msrb.mxu0 %v5871_v42  ;;  %5946 = vmatpush.msra.mxu1 %v5945_v28  ;;  %v6191_v42 = vand.u32 4294901760, %v10305_v50  ;;  %v6230_v28 = vand.u32 4294901760, %v10308_v47  ;;  %v5864_v53 = vand.u32 4294901760, %v5863_v44 }
0x2707   :  { %6017 = vmatpush.msrb.mxu2 %v10244_v60  ;;  %6059 = vmatmul.f32.vlgmr.msrb.gmra.mxu3 %v5862_v34  ;;  %v10952_v34 = vand.u32 4294901760, %v10114_v46 }
0x2708   :  { %6070 = vmatpush.msrb.mxu0 %v5877_v45  ;;  %5952 = vmatpush.msra.mxu1 %v5951_v9  ;;  %v6225_v45 = vsub.f32 %v10292_v39, %v6224_v20  ;;  %v6192_v25 = vsub.f32 %v10305_v50, %v6191_v42 }
0x2709   :  { %6020 = vmatmul.f32.vlgmr.msrb.gmra.mxu2 %v5861_v1  ;;  %6215 = vmatpush.msra.mxu3 %v6214_v31 }
0x270a   :  { %6074 = vmatpush.msrb.mxu0 %v5883_v54  ;;  %6182 = vmatpush.msra.mxu2 %v10221_v24  ;;  %v6231_v54 = vsub.f32 %v10308_v47, %v6230_v28  ;;  %v6226_v32 = vand.u32 4294901760, %v6225_v45 }
0x270b   :  { %5958 = vmatpush.msra.mxu1 %v5957_v15  ;;  %5865 = vmatmul.f32.vlgmr.msra.gmra.mxu0 %v5864_v53  ;;  %v6193_v15 = vand.u32 4294901760, %v6192_v25  ;;  %v6408_v25 = vld [vmem:[%s10859_s9 + $0x10] sm:$0xff] }
0x270c   :  { %6078 = vmatpush.msrb.mxu0 %v5889_v19  ;;  %6184 = vmatpush.msra.mxu2 %v10251_v27  ;;  %v10951_v19 = vand.u32 4294901760, %v10100_v23  ;;  %v6232_v9 = vand.u32 4294901760, %v6231_v54 }
0x270d   :  { %5964 = vmatpush.msra.mxu1 %v5963_v51  ;;  %6221 = vmatpush.msra.mxu3 %v6220_v11  ;;  %v6409_v11 = vld [vmem:[%s10859_s9 + $0x18] sm:$0xff] }
0x270e   :  { %6082 = vmatpush.msrb.mxu0 %v5895_v3  ;;  %5966 = vmatmul.f32.vlgmr.msra.gmra.mxu1 %v10236_v13  ;;  %v6424_v54 = vand.u32 4294901760, %v6409_v11 }
0x270f   :  { %6133 = vmatpush.msrb.mxu1 %v10036_v35  ;;  %6186 = vmatpush.msra.mxu2 %v10268_v62  ;;  %v10953_v35 = vand.u32 4294901760, %v10135_v58 }
0x2710   :  { %6086 = vmatpush.msrb.mxu0 %v10951_v19  ;;  %6227 = vmatpush.msra.mxu3 %v6226_v32  ;;  %v6426_v32 = vand.u32 4294901760, %v6408_v25  ;;  %v6454_v19 = vsub.f32 %v6409_v11, %v6424_v54 }
0x2711   :  { %6135 = vmatpush.msrb.mxu1 %v10038_v37  ;;  %6188 = vmatpush.msra.mxu2 %v10281_v5  ;;  %v10954_v37 = vand.u32 4294901760, %v10144_v26 }
0x2712   :  { %6090 = vmatpush.msrb.mxu0 %v10952_v34  ;;  %6194 = vmatmul.f32.vlgmr.msra.gmra.mxu2 %v6193_v15  ;;  %v6460_v15 = vsub.f32 %v6408_v25, %v6426_v32 }
0x2713   :  { %6137 = vmatpush.msrb.mxu1 %v10040_v2  ;;  %6233 = vmatpush.msra.mxu3 %v6232_v9  ;;  %v10955_v2 = vand.u32 4294901760, %v10162_v48  ;;  %v6455_v9 = vand.u32 4294901760, %v6454_v19 }
0x2714   :  { %6094 = vmatpush.msrb.mxu0 %v10953_v35  ;;  %6253 = vmatpush.msrb.mxu2 %v10254_v38  ;;  %v6461_v34 = vand.u32 4294901760, %v6460_v15 }
0x2715   :  { %6139 = vmatpush.msrb.mxu1 %v10051_v43  ;;  %6235 = vmatmul.f32.vlgmr.msra.gmra.mxu3 %v10283_v30  ;;  %v10956_v43 = vand.u32 4294901760, %v10177_v7  ;;  %v6456_v35 = vsub.f32 %v6454_v19, %v6455_v9 }
0x2716   :  { %6098 = vmatpush.msrb.mxu0 %v10954_v37  ;;  %6256 = vmatpush.msrb.mxu2 %v10279_v8  ;;  %v6462_v37 = vsub.f32 %v6460_v15, %v6461_v34 }
0x2717   :  { %6141 = vmatpush.msrb.mxu1 %v10053_v33  ;;  %6282 = vmatpush.msrb.mxu3 %v10221_v24  ;;  %v10957_v33 = vand.u32 4294901760, %v10183_v49 }
0x2718   :  { %6102 = vmatpush.msrb.mxu0 %v10955_v2  ;;  %6259 = vmatpush.msrb.mxu2 %v10292_v39  ;;  %v6457_v2 = vand.u32 4294901760, %v6456_v35 }
0x2719   :  { %6143 = vmatpush.msrb.mxu1 %v10055_v22  ;;  %6284 = vmatpush.msrb.mxu3 %v10251_v27  ;;  %v10958_v22 = vand.u32 4294901760, %v10207_v18 }
0x271a   :  { %6106 = vmatpush.msrb.mxu0 %v10956_v43  ;;  %6262 = vmatpush.msrb.mxu2 %v10308_v47  ;;  %v6463_v43 = vand.u32 4294901760, %v6462_v37 }
0x271b   :  { %6145 = vmatpush.msrb.mxu1 %v10070_v56  ;;  %6286 = vmatpush.msrb.mxu3 %v10268_v62  ;;  %v10959_v56 = vand.u32 4294901760, %v10214_v36 }
0x271c   :  { %6110 = vmatpush.msrb.mxu0 %v10957_v33  ;;  %6265 = vmatmul.f32.vlgmr.msrb.gmra.mxu2 %v10305_v50 }
0x271d   :  { %6147 = vmatpush.msrb.mxu1 %v10089_v52  ;;  %6288 = vmatpush.msrb.mxu3 %v10281_v5  ;;  %v10961_v52 = vand.u32 4294901760, %v10244_v60 }
0x271e   :  { %6114 = vmatpush.msrb.mxu0 %v10958_v22  ;;  %6311 = vmatpush.msra.mxu2 %v6212_v0 }
0x271f   :  { %6149 = vmatpush.msrb.mxu1 %v10096_v55  ;;  %6292 = vmatmul.f32.vlgmr.msrb.gmra.mxu3 %v6191_v42 }
0x2720   :  { %6118 = vmatpush.msrb.mxu0 %v10959_v56  ;;  %6315 = vmatpush.msra.mxu2 %v6218_v4  ;;  %v6407_v56 = vld [vmem:[%s10859_s9 + $0x8] sm:$0xff] }
0x2721   :  { %6151 = vmatpush.msrb.mxu1 %v10116_v41  ;;  %6342 = vmatpush.msra.mxu3 %v10221_v24 }
0x2722   :  { %6122 = vmatpush.msrb.mxu0 %v10960_v6  ;;  %6319 = vmatpush.msra.mxu2 %v6224_v20  ;;  %v6428_v6 = vand.u32 4294901760, %v6407_v56 }
0x2723   :  { %6153 = vmatpush.msrb.mxu1 %v10140_v29  ;;  %6344 = vmatpush.msra.mxu3 %v10251_v27  ;;  %v6374_v27 = vld [vmem:[#allocation5] sm:$0xff] }
0x2724   :  { %6126 = vmatpush.msrb.mxu0 %v10961_v52  ;;  %6323 = vmatpush.msra.mxu2 %v6230_v28  ;;  %v6406_v52 = vld [vmem:[%s10859_s9] sm:$0xff] }
0x2725   :  { %6155 = vmatpush.msrb.mxu1 %v10146_v17  ;;  %6128 = vmatmul.f32.vlgmr.msrb.gmra.mxu0 %v10236_v13 }
0x2726   :  { %6346 = vmatpush.msra.mxu3 %v10268_v62  ;;  %6325 = vmatmul.f32.vlgmr.msra.gmra.mxu2 %v10283_v30 }
0x2727   :  { %6157 = vmatpush.msrb.mxu1 %v10170_v10  ;;  %6425 = vmatpush.msrb.mxu2 %v6424_v54 }
0x2728   :  { %6348 = vmatpush.msra.mxu3 %v10281_v5  ;;  %6496 = vmatpush.msra.mxu0 %v6454_v19 }
0x2729   :  { %6159 = vmatpush.msrb.mxu1 %v10179_v21  ;;  %6350 = vmatmul.f32.vlgmr.msra.gmra.mxu3 %v10283_v30 }
0x272a   :  { %6427 = vmatpush.msrb.mxu2 %v6426_v32  ;;  %6499 = vmatpush.msra.mxu0 %v6460_v15 }
0x272b   :  { %6161 = vmatpush.msrb.mxu1 %v10194_v59  ;;  %6458 = vmatpush.msrb.mxu3 %v6457_v2 }
0x272c   :  { %6429 = vmatpush.msrb.mxu2 %v6428_v6 }
0x272d   :  { %6163 = vmatpush.msrb.mxu1 %v10209_v12  ;;  %6464 = vmatpush.msrb.mxu3 %v6463_v43 }
0x272e   :  { %6165 = vmatmul.f32.vlgmr.msrb.gmra.mxu1 %v10236_v13 }
0x272f   :  { %6525 = vmatpush.msra.mxu1 %v6424_v54 }
0x2731   :  { %6527 = vmatpush.msra.mxu1 %v6426_v32 }
0x2733   :  { %6529 = vmatpush.msra.mxu1 %v6428_v6 }
0x2788   :  { %v5866_v23 = vpop.f32.mrf.mxu0 }
0x278a   :  { %v6060_v3 = vpop.f32.mrf.mxu3 }
0x278b   :  { %v5967_v46 = vpop.f32.mrf.mxu1 }
0x278c   :  { %v6021_v55 = vpop.f32.mrf.mxu2  ;;  %v5968_v58 = vadd.f32 %v5967_v46, %v5866_v23 }
0x278e   :  { %v6022_v26 = vadd.f32 %v6021_v55, %v5968_v58  ;;  %v6466_v55 = vsub.f32 %v6407_v56, %v6428_v6 }
0x2790   :  { %v6061_v48 = vadd.f32 %v6060_v3, %v6022_v26  ;;  %v6430_v3 = vand.u32 4294901760, %v6406_v52  ;;  %v6467_v23 = vand.u32 4294901760, %v6466_v55  ;;  %6502 = vmatpush.msra.mxu0 %v6466_v55 }
0x2792   :  { %v6472_v46 = vsub.f32 %v6406_v52, %v6430_v3  ;;  %6531 = vmatpush.msra.mxu1 %v6430_v3  ;;  %6431 = vmatpush.msrb.mxu2 %v6430_v3 }
0x2794   :  { %v6473_v58 = vand.u32 4294901760, %v6472_v46  ;;  %6505 = vmatpush.msra.mxu0 %v6472_v46  ;;  %6554 = vmatpush.msra.mxu2 %v6455_v9 }
0x2795   :  { %v6195_v41 = vpop.f32.mrf.mxu2 }
0x2796   :  { %v6474_v26 = vsub.f32 %v6472_v46, %v6473_v58  ;;  %6558 = vmatpush.msra.mxu2 %v6461_v34 }
0x2798   :  { %v6236_v29 = vpop.f32.mrf.mxu3  ;;  %6562 = vmatpush.msra.mxu2 %v6467_v23 }
0x279a   :  { %6566 = vmatpush.msra.mxu2 %v6473_v58 }
0x279f   :  { %v6266_v10 = vpop.f32.mrf.mxu2 }
0x27a2   :  { %v6129_v17 = vpop.f32.mrf.mxu0  ;;  %v6293_v49 = vpop.f32.mrf.mxu3 }
0x27a3   :  { %v6130_v7 = vadd.f32 %v6129_v17, %v6061_v48  ;;  %v6475_v17 = vand.u32 4294901760, %v6474_v26 }
0x27a9   :  { %v6326_v20 = vpop.f32.mrf.mxu2 }
0x27ab   :  { %v6166_v21 = vpop.f32.mrf.mxu1 }
0x27ac   :  { %v6167_v62 = vadd.f32 %v6166_v21, %v6130_v7  ;;  %v6351_v24 = vpop.f32.mrf.mxu3 }
0x27ae   :  { %v6196_v59 = vadd.f32 %v6195_v41, %v6167_v62  ;;  %v6468_v41 = vsub.f32 %v6466_v55, %v6467_v23 }
0x27b0   :  { %v6237_v18 = vadd.f32 %v6236_v29, %v6196_v59  ;;  %v6469_v29 = vand.u32 4294901760, %v6468_v41 }
0x27b2   :  { %v6267_v12 = vadd.f32 %v6266_v10, %v6237_v18  ;;  %6470 = vmatpush.msrb.mxu3 %v6469_v29 }
0x27b4   :  { %v6294_v36 = vadd.f32 %v6293_v49, %v6267_v12  ;;  %6476 = vmatpush.msrb.mxu3 %v6475_v17 }
0x27b6   :  { %v6327_v61 = vadd.f32 %v6326_v20, %v6294_v36  ;;  %6585 = vmatpush.msra.mxu3 %v6424_v54 }
0x27b8   :  { %v6352_v13 = vadd.f32 %v6351_v24, %v6327_v61  ;;  %6587 = vmatpush.msra.mxu3 %v6426_v32 }
0x27ba   :  { %7651 = vtanh.f32 %v6352_v13  ;;  %v7524_v38 = vmul.f32 -1.442695, %v6352_v13  ;;  %6589 = vmatpush.msra.mxu3 %v6428_v6 }
0x27bc   :  { %7653 = vpow2.f32 %v7524_v38  ;;  %6591 = vmatpush.msra.mxu3 %v6430_v3 }
0x27c0   :  { %v7652_v60 = vpop.eup %7651 }
0x27c1   :  { %6381 = vrot.lane.b32.xlu0 %v7652_v60, %s7714_s6 }
0x27c2   :  { %v7654_v1 = vpop.eup %7653 }
0x27c3   :  { %v6357_v0 = vadd.f32 1.0, %v7654_v1 }
0x27c5   :  { %7655 = vrcp.f32 %v6357_v0  ;;  %v6369_v14 = vand.u32 2147483648, %v6357_v0  ;;  %vm6363_vm1 = vweird.f32 %v6357_v0  ;;  %v6367_v4 = vand.u32 2147483647, %v6357_v0 }
0x27c7   :  { %v6370_v47 = vor.u32 1.1754944e-38, %v6369_v14  ;;  %vm6368_vm4 = vcmp.eq.f32.partialorder %v6367_v4, 8.507059e+37 }
0x27c9   :  { %6376 = vrot.lane.b32.xlu0 %v6374_v27, %s7711_s17 }
0x27cb   :  { %v7656_v8 = vpop.eup %7655 }
0x27cc   :  { %v6359_v5 = vmul.f32 %v7656_v8, %v6357_v0  ;;  %vm6364_vm0 = vweird.f32 %v7656_v8 }
0x27cd   :  { %vm6365_vm3 = vmor %vm6363_vm1, %vm6364_vm0 }
0x27ce   :  { %v6360_v30 = vsub.f32 1.0, %v6359_v5 }
0x27d0   :  { %v6361_v40 = vmul.f32 %v7656_v8, %v6360_v30 }
0x27d2   :  { %v6362_v39 = vadd.f32 %v7656_v8, %v6361_v40 }
0x27d4   :  { %v6366_v50 = vsel %vm6365_vm3, %v7656_v8, %v6362_v39 }
0x27d5   :  { %v6371_v51 = vsel %vm6368_vm4, %v6370_v47, %v6366_v50 }
0x2833   :  { %v6382_v44 = vpop.permute.xlu0 %6381 }
0x2834   :  { %v6384_v31 = vmul.f32 %v6382_v44, %v6371_v51 }
0x2836   :  { %6386 = vrot.lane.b32.xlu1 %v6384_v31, %s7711_s17 }
0x283b   :  { %v6377_v63 = vpop.permute.xlu0 %6376 }
0x283c   :  { %v6379_v42 = vmul.f32 %v6377_v63, %v6371_v51 }
0x28a8   :  { %v6387_v28 = vpop.permute.xlu1 %6386 }
0x28a9   :  { %v6389_v53 = vadd.f32 %v6387_v28, %v6379_v42 }
0x28ab   :  { %7657 = vtanh.f32 %v6389_v53 }
0x28b1   :  { %v7658_v45 = vpop.eup %7657 }
0x28b2   :  { %6392 = vrot.lane.b32.xlu1 %v7658_v45, %s7714_s6 }
0x2924   :  { %v6393_v33 = vpop.permute.xlu1 %6392 }
0x2925   :  { %v6395_v22 = vmul.f32 %v6393_v33, %v6371_v51 }
0x2927   :  { %6402 = vrot.lane.b32.xlu2 %v6395_v22, %s7711_s17 }
0x292f   :  { %6397 = vrot.lane.b32.xlu2 %v6389_v53, %s7709_s1 }
0x2981   :  { %v6403_v48 = vpop.permute.xlu2 %6402 }
0x2982   :  { %6405 = vst.msk [vmem:[#allocation4 + $0x8] sm:$0xff] %vm491_vm2, %v6403_v48  ;;  %v6410_v10 = vsel %vm491_vm2, %v6403_v48, 0 }
0x2983   :  { %v6432_v7 = vand.u32 4294901760, %v6410_v10 }
0x2985   :  { %v6433_v21 = vsub.f32 %v6410_v10, %v6432_v7  ;;  %6478 = vmatmul.f32.vlgmr.msrb.gmra.mxu3 %v6432_v7 }
0x2987   :  { %v6434_v49 = vand.u32 4294901760, %v6433_v21  ;;  %6508 = vmatmul.f32.vlgmr.msra.gmra.mxu0 %v6433_v21 }
0x2989   :  { %v6435_v62 = vsub.f32 %v6433_v21, %v6434_v49  ;;  %6535 = vmatmul.f32.vlgmr.msra.gmra.mxu1 %v6434_v49  ;;  %v6398_v59 = vpop.permute.xlu2 %6397 }
0x298a   :  { %6400 = vst.msk [vmem:[#allocation5] sm:$0xff] %vm491_vm2, %v6398_v59 }
0x298b   :  { %v6436_v18 = vand.u32 4294901760, %v6435_v62 }
0x298d   :  { %6437 = vmatmul.f32.vlgmr.msrb.gmra.mxu2 %v6436_v18  ;;  %6593 = vmatmul.f32.vlgmr.msra.gmra.mxu3 %v6432_v7 }
0x2995   :  { %6568 = vmatmul.f32.vlgmr.msra.gmra.mxu2 %v6432_v7 }
0x2a04   :  { %v6509_v61 = vpop.f32.mrf.mxu0 }
0x2a06   :  { %v6536_v60 = vpop.f32.mrf.mxu1 }
0x2a08   :  { %v6479_v12 = vpop.f32.mrf.mxu3 }
0x2a10   :  { %v6438_v20 = vpop.f32.mrf.mxu2  ;;  %v6594_v0 = vpop.f32.mrf.mxu3 }
0x2a11   :  { %v6439_v36 = vadd.f32 %v6438_v20, %v8784_v57 }
0x2a13   :  { %v6480_v24 = vadd.f32 %v6479_v12, %v6439_v36 }
0x2a15   :  { %v6510_v13 = vadd.f32 %v6509_v61, %v6480_v24 }
0x2a17   :  { %v6537_v27 = vadd.f32 %v6536_v60, %v6510_v13 }
0x2a18   :  { %v6569_v38 = vpop.f32.mrf.mxu2 }
0x2a19   :  { %v6570_v1 = vadd.f32 %v6569_v38, %v6537_v27  ;;  %6603 = sbr.rel (%p7527_p8) target bundleno = 10784 (0x2a20), region = 85 }
0x2a1b   :  { %v6595_v8 = vadd.f32 %v6594_v0, %v6570_v1 }
0x2a1d   :  { %7525 = vst [vmem:[%s10861_s11 + $0x20] sm:$0xff] %v6595_v8 }
0x2a1e   :  { %v7528_v5 = vld [vmem:[%s10855_s5 + $0x20] sm:$0xff] }
0x2a1f   :  { %6606 = vst [vmem:[#allocation4] sm:$0xff] %v7528_v5 }
0x2a20 PF:  { %s7529_s0 = sld [smem:[#allocation6 + $0x4]] }
0x2a26   :  { %p7530_p9 = scmp.ne.s32.totalorder %s7529_s0, 0 }
0x2a28   :  { %6611 = sbr.rel (%p7530_p9) target bundleno = 11161 (0x2b99), region = 89 }
0x2a2d   :  { %v6612_v30 = vsel %vm2475_vm7, %v6595_v8, -1e+30  ;;  %v7719_v45 = vmov 0.0  }
0x2a2e   :  { %6613 = vmax.xlane.f32.xlu0 %v6612_v30 }
0x2aa1   :  { %v6614_v40 = vpop.xlane.xlu0 %6613 }
0x2aa2   :  { %vm6615_vm5 = vcmp.eq.f32.partialorder %v6612_v30, %v6614_v40 }
0x2aa3   :  { %v6616_v39 = vsel %vm6615_vm5, %v8393_v16, 128 }
0x2aa4   :  { %v6618_v14 = vshra.s32 %v6616_v39, 16  ;;  %v6617_v50 = vand.u32 65535, %v6616_v39 }
0x2aa6   :  { %v6620_v4 = vcvt.s32.f32 %v6618_v14  ;;  %v6619_v44 = vcvt.s32.f32 %v6617_v50 }
0x2aa8   :  { %6621 = vmin.xlane.f32.xlu0 %v6620_v4 }
0x2b1b   :  { %v6622_v47 = vpop.xlane.xlu0 %6621 }
0x2b1c   :  { %vm6623_vm6 = vcmp.eq.f32.partialorder %v6620_v4, %v6622_v47  ;;  %v6628_v31 = vcvt.f32.s32 %v6622_v47 }
0x2b1d   :  { %v6624_v51 = vsel %vm6623_vm6, %v6619_v44, inf }
0x2b1e   :  { %6625 = vmin.xlane.f32.xlu1 %v6624_v51  ;;  %v6629_v42 = vshll.u32 %v6628_v31, 16 }
0x2b91   :  { %v6626_v63 = vpop.xlane.xlu1 %6625 }
0x2b92   :  { %v6627_v28 = vcvt.f32.s32 %v6626_v63 }
0x2b94   :  { %v6630_v53 = vadd.s32 %v6629_v42, %v6627_v28 }
0x2b96   :  { %vm6631_vm9 = vcmp.eq.s32.totalorder %v8393_v16, %v6630_v53 }
0x2b97   :  { %v7531_v11 = vsel %vm6631_vm9, 1.0, %v7719_v45 }
0x2b98   :  { %6634 = vst [vmem:[#allocation4] sm:$0xff] %v7531_v11 }
0x2b99 PF:  { %v6652_v25 = vld [vmem:[%s10858_s8 + $0x78] sm:$0xff]  ;;  %v6651_v54 = vld [vmem:[%s10858_s8 + $0x70] sm:$0xff]  ;;  %v6650_v32 = vld [vmem:[%s10858_s8 + $0x68] sm:$0xff] }
0x2b9a   :  { %v10446_v19 = vand.u32 4294901760, %v6652_v25  ;;  %v10448_v15 = vand.u32 4294901760, %v6651_v54  ;;  %v10450_v9 = vand.u32 4294901760, %v6650_v32  ;;  %v6649_v34 = vld [vmem:[%s10858_s8 + $0x60] sm:$0xff]  ;;  %v6648_v35 = vld [vmem:[%s10858_s8 + $0x58] sm:$0xff]  ;;  %v6647_v37 = vld [vmem:[%s10858_s8 + $0x50] sm:$0xff] }
0x2b9b   :  { %v10461_v2 = vand.u32 4294901760, %v6649_v34  ;;  %v10463_v43 = vand.u32 4294901760, %v6648_v35  ;;  %v10465_v33 = vand.u32 4294901760, %v6647_v37  ;;  %v6646_v22 = vld [vmem:[%s10858_s8 + $0x48] sm:$0xff]  ;;  %v6645_v56 = vld [vmem:[%s10858_s8 + $0x40] sm:$0xff]  ;;  %v6644_v23 = vld [vmem:[%s10858_s8 + $0x38] sm:$0xff] }
0x2b9c   :  { %6661 = vmatpush.msrb.mxu0 %v10446_v19  ;;  %v10475_v6 = vsub.f32 %v6652_v25, %v10446_v19  ;;  %v10478_v52 = vsub.f32 %v6651_v54, %v10448_v15  ;;  %v10480_v55 = vand.u32 4294901760, %v6646_v22  ;;  %v10483_v3 = vsub.f32 %v6650_v32, %v10450_v9  ;;  %6857 = vmatpush.msrb.mxu3 %v10446_v19  ;;  %v6643_v48 = vld [vmem:[%s10858_s8 + $0x30] sm:$0xff]  ;;  %v6642_v36 = vld [vmem:[%s10858_s8 + $0x28] sm:$0xff]  ;;  %v6641_v27 = vld [vmem:[%s10858_s8 + $0x20] sm:$0xff] }
0x2b9d   :  { %v10490_v46 = vsub.f32 %v6649_v34, %v10461_v2  ;;  %v10493_v41 = vsub.f32 %v6648_v35, %v10463_v43  ;;  %v10499_v17 = vand.u32 4294901760, %v6645_v56  ;;  %v10506_v7 = vand.u32 4294901760, %v6644_v23  ;;  %v6640_v39 = vld [vmem:[%s10858_s8 + $0x18] sm:$0xff]  ;;  %v6639_v47 = vld [vmem:[%s10858_s8 + $0x10] sm:$0xff]  ;;  %v6638_v28 = vld [vmem:[%s10858_s8 + $0x8] sm:$0xff] }
0x2b9e   :  { %6663 = vmatpush.msrb.mxu0 %v10448_v15  ;;  %v6703_v58 = vand.u32 4294901760, %v10475_v6  ;;  %v6709_v29 = vand.u32 4294901760, %v10478_v52  ;;  %v6715_v26 = vand.u32 4294901760, %v10483_v3  ;;  %6804 = vmatpush.msrb.mxu2 %v10475_v6  ;;  %v10510_v49 = vsub.f32 %v6647_v37, %v10465_v33  ;;  %v6637_v34 = vld [vmem:[%s10858_s8] sm:$0xff]  ;;  %v6656_v37 = vld [vmem:[%s10858_s8 + $0x98] sm:$0xff] }
0x2b9f   :  { %v6721_v10 = vand.u32 4294901760, %v10490_v46  ;;  %v6727_v21 = vand.u32 4294901760, %v10493_v41  ;;  %6859 = vmatpush.msrb.mxu3 %v10448_v15  ;;  %v10524_v12 = vsub.f32 %v6646_v22, %v10480_v55  ;;  %v10526_v20 = vand.u32 4294901760, %v6643_v48 }
0x2ba0   :  { %6665 = vmatpush.msrb.mxu0 %v10450_v9  ;;  %v6704_v62 = vsub.f32 %v10475_v6, %v6703_v58  ;;  %v6710_v59 = vsub.f32 %v10478_v52, %v6709_v29  ;;  %v6716_v18 = vsub.f32 %v10483_v3, %v6715_v26  ;;  %6807 = vmatpush.msrb.mxu2 %v10478_v52  ;;  %v10915_v60 = vand.u32 4294901760, %v10510_v49 }
0x2ba1   :  { %6861 = vmatpush.msrb.mxu3 %v10450_v9  ;;  %v6722_v13 = vsub.f32 %v10490_v46, %v6721_v10  ;;  %v6728_v38 = vsub.f32 %v10493_v41, %v6727_v21  ;;  %v10545_v1 = vsub.f32 %v6645_v56, %v10499_v17  ;;  %v10550_v8 = vand.u32 4294901760, %v6642_v36 }
0x2ba2   :  { %6667 = vmatpush.msrb.mxu0 %v10461_v2  ;;  %v6705_v24 = vand.u32 4294901760, %v6704_v62  ;;  %v6711_v61 = vand.u32 4294901760, %v6710_v59  ;;  %6810 = vmatpush.msrb.mxu2 %v10483_v3  ;;  %v6717_v0 = vand.u32 4294901760, %v6716_v18  ;;  %v10912_v5 = vand.u32 4294901760, %v10524_v12 }
0x2ba3   :  { %6863 = vmatpush.msrb.mxu3 %v10461_v2  ;;  %v10554_v30 = vsub.f32 %v6644_v23, %v10506_v7  ;;  %v10556_v40 = vand.u32 4294901760, %v6641_v27  ;;  %v6723_v14 = vand.u32 4294901760, %v6722_v13  ;;  %v6734_v4 = vsub.f32 %v10510_v49, %v10915_v60 }
0x2ba4   :  { %6669 = vmatpush.msrb.mxu0 %v10463_v43  ;;  %6706 = vmatpush.msrb.mxu1 %v6705_v24  ;;  %v10911_v50 = vand.u32 4294901760, %v10545_v1  ;;  %v10572_v44 = vsub.f32 %v6643_v48, %v10526_v20  ;;  %v6729_v51 = vand.u32 4294901760, %v6728_v38  ;;  %v6740_v31 = vsub.f32 %v10524_v12, %v10912_v5  ;;  %v6655_v38 = vld [vmem:[%s10858_s8 + $0x90] sm:$0xff] }
0x2ba5   :  { %6813 = vmatpush.msrb.mxu2 %v10490_v46  ;;  %6865 = vmatpush.msrb.mxu3 %v10463_v43  ;;  %v10580_v63 = vand.u32 4294901760, %v6640_v39  ;;  %v10910_v42 = vand.u32 4294901760, %v10554_v30  ;;  %v10587_v53 = vsub.f32 %v6642_v36, %v10550_v8  ;;  %v10589_v45 = vand.u32 4294901760, %v6639_v47  ;;  %v6635_v36 = vld [vmem:[#allocation4] sm:$0xff] }
0x2ba6   :  { %6671 = vmatpush.msrb.mxu0 %v10465_v33  ;;  %6712 = vmatpush.msrb.mxu1 %v6711_v61  ;;  %v10593_v11 = vsub.f32 %v6641_v27, %v10556_v40  ;;  %v6735_v25 = vand.u32 4294901760, %v6734_v4  ;;  %v6746_v54 = vsub.f32 %v10545_v1, %v10911_v50  ;;  %v10909_v32 = vand.u32 4294901760, %v10572_v44 }
0x2ba7   :  { %6816 = vmatpush.msrb.mxu2 %v10493_v41  ;;  %6867 = vmatpush.msrb.mxu3 %v10465_v33  ;;  %v10604_v35 = vand.u32 4294901760, %v6638_v28  ;;  %v6741_v22 = vand.u32 4294901760, %v6740_v31  ;;  %v6752_v56 = vsub.f32 %v10554_v30, %v10910_v42  ;;  %v10908_v23 = vand.u32 4294901760, %v10587_v53 }
0x2ba8   :  { %6673 = vmatpush.msrb.mxu0 %v10480_v55  ;;  %6718 = vmatpush.msrb.mxu1 %v6717_v0  ;;  %v10617_v48 = vsub.f32 %v6640_v39, %v10580_v63  ;;  %v10619_v62 = vand.u32 4294901760, %v6637_v34  ;;  %v10907_v59 = vand.u32 4294901760, %v10593_v11  ;;  %v10624_v18 = vsub.f32 %v6639_v47, %v10589_v45  ;;  %v6636_v47 = vld [vmem:[#allocation4 + $0x8] sm:$0xff] }
0x2ba9   :  { %6819 = vmatpush.msrb.mxu2 %v10510_v49  ;;  %6869 = vmatpush.msrb.mxu3 %v10480_v55  ;;  %v6747_v24 = vand.u32 4294901760, %v6746_v54  ;;  %v6758_v61 = vsub.f32 %v10572_v44, %v10909_v32  ;;  %v10631_v13 = vand.u32 4294901760, %v6656_v37  ;;  %v10635_v27 = vsub.f32 %v6638_v28, %v10604_v35 }
0x2baa   :  { %6675 = vmatpush.msrb.mxu0 %v10499_v17  ;;  %6724 = vmatpush.msrb.mxu1 %v6723_v14  ;;  %v6753_v0 = vand.u32 4294901760, %v6752_v56  ;;  %v6764_v39 = vsub.f32 %v10587_v53, %v10908_v23  ;;  %v10914_v14 = vand.u32 4294901760, %v10617_v48  ;;  %v10646_v4 = vand.u32 4294901760, %v6635_v36 }
0x2bab   :  { %6822 = vmatpush.msrb.mxu2 %v10524_v12  ;;  %6871 = vmatpush.msrb.mxu3 %v10499_v17  ;;  %v10913_v31 = vand.u32 4294901760, %v10624_v18  ;;  %v10654_v28 = vsub.f32 %v6637_v34, %v10619_v62  ;;  %v6759_v54 = vand.u32 4294901760, %v6758_v61  ;;  %v10664_v56 = vsub.f32 %v6656_v37, %v10631_v13  ;;  %v6653_v34 = vld [vmem:[%s10858_s8 + $0x80] sm:$0xff] }
0x2bac   :  { %6677 = vmatpush.msrb.mxu0 %v10506_v7  ;;  %6730 = vmatpush.msrb.mxu1 %v6729_v51  ;;  %v6770_v51 = vsub.f32 %v10593_v11, %v10907_v59  ;;  %v10917_v59 = vand.u32 4294901760, %v10635_v27  ;;  %v6658_v23 = vsel %vm491_vm2, %v6636_v47, 0  ;;  %v6776_v37 = vsub.f32 %v10617_v48, %v10914_v14 }
0x2bad   :  { %6825 = vmatpush.msrb.mxu2 %v10545_v1  ;;  %6873 = vmatpush.msrb.mxu3 %v10506_v7  ;;  %v6693_v61 = vsub.f32 %v6635_v36, %v10646_v4  ;;  %v6782_v50 = vsub.f32 %v10624_v18, %v10913_v31  ;;  %v10916_v5 = vand.u32 4294901760, %v10654_v28  ;;  %v10693_v47 = vand.u32 4294901760, %v6658_v23 }
0x2bae   :  { %6679 = vmatpush.msrb.mxu0 %v10526_v20  ;;  %6736 = vmatpush.msrb.mxu1 %v6735_v25  ;;  %v6654_v25 = vld [vmem:[%s10858_s8 + $0x88] sm:$0xff]  ;;  %v6771_v42 = vand.u32 4294901760, %v6770_v51  ;;  %v6777_v51 = vand.u32 4294901760, %v6776_v37  ;;  %v10971_v41 = vand.u32 4294901760, %v10635_v27 }
0x2baf   :  { %6828 = vmatpush.msrb.mxu2 %v10554_v30  ;;  %6875 = vmatpush.msrb.mxu3 %v10526_v20  ;;  %v10678_v32 = vand.u32 4294901760, %v6654_v25  ;;  %v6694_v31 = vand.u32 4294901760, %v6693_v61  ;;  %v6783_v14 = vand.u32 4294901760, %v6782_v50  ;;  %v6794_v60 = vsub.f32 %v10654_v28, %v10916_v5 }
0x2bb0   :  { %6681 = vmatpush.msrb.mxu0 %v10550_v8  ;;  %6742 = vmatpush.msrb.mxu1 %v6741_v22  ;;  %v10661_v22 = vand.u32 4294901760, %v6655_v38 }
0x2bb1   :  { %6831 = vmatpush.msrb.mxu2 %v10572_v44  ;;  %6877 = vmatpush.msrb.mxu3 %v10550_v8 }
0x2bb2   :  { %6683 = vmatpush.msrb.mxu0 %v10556_v40  ;;  %6748 = vmatpush.msrb.mxu1 %v6747_v24  ;;  %v6765_v24 = vand.u32 4294901760, %v6764_v39  ;;  %v10689_v36 = vsub.f32 %v6655_v38, %v10661_v22  ;;  %v10691_v39 = vand.u32 4294901760, %v6653_v34  ;;  %v10702_v38 = vsub.f32 %v6654_v25, %v10678_v32 }
0x2bb3   :  { %6834 = vmatpush.msrb.mxu2 %v10587_v53  ;;  %6879 = vmatpush.msrb.mxu3 %v10556_v40  ;;  %v10715_v25 = vsub.f32 %v6658_v23, %v10693_v47  ;;  %v6795_v23 = vand.u32 4294901760, %v6794_v60 }
0x2bb4   :  { %6685 = vmatpush.msrb.mxu0 %v10580_v63  ;;  %6754 = vmatpush.msrb.mxu1 %v6753_v0  ;;  %v7044_v0 = vand.u32 4294901760, %v10664_v56  ;;  %v7050_v37 = vand.u32 4294901760, %v10689_v36  ;;  %v10718_v50 = vsub.f32 %v6653_v34, %v10691_v39 }
0x2bb5   :  { %6837 = vmatpush.msrb.mxu2 %v10593_v11  ;;  %6881 = vmatpush.msrb.mxu3 %v10580_v63 }
0x2bb6   :  { %6687 = vmatpush.msrb.mxu0 %v10589_v45  ;;  %6760 = vmatpush.msrb.mxu1 %v6759_v54  ;;  %v6788_v54 = vsub.f32 %v10635_v27, %v10917_v59  ;;  %v7056_v59 = vand.u32 4294901760, %v10702_v38  ;;  %v7051_v6 = vsub.f32 %v10689_v36, %v7050_v37 }
0x2bb7   :  { %6840 = vmatpush.msrb.mxu2 %v10617_v48  ;;  %6883 = vmatpush.msrb.mxu3 %v10589_v45 }
0x2bb8   :  { %6689 = vmatpush.msrb.mxu0 %v10604_v35  ;;  %6766 = vmatpush.msrb.mxu1 %v6765_v24  ;;  %v7045_v24 = vsub.f32 %v10664_v56, %v7044_v0  ;;  %v6789_v5 = vand.u32 4294901760, %v6788_v54  ;;  %v7052_v60 = vand.u32 4294901760, %v7051_v6 }
0x2bb9   :  { %6843 = vmatpush.msrb.mxu2 %v10624_v18  ;;  %6885 = vmatpush.msrb.mxu3 %v10604_v35 }
0x2bba   :  { %6691 = vmatpush.msrb.mxu0 %v10619_v62  ;;  %6772 = vmatpush.msrb.mxu1 %v6771_v42  ;;  %v6695_v42 = vsub.f32 %v6693_v61, %v6694_v31  ;;  %v7046_v34 = vand.u32 4294901760, %v7045_v24 }
0x2bbb   :  { %6846 = vmatpush.msrb.mxu2 %v10635_v27  ;;  %6887 = vmatpush.msrb.mxu3 %v10619_v62 }
0x2bbc   :  { %6898 = vmatpush.msra.mxu0 %v6703_v58  ;;  %6778 = vmatpush.msrb.mxu1 %v6777_v51  ;;  %v7023_v58 = vand.u32 4294901760, %v10715_v25  ;;  %v7062_v51 = vand.u32 4294901760, %v10718_v50  ;;  %v6696_v52 = vand.u32 4294901760, %v6695_v42 }
0x2bbd   :  { %6849 = vmatpush.msrb.mxu2 %v10654_v28  ;;  %6891 = vmatmul.f32.vlgmr.msrb.gmra.mxu3 %v6694_v31  ;;  %v10963_v31 = vand.u32 4294901760, %v10524_v12 }
0x2bbe   :  { %6902 = vmatpush.msra.mxu0 %v6709_v29  ;;  %6784 = vmatpush.msrb.mxu1 %v6783_v14  ;;  %v7057_v29 = vsub.f32 %v10702_v38, %v7056_v59  ;;  %v7024_v3 = vsub.f32 %v10715_v25, %v7023_v58 }
0x2bbf   :  { %6852 = vmatmul.f32.vlgmr.msrb.gmra.mxu2 %v6693_v61  ;;  %7047 = vmatpush.msra.mxu3 %v7046_v34 }
0x2bc0   :  { %6906 = vmatpush.msra.mxu0 %v6715_v26  ;;  %7014 = vmatpush.msra.mxu2 %v10631_v13  ;;  %v7063_v26 = vsub.f32 %v10718_v50, %v7062_v51  ;;  %v7058_v46 = vand.u32 4294901760, %v7057_v29 }
0x2bc1   :  { %6790 = vmatpush.msrb.mxu1 %v6789_v5  ;;  %6697 = vmatmul.f32.vlgmr.msrb.gmra.mxu0 %v6696_v52  ;;  %v7025_v5 = vand.u32 4294901760, %v7024_v3  ;;  %v7240_v3 = vld [vmem:[%s10859_s9 + $0x10] sm:$0xff] }
0x2bc2   :  { %6910 = vmatpush.msra.mxu0 %v6721_v10  ;;  %7016 = vmatpush.msra.mxu2 %v10661_v22  ;;  %v10962_v10 = vand.u32 4294901760, %v10510_v49  ;;  %v7064_v14 = vand.u32 4294901760, %v7063_v26 }
0x2bc3   :  { %6796 = vmatpush.msrb.mxu1 %v6795_v23  ;;  %7053 = vmatpush.msra.mxu3 %v7052_v60  ;;  %v7241_v60 = vld [vmem:[%s10859_s9 + $0x18] sm:$0xff] }
0x2bc4   :  { %6914 = vmatpush.msra.mxu0 %v6727_v21  ;;  %6798 = vmatmul.f32.vlgmr.msrb.gmra.mxu1 %v10646_v4  ;;  %v7256_v26 = vand.u32 4294901760, %v7241_v60 }
0x2bc5   :  { %6965 = vmatpush.msra.mxu1 %v10446_v19  ;;  %7018 = vmatpush.msra.mxu2 %v10678_v32  ;;  %v10964_v19 = vand.u32 4294901760, %v10545_v1 }
0x2bc6   :  { %6918 = vmatpush.msra.mxu0 %v10962_v10  ;;  %7059 = vmatpush.msra.mxu3 %v7058_v46  ;;  %v7258_v46 = vand.u32 4294901760, %v7240_v3  ;;  %v7286_v10 = vsub.f32 %v7241_v60, %v7256_v26 }
0x2bc7   :  { %6967 = vmatpush.msra.mxu1 %v10448_v15  ;;  %7020 = vmatpush.msra.mxu2 %v10691_v39  ;;  %v10965_v15 = vand.u32 4294901760, %v10554_v30 }
0x2bc8   :  { %6922 = vmatpush.msra.mxu0 %v10963_v31  ;;  %7026 = vmatmul.f32.vlgmr.msra.gmra.mxu2 %v7025_v5  ;;  %v7292_v5 = vsub.f32 %v7240_v3, %v7258_v46 }
0x2bc9   :  { %6969 = vmatpush.msra.mxu1 %v10450_v9  ;;  %7065 = vmatpush.msra.mxu3 %v7064_v14  ;;  %v10966_v9 = vand.u32 4294901760, %v10572_v44  ;;  %v7287_v14 = vand.u32 4294901760, %v7286_v10 }
0x2bca   :  { %6926 = vmatpush.msra.mxu0 %v10964_v19  ;;  %7085 = vmatpush.msrb.mxu2 %v10664_v56  ;;  %v7293_v31 = vand.u32 4294901760, %v7292_v5 }
0x2bcb   :  { %6971 = vmatpush.msra.mxu1 %v10461_v2  ;;  %7067 = vmatmul.f32.vlgmr.msra.gmra.mxu3 %v10693_v47  ;;  %v10967_v2 = vand.u32 4294901760, %v10587_v53  ;;  %v7288_v19 = vsub.f32 %v7286_v10, %v7287_v14 }
0x2bcc   :  { %6930 = vmatpush.msra.mxu0 %v10965_v15  ;;  %7088 = vmatpush.msrb.mxu2 %v10689_v36  ;;  %v7294_v15 = vsub.f32 %v7292_v5, %v7293_v31 }
0x2bcd   :  { %6973 = vmatpush.msra.mxu1 %v10463_v43  ;;  %7114 = vmatpush.msrb.mxu3 %v10631_v13  ;;  %v10968_v43 = vand.u32 4294901760, %v10593_v11 }
0x2bce   :  { %6934 = vmatpush.msra.mxu0 %v10966_v9  ;;  %7091 = vmatpush.msrb.mxu2 %v10702_v38  ;;  %v7289_v9 = vand.u32 4294901760, %v7288_v19 }
0x2bcf   :  { %6975 = vmatpush.msra.mxu1 %v10465_v33  ;;  %7116 = vmatpush.msrb.mxu3 %v10661_v22  ;;  %v10969_v33 = vand.u32 4294901760, %v10617_v48 }
0x2bd0   :  { %6938 = vmatpush.msra.mxu0 %v10967_v2  ;;  %7094 = vmatpush.msrb.mxu2 %v10718_v50  ;;  %v7295_v2 = vand.u32 4294901760, %v7294_v15 }
0x2bd1   :  { %6977 = vmatpush.msra.mxu1 %v10480_v55  ;;  %7118 = vmatpush.msrb.mxu3 %v10678_v32  ;;  %v10970_v55 = vand.u32 4294901760, %v10624_v18 }
0x2bd2   :  { %6942 = vmatpush.msra.mxu0 %v10968_v43  ;;  %7097 = vmatmul.f32.vlgmr.msrb.gmra.mxu2 %v10715_v25 }
0x2bd3   :  { %6979 = vmatpush.msra.mxu1 %v10499_v17  ;;  %7120 = vmatpush.msrb.mxu3 %v10691_v39  ;;  %v10972_v17 = vand.u32 4294901760, %v10654_v28 }
0x2bd4   :  { %6946 = vmatpush.msra.mxu0 %v10969_v33  ;;  %7143 = vmatpush.msra.mxu2 %v7044_v0 }
0x2bd5   :  { %6981 = vmatpush.msra.mxu1 %v10506_v7  ;;  %7124 = vmatmul.f32.vlgmr.msrb.gmra.mxu3 %v7023_v58 }
0x2bd6   :  { %6950 = vmatpush.msra.mxu0 %v10970_v55  ;;  %7147 = vmatpush.msra.mxu2 %v7050_v37  ;;  %v7239_v55 = vld [vmem:[%s10859_s9 + $0x8] sm:$0xff] }
0x2bd7   :  { %6983 = vmatpush.msra.mxu1 %v10526_v20  ;;  %7174 = vmatpush.msra.mxu3 %v10631_v13 }
0x2bd8   :  { %6954 = vmatpush.msra.mxu0 %v10971_v41  ;;  %7151 = vmatpush.msra.mxu2 %v7056_v59  ;;  %v7260_v41 = vand.u32 4294901760, %v7239_v55 }
0x2bd9   :  { %6985 = vmatpush.msra.mxu1 %v10550_v8  ;;  %7176 = vmatpush.msra.mxu3 %v10661_v22  ;;  %v7206_v22 = vld [vmem:[#allocation5] sm:$0xff] }
0x2bda   :  { %6958 = vmatpush.msra.mxu0 %v10972_v17  ;;  %7155 = vmatpush.msra.mxu2 %v7062_v51  ;;  %v7238_v17 = vld [vmem:[%s10859_s9] sm:$0xff]  ;;  %s7534_s9 = sld [smem:[#allocation6 + $0x5]] }
0x2bdb   :  { %6987 = vmatpush.msra.mxu1 %v10556_v40  ;;  %6960 = vmatmul.f32.vlgmr.msra.gmra.mxu0 %v10646_v4 }
0x2bdc   :  { %7178 = vmatpush.msra.mxu3 %v10678_v32  ;;  %7157 = vmatmul.f32.vlgmr.msra.gmra.mxu2 %v10693_v47 }
0x2bdd   :  { %6989 = vmatpush.msra.mxu1 %v10580_v63  ;;  %7257 = vmatpush.msrb.mxu2 %v7256_v26 }
0x2bde   :  { %7180 = vmatpush.msra.mxu3 %v10691_v39  ;;  %7328 = vmatpush.msrb.mxu0 %v7286_v10 }
0x2bdf   :  { %6991 = vmatpush.msra.mxu1 %v10589_v45  ;;  %7182 = vmatmul.f32.vlgmr.msra.gmra.mxu3 %v10693_v47 }
0x2be0   :  { %7259 = vmatpush.msrb.mxu2 %v7258_v46  ;;  %7331 = vmatpush.msrb.mxu0 %v7292_v5  ;;  %p7535_p10 = scmp.eq.s32.totalorder %s7534_s9, 0 }
0x2be1   :  { %6993 = vmatpush.msra.mxu1 %v10604_v35  ;;  %7290 = vmatpush.msrb.mxu3 %v7289_v9 }
0x2be2   :  { %7261 = vmatpush.msrb.mxu2 %v7260_v41 }
0x2be3   :  { %6995 = vmatpush.msra.mxu1 %v10619_v62  ;;  %7296 = vmatpush.msrb.mxu3 %v7295_v2 }
0x2be4   :  { %6997 = vmatmul.f32.vlgmr.msra.gmra.mxu1 %v10646_v4 }
0x2be5   :  { %7357 = vmatpush.msrb.mxu1 %v7256_v26 }
0x2be7   :  { %7359 = vmatpush.msrb.mxu1 %v7258_v46 }
0x2be9   :  { %7361 = vmatpush.msrb.mxu1 %v7260_v41 }
0x2c3e   :  { %v6698_v49 = vpop.f32.mrf.mxu0 }
0x2c40   :  { %v6892_v21 = vpop.f32.mrf.mxu3 }
0x2c41   :  { %v6799_v12 = vpop.f32.mrf.mxu1 }
0x2c42   :  { %v6853_v7 = vpop.f32.mrf.mxu2  ;;  %v6800_v1 = vadd.f32 %v6799_v12, %v6698_v49 }
0x2c44   :  { %v6854_v30 = vadd.f32 %v6853_v7, %v6800_v1  ;;  %v7298_v7 = vsub.f32 %v7239_v55, %v7260_v41 }
0x2c46   :  { %v6893_v44 = vadd.f32 %v6892_v21, %v6854_v30  ;;  %v7262_v21 = vand.u32 4294901760, %v7238_v17  ;;  %v7299_v49 = vand.u32 4294901760, %v7298_v7  ;;  %7334 = vmatpush.msrb.mxu0 %v7298_v7 }
0x2c48   :  { %v7304_v12 = vsub.f32 %v7238_v17, %v7262_v21  ;;  %7363 = vmatpush.msrb.mxu1 %v7262_v21  ;;  %7263 = vmatpush.msrb.mxu2 %v7262_v21 }
0x2c4a   :  { %v7305_v1 = vand.u32 4294901760, %v7304_v12  ;;  %7337 = vmatpush.msrb.mxu0 %v7304_v12  ;;  %7386 = vmatpush.msra.mxu2 %v7287_v14 }
0x2c4b   :  { %v7027_v20 = vpop.f32.mrf.mxu2 }
0x2c4c   :  { %v7306_v30 = vsub.f32 %v7304_v12, %v7305_v1  ;;  %7390 = vmatpush.msra.mxu2 %v7293_v31 }
0x2c4e   :  { %v7068_v8 = vpop.f32.mrf.mxu3  ;;  %7394 = vmatpush.msra.mxu2 %v7299_v49 }
0x2c50   :  { %7398 = vmatpush.msra.mxu2 %v7305_v1 }
0x2c55   :  { %v7098_v63 = vpop.f32.mrf.mxu2 }
0x2c58   :  { %v6961_v40 = vpop.f32.mrf.mxu0  ;;  %v7125_v11 = vpop.f32.mrf.mxu3 }
0x2c59   :  { %v6962_v53 = vadd.f32 %v6961_v40, %v6893_v44  ;;  %v7307_v40 = vand.u32 4294901760, %v7306_v30 }
0x2c5f   :  { %v7158_v59 = vpop.f32.mrf.mxu2 }
0x2c61   :  { %v6998_v45 = vpop.f32.mrf.mxu1 }
0x2c62   :  { %v6999_v32 = vadd.f32 %v6998_v45, %v6962_v53  ;;  %v7183_v13 = vpop.f32.mrf.mxu3 }
0x2c64   :  { %v7028_v35 = vadd.f32 %v7027_v20, %v6999_v32  ;;  %v7300_v20 = vsub.f32 %v7298_v7, %v7299_v49 }
0x2c66   :  { %v7069_v48 = vadd.f32 %v7068_v8, %v7028_v35  ;;  %v7301_v8 = vand.u32 4294901760, %v7300_v20 }
0x2c68   :  { %v7099_v62 = vadd.f32 %v7098_v63, %v7069_v48  ;;  %7302 = vmatpush.msrb.mxu3 %v7301_v8 }
0x2c6a   :  { %v7126_v18 = vadd.f32 %v7125_v11, %v7099_v62  ;;  %7308 = vmatpush.msrb.mxu3 %v7307_v40 }
0x2c6c   :  { %v7159_v27 = vadd.f32 %v7158_v59, %v7126_v18  ;;  %7417 = vmatpush.msra.mxu3 %v7256_v26 }
0x2c6e   :  { %v7184_v4 = vadd.f32 %v7183_v13, %v7159_v27  ;;  %7419 = vmatpush.msra.mxu3 %v7258_v46 }
0x2c70   :  { %7659 = vtanh.f32 %v7184_v4  ;;  %v7532_v56 = vmul.f32 -1.442695, %v7184_v4  ;;  %7421 = vmatpush.msra.mxu3 %v7260_v41 }
0x2c72   :  { %7661 = vpow2.f32 %v7532_v56  ;;  %7423 = vmatpush.msra.mxu3 %v7262_v21 }
0x2c76   :  { %v7660_v28 = vpop.eup %7659 }
0x2c77   :  { %7213 = vrot.lane.b32.xlu0 %v7660_v28, %s7714_s6 }
0x2c78   :  { %v7662_v61 = vpop.eup %7661 }
0x2c79   :  { %v7189_v0 = vadd.f32 1.0, %v7662_v61 }
0x2c7b   :  { %7663 = vrcp.f32 %v7189_v0  ;;  %v7201_v24 = vand.u32 2147483648, %v7189_v0  ;;  %vm7195_vm8 = vweird.f32 %v7189_v0  ;;  %v7199_v37 = vand.u32 2147483647, %v7189_v0 }
0x2c7d   :  { %v7202_v50 = vor.u32 1.1754944e-38, %v7201_v24  ;;  %vm7200_vm12 = vcmp.eq.f32.partialorder %v7199_v37, 8.507059e+37 }
0x2c7f   :  { %7208 = vrot.lane.b32.xlu0 %v7206_v22, %s7711_s17 }
0x2c81   :  { %v7664_v36 = vpop.eup %7663 }
0x2c82   :  { %v7191_v39 = vmul.f32 %v7664_v36, %v7189_v0  ;;  %vm7196_vm10 = vweird.f32 %v7664_v36 }
0x2c83   :  { %vm7197_vm11 = vmor %vm7195_vm8, %vm7196_vm10 }
0x2c84   :  { %v7192_v47 = vsub.f32 1.0, %v7191_v39 }
0x2c86   :  { %v7193_v54 = vmul.f32 %v7664_v36, %v7192_v47 }
0x2c88   :  { %v7194_v38 = vadd.f32 %v7664_v36, %v7193_v54 }
0x2c8a   :  { %v7198_v25 = vsel %vm7197_vm11, %v7664_v36, %v7194_v38 }
0x2c8b   :  { %v7203_v23 = vsel %vm7200_vm12, %v7202_v50, %v7198_v25 }
0x2ce9   :  { %v7214_v42 = vpop.permute.xlu0 %7213 }
0x2cea   :  { %v7216_v34 = vmul.f32 %v7214_v42, %v7203_v23 }
0x2cec   :  { %7218 = vrot.lane.b32.xlu1 %v7216_v34, %s7711_s17 }
0x2cf1   :  { %v7209_v6 = vpop.permute.xlu0 %7208 }
0x2cf2   :  { %v7211_v58 = vmul.f32 %v7209_v6, %v7203_v23 }
0x2d5e   :  { %v7219_v51 = vpop.permute.xlu1 %7218 }
0x2d5f   :  { %v7221_v52 = vadd.f32 %v7219_v51, %v7211_v58 }
0x2d61   :  { %7665 = vtanh.f32 %v7221_v52 }
0x2d67   :  { %v7666_v29 = vpop.eup %7665 }
0x2d68   :  { %7224 = vrot.lane.b32.xlu1 %v7666_v29, %s7714_s6 }
0x2dda   :  { %v7225_v43 = vpop.permute.xlu1 %7224 }
0x2ddb   :  { %v7227_v33 = vmul.f32 %v7225_v43, %v7203_v23 }
0x2ddd   :  { %7234 = vrot.lane.b32.xlu2 %v7227_v33, %s7711_s17 }
0x2de5   :  { %7229 = vrot.lane.b32.xlu2 %v7221_v52, %s7709_s1 }
0x2e37   :  { %v7235_v44 = vpop.permute.xlu2 %7234 }
0x2e38   :  { %7237 = vst.msk [vmem:[#allocation4 + $0x8] sm:$0xff] %vm491_vm2, %v7235_v44  ;;  %v7242_v63 = vsel %vm491_vm2, %v7235_v44, 0 }
0x2e39   :  { %v7264_v53 = vand.u32 4294901760, %v7242_v63 }
0x2e3b   :  { %v7265_v45 = vsub.f32 %v7242_v63, %v7264_v53  ;;  %7310 = vmatmul.f32.vlgmr.msrb.gmra.mxu3 %v7264_v53 }
0x2e3d   :  { %v7266_v11 = vand.u32 4294901760, %v7265_v45  ;;  %7340 = vmatmul.f32.vlgmr.msrb.gmra.mxu0 %v7265_v45 }
0x2e3f   :  { %v7267_v32 = vsub.f32 %v7265_v45, %v7266_v11  ;;  %7367 = vmatmul.f32.vlgmr.msrb.gmra.mxu1 %v7266_v11  ;;  %v7230_v35 = vpop.permute.xlu2 %7229 }
0x2e40   :  { %7232 = vst.msk [vmem:[#allocation5] sm:$0xff] %vm491_vm2, %v7230_v35 }
0x2e41   :  { %v7268_v48 = vand.u32 4294901760, %v7267_v32 }
0x2e43   :  { %7269 = vmatmul.f32.vlgmr.msrb.gmra.mxu2 %v7268_v48  ;;  %7425 = vmatmul.f32.vlgmr.msra.gmra.mxu3 %v7264_v53 }
0x2e4b   :  { %7400 = vmatmul.f32.vlgmr.msra.gmra.mxu2 %v7264_v53 }
0x2eba   :  { %v7341_v27 = vpop.f32.mrf.mxu0 }
0x2ebc   :  { %v7368_v28 = vpop.f32.mrf.mxu1 }
0x2ebe   :  { %v7311_v62 = vpop.f32.mrf.mxu3 }
0x2ec6   :  { %v7270_v59 = vpop.f32.mrf.mxu2  ;;  %v7426_v0 = vpop.f32.mrf.mxu3 }
0x2ec7   :  { %v7271_v18 = vadd.f32 %v7270_v59, %v8784_v57 }
0x2ec9   :  { %v7312_v13 = vadd.f32 %v7311_v62, %v7271_v18 }
0x2ecb   :  { %v7342_v4 = vadd.f32 %v7341_v27, %v7312_v13 }
0x2ecd   :  { %v7369_v22 = vadd.f32 %v7368_v28, %v7342_v4 }
0x2ece   :  { %v7401_v56 = vpop.f32.mrf.mxu2 }
0x2ecf   :  { %v7402_v61 = vadd.f32 %v7401_v56, %v7369_v22  ;;  %7435 = sbr.rel (%p7535_p10) target bundleno = 11990 (0x2ed6), region = 93 }
0x2ed1   :  { %v7427_v36 = vadd.f32 %v7426_v0, %v7402_v61 }
0x2ed3   :  { %7533 = vst [vmem:[%s10861_s11 + $0x28] sm:$0xff] %v7427_v36 }
0x2ed4   :  { %v7536_v39 = vld [vmem:[%s10855_s5 + $0x28] sm:$0xff] }
0x2ed5   :  { %7438 = vst [vmem:[#allocation4] sm:$0xff] %v7536_v39 }
0x2ed6 PF:  { %s7537_s15 = sld [smem:[#allocation6 + $0x5]] }
0x2edc   :  { %p7538_p11 = scmp.ne.s32.totalorder %s7537_s15, 0 }
0x2ede   :  { %7443 = sbr.rel (%p7538_p11) target bundleno = 12367 (0x304f), region = 97 }
0x2ee3   :  { %v7444_v57 = vsel %vm2475_vm7, %v7427_v36, -1e+30  ;;  %v7720_v52 = vmov 0.0  }
0x2ee4   :  { %7445 = vmax.xlane.f32.xlu0 %v7444_v57 }
0x2f57   :  { %v7446_v47 = vpop.xlane.xlu0 %7445 }
0x2f58   :  { %vm7447_vm2 = vcmp.eq.f32.partialorder %v7444_v57, %v7446_v47 }
0x2f59   :  { %v7448_v54 = vsel %vm7447_vm2, %v8393_v16, 128 }
0x2f5a   :  { %v7450_v38 = vshra.s32 %v7448_v54, 16  ;;  %v7449_v37 = vand.u32 65535, %v7448_v54 }
0x2f5c   :  { %v7452_v24 = vcvt.s32.f32 %v7450_v38  ;;  %v7451_v50 = vcvt.s32.f32 %v7449_v37 }
0x2f5e   :  { %7453 = vmin.xlane.f32.xlu0 %v7452_v24 }
0x2fd1   :  { %v7454_v25 = vpop.xlane.xlu0 %7453 }
0x2fd2   :  { %vm7455_vm13 = vcmp.eq.f32.partialorder %v7452_v24, %v7454_v25  ;;  %v7460_v23 = vcvt.f32.s32 %v7454_v25 }
0x2fd3   :  { %v7456_v42 = vsel %vm7455_vm13, %v7451_v50, inf }
0x2fd4   :  { %7457 = vmin.xlane.f32.xlu1 %v7456_v42  ;;  %v7461_v6 = vshll.u32 %v7460_v23, 16 }
0x3047   :  { %v7458_v34 = vpop.xlane.xlu1 %7457 }
0x3048   :  { %v7459_v58 = vcvt.f32.s32 %v7458_v34 }
0x304a   :  { %v7462_v51 = vadd.s32 %v7461_v6, %v7459_v58 }
0x304c   :  { %vm7463_vm7 = vcmp.eq.s32.totalorder %v8393_v16, %v7462_v51 }
0x304d   :  { %v7539_v29 = vsel %vm7463_vm7, 1.0, %v7720_v52 }
0x304e   :  { %7466 = vst [vmem:[#allocation4] sm:$0xff] %v7539_v29 }
0x304f PF:  { %s7476_s2 = sshll.u32 %s10862_s12, 4  ;;  %s7721_s7 = smov [#allocation9]   ;;  %s7477_s2 = int_to_ptr.hbm [resolvable:$true] %s7476_s2 }
0x3050   :  { %s7474_s18 = sshll.u32 %s7721_s7, 4  ;;  %s7475_s18 = int_to_ptr.vmem [resolvable:$true] %s7474_s18 }
0x3051   :  { %7479 = dma.vmem_to_hbm [thread:$0]  %s7475_s18, 32, %s7477_s2, [#allocation7]  }
0x3052   :  { %7705 = dma.done.wait [#allocation7], 32  }
0x3053   :  { %7706 = vsyncadd [#allocation7], 4294967264 }
0x3054   :  { %7486 = vsyncpa [#allocation7], 1 }
0x3055   :  { %7487 = vsyncpa [#allocation8], 1 }

</bundles_post_ra>
